<compile_context>
chip_gen: v7x
topology: tpu7x:2x2x1
jax: 0.10.0
libtpu: 0.0.40
codegen_flags: <defaults>
</compile_context>

<pallas_src>
import math

import jax
import jax.numpy as jnp
from jax.experimental import pallas as pl
from jax.experimental.pallas import tpu as pltpu

# ----------------------------- config (small synthetic shapes) -----------------------------
N_EMBD = 32
N_HEAD = 8                       # fixed nhead=8 in the module
HEAD_DIM = N_EMBD // N_HEAD
ATTN_SCALE = 1.0 / math.sqrt(HEAD_DIM)
D_FF = 512
N_LBL_CLASS = 10
N_LBLS = 4
BLOCK_SIZE = 8
VOCAB = 64
IMG_HW = 16
PATCH = 8
F_ENC = 24                       # img_enc_out_shape[1]
T_IMG = (IMG_HW // PATCH) ** 2   # 4
S_ENC = T_IMG + N_LBLS           # 8  (encoder sequence length)
S_DEC = BLOCK_SIZE - 1           # 7  (decoder sequence length)
LN_EPS = 1e-5
BATCH = 2
NEG = -1e30                      # finite "masked" value (avoids -inf -> NaN pathologies)


# -------------------------------- in-kernel math helpers -----------------------------------
def _erf(x):
    # Exact-erf GELU support: Abramowitz-Stegun 7.1.26 polynomial, |abs err| <= 1.5e-7,
    # built only from exp/div/select so it lowers cleanly in Mosaic (EUP ops).
    p = 0.3275911
    a1, a2, a3, a4, a5 = 0.254829592, -0.284496736, 1.421413741, -1.453152027, 1.061405429
    sgn = jnp.where(x >= 0.0, 1.0, -1.0)
    ax = jnp.abs(x)
    t = 1.0 / (1.0 + p * ax)
    poly = ((((a5 * t + a4) * t + a3) * t + a2) * t + a1) * t
    return sgn * (1.0 - poly * jnp.exp(-(ax * ax)))


def _gelu(x):
    # erf-form GELU (PyTorch activation='gelu' default, approximate='none')
    return 0.5 * x * (1.0 + _erf(x * 0.7071067811865476))


def _layernorm(x, g, b):
    mu = jnp.mean(x, axis=-1, keepdims=True)
    xc = x - mu
    var = jnp.mean(xc * xc, axis=-1, keepdims=True)
    return xc * jax.lax.rsqrt(var + LN_EPS) * g + b


def _mha_proj(q, k, v, wo, bias):
    # q (pre-scaled), k, v: (S*, E); heads are contiguous 4-lane slices.
    # The out-projection distributes over head blocks, so we never concatenate heads:
    #   concat_h(attn_h) @ wo == sum_h attn_h @ wo[h*d:(h+1)*d, :]
    out = None
    for h in range(N_HEAD):
        lo = h * HEAD_DIM
        qh = q[:, lo:lo + HEAD_DIM]
        kh = k[:, lo:lo + HEAD_DIM]
        vh = v[:, lo:lo + HEAD_DIM]
        s = jax.lax.dot_general(qh, kh, (((1,), (1,)), ((), ())),
                                preferred_element_type=jnp.float32)
        if bias is not None:
            s = s + bias
        m = jnp.max(s, axis=-1, keepdims=True)
        p = jnp.exp(s - m)
        p = p / jnp.sum(p, axis=-1, keepdims=True)
        oh = jnp.dot(p, vh, preferred_element_type=jnp.float32)              # (Sq, d)
        ph = jnp.dot(oh, wo[lo:lo + HEAD_DIM, :],
                     preferred_element_type=jnp.float32)                     # (Sq, E)
        out = ph if out is None else out + ph
    return out


def _self_attn(x_norm, wqkv, bqkv, wo, bo, bias):
    qkv = jnp.dot(x_norm, wqkv, preferred_element_type=jnp.float32) + bqkv   # (S, 3E)
    q = qkv[:, 0:N_EMBD] * ATTN_SCALE          # fold 1/sqrt(d) into q once
    k = qkv[:, N_EMBD:2 * N_EMBD]
    v = qkv[:, 2 * N_EMBD:3 * N_EMBD]
    return _mha_proj(q, k, v, wo, bias) + bo


def _cross_attn(x_norm, mem, wq, bq, wkv, bkv, wo, bo):
    q = (jnp.dot(x_norm, wq, preferred_element_type=jnp.float32) + bq) * ATTN_SCALE
    kv = jnp.dot(mem, wkv, preferred_element_type=jnp.float32) + bkv         # (S_enc, 2E)
    k = kv[:, 0:N_EMBD]
    v = kv[:, N_EMBD:2 * N_EMBD]
    return _mha_proj(q, k, v, wo, None) + bo


def _ffn(x_norm, w1, b1, w2, b2):
    h = jnp.dot(x_norm, w1, preferred_element_type=jnp.float32) + b1         # (S, D_FF)
    h = _gelu(h)                                                             # GELU in-kernel
    return jnp.dot(h, w2, preferred_element_type=jnp.float32) + b2


# ------------------------------------ fused kernels ----------------------------------------
def _make_encode_kernel(treedef, n_params):
    def kernel(patches_ref, lbl_ref, pos_ref, *rest):
        refs = jax.tree_util.tree_unflatten(treedef, list(rest[:n_params]))
        o_ref = rest[n_params]
        x_scr = rest[n_params + 1]
        prm = jax.tree_util.tree_map(lambda r: r[...], refs)
        lp = prm["layer"]

        # synthetic image encoder: Conv2d(3, F_ENC, PATCH, stride=PATCH) as a matmul
        feat = jnp.dot(patches_ref[0], prm["conv_w"],
                       preferred_element_type=jnp.float32) + prm["conv_b"]   # (T_IMG, F_ENC)
        feat = jnp.dot(feat, prm["img_lin_w"],
                       preferred_element_type=jnp.float32)                   # (T_IMG, E), bias=False
        feat = feat + pos_ref[0]                                             # + pos_emb[:, :T_IMG]

        # concat(img feats, label embeddings) along the sequence dim via VMEM scratch
        x_scr[0:T_IMG, :] = feat
        x_scr[T_IMG:S_ENC, :] = lbl_ref[0]
        x = x_scr[...]                                                       # (S_ENC, E)

        # nn.TransformerEncoderLayer, norm_first=True, eval (dropout = identity)
        h = _layernorm(x, lp["ln1_g"], lp["ln1_b"])
        x = x + _self_attn(h, lp["wqkv"], lp["bqkv"], lp["wo"], lp["bo"], None)
        h = _layernorm(x, lp["ln2_g"], lp["ln2_b"])
        x = x + _ffn(h, lp["w1"], lp["b1"], lp["w2"], lp["b2"])
        o_ref[0] = x
    return kernel


def _make_decode_kernel(treedef, n_params):
    def kernel(tgt_ref, mem_ref, kpm_ref, tgtout_ref, *rest):
        refs = jax.tree_util.tree_unflatten(treedef, list(rest[:n_params]))
        logits_ref = rest[n_params]
        loss_ref = rest[n_params + 1]
        prm = jax.tree_util.tree_map(lambda r: r[...], refs)

        x = tgt_ref[0]                                                       # (S_DEC, E)
        mem = mem_ref[0]                                                     # (S_ENC, E)

        # additive self-attn bias built in-kernel: causal (mask[:-1,:-1]) + key padding
        row = jax.lax.broadcasted_iota(jnp.int32, (S_DEC, S_DEC), 0)
        col = jax.lax.broadcasted_iota(jnp.int32, (S_DEC, S_DEC), 1)
        bias = jnp.where(col > row, NEG, 0.0) + kpm_ref[0] * NEG             # (S_DEC, S_DEC)

        # 2 x nn.TransformerDecoderLayer, norm_first=True, eval (dropout = identity)
        for lp in prm["layers"]:
            h = _layernorm(x, lp["ln1_g"], lp["ln1_b"])
            x = x + _self_attn(h, lp["wqkv"], lp["bqkv"], lp["wo_s"], lp["bo_s"], bias)
            h = _layernorm(x, lp["ln2_g"], lp["ln2_b"])
            x = x + _cross_attn(h, mem, lp["wq_c"], lp["bq_c"], lp["wkv_c"], lp["bkv_c"],
                                lp["wo_c"], lp["bo_c"])
            h = _layernorm(x, lp["ln3_g"], lp["ln3_b"])
            x = x + _ffn(h, lp["w1"], lp["b1"], lp["w2"], lp["b2"])

        # dcd_proj + per-token cross entropy (mean taken in glue, matching F.cross_entropy)
        logits = jnp.dot(x, prm["dcd_w"], preferred_element_type=jnp.float32) + prm["dcd_b"]
        logits_ref[0] = logits

        m = jnp.max(logits, axis=-1, keepdims=True)
        lse = jnp.log(jnp.sum(jnp.exp(logits - m), axis=-1, keepdims=True)) + m
        vcol = jax.lax.broadcasted_iota(jnp.int32, (S_DEC, VOCAB), 1)
        picked = jnp.sum(jnp.where(vcol == tgtout_ref[0], logits, 0.0),
                         axis=-1, keepdims=True)
        loss_ref[0] = lse - picked
    return kernel


# --------------------------------------- wrappers -------------------------------------------
def _full_spec(arr):
    nd = arr.ndim
    return pl.BlockSpec(arr.shape, lambda b, _nd=nd: (0,) * _nd)


def encode(params, x_img, labels):
    bsz = x_img.shape[0]
    # ---- plain-JAX glue: rgb replicate + patch extraction + embedding gather ----
    x3 = jnp.stack([x_img, x_img, x_img], axis=1)                            # (B, 3, H, W) NCHW
    hp, wp = IMG_HW // PATCH, IMG_HW // PATCH
    patches = (x3.reshape(bsz, 3, hp, PATCH, wp, PATCH)
                 .transpose(0, 2, 4, 1, 3, 5)
                 .reshape(bsz, hp * wp, 3 * PATCH * PATCH))                  # (B, T_IMG, 3*P*P)
    # TODO(synk): embedding lookups (jnp.take gathers) stay in plain JAX, not in-kernel.
    lbl_tok = jnp.take(params["label_emb"], labels, axis=0) + params["pos_emb_labels"]
    pos_img = params["pos_emb"][:, :T_IMG, :]

    flat, treedef = jax.tree_util.tree_flatten(params["enc"])
    kernel = _make_encode_kernel(treedef, len(flat))

    in_specs = ([pl.BlockSpec((1, T_IMG, 3 * PATCH * PATCH), lambda b: (b, 0, 0)),
                 pl.BlockSpec((1, N_LBLS, N_EMBD), lambda b: (b, 0, 0)),
                 _full_spec(pos_img)]
                + [_full_spec(a) for a in flat])

    reps = pl.pallas_call(
        kernel,
        grid=(bsz,),
        in_specs=in_specs,
        out_specs=pl.BlockSpec((1, S_ENC, N_EMBD), lambda b: (b, 0, 0)),
        out_shape=jax.ShapeDtypeStruct((bsz, S_ENC, N_EMBD), jnp.float32),
        scratch_shapes=[pltpu.VMEM((S_ENC, N_EMBD), jnp.float32)],
        compiler_params=pltpu.CompilerParams(dimension_semantics=("parallel",)),
        cost_estimate=pl.CostEstimate(flops=1_500_000, transcendentals=20_000,
                                      bytes_accessed=450_000),
    )(patches, lbl_tok, pos_img, *flat)
    return reps


def decode(params, reps, targets, len_mask):
    bsz, t = targets.shape                                                   # t == BLOCK_SIZE
    # ---- plain-JAX glue: tgt embedding gather + pos, mask prep ----
    tgt_emb = jnp.take(params["tgt_emb"], targets, axis=0) + params["pos_emb"][:, :t, :]
    tgt_in = tgt_emb[:, :-1, :]                                              # (B, S_DEC, E)
    kpm = (len_mask[:, :S_DEC] > 0).astype(jnp.float32).reshape(bsz, 1, S_DEC)
    tgt_out = targets[:, 1:].astype(jnp.int32).reshape(bsz, S_DEC, 1)

    flat, treedef = jax.tree_util.tree_flatten(params["dec"])
    kernel = _make_decode_kernel(treedef, len(flat))

    in_specs = ([pl.BlockSpec((1, S_DEC, N_EMBD), lambda b: (b, 0, 0)),
                 pl.BlockSpec((1, S_ENC, N_EMBD), lambda b: (b, 0, 0)),
                 pl.BlockSpec((1, 1, S_DEC), lambda b: (b, 0, 0)),
                 pl.BlockSpec((1, S_DEC, 1), lambda b: (b, 0, 0))]
                + [_full_spec(a) for a in flat])

    logits, loss_tok = pl.pallas_call(
        kernel,
        grid=(bsz,),
        in_specs=in_specs,
        out_specs=(pl.BlockSpec((1, S_DEC, VOCAB), lambda b: (b, 0, 0)),
                   pl.BlockSpec((1, S_DEC, 1), lambda b: (b, 0, 0))),
        out_shape=(jax.ShapeDtypeStruct((bsz, S_DEC, VOCAB), jnp.float32),
                   jax.ShapeDtypeStruct((bsz, S_DEC, 1), jnp.float32)),
        compiler_params=pltpu.CompilerParams(dimension_semantics=("parallel",)),
        cost_estimate=pl.CostEstimate(flops=3_000_000, transcendentals=40_000,
                                      bytes_accessed=900_000),
    )(tgt_in, reps, kpm, tgt_out, *flat)

    loss = jnp.mean(loss_tok)                      # F.cross_entropy(..., reduction='mean')
    prediction = jnp.argmax(logits, axis=-1)       # argmax kept in glue
    return logits, loss, prediction


def forward(params, x, targets, len_mask, labels):
    reps = encode(params, x, labels)
    return decode(params, reps, targets, len_mask)


# ----------------------------------- parameter init ----------------------------------------
def init_params(key):
    keys = iter(jax.random.split(key, 64))

    def w(shape):
        return 0.02 * jax.random.normal(next(keys), shape, jnp.float32)

    def zeros(shape):
        return jnp.zeros(shape, jnp.float32)

    def ones(shape):
        return jnp.ones(shape, jnp.float32)

    def enc_layer():
        return dict(ln1_g=ones((1, N_EMBD)), ln1_b=zeros((1, N_EMBD)),
                    wqkv=w((N_EMBD, 3 * N_EMBD)), bqkv=zeros((1, 3 * N_EMBD)),
                    wo=w((N_EMBD, N_EMBD)), bo=zeros((1, N_EMBD)),
                    ln2_g=ones((1, N_EMBD)), ln2_b=zeros((1, N_EMBD)),
                    w1=w((N_EMBD, D_FF)), b1=zeros((1, D_FF)),
                    w2=w((D_FF, N_EMBD)), b2=zeros((1, N_EMBD)))

    def dec_layer():
        return dict(ln1_g=ones((1, N_EMBD)), ln1_b=zeros((1, N_EMBD)),
                    wqkv=w((N_EMBD, 3 * N_EMBD)), bqkv=zeros((1, 3 * N_EMBD)),
                    wo_s=w((N_EMBD, N_EMBD)), bo_s=zeros((1, N_EMBD)),
                    ln2_g=ones((1, N_EMBD)), ln2_b=zeros((1, N_EMBD)),
                    wq_c=w((N_EMBD, N_EMBD)), bq_c=zeros((1, N_EMBD)),
                    wkv_c=w((N_EMBD, 2 * N_EMBD)), bkv_c=zeros((1, 2 * N_EMBD)),
                    wo_c=w((N_EMBD, N_EMBD)), bo_c=zeros((1, N_EMBD)),
                    ln3_g=ones((1, N_EMBD)), ln3_b=zeros((1, N_EMBD)),
                    w1=w((N_EMBD, D_FF)), b1=zeros((1, D_FF)),
                    w2=w((D_FF, N_EMBD)), b2=zeros((1, N_EMBD)))

    return dict(
        label_emb=w((N_LBL_CLASS, N_EMBD)),
        pos_emb_labels=w((1, N_LBLS, N_EMBD)),
        pos_emb=w((1, BLOCK_SIZE, N_EMBD)),
        tgt_emb=w((VOCAB, N_EMBD)),
        enc=dict(conv_w=w((3 * PATCH * PATCH, F_ENC)), conv_b=zeros((1, F_ENC)),
                 img_lin_w=w((F_ENC, N_EMBD)),                  # img_enc_linear, bias=False
                 layer=enc_layer()),
        dec=dict(layers=[dec_layer(), dec_layer()],
                 dcd_w=w((N_EMBD, VOCAB)), dcd_b=zeros((1, VOCAB))),
    )


# --------------------------------------- main -----------------------------------------------
if __name__ == "__main__":
    key = jax.random.PRNGKey(0)
    kp, kx, kt, kl = jax.random.split(key, 4)

    params = init_params(kp)
    x = jax.random.normal(kx, (BATCH, IMG_HW, IMG_HW), jnp.float32)          # grayscale image
    targets = jax.random.randint(kt, (BATCH, BLOCK_SIZE), 0, VOCAB)          # report tokens
    labels = jax.random.randint(kl, (BATCH, N_LBLS), 0, N_LBL_CLASS)         # label tokens
    # len_mask > 0 marks padded target positions
    len_mask = jnp.zeros((BATCH, BLOCK_SIZE), jnp.int32).at[0, BLOCK_SIZE - 2].set(1)

    fwd = jax.jit(forward)
    logits, loss, prediction = fwd(params, x, targets, len_mask, labels)
    jax.block_until_ready((logits, loss, prediction))

    assert logits.shape == (BATCH, BLOCK_SIZE - 1, VOCAB)
    assert prediction.shape == (BATCH, BLOCK_SIZE - 1)
    assert loss.shape == ()
    assert bool(jnp.isfinite(loss))
    print("KERNEL_OK")
</pallas_src>

<mosaic_0001>
module attributes {stable_mosaic.version = 11 : i64} {
  func.func @kernel(%arg0: i32, %arg1: memref<1x4x192xf32, #tpu.memory_space<vmem>>, %arg2: memref<1x4x32xf32, #tpu.memory_space<vmem>>, %arg3: memref<1x4x32xf32, #tpu.memory_space<vmem>>, %arg4: memref<1x24xf32, #tpu.memory_space<vmem>>, %arg5: memref<192x24xf32, #tpu.memory_space<vmem>>, %arg6: memref<24x32xf32, #tpu.memory_space<vmem>>, %arg7: memref<1x512xf32, #tpu.memory_space<vmem>>, %arg8: memref<1x32xf32, #tpu.memory_space<vmem>>, %arg9: memref<1x32xf32, #tpu.memory_space<vmem>>, %arg10: memref<1x96xf32, #tpu.memory_space<vmem>>, %arg11: memref<1x32xf32, #tpu.memory_space<vmem>>, %arg12: memref<1x32xf32, #tpu.memory_space<vmem>>, %arg13: memref<1x32xf32, #tpu.memory_space<vmem>>, %arg14: memref<1x32xf32, #tpu.memory_space<vmem>>, %arg15: memref<32x512xf32, #tpu.memory_space<vmem>>, %arg16: memref<512x32xf32, #tpu.memory_space<vmem>>, %arg17: memref<32x32xf32, #tpu.memory_space<vmem>>, %arg18: memref<32x96xf32, #tpu.memory_space<vmem>>, %arg19: memref<1x8x32xf32, #tpu.memory_space<vmem>>, %arg20: memref<8x32xf32, #tpu.memory_space<vmem>>) attributes {dimension_semantics = [#tpu.dimension_semantics<parallel>], iteration_bounds = array<i64: 2>, scalar_prefetch = 0 : i64, scratch_operands = 1 : i64, tpu.core_type = #tpu.core_type<tc>, window_params = [{transform_indices = @transform_0, window_bounds = array<i64: 1, 4, 192>}, {transform_indices = @transform_1, window_bounds = array<i64: 1, 4, 32>}, {pipeline_mode = #tpu.pipeline_mode<synchronous>, transform_indices = @transform_2, window_bounds = array<i64: 1, 4, 32>}, {pipeline_mode = #tpu.pipeline_mode<synchronous>, transform_indices = @transform_3, window_bounds = array<i64: 1, 24>}, {pipeline_mode = #tpu.pipeline_mode<synchronous>, transform_indices = @transform_4, window_bounds = array<i64: 192, 24>}, {pipeline_mode = #tpu.pipeline_mode<synchronous>, transform_indices = @transform_5, window_bounds = array<i64: 24, 32>}, {pipeline_mode = #tpu.pipeline_mode<synchronous>, transform_indices = @transform_6, window_bounds = array<i64: 1, 512>}, {pipeline_mode = #tpu.pipeline_mode<synchronous>, transform_indices = @transform_7, window_bounds = array<i64: 1, 32>}, {pipeline_mode = #tpu.pipeline_mode<synchronous>, transform_indices = @transform_8, window_bounds = array<i64: 1, 32>}, {pipeline_mode = #tpu.pipeline_mode<synchronous>, transform_indices = @transform_9, window_bounds = array<i64: 1, 96>}, {pipeline_mode = #tpu.pipeline_mode<synchronous>, transform_indices = @transform_10, window_bounds = array<i64: 1, 32>}, {pipeline_mode = #tpu.pipeline_mode<synchronous>, transform_indices = @transform_11, window_bounds = array<i64: 1, 32>}, {pipeline_mode = #tpu.pipeline_mode<synchronous>, transform_indices = @transform_12, window_bounds = array<i64: 1, 32>}, {pipeline_mode = #tpu.pipeline_mode<synchronous>, transform_indices = @transform_13, window_bounds = array<i64: 1, 32>}, {pipeline_mode = #tpu.pipeline_mode<synchronous>, transform_indices = @transform_14, window_bounds = array<i64: 32, 512>}, {pipeline_mode = #tpu.pipeline_mode<synchronous>, transform_indices = @transform_15, window_bounds = array<i64: 512, 32>}, {pipeline_mode = #tpu.pipeline_mode<synchronous>, transform_indices = @transform_16, window_bounds = array<i64: 32, 32>}, {pipeline_mode = #tpu.pipeline_mode<synchronous>, transform_indices = @transform_17, window_bounds = array<i64: 32, 96>}, {transform_indices = @transform_18, window_bounds = array<i64: 1, 8, 32>}]} {
    %c0 = arith.constant 0 : index
    %c0_0 = arith.constant 0 : index
    %0 = vector.load %arg4[%c0, %c0_0] : memref<1x24xf32, #tpu.memory_space<vmem>>, vector<1x24xf32>
    %c0_1 = arith.constant 0 : index
    %c0_2 = arith.constant 0 : index
    %1 = vector.load %arg5[%c0_1, %c0_2] : memref<192x24xf32, #tpu.memory_space<vmem>>, vector<192x24xf32>
    %c0_3 = arith.constant 0 : index
    %c0_4 = arith.constant 0 : index
    %2 = vector.load %arg6[%c0_3, %c0_4] : memref<24x32xf32, #tpu.memory_space<vmem>>, vector<24x32xf32>
    %c0_5 = arith.constant 0 : index
    %c0_6 = arith.constant 0 : index
    %3 = vector.load %arg7[%c0_5, %c0_6] : memref<1x512xf32, #tpu.memory_space<vmem>>, vector<1x512xf32>
    %c0_7 = arith.constant 0 : index
    %c0_8 = arith.constant 0 : index
    %4 = vector.load %arg8[%c0_7, %c0_8] : memref<1x32xf32, #tpu.memory_space<vmem>>, vector<1x32xf32>
    %c0_9 = arith.constant 0 : index
    %c0_10 = arith.constant 0 : index
    %5 = vector.load %arg9[%c0_9, %c0_10] : memref<1x32xf32, #tpu.memory_space<vmem>>, vector<1x32xf32>
    %c0_11 = arith.constant 0 : index
    %c0_12 = arith.constant 0 : index
    %6 = vector.load %arg10[%c0_11, %c0_12] : memref<1x96xf32, #tpu.memory_space<vmem>>, vector<1x96xf32>
    %c0_13 = arith.constant 0 : index
    %c0_14 = arith.constant 0 : index
    %7 = vector.load %arg11[%c0_13, %c0_14] : memref<1x32xf32, #tpu.memory_space<vmem>>, vector<1x32xf32>
    %c0_15 = arith.constant 0 : index
    %c0_16 = arith.constant 0 : index
    %8 = vector.load %arg12[%c0_15, %c0_16] : memref<1x32xf32, #tpu.memory_space<vmem>>, vector<1x32xf32>
    %c0_17 = arith.constant 0 : index
    %c0_18 = arith.constant 0 : index
    %9 = vector.load %arg13[%c0_17, %c0_18] : memref<1x32xf32, #tpu.memory_space<vmem>>, vector<1x32xf32>
    %c0_19 = arith.constant 0 : index
    %c0_20 = arith.constant 0 : index
    %10 = vector.load %arg14[%c0_19, %c0_20] : memref<1x32xf32, #tpu.memory_space<vmem>>, vector<1x32xf32>
    %c0_21 = arith.constant 0 : index
    %c0_22 = arith.constant 0 : index
    %11 = vector.load %arg15[%c0_21, %c0_22] : memref<32x512xf32, #tpu.memory_space<vmem>>, vector<32x512xf32>
    %c0_23 = arith.constant 0 : index
    %c0_24 = arith.constant 0 : index
    %12 = vector.load %arg16[%c0_23, %c0_24] : memref<512x32xf32, #tpu.memory_space<vmem>>, vector<512x32xf32>
    %c0_25 = arith.constant 0 : index
    %c0_26 = arith.constant 0 : index
    %13 = vector.load %arg17[%c0_25, %c0_26] : memref<32x32xf32, #tpu.memory_space<vmem>>, vector<32x32xf32>
    %c0_27 = arith.constant 0 : index
    %c0_28 = arith.constant 0 : index
    %14 = vector.load %arg18[%c0_27, %c0_28] : memref<32x96xf32, #tpu.memory_space<vmem>>, vector<32x96xf32>
    %c0_29 = arith.constant 0 : index
    %c0_30 = arith.constant 0 : index
    %c0_31 = arith.constant 0 : index
    %15 = vector.load %arg1[%c0_29, %c0_30, %c0_31] : memref<1x4x192xf32, #tpu.memory_space<vmem>>, vector<1x4x192xf32>
    %16 = vector.shape_cast %15 : vector<1x4x192xf32> to vector<4x192xf32>
    %cst = arith.constant dense<0.000000e+00> : vector<4x24xf32>
    %17 = tpu.matmul %16, %1, %cst {dimension_numbers = #tpu.dot_dimension_numbers<[1], [0], [0], [1], [0, 0, 1, 1], [], []>} : vector<4x192xf32>, vector<192x24xf32>, vector<4x24xf32> -> vector<4x24xf32>
    %18 = vector.broadcast %0 : vector<1x24xf32> to vector<4x24xf32>
    %19 = arith.addf %17, %18 : vector<4x24xf32>
    %cst_32 = arith.constant dense<0.000000e+00> : vector<4x32xf32>
    %20 = tpu.matmul %19, %2, %cst_32 {dimension_numbers = #tpu.dot_dimension_numbers<[1], [0], [0], [1], [0, 0, 1, 1], [], []>} : vector<4x24xf32>, vector<24x32xf32>, vector<4x32xf32> -> vector<4x32xf32>
    %c0_33 = arith.constant 0 : index
    %c0_34 = arith.constant 0 : index
    %c0_35 = arith.constant 0 : index
    %21 = vector.load %arg3[%c0_33, %c0_34, %c0_35] : memref<1x4x32xf32, #tpu.memory_space<vmem>>, vector<1x4x32xf32>
    %22 = vector.shape_cast %21 : vector<1x4x32xf32> to vector<4x32xf32>
    %23 = arith.addf %20, %22 : vector<4x32xf32>
    %c0_36 = arith.constant 0 : index
    %c0_37 = arith.constant 0 : index
    %24 = vector.load %arg20[%c0_36, %c0_37] : memref<8x32xf32, #tpu.memory_space<vmem>>, vector<4x32xf32>
    tpu.vector_store %arg20[%c0_36, %c0_37], %23 {strides = array<i32>} : memref<8x32xf32, #tpu.memory_space<vmem>>, vector<4x32xf32>,
    %c0_38 = arith.constant 0 : index
    %c0_39 = arith.constant 0 : index
    %c0_40 = arith.constant 0 : index
    %25 = vector.load %arg2[%c0_38, %c0_39, %c0_40] : memref<1x4x32xf32, #tpu.memory_space<vmem>>, vector<1x4x32xf32>
    %26 = vector.shape_cast %25 : vector<1x4x32xf32> to vector<4x32xf32>
    %c4 = arith.constant 4 : index
    %c0_41 = arith.constant 0 : index
    %27 = vector.load %arg20[%c4, %c0_41] : memref<8x32xf32, #tpu.memory_space<vmem>>, vector<4x32xf32>
    tpu.vector_store %arg20[%c4, %c0_41], %26 {strides = array<i32>} : memref<8x32xf32, #tpu.memory_space<vmem>>, vector<4x32xf32>,
    %c0_42 = arith.constant 0 : index
    %c0_43 = arith.constant 0 : index
    %28 = vector.load %arg20[%c0_42, %c0_43] : memref<8x32xf32, #tpu.memory_space<vmem>>, vector<8x32xf32>
    %cst_44 = arith.constant dense<0.000000e+00> : vector<8xf32>
    %29 = vector.multi_reduction <add>, %28, %cst_44 [1] : vector<8x32xf32> to vector<8xf32>
    %30 = vector.shape_cast %29 : vector<8xf32> to vector<8x1xf32>
    %cst_45 = arith.constant 3.200000e+01 : f32
    %31 = vector.broadcast %cst_45 : f32 to vector<8x1xf32>
    %32 = arith.divf %30, %31 : vector<8x1xf32>
    %33 = vector.broadcast %32 : vector<8x1xf32> to vector<8x32xf32>
    %34 = arith.subf %28, %33 : vector<8x32xf32>
    %35 = arith.mulf %34, %34 : vector<8x32xf32>
    %cst_46 = arith.constant dense<0.000000e+00> : vector<8xf32>
    %36 = vector.multi_reduction <add>, %35, %cst_46 [1] : vector<8x32xf32> to vector<8xf32>
    %37 = vector.shape_cast %36 : vector<8xf32> to vector<8x1xf32>
    %cst_47 = arith.constant 3.200000e+01 : f32
    %38 = vector.broadcast %cst_47 : f32 to vector<8x1xf32>
    %39 = arith.divf %37, %38 : vector<8x1xf32>
    %cst_48 = arith.constant 9.99999974E-6 : f32
    %40 = vector.broadcast %cst_48 : f32 to vector<8x1xf32>
    %41 = arith.addf %39, %40 : vector<8x1xf32>
    %42 = math.rsqrt %41 : vector<8x1xf32>
    %43 = vector.broadcast %42 : vector<8x1xf32> to vector<8x32xf32>
    %44 = arith.mulf %34, %43 : vector<8x32xf32>
    %45 = vector.broadcast %8 : vector<1x32xf32> to vector<8x32xf32>
    %46 = arith.mulf %44, %45 : vector<8x32xf32>
    %47 = vector.broadcast %7 : vector<1x32xf32> to vector<8x32xf32>
    %48 = arith.addf %46, %47 : vector<8x32xf32>
    %cst_49 = arith.constant dense<0.000000e+00> : vector<8x96xf32>
    %49 = tpu.matmul %48, %14, %cst_49 {dimension_numbers = #tpu.dot_dimension_numbers<[1], [0], [0], [1], [0, 0, 1, 1], [], []>} : vector<8x32xf32>, vector<32x96xf32>, vector<8x96xf32> -> vector<8x96xf32>
    %50 = vector.broadcast %6 : vector<1x96xf32> to vector<8x96xf32>
    %51 = arith.addf %49, %50 : vector<8x96xf32>
    %52 = vector.extract_strided_slice %51 {offsets = [0, 0], sizes = [8, 32], strides = [1, 1]} : vector<8x96xf32> to vector<8x32xf32>
    %cst_50 = arith.constant 5.000000e-01 : f32
    %53 = vector.broadcast %cst_50 : f32 to vector<8x32xf32>
    %54 = arith.mulf %52, %53 : vector<8x32xf32>
    %55 = vector.extract_strided_slice %51 {offsets = [0, 32], sizes = [8, 32], strides = [1, 1]} : vector<8x96xf32> to vector<8x32xf32>
    %56 = vector.extract_strided_slice %51 {offsets = [0, 64], sizes = [8, 32], strides = [1, 1]} : vector<8x96xf32> to vector<8x32xf32>
    %57 = vector.extract_strided_slice %54 {offsets = [0, 0], sizes = [8, 4], strides = [1, 1]} : vector<8x32xf32> to vector<8x4xf32>
    %58 = vector.extract_strided_slice %55 {offsets = [0, 0], sizes = [8, 4], strides = [1, 1]} : vector<8x32xf32> to vector<8x4xf32>
    %59 = vector.extract_strided_slice %56 {offsets = [0, 0], sizes = [8, 4], strides = [1, 1]} : vector<8x32xf32> to vector<8x4xf32>
    %cst_51 = arith.constant dense<0.000000e+00> : vector<8x8xf32>
    %60 = tpu.matmul %57, %58, %cst_51 {dimension_numbers = #tpu.dot_dimension_numbers<[1], [1], [0], [0], [0, 0, 1, 0], [], []>} : vector<8x4xf32>, vector<8x4xf32>, vector<8x8xf32> -> vector<8x8xf32>
    %cst_52 = arith.constant dense<0xFF800000> : vector<8xf32>
    %61 = vector.multi_reduction <maximumf>, %60, %cst_52 [1] : vector<8x8xf32> to vector<8xf32>
    %62 = vector.shape_cast %61 : vector<8xf32> to vector<8x1xf32>
    %63 = vector.broadcast %62 : vector<8x1xf32> to vector<8x8xf32>
    %64 = arith.subf %60, %63 : vector<8x8xf32>
    %65 = math.exp %64 : vector<8x8xf32>
    %cst_53 = arith.constant dense<0.000000e+00> : vector<8xf32>
    %66 = vector.multi_reduction <add>, %65, %cst_53 [1] : vector<8x8xf32> to vector<8xf32>
    %67 = vector.shape_cast %66 : vector<8xf32> to vector<8x1xf32>
    %68 = vector.broadcast %67 : vector<8x1xf32> to vector<8x8xf32>
    %69 = arith.divf %65, %68 : vector<8x8xf32>
    %cst_54 = arith.constant dense<0.000000e+00> : vector<8x4xf32>
    %70 = tpu.matmul %69, %59, %cst_54 {dimension_numbers = #tpu.dot_dimension_numbers<[1], [0], [0], [1], [0, 0, 1, 1], [], []>} : vector<8x8xf32>, vector<8x4xf32>, vector<8x4xf32> -> vector<8x4xf32>
    %71 = vector.extract_strided_slice %13 {offsets = [0, 0], sizes = [4, 32], strides = [1, 1]} : vector<32x32xf32> to vector<4x32xf32>
    %cst_55 = arith.constant dense<0.000000e+00> : vector<8x32xf32>
    %72 = tpu.matmul %70, %71, %cst_55 {dimension_numbers = #tpu.dot_dimension_numbers<[1], [0], [0], [1], [0, 0, 1, 1], [], []>} : vector<8x4xf32>, vector<4x32xf32>, vector<8x32xf32> -> vector<8x32xf32>
    %73 = vector.extract_strided_slice %54 {offsets = [0, 4], sizes = [8, 4], strides = [1, 1]} : vector<8x32xf32> to vector<8x4xf32>
    %74 = vector.extract_strided_slice %55 {offsets = [0, 4], sizes = [8, 4], strides = [1, 1]} : vector<8x32xf32> to vector<8x4xf32>
    %75 = vector.extract_strided_slice %56 {offsets = [0, 4], sizes = [8, 4], strides = [1, 1]} : vector<8x32xf32> to vector<8x4xf32>
    %cst_56 = arith.constant dense<0.000000e+00> : vector<8x8xf32>
    %76 = tpu.matmul %73, %74, %cst_56 {dimension_numbers = #tpu.dot_dimension_numbers<[1], [1], [0], [0], [0, 0, 1, 0], [], []>} : vector<8x4xf32>, vector<8x4xf32>, vector<8x8xf32> -> vector<8x8xf32>
    %cst_57 = arith.constant dense<0xFF800000> : vector<8xf32>
    %77 = vector.multi_reduction <maximumf>, %76, %cst_57 [1] : vector<8x8xf32> to vector<8xf32>
    %78 = vector.shape_cast %77 : vector<8xf32> to vector<8x1xf32>
    %79 = vector.broadcast %78 : vector<8x1xf32> to vector<8x8xf32>
    %80 = arith.subf %76, %79 : vector<8x8xf32>
    %81 = math.exp %80 : vector<8x8xf32>
    %cst_58 = arith.constant dense<0.000000e+00> : vector<8xf32>
    %82 = vector.multi_reduction <add>, %81, %cst_58 [1] : vector<8x8xf32> to vector<8xf32>
    %83 = vector.shape_cast %82 : vector<8xf32> to vector<8x1xf32>
    %84 = vector.broadcast %83 : vector<8x1xf32> to vector<8x8xf32>
    %85 = arith.divf %81, %84 : vector<8x8xf32>
    %cst_59 = arith.constant dense<0.000000e+00> : vector<8x4xf32>
    %86 = tpu.matmul %85, %75, %cst_59 {dimension_numbers = #tpu.dot_dimension_numbers<[1], [0], [0], [1], [0, 0, 1, 1], [], []>} : vector<8x8xf32>, vector<8x4xf32>, vector<8x4xf32> -> vector<8x4xf32>
    %87 = vector.extract_strided_slice %13 {offsets = [4, 0], sizes = [4, 32], strides = [1, 1]} : vector<32x32xf32> to vector<4x32xf32>
    %cst_60 = arith.constant dense<0.000000e+00> : vector<8x32xf32>
    %88 = tpu.matmul %86, %87, %cst_60 {dimension_numbers = #tpu.dot_dimension_numbers<[1], [0], [0], [1], [0, 0, 1, 1], [], []>} : vector<8x4xf32>, vector<4x32xf32>, vector<8x32xf32> -> vector<8x32xf32>
    %89 = arith.addf %72, %88 : vector<8x32xf32>
    %90 = vector.extract_strided_slice %54 {offsets = [0, 8], sizes = [8, 4], strides = [1, 1]} : vector<8x32xf32> to vector<8x4xf32>
    %91 = vector.extract_strided_slice %55 {offsets = [0, 8], sizes = [8, 4], strides = [1, 1]} : vector<8x32xf32> to vector<8x4xf32>
    %92 = vector.extract_strided_slice %56 {offsets = [0, 8], sizes = [8, 4], strides = [1, 1]} : vector<8x32xf32> to vector<8x4xf32>
    %cst_61 = arith.constant dense<0.000000e+00> : vector<8x8xf32>
    %93 = tpu.matmul %90, %91, %cst_61 {dimension_numbers = #tpu.dot_dimension_numbers<[1], [1], [0], [0], [0, 0, 1, 0], [], []>} : vector<8x4xf32>, vector<8x4xf32>, vector<8x8xf32> -> vector<8x8xf32>
    %cst_62 = arith.constant dense<0xFF800000> : vector<8xf32>
    %94 = vector.multi_reduction <maximumf>, %93, %cst_62 [1] : vector<8x8xf32> to vector<8xf32>
    %95 = vector.shape_cast %94 : vector<8xf32> to vector<8x1xf32>
    %96 = vector.broadcast %95 : vector<8x1xf32> to vector<8x8xf32>
    %97 = arith.subf %93, %96 : vector<8x8xf32>
    %98 = math.exp %97 : vector<8x8xf32>
    %cst_63 = arith.constant dense<0.000000e+00> : vector<8xf32>
    %99 = vector.multi_reduction <add>, %98, %cst_63 [1] : vector<8x8xf32> to vector<8xf32>
    %100 = vector.shape_cast %99 : vector<8xf32> to vector<8x1xf32>
    %101 = vector.broadcast %100 : vector<8x1xf32> to vector<8x8xf32>
    %102 = arith.divf %98, %101 : vector<8x8xf32>
    %cst_64 = arith.constant dense<0.000000e+00> : vector<8x4xf32>
    %103 = tpu.matmul %102, %92, %cst_64 {dimension_numbers = #tpu.dot_dimension_numbers<[1], [0], [0], [1], [0, 0, 1, 1], [], []>} : vector<8x8xf32>, vector<8x4xf32>, vector<8x4xf32> -> vector<8x4xf32>
    %104 = vector.extract_strided_slice %13 {offsets = [8, 0], sizes = [4, 32], strides = [1, 1]} : vector<32x32xf32> to vector<4x32xf32>
    %cst_65 = arith.constant dense<0.000000e+00> : vector<8x32xf32>
    %105 = tpu.matmul %103, %104, %cst_65 {dimension_numbers = #tpu.dot_dimension_numbers<[1], [0], [0], [1], [0, 0, 1, 1], [], []>} : vector<8x4xf32>, vector<4x32xf32>, vector<8x32xf32> -> vector<8x32xf32>
    %106 = arith.addf %89, %105 : vector<8x32xf32>
    %107 = vector.extract_strided_slice %54 {offsets = [0, 12], sizes = [8, 4], strides = [1, 1]} : vector<8x32xf32> to vector<8x4xf32>
    %108 = vector.extract_strided_slice %55 {offsets = [0, 12], sizes = [8, 4], strides = [1, 1]} : vector<8x32xf32> to vector<8x4xf32>
    %109 = vector.extract_strided_slice %56 {offsets = [0, 12], sizes = [8, 4], strides = [1, 1]} : vector<8x32xf32> to vector<8x4xf32>
    %cst_66 = arith.constant dense<0.000000e+00> : vector<8x8xf32>
    %110 = tpu.matmul %107, %108, %cst_66 {dimension_numbers = #tpu.dot_dimension_numbers<[1], [1], [0], [0], [0, 0, 1, 0], [], []>} : vector<8x4xf32>, vector<8x4xf32>, vector<8x8xf32> -> vector<8x8xf32>
    %cst_67 = arith.constant dense<0xFF800000> : vector<8xf32>
    %111 = vector.multi_reduction <maximumf>, %110, %cst_67 [1] : vector<8x8xf32> to vector<8xf32>
    %112 = vector.shape_cast %111 : vector<8xf32> to vector<8x1xf32>
    %113 = vector.broadcast %112 : vector<8x1xf32> to vector<8x8xf32>
    %114 = arith.subf %110, %113 : vector<8x8xf32>
    %115 = math.exp %114 : vector<8x8xf32>
    %cst_68 = arith.constant dense<0.000000e+00> : vector<8xf32>
    %116 = vector.multi_reduction <add>, %115, %cst_68 [1] : vector<8x8xf32> to vector<8xf32>
    %117 = vector.shape_cast %116 : vector<8xf32> to vector<8x1xf32>
    %118 = vector.broadcast %117 : vector<8x1xf32> to vector<8x8xf32>
    %119 = arith.divf %115, %118 : vector<8x8xf32>
    %cst_69 = arith.constant dense<0.000000e+00> : vector<8x4xf32>
    %120 = tpu.matmul %119, %109, %cst_69 {dimension_numbers = #tpu.dot_dimension_numbers<[1], [0], [0], [1], [0, 0, 1, 1], [], []>} : vector<8x8xf32>, vector<8x4xf32>, vector<8x4xf32> -> vector<8x4xf32>
    %121 = vector.extract_strided_slice %13 {offsets = [12, 0], sizes = [4, 32], strides = [1, 1]} : vector<32x32xf32> to vector<4x32xf32>
    %cst_70 = arith.constant dense<0.000000e+00> : vector<8x32xf32>
    %122 = tpu.matmul %120, %121, %cst_70 {dimension_numbers = #tpu.dot_dimension_numbers<[1], [0], [0], [1], [0, 0, 1, 1], [], []>} : vector<8x4xf32>, vector<4x32xf32>, vector<8x32xf32> -> vector<8x32xf32>
    %123 = arith.addf %106, %122 : vector<8x32xf32>
    %124 = vector.extract_strided_slice %54 {offsets = [0, 16], sizes = [8, 4], strides = [1, 1]} : vector<8x32xf32> to vector<8x4xf32>
    %125 = vector.extract_strided_slice %55 {offsets = [0, 16], sizes = [8, 4], strides = [1, 1]} : vector<8x32xf32> to vector<8x4xf32>
    %126 = vector.extract_strided_slice %56 {offsets = [0, 16], sizes = [8, 4], strides = [1, 1]} : vector<8x32xf32> to vector<8x4xf32>
    %cst_71 = arith.constant dense<0.000000e+00> : vector<8x8xf32>
    %127 = tpu.matmul %124, %125, %cst_71 {dimension_numbers = #tpu.dot_dimension_numbers<[1], [1], [0], [0], [0, 0, 1, 0], [], []>} : vector<8x4xf32>, vector<8x4xf32>, vector<8x8xf32> -> vector<8x8xf32>
    %cst_72 = arith.constant dense<0xFF800000> : vector<8xf32>
    %128 = vector.multi_reduction <maximumf>, %127, %cst_72 [1] : vector<8x8xf32> to vector<8xf32>
    %129 = vector.shape_cast %128 : vector<8xf32> to vector<8x1xf32>
    %130 = vector.broadcast %129 : vector<8x1xf32> to vector<8x8xf32>
    %131 = arith.subf %127, %130 : vector<8x8xf32>
    %132 = math.exp %131 : vector<8x8xf32>
    %cst_73 = arith.constant dense<0.000000e+00> : vector<8xf32>
    %133 = vector.multi_reduction <add>, %132, %cst_73 [1] : vector<8x8xf32> to vector<8xf32>
    %134 = vector.shape_cast %133 : vector<8xf32> to vector<8x1xf32>
    %135 = vector.broadcast %134 : vector<8x1xf32> to vector<8x8xf32>
    %136 = arith.divf %132, %135 : vector<8x8xf32>
    %cst_74 = arith.constant dense<0.000000e+00> : vector<8x4xf32>
    %137 = tpu.matmul %136, %126, %cst_74 {dimension_numbers = #tpu.dot_dimension_numbers<[1], [0], [0], [1], [0, 0, 1, 1], [], []>} : vector<8x8xf32>, vector<8x4xf32>, vector<8x4xf32> -> vector<8x4xf32>
    %138 = vector.extract_strided_slice %13 {offsets = [16, 0], sizes = [4, 32], strides = [1, 1]} : vector<32x32xf32> to vector<4x32xf32>
    %cst_75 = arith.constant dense<0.000000e+00> : vector<8x32xf32>
    %139 = tpu.matmul %137, %138, %cst_75 {dimension_numbers = #tpu.dot_dimension_numbers<[1], [0], [0], [1], [0, 0, 1, 1], [], []>} : vector<8x4xf32>, vector<4x32xf32>, vector<8x32xf32> -> vector<8x32xf32>
    %140 = arith.addf %123, %139 : vector<8x32xf32>
    %141 = vector.extract_strided_slice %54 {offsets = [0, 20], sizes = [8, 4], strides = [1, 1]} : vector<8x32xf32> to vector<8x4xf32>
    %142 = vector.extract_strided_slice %55 {offsets = [0, 20], sizes = [8, 4], strides = [1, 1]} : vector<8x32xf32> to vector<8x4xf32>
    %143 = vector.extract_strided_slice %56 {offsets = [0, 20], sizes = [8, 4], strides = [1, 1]} : vector<8x32xf32> to vector<8x4xf32>
    %cst_76 = arith.constant dense<0.000000e+00> : vector<8x8xf32>
    %144 = tpu.matmul %141, %142, %cst_76 {dimension_numbers = #tpu.dot_dimension_numbers<[1], [1], [0], [0], [0, 0, 1, 0], [], []>} : vector<8x4xf32>, vector<8x4xf32>, vector<8x8xf32> -> vector<8x8xf32>
    %cst_77 = arith.constant dense<0xFF800000> : vector<8xf32>
    %145 = vector.multi_reduction <maximumf>, %144, %cst_77 [1] : vector<8x8xf32> to vector<8xf32>
    %146 = vector.shape_cast %145 : vector<8xf32> to vector<8x1xf32>
    %147 = vector.broadcast %146 : vector<8x1xf32> to vector<8x8xf32>
    %148 = arith.subf %144, %147 : vector<8x8xf32>
    %149 = math.exp %148 : vector<8x8xf32>
    %cst_78 = arith.constant dense<0.000000e+00> : vector<8xf32>
    %150 = vector.multi_reduction <add>, %149, %cst_78 [1] : vector<8x8xf32> to vector<8xf32>
    %151 = vector.shape_cast %150 : vector<8xf32> to vector<8x1xf32>
    %152 = vector.broadcast %151 : vector<8x1xf32> to vector<8x8xf32>
    %153 = arith.divf %149, %152 : vector<8x8xf32>
    %cst_79 = arith.constant dense<0.000000e+00> : vector<8x4xf32>
    %154 = tpu.matmul %153, %143, %cst_79 {dimension_numbers = #tpu.dot_dimension_numbers<[1], [0], [0], [1], [0, 0, 1, 1], [], []>} : vector<8x8xf32>, vector<8x4xf32>, vector<8x4xf32> -> vector<8x4xf32>
    %155 = vector.extract_strided_slice %13 {offsets = [20, 0], sizes = [4, 32], strides = [1, 1]} : vector<32x32xf32> to vector<4x32xf32>
    %cst_80 = arith.constant dense<0.000000e+00> : vector<8x32xf32>
    %156 = tpu.matmul %154, %155, %cst_80 {dimension_numbers = #tpu.dot_dimension_numbers<[1], [0], [0], [1], [0, 0, 1, 1], [], []>} : vector<8x4xf32>, vector<4x32xf32>, vector<8x32xf32> -> vector<8x32xf32>
    %157 = arith.addf %140, %156 : vector<8x32xf32>
    %158 = vector.extract_strided_slice %54 {offsets = [0, 24], sizes = [8, 4], strides = [1, 1]} : vector<8x32xf32> to vector<8x4xf32>
    %159 = vector.extract_strided_slice %55 {offsets = [0, 24], sizes = [8, 4], strides = [1, 1]} : vector<8x32xf32> to vector<8x4xf32>
    %160 = vector.extract_strided_slice %56 {offsets = [0, 24], sizes = [8, 4], strides = [1, 1]} : vector<8x32xf32> to vector<8x4xf32>
    %cst_81 = arith.constant dense<0.000000e+00> : vector<8x8xf32>
    %161 = tpu.matmul %158, %159, %cst_81 {dimension_numbers = #tpu.dot_dimension_numbers<[1], [1], [0], [0], [0, 0, 1, 0], [], []>} : vector<8x4xf32>, vector<8x4xf32>, vector<8x8xf32> -> vector<8x8xf32>
    %cst_82 = arith.constant dense<0xFF800000> : vector<8xf32>
    %162 = vector.multi_reduction <maximumf>, %161, %cst_82 [1] : vector<8x8xf32> to vector<8xf32>
    %163 = vector.shape_cast %162 : vector<8xf32> to vector<8x1xf32>
    %164 = vector.broadcast %163 : vector<8x1xf32> to vector<8x8xf32>
    %165 = arith.subf %161, %164 : vector<8x8xf32>
    %166 = math.exp %165 : vector<8x8xf32>
    %cst_83 = arith.constant dense<0.000000e+00> : vector<8xf32>
    %167 = vector.multi_reduction <add>, %166, %cst_83 [1] : vector<8x8xf32> to vector<8xf32>
    %168 = vector.shape_cast %167 : vector<8xf32> to vector<8x1xf32>
    %169 = vector.broadcast %168 : vector<8x1xf32> to vector<8x8xf32>
    %170 = arith.divf %166, %169 : vector<8x8xf32>
    %cst_84 = arith.constant dense<0.000000e+00> : vector<8x4xf32>
    %171 = tpu.matmul %170, %160, %cst_84 {dimension_numbers = #tpu.dot_dimension_numbers<[1], [0], [0], [1], [0, 0, 1, 1], [], []>} : vector<8x8xf32>, vector<8x4xf32>, vector<8x4xf32> -> vector<8x4xf32>
    %172 = vector.extract_strided_slice %13 {offsets = [24, 0], sizes = [4, 32], strides = [1, 1]} : vector<32x32xf32> to vector<4x32xf32>
    %cst_85 = arith.constant dense<0.000000e+00> : vector<8x32xf32>
    %173 = tpu.matmul %171, %172, %cst_85 {dimension_numbers = #tpu.dot_dimension_numbers<[1], [0], [0], [1], [0, 0, 1, 1], [], []>} : vector<8x4xf32>, vector<4x32xf32>, vector<8x32xf32> -> vector<8x32xf32>
    %174 = arith.addf %157, %173 : vector<8x32xf32>
    %175 = vector.extract_strided_slice %54 {offsets = [0, 28], sizes = [8, 4], strides = [1, 1]} : vector<8x32xf32> to vector<8x4xf32>
    %176 = vector.extract_strided_slice %55 {offsets = [0, 28], sizes = [8, 4], strides = [1, 1]} : vector<8x32xf32> to vector<8x4xf32>
    %177 = vector.extract_strided_slice %56 {offsets = [0, 28], sizes = [8, 4], strides = [1, 1]} : vector<8x32xf32> to vector<8x4xf32>
    %cst_86 = arith.constant dense<0.000000e+00> : vector<8x8xf32>
    %178 = tpu.matmul %175, %176, %cst_86 {dimension_numbers = #tpu.dot_dimension_numbers<[1], [1], [0], [0], [0, 0, 1, 0], [], []>} : vector<8x4xf32>, vector<8x4xf32>, vector<8x8xf32> -> vector<8x8xf32>
    %cst_87 = arith.constant dense<0xFF800000> : vector<8xf32>
    %179 = vector.multi_reduction <maximumf>, %178, %cst_87 [1] : vector<8x8xf32> to vector<8xf32>
    %180 = vector.shape_cast %179 : vector<8xf32> to vector<8x1xf32>
    %181 = vector.broadcast %180 : vector<8x1xf32> to vector<8x8xf32>
    %182 = arith.subf %178, %181 : vector<8x8xf32>
    %183 = math.exp %182 : vector<8x8xf32>
    %cst_88 = arith.constant dense<0.000000e+00> : vector<8xf32>
    %184 = vector.multi_reduction <add>, %183, %cst_88 [1] : vector<8x8xf32> to vector<8xf32>
    %185 = vector.shape_cast %184 : vector<8xf32> to vector<8x1xf32>
    %186 = vector.broadcast %185 : vector<8x1xf32> to vector<8x8xf32>
    %187 = arith.divf %183, %186 : vector<8x8xf32>
    %cst_89 = arith.constant dense<0.000000e+00> : vector<8x4xf32>
    %188 = tpu.matmul %187, %177, %cst_89 {dimension_numbers = #tpu.dot_dimension_numbers<[1], [0], [0], [1], [0, 0, 1, 1], [], []>} : vector<8x8xf32>, vector<8x4xf32>, vector<8x4xf32> -> vector<8x4xf32>
    %189 = vector.extract_strided_slice %13 {offsets = [28, 0], sizes = [4, 32], strides = [1, 1]} : vector<32x32xf32> to vector<4x32xf32>
    %cst_90 = arith.constant dense<0.000000e+00> : vector<8x32xf32>
    %190 = tpu.matmul %188, %189, %cst_90 {dimension_numbers = #tpu.dot_dimension_numbers<[1], [0], [0], [1], [0, 0, 1, 1], [], []>} : vector<8x4xf32>, vector<4x32xf32>, vector<8x32xf32> -> vector<8x32xf32>
    %191 = arith.addf %174, %190 : vector<8x32xf32>
    %192 = vector.broadcast %5 : vector<1x32xf32> to vector<8x32xf32>
    %193 = arith.addf %191, %192 : vector<8x32xf32>
    %194 = arith.addf %28, %193 : vector<8x32xf32>
    %cst_91 = arith.constant dense<0.000000e+00> : vector<8xf32>
    %195 = vector.multi_reduction <add>, %194, %cst_91 [1] : vector<8x32xf32> to vector<8xf32>
    %196 = vector.shape_cast %195 : vector<8xf32> to vector<8x1xf32>
    %cst_92 = arith.constant 3.200000e+01 : f32
    %197 = vector.broadcast %cst_92 : f32 to vector<8x1xf32>
    %198 = arith.divf %196, %197 : vector<8x1xf32>
    %199 = vector.broadcast %198 : vector<8x1xf32> to vector<8x32xf32>
    %200 = arith.subf %194, %199 : vector<8x32xf32>
    %201 = arith.mulf %200, %200 : vector<8x32xf32>
    %cst_93 = arith.constant dense<0.000000e+00> : vector<8xf32>
    %202 = vector.multi_reduction <add>, %201, %cst_93 [1] : vector<8x32xf32> to vector<8xf32>
    %203 = vector.shape_cast %202 : vector<8xf32> to vector<8x1xf32>
    %cst_94 = arith.constant 3.200000e+01 : f32
    %204 = vector.broadcast %cst_94 : f32 to vector<8x1xf32>
    %205 = arith.divf %203, %204 : vector<8x1xf32>
    %cst_95 = arith.constant 9.99999974E-6 : f32
    %206 = vector.broadcast %cst_95 : f32 to vector<8x1xf32>
    %207 = arith.addf %205, %206 : vector<8x1xf32>
    %208 = math.rsqrt %207 : vector<8x1xf32>
    %209 = vector.broadcast %208 : vector<8x1xf32> to vector<8x32xf32>
    %210 = arith.mulf %200, %209 : vector<8x32xf32>
    %211 = vector.broadcast %10 : vector<1x32xf32> to vector<8x32xf32>
    %212 = arith.mulf %210, %211 : vector<8x32xf32>
    %213 = vector.broadcast %9 : vector<1x32xf32> to vector<8x32xf32>
    %214 = arith.addf %212, %213 : vector<8x32xf32>
    %cst_96 = arith.constant dense<0.000000e+00> : vector<8x512xf32>
    %215 = tpu.matmul %214, %11, %cst_96 {dimension_numbers = #tpu.dot_dimension_numbers<[1], [0], [0], [1], [0, 0, 1, 1], [], []>} : vector<8x32xf32>, vector<32x512xf32>, vector<8x512xf32> -> vector<8x512xf32>
    %216 = vector.broadcast %3 : vector<1x512xf32> to vector<8x512xf32>
    %217 = arith.addf %215, %216 : vector<8x512xf32>
    %cst_97 = arith.constant 5.000000e-01 : f32
    %218 = vector.broadcast %cst_97 : f32 to vector<8x512xf32>
    %219 = arith.mulf %218, %217 : vector<8x512xf32>
    %cst_98 = arith.constant 0.707106769 : f32
    %220 = vector.broadcast %cst_98 : f32 to vector<8x512xf32>
    %221 = arith.mulf %217, %220 : vector<8x512xf32>
    %cst_99 = arith.constant 0.000000e+00 : f32
    %222 = vector.broadcast %cst_99 : f32 to vector<8x512xf32>
    %223 = arith.cmpf oge, %221, %222 : vector<8x512xf32>
    %cst_100 = arith.constant 1.000000e+00 : f32
    %cst_101 = arith.constant -1.000000e+00 : f32
    %224 = vector.broadcast %cst_100 : f32 to vector<8x512xf32>
    %225 = vector.broadcast %cst_101 : f32 to vector<8x512xf32>
    %226 = arith.select %223, %224, %225 : vector<8x512xi1>, vector<8x512xf32>
    %227 = math.absf %221 : vector<8x512xf32>
    %cst_102 = arith.constant 0.327591091 : f32
    %228 = vector.broadcast %cst_102 : f32 to vector<8x512xf32>
    %229 = arith.mulf %228, %227 : vector<8x512xf32>
    %cst_103 = arith.constant 1.000000e+00 : f32
    %230 = vector.broadcast %cst_103 : f32 to vector<8x512xf32>
    %231 = arith.addf %230, %229 : vector<8x512xf32>
    %cst_104 = arith.constant 1.000000e+00 : f32
    %232 = vector.broadcast %cst_104 : f32 to vector<8x512xf32>
    %233 = arith.divf %232, %231 : vector<8x512xf32>
    %cst_105 = arith.constant 1.06140542 : f32
    %234 = vector.broadcast %cst_105 : f32 to vector<8x512xf32>
    %235 = arith.mulf %234, %233 : vector<8x512xf32>
    %cst_106 = arith.constant -1.45315206 : f32
    %236 = vector.broadcast %cst_106 : f32 to vector<8x512xf32>
    %237 = arith.addf %235, %236 : vector<8x512xf32>
    %238 = arith.mulf %237, %233 : vector<8x512xf32>
    %cst_107 = arith.constant 1.42141378 : f32
    %239 = vector.broadcast %cst_107 : f32 to vector<8x512xf32>
    %240 = arith.addf %238, %239 : vector<8x512xf32>
    %241 = arith.mulf %240, %233 : vector<8x512xf32>
    %cst_108 = arith.constant -0.284496725 : f32
    %242 = vector.broadcast %cst_108 : f32 to vector<8x512xf32>
    %243 = arith.addf %241, %242 : vector<8x512xf32>
    %244 = arith.mulf %243, %233 : vector<8x512xf32>
    %cst_109 = arith.constant 0.254829586 : f32
    %245 = vector.broadcast %cst_109 : f32 to vector<8x512xf32>
    %246 = arith.addf %244, %245 : vector<8x512xf32>
    %247 = arith.mulf %246, %233 : vector<8x512xf32>
    %248 = arith.mulf %227, %227 : vector<8x512xf32>
    %cst_110 = arith.constant 0.000000e+00 : f32
    %249 = vector.broadcast %cst_110 : f32 to vector<8x512xf32>
    %250 = arith.subf %249, %248 : vector<8x512xf32>
    %251 = math.exp %250 : vector<8x512xf32>
    %252 = arith.mulf %247, %251 : vector<8x512xf32>
    %cst_111 = arith.constant 1.000000e+00 : f32
    %253 = vector.broadcast %cst_111 : f32 to vector<8x512xf32>
    %254 = arith.subf %253, %252 : vector<8x512xf32>
    %255 = arith.mulf %226, %254 : vector<8x512xf32>
    %cst_112 = arith.constant 1.000000e+00 : f32
    %256 = vector.broadcast %cst_112 : f32 to vector<8x512xf32>
    %257 = arith.addf %256, %255 : vector<8x512xf32>
    %258 = arith.mulf %219, %257 : vector<8x512xf32>
    %cst_113 = arith.constant dense<0.000000e+00> : vector<8x32xf32>
    %259 = tpu.matmul %258, %12, %cst_113 {dimension_numbers = #tpu.dot_dimension_numbers<[1], [0], [0], [1], [0, 0, 1, 1], [], []>} : vector<8x512xf32>, vector<512x32xf32>, vector<8x32xf32> -> vector<8x32xf32>
    %260 = vector.broadcast %4 : vector<1x32xf32> to vector<8x32xf32>
    %261 = arith.addf %259, %260 : vector<8x32xf32>
    %262 = arith.addf %194, %261 : vector<8x32xf32>
    %c0_114 = arith.constant 0 : index
    %c0_115 = arith.constant 0 : index
    %c0_116 = arith.constant 0 : index
    %263 = vector.load %arg19[%c0_114, %c0_115, %c0_116] : memref<1x8x32xf32, #tpu.memory_space<vmem>>, vector<1x8x32xf32>
    %264 = vector.shape_cast %263 : vector<1x8x32xf32> to vector<8x32xf32>
    %265 = vector.shape_cast %262 : vector<8x32xf32> to vector<1x8x32xf32>
    tpu.vector_store %arg19[%c0_114, %c0_115, %c0_116], %265 {strides = array<i32>} : memref<1x8x32xf32, #tpu.memory_space<vmem>>, vector<1x8x32xf32>,
    return
  }
  func.func @transform_0(%arg0: i32) -> (i32, i32, i32) {
    %c0_i32 = arith.constant 0 : i32
    %c0_i32_0 = arith.constant 0 : i32
    %c0_i32_1 = arith.constant 0 : i32
    return %arg0, %c0_i32, %c0_i32_0 : i32, i32, i32
  }
  func.func @transform_1(%arg0: i32) -> (i32, i32, i32) {
    %c0_i32 = arith.constant 0 : i32
    %c0_i32_0 = arith.constant 0 : i32
    %c0_i32_1 = arith.constant 0 : i32
    return %arg0, %c0_i32, %c0_i32_0 : i32, i32, i32
  }
  func.func @transform_2(%arg0: i32) -> (i32, i32, i32) {
    %c0_i32 = arith.constant 0 : i32
    %c0_i32_0 = arith.constant 0 : i32
    %c0_i32_1 = arith.constant 0 : i32
    %c0_i32_2 = arith.constant 0 : i32
    return %c0_i32, %c0_i32_0, %c0_i32_1 : i32, i32, i32
  }
  func.func @transform_3(%arg0: i32) -> (i32, i32) {
    %c0_i32 = arith.constant 0 : i32
    %c0_i32_0 = arith.constant 0 : i32
    %c0_i32_1 = arith.constant 0 : i32
    return %c0_i32, %c0_i32_0 : i32, i32
  }
  func.func @transform_4(%arg0: i32) -> (i32, i32) {
    %c0_i32 = arith.constant 0 : i32
    %c0_i32_0 = arith.constant 0 : i32
    %c0_i32_1 = arith.constant 0 : i32
    return %c0_i32, %c0_i32_0 : i32, i32
  }
  func.func @transform_5(%arg0: i32) -> (i32, i32) {
    %c0_i32 = arith.constant 0 : i32
    %c0_i32_0 = arith.constant 0 : i32
    %c0_i32_1 = arith.constant 0 : i32
    return %c0_i32, %c0_i32_0 : i32, i32
  }
  func.func @transform_6(%arg0: i32) -> (i32, i32) {
    %c0_i32 = arith.constant 0 : i32
    %c0_i32_0 = arith.constant 0 : i32
    %c0_i32_1 = arith.constant 0 : i32
    return %c0_i32, %c0_i32_0 : i32, i32
  }
  func.func @transform_7(%arg0: i32) -> (i32, i32) {
    %c0_i32 = arith.constant 0 : i32
    %c0_i32_0 = arith.constant 0 : i32
    %c0_i32_1 = arith.constant 0 : i32
    return %c0_i32, %c0_i32_0 : i32, i32
  }
  func.func @transform_8(%arg0: i32) -> (i32, i32) {
    %c0_i32 = arith.constant 0 : i32
    %c0_i32_0 = arith.constant 0 : i32
    %c0_i32_1 = arith.constant 0 : i32
    return %c0_i32, %c0_i32_0 : i32, i32
  }
  func.func @transform_9(%arg0: i32) -> (i32, i32) {
    %c0_i32 = arith.constant 0 : i32
    %c0_i32_0 = arith.constant 0 : i32
    %c0_i32_1 = arith.constant 0 : i32
    return %c0_i32, %c0_i32_0 : i32, i32
  }
  func.func @transform_10(%arg0: i32) -> (i32, i32) {
    %c0_i32 = arith.constant 0 : i32
    %c0_i32_0 = arith.constant 0 : i32
    %c0_i32_1 = arith.constant 0 : i32
    return %c0_i32, %c0_i32_0 : i32, i32
  }
  func.func @transform_11(%arg0: i32) -> (i32, i32) {
    %c0_i32 = arith.constant 0 : i32
    %c0_i32_0 = arith.constant 0 : i32
    %c0_i32_1 = arith.constant 0 : i32
    return %c0_i32, %c0_i32_0 : i32, i32
  }
  func.func @transform_12(%arg0: i32) -> (i32, i32) {
    %c0_i32 = arith.constant 0 : i32
    %c0_i32_0 = arith.constant 0 : i32
    %c0_i32_1 = arith.constant 0 : i32
    return %c0_i32, %c0_i32_0 : i32, i32
  }
  func.func @transform_13(%arg0: i32) -> (i32, i32) {
    %c0_i32 = arith.constant 0 : i32
    %c0_i32_0 = arith.constant 0 : i32
    %c0_i32_1 = arith.constant 0 : i32
    return %c0_i32, %c0_i32_0 : i32, i32
  }
  func.func @transform_14(%arg0: i32) -> (i32, i32) {
    %c0_i32 = arith.constant 0 : i32
    %c0_i32_0 = arith.constant 0 : i32
    %c0_i32_1 = arith.constant 0 : i32
    return %c0_i32, %c0_i32_0 : i32, i32
  }
  func.func @transform_15(%arg0: i32) -> (i32, i32) {
    %c0_i32 = arith.constant 0 : i32
    %c0_i32_0 = arith.constant 0 : i32
    %c0_i32_1 = arith.constant 0 : i32
    return %c0_i32, %c0_i32_0 : i32, i32
  }
  func.func @transform_16(%arg0: i32) -> (i32, i32) {
    %c0_i32 = arith.constant 0 : i32
    %c0_i32_0 = arith.constant 0 : i32
    %c0_i32_1 = arith.constant 0 : i32
    return %c0_i32, %c0_i32_0 : i32, i32
  }
  func.func @transform_17(%arg0: i32) -> (i32, i32) {
    %c0_i32 = arith.constant 0 : i32
    %c0_i32_0 = arith.constant 0 : i32
    %c0_i32_1 = arith.constant 0 : i32
    return %c0_i32, %c0_i32_0 : i32, i32
  }
  func.func @transform_18(%arg0: i32) -> (i32, i32, i32) {
    %c0_i32 = arith.constant 0 : i32
    %c0_i32_0 = arith.constant 0 : i32
    %c0_i32_1 = arith.constant 0 : i32
    return %arg0, %c0_i32, %c0_i32_0 : i32, i32, i32
  }
}

module attributes {stable_mosaic.version = 11 : i64} {
  func.func @kernel(%arg0: i32, %arg1: memref<1x7x32xf32, #tpu.memory_space<vmem>>, %arg2: memref<1x8x32xf32, #tpu.memory_space<vmem>>, %arg3: memref<1x1x7xf32, #tpu.memory_space<vmem>>, %arg4: memref<1x7x1xi32, #tpu.memory_space<vmem>>, %arg5: memref<1x64xf32, #tpu.memory_space<vmem>>, %arg6: memref<32x64xf32, #tpu.memory_space<vmem>>, %arg7: memref<1x512xf32, #tpu.memory_space<vmem>>, %arg8: memref<1x32xf32, #tpu.memory_space<vmem>>, %arg9: memref<1x64xf32, #tpu.memory_space<vmem>>, %arg10: memref<1x32xf32, #tpu.memory_space<vmem>>, %arg11: memref<1x32xf32, #tpu.memory_space<vmem>>, %arg12: memref<1x32xf32, #tpu.memory_space<vmem>>, %arg13: memref<1x96xf32, #tpu.memory_space<vmem>>, %arg14: memref<1x32xf32, #tpu.memory_space<vmem>>, %arg15: memref<1x32xf32, #tpu.memory_space<vmem>>, %arg16: memref<1x32xf32, #tpu.memory_space<vmem>>, %arg17: memref<1x32xf32, #tpu.memory_space<vmem>>, %arg18: memref<1x32xf32, #tpu.memory_space<vmem>>, %arg19: memref<1x32xf32, #tpu.memory_space<vmem>>, %arg20: memref<32x512xf32, #tpu.memory_space<vmem>>, %arg21: memref<512x32xf32, #tpu.memory_space<vmem>>, %arg22: memref<32x64xf32, #tpu.memory_space<vmem>>, %arg23: memref<32x32xf32, #tpu.memory_space<vmem>>, %arg24: memref<32x32xf32, #tpu.memory_space<vmem>>, %arg25: memref<32x32xf32, #tpu.memory_space<vmem>>, %arg26: memref<32x96xf32, #tpu.memory_space<vmem>>, %arg27: memref<1x512xf32, #tpu.memory_space<vmem>>, %arg28: memref<1x32xf32, #tpu.memory_space<vmem>>, %arg29: memref<1x64xf32, #tpu.memory_space<vmem>>, %arg30: memref<1x32xf32, #tpu.memory_space<vmem>>, %arg31: memref<1x32xf32, #tpu.memory_space<vmem>>, %arg32: memref<1x32xf32, #tpu.memory_space<vmem>>, %arg33: memref<1x96xf32, #tpu.memory_space<vmem>>, %arg34: memref<1x32xf32, #tpu.memory_space<vmem>>, %arg35: memref<1x32xf32, #tpu.memory_space<vmem>>, %arg36: memref<1x32xf32, #tpu.memory_space<vmem>>, %arg37: memref<1x32xf32, #tpu.memory_space<vmem>>, %arg38: memref<1x32xf32, #tpu.memory_space<vmem>>, %arg39: memref<1x32xf32, #tpu.memory_space<vmem>>, %arg40: memref<32x512xf32, #tpu.memory_space<vmem>>, %arg41: memref<512x32xf32, #tpu.memory_space<vmem>>, %arg42: memref<32x64xf32, #tpu.memory_space<vmem>>, %arg43: memref<32x32xf32, #tpu.memory_space<vmem>>, %arg44: memref<32x32xf32, #tpu.memory_space<vmem>>, %arg45: memref<32x32xf32, #tpu.memory_space<vmem>>, %arg46: memref<32x96xf32, #tpu.memory_space<vmem>>, %arg47: memref<1x7x64xf32, #tpu.memory_space<vmem>>, %arg48: memref<1x7x1xf32, #tpu.memory_space<vmem>>) attributes {dimension_semantics = [#tpu.dimension_semantics<parallel>], iteration_bounds = array<i64: 2>, scalar_prefetch = 0 : i64, scratch_operands = 0 : i64, tpu.core_type = #tpu.core_type<tc>, window_params = [{transform_indices = @transform_0, window_bounds = array<i64: 1, 7, 32>}, {transform_indices = @transform_1, window_bounds = array<i64: 1, 8, 32>}, {transform_indices = @transform_2, window_bounds = array<i64: 1, 1, 7>}, {transform_indices = @transform_3, window_bounds = array<i64: 1, 7, 1>}, {pipeline_mode = #tpu.pipeline_mode<synchronous>, transform_indices = @transform_4, window_bounds = array<i64: 1, 64>}, {pipeline_mode = #tpu.pipeline_mode<synchronous>, transform_indices = @transform_5, window_bounds = array<i64: 32, 64>}, {pipeline_mode = #tpu.pipeline_mode<synchronous>, transform_indices = @transform_6, window_bounds = array<i64: 1, 512>}, {pipeline_mode = #tpu.pipeline_mode<synchronous>, transform_indices = @transform_7, window_bounds = array<i64: 1, 32>}, {pipeline_mode = #tpu.pipeline_mode<synchronous>, transform_indices = @transform_8, window_bounds = array<i64: 1, 64>}, {pipeline_mode = #tpu.pipeline_mode<synchronous>, transform_indices = @transform_9, window_bounds = array<i64: 1, 32>}, {pipeline_mode = #tpu.pipeline_mode<synchronous>, transform_indices = @transform_10, window_bounds = array<i64: 1, 32>}, {pipeline_mode = #tpu.pipeline_mode<synchronous>, transform_indices = @transform_11, window_bounds = array<i64: 1, 32>}, {pipeline_mode = #tpu.pipeline_mode<synchronous>, transform_indices = @transform_12, window_bounds = array<i64: 1, 96>}, {pipeline_mode = #tpu.pipeline_mode<synchronous>, transform_indices = @transform_13, window_bounds = array<i64: 1, 32>}, {pipeline_mode = #tpu.pipeline_mode<synchronous>, transform_indices = @transform_14, window_bounds = array<i64: 1, 32>}, {pipeline_mode = #tpu.pipeline_mode<synchronous>, transform_indices = @transform_15, window_bounds = array<i64: 1, 32>}, {pipeline_mode = #tpu.pipeline_mode<synchronous>, transform_indices = @transform_16, window_bounds = array<i64: 1, 32>}, {pipeline_mode = #tpu.pipeline_mode<synchronous>, transform_indices = @transform_17, window_bounds = array<i64: 1, 32>}, {pipeline_mode = #tpu.pipeline_mode<synchronous>, transform_indices = @transform_18, window_bounds = array<i64: 1, 32>}, {pipeline_mode = #tpu.pipeline_mode<synchronous>, transform_indices = @transform_19, window_bounds = array<i64: 32, 512>}, {pipeline_mode = #tpu.pipeline_mode<synchronous>, transform_indices = @transform_20, window_bounds = array<i64: 512, 32>}, {pipeline_mode = #tpu.pipeline_mode<synchronous>, transform_indices = @transform_21, window_bounds = array<i64: 32, 64>}, {pipeline_mode = #tpu.pipeline_mode<synchronous>, transform_indices = @transform_22, window_bounds = array<i64: 32, 32>}, {pipeline_mode = #tpu.pipeline_mode<synchronous>, transform_indices = @transform_23, window_bounds = array<i64: 32, 32>}, {pipeline_mode = #tpu.pipeline_mode<synchronous>, transform_indices = @transform_24, window_bounds = array<i64: 32, 32>}, {pipeline_mode = #tpu.pipeline_mode<synchronous>, transform_indices = @transform_25, window_bounds = array<i64: 32, 96>}, {pipeline_mode = #tpu.pipeline_mode<synchronous>, transform_indices = @transform_26, window_bounds = array<i64: 1, 512>}, {pipeline_mode = #tpu.pipeline_mode<synchronous>, transform_indices = @transform_27, window_bounds = array<i64: 1, 32>}, {pipeline_mode = #tpu.pipeline_mode<synchronous>, transform_indices = @transform_28, window_bounds = array<i64: 1, 64>}, {pipeline_mode = #tpu.pipeline_mode<synchronous>, transform_indices = @transform_29, window_bounds = array<i64: 1, 32>}, {pipeline_mode = #tpu.pipeline_mode<synchronous>, transform_indices = @transform_30, window_bounds = array<i64: 1, 32>}, {pipeline_mode = #tpu.pipeline_mode<synchronous>, transform_indices = @transform_31, window_bounds = array<i64: 1, 32>}, {pipeline_mode = #tpu.pipeline_mode<synchronous>, transform_indices = @transform_32, window_bounds = array<i64: 1, 96>}, {pipeline_mode = #tpu.pipeline_mode<synchronous>, transform_indices = @transform_33, window_bounds = array<i64: 1, 32>}, {pipeline_mode = #tpu.pipeline_mode<synchronous>, transform_indices = @transform_34, window_bounds = array<i64: 1, 32>}, {pipeline_mode = #tpu.pipeline_mode<synchronous>, transform_indices = @transform_35, window_bounds = array<i64: 1, 32>}, {pipeline_mode = #tpu.pipeline_mode<synchronous>, transform_indices = @transform_36, window_bounds = array<i64: 1, 32>}, {pipeline_mode = #tpu.pipeline_mode<synchronous>, transform_indices = @transform_37, window_bounds = array<i64: 1, 32>}, {pipeline_mode = #tpu.pipeline_mode<synchronous>, transform_indices = @transform_38, window_bounds = array<i64: 1, 32>}, {pipeline_mode = #tpu.pipeline_mode<synchronous>, transform_indices = @transform_39, window_bounds = array<i64: 32, 512>}, {pipeline_mode = #tpu.pipeline_mode<synchronous>, transform_indices = @transform_40, window_bounds = array<i64: 512, 32>}, {pipeline_mode = #tpu.pipeline_mode<synchronous>, transform_indices = @transform_41, window_bounds = array<i64: 32, 64>}, {pipeline_mode = #tpu.pipeline_mode<synchronous>, transform_indices = @transform_42, window_bounds = array<i64: 32, 32>}, {pipeline_mode = #tpu.pipeline_mode<synchronous>, transform_indices = @transform_43, window_bounds = array<i64: 32, 32>}, {pipeline_mode = #tpu.pipeline_mode<synchronous>, transform_indices = @transform_44, window_bounds = array<i64: 32, 32>}, {pipeline_mode = #tpu.pipeline_mode<synchronous>, transform_indices = @transform_45, window_bounds = array<i64: 32, 96>}, {transform_indices = @transform_46, window_bounds = array<i64: 1, 7, 64>}, {transform_indices = @transform_47, window_bounds = array<i64: 1, 7, 1>}]} {
    %c0 = arith.constant 0 : index
    %c0_0 = arith.constant 0 : index
    %0 = vector.load %arg5[%c0, %c0_0] : memref<1x64xf32, #tpu.memory_space<vmem>>, vector<1x64xf32>
    %c0_1 = arith.constant 0 : index
    %c0_2 = arith.constant 0 : index
    %1 = vector.load %arg6[%c0_1, %c0_2] : memref<32x64xf32, #tpu.memory_space<vmem>>, vector<32x64xf32>
    %c0_3 = arith.constant 0 : index
    %c0_4 = arith.constant 0 : index
    %2 = vector.load %arg7[%c0_3, %c0_4] : memref<1x512xf32, #tpu.memory_space<vmem>>, vector<1x512xf32>
    %c0_5 = arith.constant 0 : index
    %c0_6 = arith.constant 0 : index
    %3 = vector.load %arg8[%c0_5, %c0_6] : memref<1x32xf32, #tpu.memory_space<vmem>>, vector<1x32xf32>
    %c0_7 = arith.constant 0 : index
    %c0_8 = arith.constant 0 : index
    %4 = vector.load %arg9[%c0_7, %c0_8] : memref<1x64xf32, #tpu.memory_space<vmem>>, vector<1x64xf32>
    %c0_9 = arith.constant 0 : index
    %c0_10 = arith.constant 0 : index
    %5 = vector.load %arg10[%c0_9, %c0_10] : memref<1x32xf32, #tpu.memory_space<vmem>>, vector<1x32xf32>
    %c0_11 = arith.constant 0 : index
    %c0_12 = arith.constant 0 : index
    %6 = vector.load %arg11[%c0_11, %c0_12] : memref<1x32xf32, #tpu.memory_space<vmem>>, vector<1x32xf32>
    %c0_13 = arith.constant 0 : index
    %c0_14 = arith.constant 0 : index
    %7 = vector.load %arg12[%c0_13, %c0_14] : memref<1x32xf32, #tpu.memory_space<vmem>>, vector<1x32xf32>
    %c0_15 = arith.constant 0 : index
    %c0_16 = arith.constant 0 : index
    %8 = vector.load %arg13[%c0_15, %c0_16] : memref<1x96xf32, #tpu.memory_space<vmem>>, vector<1x96xf32>
    %c0_17 = arith.constant 0 : index
    %c0_18 = arith.constant 0 : index
    %9 = vector.load %arg14[%c0_17, %c0_18] : memref<1x32xf32, #tpu.memory_space<vmem>>, vector<1x32xf32>
    %c0_19 = arith.constant 0 : index
    %c0_20 = arith.constant 0 : index
    %10 = vector.load %arg15[%c0_19, %c0_20] : memref<1x32xf32, #tpu.memory_space<vmem>>, vector<1x32xf32>
    %c0_21 = arith.constant 0 : index
    %c0_22 = arith.constant 0 : index
    %11 = vector.load %arg16[%c0_21, %c0_22] : memref<1x32xf32, #tpu.memory_space<vmem>>, vector<1x32xf32>
    %c0_23 = arith.constant 0 : index
    %c0_24 = arith.constant 0 : index
    %12 = vector.load %arg17[%c0_23, %c0_24] : memref<1x32xf32, #tpu.memory_space<vmem>>, vector<1x32xf32>
    %c0_25 = arith.constant 0 : index
    %c0_26 = arith.constant 0 : index
    %13 = vector.load %arg18[%c0_25, %c0_26] : memref<1x32xf32, #tpu.memory_space<vmem>>, vector<1x32xf32>
    %c0_27 = arith.constant 0 : index
    %c0_28 = arith.constant 0 : index
    %14 = vector.load %arg19[%c0_27, %c0_28] : memref<1x32xf32, #tpu.memory_space<vmem>>, vector<1x32xf32>
    %c0_29 = arith.constant 0 : index
    %c0_30 = arith.constant 0 : index
    %15 = vector.load %arg20[%c0_29, %c0_30] : memref<32x512xf32, #tpu.memory_space<vmem>>, vector<32x512xf32>
    %c0_31 = arith.constant 0 : index
    %c0_32 = arith.constant 0 : index
    %16 = vector.load %arg21[%c0_31, %c0_32] : memref<512x32xf32, #tpu.memory_space<vmem>>, vector<512x32xf32>
    %c0_33 = arith.constant 0 : index
    %c0_34 = arith.constant 0 : index
    %17 = vector.load %arg22[%c0_33, %c0_34] : memref<32x64xf32, #tpu.memory_space<vmem>>, vector<32x64xf32>
    %c0_35 = arith.constant 0 : index
    %c0_36 = arith.constant 0 : index
    %18 = vector.load %arg23[%c0_35, %c0_36] : memref<32x32xf32, #tpu.memory_space<vmem>>, vector<32x32xf32>
    %c0_37 = arith.constant 0 : index
    %c0_38 = arith.constant 0 : index
    %19 = vector.load %arg24[%c0_37, %c0_38] : memref<32x32xf32, #tpu.memory_space<vmem>>, vector<32x32xf32>
    %c0_39 = arith.constant 0 : index
    %c0_40 = arith.constant 0 : index
    %20 = vector.load %arg25[%c0_39, %c0_40] : memref<32x32xf32, #tpu.memory_space<vmem>>, vector<32x32xf32>
    %c0_41 = arith.constant 0 : index
    %c0_42 = arith.constant 0 : index
    %21 = vector.load %arg26[%c0_41, %c0_42] : memref<32x96xf32, #tpu.memory_space<vmem>>, vector<32x96xf32>
    %c0_43 = arith.constant 0 : index
    %c0_44 = arith.constant 0 : index
    %22 = vector.load %arg27[%c0_43, %c0_44] : memref<1x512xf32, #tpu.memory_space<vmem>>, vector<1x512xf32>
    %c0_45 = arith.constant 0 : index
    %c0_46 = arith.constant 0 : index
    %23 = vector.load %arg28[%c0_45, %c0_46] : memref<1x32xf32, #tpu.memory_space<vmem>>, vector<1x32xf32>
    %c0_47 = arith.constant 0 : index
    %c0_48 = arith.constant 0 : index
    %24 = vector.load %arg29[%c0_47, %c0_48] : memref<1x64xf32, #tpu.memory_space<vmem>>, vector<1x64xf32>
    %c0_49 = arith.constant 0 : index
    %c0_50 = arith.constant 0 : index
    %25 = vector.load %arg30[%c0_49, %c0_50] : memref<1x32xf32, #tpu.memory_space<vmem>>, vector<1x32xf32>
    %c0_51 = arith.constant 0 : index
    %c0_52 = arith.constant 0 : index
    %26 = vector.load %arg31[%c0_51, %c0_52] : memref<1x32xf32, #tpu.memory_space<vmem>>, vector<1x32xf32>
    %c0_53 = arith.constant 0 : index
    %c0_54 = arith.constant 0 : index
    %27 = vector.load %arg32[%c0_53, %c0_54] : memref<1x32xf32, #tpu.memory_space<vmem>>, vector<1x32xf32>
    %c0_55 = arith.constant 0 : index
    %c0_56 = arith.constant 0 : index
    %28 = vector.load %arg33[%c0_55, %c0_56] : memref<1x96xf32, #tpu.memory_space<vmem>>, vector<1x96xf32>
    %c0_57 = arith.constant 0 : index
    %c0_58 = arith.constant 0 : index
    %29 = vector.load %arg34[%c0_57, %c0_58] : memref<1x32xf32, #tpu.memory_space<vmem>>, vector<1x32xf32>
    %c0_59 = arith.constant 0 : index
    %c0_60 = arith.constant 0 : index
    %30 = vector.load %arg35[%c0_59, %c0_60] : memref<1x32xf32, #tpu.memory_space<vmem>>, vector<1x32xf32>
    %c0_61 = arith.constant 0 : index
    %c0_62 = arith.constant 0 : index
    %31 = vector.load %arg36[%c0_61, %c0_62] : memref<1x32xf32, #tpu.memory_space<vmem>>, vector<1x32xf32>
    %c0_63 = arith.constant 0 : index
    %c0_64 = arith.constant 0 : index
    %32 = vector.load %arg37[%c0_63, %c0_64] : memref<1x32xf32, #tpu.memory_space<vmem>>, vector<1x32xf32>
    %c0_65 = arith.constant 0 : index
    %c0_66 = arith.constant 0 : index
    %33 = vector.load %arg38[%c0_65, %c0_66] : memref<1x32xf32, #tpu.memory_space<vmem>>, vector<1x32xf32>
    %c0_67 = arith.constant 0 : index
    %c0_68 = arith.constant 0 : index
    %34 = vector.load %arg39[%c0_67, %c0_68] : memref<1x32xf32, #tpu.memory_space<vmem>>, vector<1x32xf32>
    %c0_69 = arith.constant 0 : index
    %c0_70 = arith.constant 0 : index
    %35 = vector.load %arg40[%c0_69, %c0_70] : memref<32x512xf32, #tpu.memory_space<vmem>>, vector<32x512xf32>
    %c0_71 = arith.constant 0 : index
    %c0_72 = arith.constant 0 : index
    %36 = vector.load %arg41[%c0_71, %c0_72] : memref<512x32xf32, #tpu.memory_space<vmem>>, vector<512x32xf32>
    %c0_73 = arith.constant 0 : index
    %c0_74 = arith.constant 0 : index
    %37 = vector.load %arg42[%c0_73, %c0_74] : memref<32x64xf32, #tpu.memory_space<vmem>>, vector<32x64xf32>
    %c0_75 = arith.constant 0 : index
    %c0_76 = arith.constant 0 : index
    %38 = vector.load %arg43[%c0_75, %c0_76] : memref<32x32xf32, #tpu.memory_space<vmem>>, vector<32x32xf32>
    %c0_77 = arith.constant 0 : index
    %c0_78 = arith.constant 0 : index
    %39 = vector.load %arg44[%c0_77, %c0_78] : memref<32x32xf32, #tpu.memory_space<vmem>>, vector<32x32xf32>
    %c0_79 = arith.constant 0 : index
    %c0_80 = arith.constant 0 : index
    %40 = vector.load %arg45[%c0_79, %c0_80] : memref<32x32xf32, #tpu.memory_space<vmem>>, vector<32x32xf32>
    %c0_81 = arith.constant 0 : index
    %c0_82 = arith.constant 0 : index
    %41 = vector.load %arg46[%c0_81, %c0_82] : memref<32x96xf32, #tpu.memory_space<vmem>>, vector<32x96xf32>
    %c0_83 = arith.constant 0 : index
    %c0_84 = arith.constant 0 : index
    %c0_85 = arith.constant 0 : index
    %42 = vector.load %arg1[%c0_83, %c0_84, %c0_85] : memref<1x7x32xf32, #tpu.memory_space<vmem>>, vector<1x7x32xf32>
    %43 = vector.shape_cast %42 : vector<1x7x32xf32> to vector<7x32xf32>
    %c0_86 = arith.constant 0 : index
    %c0_87 = arith.constant 0 : index
    %c0_88 = arith.constant 0 : index
    %44 = vector.load %arg2[%c0_86, %c0_87, %c0_88] : memref<1x8x32xf32, #tpu.memory_space<vmem>>, vector<1x8x32xf32>
    %45 = vector.shape_cast %44 : vector<1x8x32xf32> to vector<8x32xf32>
    %46 = tpu.iota {dimensions = array<i32: 0>} : vector<7x7xi32>
    %47 = tpu.iota {dimensions = array<i32: 1>} : vector<7x7xi32>
    %48 = arith.cmpi sgt, %47, %46 : vector<7x7xi32>
    %cst = arith.constant -1.000000e+30 : f32
    %cst_89 = arith.constant 0.000000e+00 : f32
    %49 = vector.broadcast %cst : f32 to vector<7x7xf32>
    %50 = vector.broadcast %cst_89 : f32 to vector<7x7xf32>
    %51 = arith.select %48, %49, %50 : vector<7x7xi1>, vector<7x7xf32>
    %c0_90 = arith.constant 0 : index
    %c0_91 = arith.constant 0 : index
    %c0_92 = arith.constant 0 : index
    %52 = vector.load %arg3[%c0_90, %c0_91, %c0_92] : memref<1x1x7xf32, #tpu.memory_space<vmem>>, vector<1x1x7xf32>
    %53 = vector.shape_cast %52 : vector<1x1x7xf32> to vector<1x7xf32>
    %cst_93 = arith.constant -1.000000e+30 : f32
    %54 = vector.broadcast %cst_93 : f32 to vector<1x7xf32>
    %55 = arith.mulf %53, %54 : vector<1x7xf32>
    %56 = vector.broadcast %55 : vector<1x7xf32> to vector<7x7xf32>
    %57 = arith.addf %51, %56 : vector<7x7xf32>
    %cst_94 = arith.constant dense<0.000000e+00> : vector<7xf32>
    %58 = vector.multi_reduction <add>, %43, %cst_94 [1] : vector<7x32xf32> to vector<7xf32>
    %59 = vector.shape_cast %58 : vector<7xf32> to vector<7x1xf32>
    %cst_95 = arith.constant 3.200000e+01 : f32
    %60 = vector.broadcast %cst_95 : f32 to vector<7x1xf32>
    %61 = arith.divf %59, %60 : vector<7x1xf32>
    %62 = vector.broadcast %61 : vector<7x1xf32> to vector<7x32xf32>
    %63 = arith.subf %43, %62 : vector<7x32xf32>
    %64 = arith.mulf %63, %63 : vector<7x32xf32>
    %cst_96 = arith.constant dense<0.000000e+00> : vector<7xf32>
    %65 = vector.multi_reduction <add>, %64, %cst_96 [1] : vector<7x32xf32> to vector<7xf32>
    %66 = vector.shape_cast %65 : vector<7xf32> to vector<7x1xf32>
    %cst_97 = arith.constant 3.200000e+01 : f32
    %67 = vector.broadcast %cst_97 : f32 to vector<7x1xf32>
    %68 = arith.divf %66, %67 : vector<7x1xf32>
    %cst_98 = arith.constant 9.99999974E-6 : f32
    %69 = vector.broadcast %cst_98 : f32 to vector<7x1xf32>
    %70 = arith.addf %68, %69 : vector<7x1xf32>
    %71 = math.rsqrt %70 : vector<7x1xf32>
    %72 = vector.broadcast %71 : vector<7x1xf32> to vector<7x32xf32>
    %73 = arith.mulf %63, %72 : vector<7x32xf32>
    %74 = vector.broadcast %10 : vector<1x32xf32> to vector<7x32xf32>
    %75 = arith.mulf %73, %74 : vector<7x32xf32>
    %76 = vector.broadcast %9 : vector<1x32xf32> to vector<7x32xf32>
    %77 = arith.addf %75, %76 : vector<7x32xf32>
    %cst_99 = arith.constant dense<0.000000e+00> : vector<7x96xf32>
    %78 = tpu.matmul %77, %21, %cst_99 {dimension_numbers = #tpu.dot_dimension_numbers<[1], [0], [0], [1], [0, 0, 1, 1], [], []>} : vector<7x32xf32>, vector<32x96xf32>, vector<7x96xf32> -> vector<7x96xf32>
    %79 = vector.broadcast %8 : vector<1x96xf32> to vector<7x96xf32>
    %80 = arith.addf %78, %79 : vector<7x96xf32>
    %81 = vector.extract_strided_slice %80 {offsets = [0, 0], sizes = [7, 32], strides = [1, 1]} : vector<7x96xf32> to vector<7x32xf32>
    %cst_100 = arith.constant 5.000000e-01 : f32
    %82 = vector.broadcast %cst_100 : f32 to vector<7x32xf32>
    %83 = arith.mulf %81, %82 : vector<7x32xf32>
    %84 = vector.extract_strided_slice %80 {offsets = [0, 32], sizes = [7, 32], strides = [1, 1]} : vector<7x96xf32> to vector<7x32xf32>
    %85 = vector.extract_strided_slice %80 {offsets = [0, 64], sizes = [7, 32], strides = [1, 1]} : vector<7x96xf32> to vector<7x32xf32>
    %86 = vector.extract_strided_slice %83 {offsets = [0, 0], sizes = [7, 4], strides = [1, 1]} : vector<7x32xf32> to vector<7x4xf32>
    %87 = vector.extract_strided_slice %84 {offsets = [0, 0], sizes = [7, 4], strides = [1, 1]} : vector<7x32xf32> to vector<7x4xf32>
    %88 = vector.extract_strided_slice %85 {offsets = [0, 0], sizes = [7, 4], strides = [1, 1]} : vector<7x32xf32> to vector<7x4xf32>
    %cst_101 = arith.constant dense<0.000000e+00> : vector<7x7xf32>
    %89 = tpu.matmul %86, %87, %cst_101 {dimension_numbers = #tpu.dot_dimension_numbers<[1], [1], [0], [0], [0, 0, 1, 0], [], []>} : vector<7x4xf32>, vector<7x4xf32>, vector<7x7xf32> -> vector<7x7xf32>
    %90 = arith.addf %89, %57 : vector<7x7xf32>
    %cst_102 = arith.constant dense<0xFF800000> : vector<7xf32>
    %91 = vector.multi_reduction <maximumf>, %90, %cst_102 [1] : vector<7x7xf32> to vector<7xf32>
    %92 = vector.shape_cast %91 : vector<7xf32> to vector<7x1xf32>
    %93 = vector.broadcast %92 : vector<7x1xf32> to vector<7x7xf32>
    %94 = arith.subf %90, %93 : vector<7x7xf32>
    %95 = math.exp %94 : vector<7x7xf32>
    %cst_103 = arith.constant dense<0.000000e+00> : vector<7xf32>
    %96 = vector.multi_reduction <add>, %95, %cst_103 [1] : vector<7x7xf32> to vector<7xf32>
    %97 = vector.shape_cast %96 : vector<7xf32> to vector<7x1xf32>
    %98 = vector.broadcast %97 : vector<7x1xf32> to vector<7x7xf32>
    %99 = arith.divf %95, %98 : vector<7x7xf32>
    %cst_104 = arith.constant dense<0.000000e+00> : vector<7x4xf32>
    %100 = tpu.matmul %99, %88, %cst_104 {dimension_numbers = #tpu.dot_dimension_numbers<[1], [0], [0], [1], [0, 0, 1, 1], [], []>} : vector<7x7xf32>, vector<7x4xf32>, vector<7x4xf32> -> vector<7x4xf32>
    %101 = vector.extract_strided_slice %19 {offsets = [0, 0], sizes = [4, 32], strides = [1, 1]} : vector<32x32xf32> to vector<4x32xf32>
    %cst_105 = arith.constant dense<0.000000e+00> : vector<7x32xf32>
    %102 = tpu.matmul %100, %101, %cst_105 {dimension_numbers = #tpu.dot_dimension_numbers<[1], [0], [0], [1], [0, 0, 1, 1], [], []>} : vector<7x4xf32>, vector<4x32xf32>, vector<7x32xf32> -> vector<7x32xf32>
    %103 = vector.extract_strided_slice %83 {offsets = [0, 4], sizes = [7, 4], strides = [1, 1]} : vector<7x32xf32> to vector<7x4xf32>
    %104 = vector.extract_strided_slice %84 {offsets = [0, 4], sizes = [7, 4], strides = [1, 1]} : vector<7x32xf32> to vector<7x4xf32>
    %105 = vector.extract_strided_slice %85 {offsets = [0, 4], sizes = [7, 4], strides = [1, 1]} : vector<7x32xf32> to vector<7x4xf32>
    %cst_106 = arith.constant dense<0.000000e+00> : vector<7x7xf32>
    %106 = tpu.matmul %103, %104, %cst_106 {dimension_numbers = #tpu.dot_dimension_numbers<[1], [1], [0], [0], [0, 0, 1, 0], [], []>} : vector<7x4xf32>, vector<7x4xf32>, vector<7x7xf32> -> vector<7x7xf32>
    %107 = arith.addf %106, %57 : vector<7x7xf32>
    %cst_107 = arith.constant dense<0xFF800000> : vector<7xf32>
    %108 = vector.multi_reduction <maximumf>, %107, %cst_107 [1] : vector<7x7xf32> to vector<7xf32>
    %109 = vector.shape_cast %108 : vector<7xf32> to vector<7x1xf32>
    %110 = vector.broadcast %109 : vector<7x1xf32> to vector<7x7xf32>
    %111 = arith.subf %107, %110 : vector<7x7xf32>
    %112 = math.exp %111 : vector<7x7xf32>
    %cst_108 = arith.constant dense<0.000000e+00> : vector<7xf32>
    %113 = vector.multi_reduction <add>, %112, %cst_108 [1] : vector<7x7xf32> to vector<7xf32>
    %114 = vector.shape_cast %113 : vector<7xf32> to vector<7x1xf32>
    %115 = vector.broadcast %114 : vector<7x1xf32> to vector<7x7xf32>
    %116 = arith.divf %112, %115 : vector<7x7xf32>
    %cst_109 = arith.constant dense<0.000000e+00> : vector<7x4xf32>
    %117 = tpu.matmul %116, %105, %cst_109 {dimension_numbers = #tpu.dot_dimension_numbers<[1], [0], [0], [1], [0, 0, 1, 1], [], []>} : vector<7x7xf32>, vector<7x4xf32>, vector<7x4xf32> -> vector<7x4xf32>
    %118 = vector.extract_strided_slice %19 {offsets = [4, 0], sizes = [4, 32], strides = [1, 1]} : vector<32x32xf32> to vector<4x32xf32>
    %cst_110 = arith.constant dense<0.000000e+00> : vector<7x32xf32>
    %119 = tpu.matmul %117, %118, %cst_110 {dimension_numbers = #tpu.dot_dimension_numbers<[1], [0], [0], [1], [0, 0, 1, 1], [], []>} : vector<7x4xf32>, vector<4x32xf32>, vector<7x32xf32> -> vector<7x32xf32>
    %120 = arith.addf %102, %119 : vector<7x32xf32>
    %121 = vector.extract_strided_slice %83 {offsets = [0, 8], sizes = [7, 4], strides = [1, 1]} : vector<7x32xf32> to vector<7x4xf32>
    %122 = vector.extract_strided_slice %84 {offsets = [0, 8], sizes = [7, 4], strides = [1, 1]} : vector<7x32xf32> to vector<7x4xf32>
    %123 = vector.extract_strided_slice %85 {offsets = [0, 8], sizes = [7, 4], strides = [1, 1]} : vector<7x32xf32> to vector<7x4xf32>
    %cst_111 = arith.constant dense<0.000000e+00> : vector<7x7xf32>
    %124 = tpu.matmul %121, %122, %cst_111 {dimension_numbers = #tpu.dot_dimension_numbers<[1], [1], [0], [0], [0, 0, 1, 0], [], []>} : vector<7x4xf32>, vector<7x4xf32>, vector<7x7xf32> -> vector<7x7xf32>
    %125 = arith.addf %124, %57 : vector<7x7xf32>
    %cst_112 = arith.constant dense<0xFF800000> : vector<7xf32>
    %126 = vector.multi_reduction <maximumf>, %125, %cst_112 [1] : vector<7x7xf32> to vector<7xf32>
    %127 = vector.shape_cast %126 : vector<7xf32> to vector<7x1xf32>
    %128 = vector.broadcast %127 : vector<7x1xf32> to vector<7x7xf32>
    %129 = arith.subf %125, %128 : vector<7x7xf32>
    %130 = math.exp %129 : vector<7x7xf32>
    %cst_113 = arith.constant dense<0.000000e+00> : vector<7xf32>
    %131 = vector.multi_reduction <add>, %130, %cst_113 [1] : vector<7x7xf32> to vector<7xf32>
    %132 = vector.shape_cast %131 : vector<7xf32> to vector<7x1xf32>
    %133 = vector.broadcast %132 : vector<7x1xf32> to vector<7x7xf32>
    %134 = arith.divf %130, %133 : vector<7x7xf32>
    %cst_114 = arith.constant dense<0.000000e+00> : vector<7x4xf32>
    %135 = tpu.matmul %134, %123, %cst_114 {dimension_numbers = #tpu.dot_dimension_numbers<[1], [0], [0], [1], [0, 0, 1, 1], [], []>} : vector<7x7xf32>, vector<7x4xf32>, vector<7x4xf32> -> vector<7x4xf32>
    %136 = vector.extract_strided_slice %19 {offsets = [8, 0], sizes = [4, 32], strides = [1, 1]} : vector<32x32xf32> to vector<4x32xf32>
    %cst_115 = arith.constant dense<0.000000e+00> : vector<7x32xf32>
    %137 = tpu.matmul %135, %136, %cst_115 {dimension_numbers = #tpu.dot_dimension_numbers<[1], [0], [0], [1], [0, 0, 1, 1], [], []>} : vector<7x4xf32>, vector<4x32xf32>, vector<7x32xf32> -> vector<7x32xf32>
    %138 = arith.addf %120, %137 : vector<7x32xf32>
    %139 = vector.extract_strided_slice %83 {offsets = [0, 12], sizes = [7, 4], strides = [1, 1]} : vector<7x32xf32> to vector<7x4xf32>
    %140 = vector.extract_strided_slice %84 {offsets = [0, 12], sizes = [7, 4], strides = [1, 1]} : vector<7x32xf32> to vector<7x4xf32>
    %141 = vector.extract_strided_slice %85 {offsets = [0, 12], sizes = [7, 4], strides = [1, 1]} : vector<7x32xf32> to vector<7x4xf32>
    %cst_116 = arith.constant dense<0.000000e+00> : vector<7x7xf32>
    %142 = tpu.matmul %139, %140, %cst_116 {dimension_numbers = #tpu.dot_dimension_numbers<[1], [1], [0], [0], [0, 0, 1, 0], [], []>} : vector<7x4xf32>, vector<7x4xf32>, vector<7x7xf32> -> vector<7x7xf32>
    %143 = arith.addf %142, %57 : vector<7x7xf32>
    %cst_117 = arith.constant dense<0xFF800000> : vector<7xf32>
    %144 = vector.multi_reduction <maximumf>, %143, %cst_117 [1] : vector<7x7xf32> to vector<7xf32>
    %145 = vector.shape_cast %144 : vector<7xf32> to vector<7x1xf32>
    %146 = vector.broadcast %145 : vector<7x1xf32> to vector<7x7xf32>
    %147 = arith.subf %143, %146 : vector<7x7xf32>
    %148 = math.exp %147 : vector<7x7xf32>
    %cst_118 = arith.constant dense<0.000000e+00> : vector<7xf32>
    %149 = vector.multi_reduction <add>, %148, %cst_118 [1] : vector<7x7xf32> to vector<7xf32>
    %150 = vector.shape_cast %149 : vector<7xf32> to vector<7x1xf32>
    %151 = vector.broadcast %150 : vector<7x1xf32> to vector<7x7xf32>
    %152 = arith.divf %148, %151 : vector<7x7xf32>
    %cst_119 = arith.constant dense<0.000000e+00> : vector<7x4xf32>
    %153 = tpu.matmul %152, %141, %cst_119 {dimension_numbers = #tpu.dot_dimension_numbers<[1], [0], [0], [1], [0, 0, 1, 1], [], []>} : vector<7x7xf32>, vector<7x4xf32>, vector<7x4xf32> -> vector<7x4xf32>
    %154 = vector.extract_strided_slice %19 {offsets = [12, 0], sizes = [4, 32], strides = [1, 1]} : vector<32x32xf32> to vector<4x32xf32>
    %cst_120 = arith.constant dense<0.000000e+00> : vector<7x32xf32>
    %155 = tpu.matmul %153, %154, %cst_120 {dimension_numbers = #tpu.dot_dimension_numbers<[1], [0], [0], [1], [0, 0, 1, 1], [], []>} : vector<7x4xf32>, vector<4x32xf32>, vector<7x32xf32> -> vector<7x32xf32>
    %156 = arith.addf %138, %155 : vector<7x32xf32>
    %157 = vector.extract_strided_slice %83 {offsets = [0, 16], sizes = [7, 4], strides = [1, 1]} : vector<7x32xf32> to vector<7x4xf32>
    %158 = vector.extract_strided_slice %84 {offsets = [0, 16], sizes = [7, 4], strides = [1, 1]} : vector<7x32xf32> to vector<7x4xf32>
    %159 = vector.extract_strided_slice %85 {offsets = [0, 16], sizes = [7, 4], strides = [1, 1]} : vector<7x32xf32> to vector<7x4xf32>
    %cst_121 = arith.constant dense<0.000000e+00> : vector<7x7xf32>
    %160 = tpu.matmul %157, %158, %cst_121 {dimension_numbers = #tpu.dot_dimension_numbers<[1], [1], [0], [0], [0, 0, 1, 0], [], []>} : vector<7x4xf32>, vector<7x4xf32>, vector<7x7xf32> -> vector<7x7xf32>
    %161 = arith.addf %160, %57 : vector<7x7xf32>
    %cst_122 = arith.constant dense<0xFF800000> : vector<7xf32>
    %162 = vector.multi_reduction <maximumf>, %161, %cst_122 [1] : vector<7x7xf32> to vector<7xf32>
    %163 = vector.shape_cast %162 : vector<7xf32> to vector<7x1xf32>
    %164 = vector.broadcast %163 : vector<7x1xf32> to vector<7x7xf32>
    %165 = arith.subf %161, %164 : vector<7x7xf32>
    %166 = math.exp %165 : vector<7x7xf32>
    %cst_123 = arith.constant dense<0.000000e+00> : vector<7xf32>
    %167 = vector.multi_reduction <add>, %166, %cst_123 [1] : vector<7x7xf32> to vector<7xf32>
    %168 = vector.shape_cast %167 : vector<7xf32> to vector<7x1xf32>
    %169 = vector.broadcast %168 : vector<7x1xf32> to vector<7x7xf32>
    %170 = arith.divf %166, %169 : vector<7x7xf32>
    %cst_124 = arith.constant dense<0.000000e+00> : vector<7x4xf32>
    %171 = tpu.matmul %170, %159, %cst_124 {dimension_numbers = #tpu.dot_dimension_numbers<[1], [0], [0], [1], [0, 0, 1, 1], [], []>} : vector<7x7xf32>, vector<7x4xf32>, vector<7x4xf32> -> vector<7x4xf32>
    %172 = vector.extract_strided_slice %19 {offsets = [16, 0], sizes = [4, 32], strides = [1, 1]} : vector<32x32xf32> to vector<4x32xf32>
    %cst_125 = arith.constant dense<0.000000e+00> : vector<7x32xf32>
    %173 = tpu.matmul %171, %172, %cst_125 {dimension_numbers = #tpu.dot_dimension_numbers<[1], [0], [0], [1], [0, 0, 1, 1], [], []>} : vector<7x4xf32>, vector<4x32xf32>, vector<7x32xf32> -> vector<7x32xf32>
    %174 = arith.addf %156, %173 : vector<7x32xf32>
    %175 = vector.extract_strided_slice %83 {offsets = [0, 20], sizes = [7, 4], strides = [1, 1]} : vector<7x32xf32> to vector<7x4xf32>
    %176 = vector.extract_strided_slice %84 {offsets = [0, 20], sizes = [7, 4], strides = [1, 1]} : vector<7x32xf32> to vector<7x4xf32>
    %177 = vector.extract_strided_slice %85 {offsets = [0, 20], sizes = [7, 4], strides = [1, 1]} : vector<7x32xf32> to vector<7x4xf32>
    %cst_126 = arith.constant dense<0.000000e+00> : vector<7x7xf32>
    %178 = tpu.matmul %175, %176, %cst_126 {dimension_numbers = #tpu.dot_dimension_numbers<[1], [1], [0], [0], [0, 0, 1, 0], [], []>} : vector<7x4xf32>, vector<7x4xf32>, vector<7x7xf32> -> vector<7x7xf32>
    %179 = arith.addf %178, %57 : vector<7x7xf32>
    %cst_127 = arith.constant dense<0xFF800000> : vector<7xf32>
    %180 = vector.multi_reduction <maximumf>, %179, %cst_127 [1] : vector<7x7xf32> to vector<7xf32>
    %181 = vector.shape_cast %180 : vector<7xf32> to vector<7x1xf32>
    %182 = vector.broadcast %181 : vector<7x1xf32> to vector<7x7xf32>
    %183 = arith.subf %179, %182 : vector<7x7xf32>
    %184 = math.exp %183 : vector<7x7xf32>
    %cst_128 = arith.constant dense<0.000000e+00> : vector<7xf32>
    %185 = vector.multi_reduction <add>, %184, %cst_128 [1] : vector<7x7xf32> to vector<7xf32>
    %186 = vector.shape_cast %185 : vector<7xf32> to vector<7x1xf32>
    %187 = vector.broadcast %186 : vector<7x1xf32> to vector<7x7xf32>
    %188 = arith.divf %184, %187 : vector<7x7xf32>
    %cst_129 = arith.constant dense<0.000000e+00> : vector<7x4xf32>
    %189 = tpu.matmul %188, %177, %cst_129 {dimension_numbers = #tpu.dot_dimension_numbers<[1], [0], [0], [1], [0, 0, 1, 1], [], []>} : vector<7x7xf32>, vector<7x4xf32>, vector<7x4xf32> -> vector<7x4xf32>
    %190 = vector.extract_strided_slice %19 {offsets = [20, 0], sizes = [4, 32], strides = [1, 1]} : vector<32x32xf32> to vector<4x32xf32>
    %cst_130 = arith.constant dense<0.000000e+00> : vector<7x32xf32>
    %191 = tpu.matmul %189, %190, %cst_130 {dimension_numbers = #tpu.dot_dimension_numbers<[1], [0], [0], [1], [0, 0, 1, 1], [], []>} : vector<7x4xf32>, vector<4x32xf32>, vector<7x32xf32> -> vector<7x32xf32>
    %192 = arith.addf %174, %191 : vector<7x32xf32>
    %193 = vector.extract_strided_slice %83 {offsets = [0, 24], sizes = [7, 4], strides = [1, 1]} : vector<7x32xf32> to vector<7x4xf32>
    %194 = vector.extract_strided_slice %84 {offsets = [0, 24], sizes = [7, 4], strides = [1, 1]} : vector<7x32xf32> to vector<7x4xf32>
    %195 = vector.extract_strided_slice %85 {offsets = [0, 24], sizes = [7, 4], strides = [1, 1]} : vector<7x32xf32> to vector<7x4xf32>
    %cst_131 = arith.constant dense<0.000000e+00> : vector<7x7xf32>
    %196 = tpu.matmul %193, %194, %cst_131 {dimension_numbers = #tpu.dot_dimension_numbers<[1], [1], [0], [0], [0, 0, 1, 0], [], []>} : vector<7x4xf32>, vector<7x4xf32>, vector<7x7xf32> -> vector<7x7xf32>
    %197 = arith.addf %196, %57 : vector<7x7xf32>
    %cst_132 = arith.constant dense<0xFF800000> : vector<7xf32>
    %198 = vector.multi_reduction <maximumf>, %197, %cst_132 [1] : vector<7x7xf32> to vector<7xf32>
    %199 = vector.shape_cast %198 : vector<7xf32> to vector<7x1xf32>
    %200 = vector.broadcast %199 : vector<7x1xf32> to vector<7x7xf32>
    %201 = arith.subf %197, %200 : vector<7x7xf32>
    %202 = math.exp %201 : vector<7x7xf32>
    %cst_133 = arith.constant dense<0.000000e+00> : vector<7xf32>
    %203 = vector.multi_reduction <add>, %202, %cst_133 [1] : vector<7x7xf32> to vector<7xf32>
    %204 = vector.shape_cast %203 : vector<7xf32> to vector<7x1xf32>
    %205 = vector.broadcast %204 : vector<7x1xf32> to vector<7x7xf32>
    %206 = arith.divf %202, %205 : vector<7x7xf32>
    %cst_134 = arith.constant dense<0.000000e+00> : vector<7x4xf32>
    %207 = tpu.matmul %206, %195, %cst_134 {dimension_numbers = #tpu.dot_dimension_numbers<[1], [0], [0], [1], [0, 0, 1, 1], [], []>} : vector<7x7xf32>, vector<7x4xf32>, vector<7x4xf32> -> vector<7x4xf32>
    %208 = vector.extract_strided_slice %19 {offsets = [24, 0], sizes = [4, 32], strides = [1, 1]} : vector<32x32xf32> to vector<4x32xf32>
    %cst_135 = arith.constant dense<0.000000e+00> : vector<7x32xf32>
    %209 = tpu.matmul %207, %208, %cst_135 {dimension_numbers = #tpu.dot_dimension_numbers<[1], [0], [0], [1], [0, 0, 1, 1], [], []>} : vector<7x4xf32>, vector<4x32xf32>, vector<7x32xf32> -> vector<7x32xf32>
    %210 = arith.addf %192, %209 : vector<7x32xf32>
    %211 = vector.extract_strided_slice %83 {offsets = [0, 28], sizes = [7, 4], strides = [1, 1]} : vector<7x32xf32> to vector<7x4xf32>
    %212 = vector.extract_strided_slice %84 {offsets = [0, 28], sizes = [7, 4], strides = [1, 1]} : vector<7x32xf32> to vector<7x4xf32>
    %213 = vector.extract_strided_slice %85 {offsets = [0, 28], sizes = [7, 4], strides = [1, 1]} : vector<7x32xf32> to vector<7x4xf32>
    %cst_136 = arith.constant dense<0.000000e+00> : vector<7x7xf32>
    %214 = tpu.matmul %211, %212, %cst_136 {dimension_numbers = #tpu.dot_dimension_numbers<[1], [1], [0], [0], [0, 0, 1, 0], [], []>} : vector<7x4xf32>, vector<7x4xf32>, vector<7x7xf32> -> vector<7x7xf32>
    %215 = arith.addf %214, %57 : vector<7x7xf32>
    %cst_137 = arith.constant dense<0xFF800000> : vector<7xf32>
    %216 = vector.multi_reduction <maximumf>, %215, %cst_137 [1] : vector<7x7xf32> to vector<7xf32>
    %217 = vector.shape_cast %216 : vector<7xf32> to vector<7x1xf32>
    %218 = vector.broadcast %217 : vector<7x1xf32> to vector<7x7xf32>
    %219 = arith.subf %215, %218 : vector<7x7xf32>
    %220 = math.exp %219 : vector<7x7xf32>
    %cst_138 = arith.constant dense<0.000000e+00> : vector<7xf32>
    %221 = vector.multi_reduction <add>, %220, %cst_138 [1] : vector<7x7xf32> to vector<7xf32>
    %222 = vector.shape_cast %221 : vector<7xf32> to vector<7x1xf32>
    %223 = vector.broadcast %222 : vector<7x1xf32> to vector<7x7xf32>
    %224 = arith.divf %220, %223 : vector<7x7xf32>
    %cst_139 = arith.constant dense<0.000000e+00> : vector<7x4xf32>
    %225 = tpu.matmul %224, %213, %cst_139 {dimension_numbers = #tpu.dot_dimension_numbers<[1], [0], [0], [1], [0, 0, 1, 1], [], []>} : vector<7x7xf32>, vector<7x4xf32>, vector<7x4xf32> -> vector<7x4xf32>
    %226 = vector.extract_strided_slice %19 {offsets = [28, 0], sizes = [4, 32], strides = [1, 1]} : vector<32x32xf32> to vector<4x32xf32>
    %cst_140 = arith.constant dense<0.000000e+00> : vector<7x32xf32>
    %227 = tpu.matmul %225, %226, %cst_140 {dimension_numbers = #tpu.dot_dimension_numbers<[1], [0], [0], [1], [0, 0, 1, 1], [], []>} : vector<7x4xf32>, vector<4x32xf32>, vector<7x32xf32> -> vector<7x32xf32>
    %228 = arith.addf %210, %227 : vector<7x32xf32>
    %229 = vector.broadcast %6 : vector<1x32xf32> to vector<7x32xf32>
    %230 = arith.addf %228, %229 : vector<7x32xf32>
    %231 = arith.addf %43, %230 : vector<7x32xf32>
    %cst_141 = arith.constant dense<0.000000e+00> : vector<7xf32>
    %232 = vector.multi_reduction <add>, %231, %cst_141 [1] : vector<7x32xf32> to vector<7xf32>
    %233 = vector.shape_cast %232 : vector<7xf32> to vector<7x1xf32>
    %cst_142 = arith.constant 3.200000e+01 : f32
    %234 = vector.broadcast %cst_142 : f32 to vector<7x1xf32>
    %235 = arith.divf %233, %234 : vector<7x1xf32>
    %236 = vector.broadcast %235 : vector<7x1xf32> to vector<7x32xf32>
    %237 = arith.subf %231, %236 : vector<7x32xf32>
    %238 = arith.mulf %237, %237 : vector<7x32xf32>
    %cst_143 = arith.constant dense<0.000000e+00> : vector<7xf32>
    %239 = vector.multi_reduction <add>, %238, %cst_143 [1] : vector<7x32xf32> to vector<7xf32>
    %240 = vector.shape_cast %239 : vector<7xf32> to vector<7x1xf32>
    %cst_144 = arith.constant 3.200000e+01 : f32
    %241 = vector.broadcast %cst_144 : f32 to vector<7x1xf32>
    %242 = arith.divf %240, %241 : vector<7x1xf32>
    %cst_145 = arith.constant 9.99999974E-6 : f32
    %243 = vector.broadcast %cst_145 : f32 to vector<7x1xf32>
    %244 = arith.addf %242, %243 : vector<7x1xf32>
    %245 = math.rsqrt %244 : vector<7x1xf32>
    %246 = vector.broadcast %245 : vector<7x1xf32> to vector<7x32xf32>
    %247 = arith.mulf %237, %246 : vector<7x32xf32>
    %248 = vector.broadcast %12 : vector<1x32xf32> to vector<7x32xf32>
    %249 = arith.mulf %247, %248 : vector<7x32xf32>
    %250 = vector.broadcast %11 : vector<1x32xf32> to vector<7x32xf32>
    %251 = arith.addf %249, %250 : vector<7x32xf32>
    %cst_146 = arith.constant dense<0.000000e+00> : vector<7x32xf32>
    %252 = tpu.matmul %251, %20, %cst_146 {dimension_numbers = #tpu.dot_dimension_numbers<[1], [0], [0], [1], [0, 0, 1, 1], [], []>} : vector<7x32xf32>, vector<32x32xf32>, vector<7x32xf32> -> vector<7x32xf32>
    %253 = vector.broadcast %7 : vector<1x32xf32> to vector<7x32xf32>
    %254 = arith.addf %252, %253 : vector<7x32xf32>
    %cst_147 = arith.constant 5.000000e-01 : f32
    %255 = vector.broadcast %cst_147 : f32 to vector<7x32xf32>
    %256 = arith.mulf %254, %255 : vector<7x32xf32>
    %cst_148 = arith.constant dense<0.000000e+00> : vector<8x64xf32>
    %257 = tpu.matmul %45, %17, %cst_148 {dimension_numbers = #tpu.dot_dimension_numbers<[1], [0], [0], [1], [0, 0, 1, 1], [], []>} : vector<8x32xf32>, vector<32x64xf32>, vector<8x64xf32> -> vector<8x64xf32>
    %258 = vector.broadcast %4 : vector<1x64xf32> to vector<8x64xf32>
    %259 = arith.addf %257, %258 : vector<8x64xf32>
    %260 = vector.extract_strided_slice %259 {offsets = [0, 0], sizes = [8, 32], strides = [1, 1]} : vector<8x64xf32> to vector<8x32xf32>
    %261 = vector.extract_strided_slice %259 {offsets = [0, 32], sizes = [8, 32], strides = [1, 1]} : vector<8x64xf32> to vector<8x32xf32>
    %262 = vector.extract_strided_slice %256 {offsets = [0, 0], sizes = [7, 4], strides = [1, 1]} : vector<7x32xf32> to vector<7x4xf32>
    %263 = vector.extract_strided_slice %260 {offsets = [0, 0], sizes = [8, 4], strides = [1, 1]} : vector<8x32xf32> to vector<8x4xf32>
    %264 = vector.extract_strided_slice %261 {offsets = [0, 0], sizes = [8, 4], strides = [1, 1]} : vector<8x32xf32> to vector<8x4xf32>
    %cst_149 = arith.constant dense<0.000000e+00> : vector<7x8xf32>
    %265 = tpu.matmul %262, %263, %cst_149 {dimension_numbers = #tpu.dot_dimension_numbers<[1], [1], [0], [0], [0, 0, 1, 0], [], []>} : vector<7x4xf32>, vector<8x4xf32>, vector<7x8xf32> -> vector<7x8xf32>
    %cst_150 = arith.constant dense<0xFF800000> : vector<7xf32>
    %266 = vector.multi_reduction <maximumf>, %265, %cst_150 [1] : vector<7x8xf32> to vector<7xf32>
    %267 = vector.shape_cast %266 : vector<7xf32> to vector<7x1xf32>
    %268 = vector.broadcast %267 : vector<7x1xf32> to vector<7x8xf32>
    %269 = arith.subf %265, %268 : vector<7x8xf32>
    %270 = math.exp %269 : vector<7x8xf32>
    %cst_151 = arith.constant dense<0.000000e+00> : vector<7xf32>
    %271 = vector.multi_reduction <add>, %270, %cst_151 [1] : vector<7x8xf32> to vector<7xf32>
    %272 = vector.shape_cast %271 : vector<7xf32> to vector<7x1xf32>
    %273 = vector.broadcast %272 : vector<7x1xf32> to vector<7x8xf32>
    %274 = arith.divf %270, %273 : vector<7x8xf32>
    %cst_152 = arith.constant dense<0.000000e+00> : vector<7x4xf32>
    %275 = tpu.matmul %274, %264, %cst_152 {dimension_numbers = #tpu.dot_dimension_numbers<[1], [0], [0], [1], [0, 0, 1, 1], [], []>} : vector<7x8xf32>, vector<8x4xf32>, vector<7x4xf32> -> vector<7x4xf32>
    %276 = vector.extract_strided_slice %18 {offsets = [0, 0], sizes = [4, 32], strides = [1, 1]} : vector<32x32xf32> to vector<4x32xf32>
    %cst_153 = arith.constant dense<0.000000e+00> : vector<7x32xf32>
    %277 = tpu.matmul %275, %276, %cst_153 {dimension_numbers = #tpu.dot_dimension_numbers<[1], [0], [0], [1], [0, 0, 1, 1], [], []>} : vector<7x4xf32>, vector<4x32xf32>, vector<7x32xf32> -> vector<7x32xf32>
    %278 = vector.extract_strided_slice %256 {offsets = [0, 4], sizes = [7, 4], strides = [1, 1]} : vector<7x32xf32> to vector<7x4xf32>
    %279 = vector.extract_strided_slice %260 {offsets = [0, 4], sizes = [8, 4], strides = [1, 1]} : vector<8x32xf32> to vector<8x4xf32>
    %280 = vector.extract_strided_slice %261 {offsets = [0, 4], sizes = [8, 4], strides = [1, 1]} : vector<8x32xf32> to vector<8x4xf32>
    %cst_154 = arith.constant dense<0.000000e+00> : vector<7x8xf32>
    %281 = tpu.matmul %278, %279, %cst_154 {dimension_numbers = #tpu.dot_dimension_numbers<[1], [1], [0], [0], [0, 0, 1, 0], [], []>} : vector<7x4xf32>, vector<8x4xf32>, vector<7x8xf32> -> vector<7x8xf32>
    %cst_155 = arith.constant dense<0xFF800000> : vector<7xf32>
    %282 = vector.multi_reduction <maximumf>, %281, %cst_155 [1] : vector<7x8xf32> to vector<7xf32>
    %283 = vector.shape_cast %282 : vector<7xf32> to vector<7x1xf32>
    %284 = vector.broadcast %283 : vector<7x1xf32> to vector<7x8xf32>
    %285 = arith.subf %281, %284 : vector<7x8xf32>
    %286 = math.exp %285 : vector<7x8xf32>
    %cst_156 = arith.constant dense<0.000000e+00> : vector<7xf32>
    %287 = vector.multi_reduction <add>, %286, %cst_156 [1] : vector<7x8xf32> to vector<7xf32>
    %288 = vector.shape_cast %287 : vector<7xf32> to vector<7x1xf32>
    %289 = vector.broadcast %288 : vector<7x1xf32> to vector<7x8xf32>
    %290 = arith.divf %286, %289 : vector<7x8xf32>
    %cst_157 = arith.constant dense<0.000000e+00> : vector<7x4xf32>
    %291 = tpu.matmul %290, %280, %cst_157 {dimension_numbers = #tpu.dot_dimension_numbers<[1], [0], [0], [1], [0, 0, 1, 1], [], []>} : vector<7x8xf32>, vector<8x4xf32>, vector<7x4xf32> -> vector<7x4xf32>
    %292 = vector.extract_strided_slice %18 {offsets = [4, 0], sizes = [4, 32], strides = [1, 1]} : vector<32x32xf32> to vector<4x32xf32>
    %cst_158 = arith.constant dense<0.000000e+00> : vector<7x32xf32>
    %293 = tpu.matmul %291, %292, %cst_158 {dimension_numbers = #tpu.dot_dimension_numbers<[1], [0], [0], [1], [0, 0, 1, 1], [], []>} : vector<7x4xf32>, vector<4x32xf32>, vector<7x32xf32> -> vector<7x32xf32>
    %294 = arith.addf %277, %293 : vector<7x32xf32>
    %295 = vector.extract_strided_slice %256 {offsets = [0, 8], sizes = [7, 4], strides = [1, 1]} : vector<7x32xf32> to vector<7x4xf32>
    %296 = vector.extract_strided_slice %260 {offsets = [0, 8], sizes = [8, 4], strides = [1, 1]} : vector<8x32xf32> to vector<8x4xf32>
    %297 = vector.extract_strided_slice %261 {offsets = [0, 8], sizes = [8, 4], strides = [1, 1]} : vector<8x32xf32> to vector<8x4xf32>
    %cst_159 = arith.constant dense<0.000000e+00> : vector<7x8xf32>
    %298 = tpu.matmul %295, %296, %cst_159 {dimension_numbers = #tpu.dot_dimension_numbers<[1], [1], [0], [0], [0, 0, 1, 0], [], []>} : vector<7x4xf32>, vector<8x4xf32>, vector<7x8xf32> -> vector<7x8xf32>
    %cst_160 = arith.constant dense<0xFF800000> : vector<7xf32>
    %299 = vector.multi_reduction <maximumf>, %298, %cst_160 [1] : vector<7x8xf32> to vector<7xf32>
    %300 = vector.shape_cast %299 : vector<7xf32> to vector<7x1xf32>
    %301 = vector.broadcast %300 : vector<7x1xf32> to vector<7x8xf32>
    %302 = arith.subf %298, %301 : vector<7x8xf32>
    %303 = math.exp %302 : vector<7x8xf32>
    %cst_161 = arith.constant dense<0.000000e+00> : vector<7xf32>
    %304 = vector.multi_reduction <add>, %303, %cst_161 [1] : vector<7x8xf32> to vector<7xf32>
    %305 = vector.shape_cast %304 : vector<7xf32> to vector<7x1xf32>
    %306 = vector.broadcast %305 : vector<7x1xf32> to vector<7x8xf32>
    %307 = arith.divf %303, %306 : vector<7x8xf32>
    %cst_162 = arith.constant dense<0.000000e+00> : vector<7x4xf32>
    %308 = tpu.matmul %307, %297, %cst_162 {dimension_numbers = #tpu.dot_dimension_numbers<[1], [0], [0], [1], [0, 0, 1, 1], [], []>} : vector<7x8xf32>, vector<8x4xf32>, vector<7x4xf32> -> vector<7x4xf32>
    %309 = vector.extract_strided_slice %18 {offsets = [8, 0], sizes = [4, 32], strides = [1, 1]} : vector<32x32xf32> to vector<4x32xf32>
    %cst_163 = arith.constant dense<0.000000e+00> : vector<7x32xf32>
    %310 = tpu.matmul %308, %309, %cst_163 {dimension_numbers = #tpu.dot_dimension_numbers<[1], [0], [0], [1], [0, 0, 1, 1], [], []>} : vector<7x4xf32>, vector<4x32xf32>, vector<7x32xf32> -> vector<7x32xf32>
    %311 = arith.addf %294, %310 : vector<7x32xf32>
    %312 = vector.extract_strided_slice %256 {offsets = [0, 12], sizes = [7, 4], strides = [1, 1]} : vector<7x32xf32> to vector<7x4xf32>
    %313 = vector.extract_strided_slice %260 {offsets = [0, 12], sizes = [8, 4], strides = [1, 1]} : vector<8x32xf32> to vector<8x4xf32>
    %314 = vector.extract_strided_slice %261 {offsets = [0, 12], sizes = [8, 4], strides = [1, 1]} : vector<8x32xf32> to vector<8x4xf32>
    %cst_164 = arith.constant dense<0.000000e+00> : vector<7x8xf32>
    %315 = tpu.matmul %312, %313, %cst_164 {dimension_numbers = #tpu.dot_dimension_numbers<[1], [1], [0], [0], [0, 0, 1, 0], [], []>} : vector<7x4xf32>, vector<8x4xf32>, vector<7x8xf32> -> vector<7x8xf32>
    %cst_165 = arith.constant dense<0xFF800000> : vector<7xf32>
    %316 = vector.multi_reduction <maximumf>, %315, %cst_165 [1] : vector<7x8xf32> to vector<7xf32>
    %317 = vector.shape_cast %316 : vector<7xf32> to vector<7x1xf32>
    %318 = vector.broadcast %317 : vector<7x1xf32> to vector<7x8xf32>
    %319 = arith.subf %315, %318 : vector<7x8xf32>
    %320 = math.exp %319 : vector<7x8xf32>
    %cst_166 = arith.constant dense<0.000000e+00> : vector<7xf32>
    %321 = vector.multi_reduction <add>, %320, %cst_166 [1] : vector<7x8xf32> to vector<7xf32>
    %322 = vector.shape_cast %321 : vector<7xf32> to vector<7x1xf32>
    %323 = vector.broadcast %322 : vector<7x1xf32> to vector<7x8xf32>
    %324 = arith.divf %320, %323 : vector<7x8xf32>
    %cst_167 = arith.constant dense<0.000000e+00> : vector<7x4xf32>
    %325 = tpu.matmul %324, %314, %cst_167 {dimension_numbers = #tpu.dot_dimension_numbers<[1], [0], [0], [1], [0, 0, 1, 1], [], []>} : vector<7x8xf32>, vector<8x4xf32>, vector<7x4xf32> -> vector<7x4xf32>
    %326 = vector.extract_strided_slice %18 {offsets = [12, 0], sizes = [4, 32], strides = [1, 1]} : vector<32x32xf32> to vector<4x32xf32>
    %cst_168 = arith.constant dense<0.000000e+00> : vector<7x32xf32>
    %327 = tpu.matmul %325, %326, %cst_168 {dimension_numbers = #tpu.dot_dimension_numbers<[1], [0], [0], [1], [0, 0, 1, 1], [], []>} : vector<7x4xf32>, vector<4x32xf32>, vector<7x32xf32> -> vector<7x32xf32>
    %328 = arith.addf %311, %327 : vector<7x32xf32>
    %329 = vector.extract_strided_slice %256 {offsets = [0, 16], sizes = [7, 4], strides = [1, 1]} : vector<7x32xf32> to vector<7x4xf32>
    %330 = vector.extract_strided_slice %260 {offsets = [0, 16], sizes = [8, 4], strides = [1, 1]} : vector<8x32xf32> to vector<8x4xf32>
    %331 = vector.extract_strided_slice %261 {offsets = [0, 16], sizes = [8, 4], strides = [1, 1]} : vector<8x32xf32> to vector<8x4xf32>
    %cst_169 = arith.constant dense<0.000000e+00> : vector<7x8xf32>
    %332 = tpu.matmul %329, %330, %cst_169 {dimension_numbers = #tpu.dot_dimension_numbers<[1], [1], [0], [0], [0, 0, 1, 0], [], []>} : vector<7x4xf32>, vector<8x4xf32>, vector<7x8xf32> -> vector<7x8xf32>
    %cst_170 = arith.constant dense<0xFF800000> : vector<7xf32>
    %333 = vector.multi_reduction <maximumf>, %332, %cst_170 [1] : vector<7x8xf32> to vector<7xf32>
    %334 = vector.shape_cast %333 : vector<7xf32> to vector<7x1xf32>
    %335 = vector.broadcast %334 : vector<7x1xf32> to vector<7x8xf32>
    %336 = arith.subf %332, %335 : vector<7x8xf32>
    %337 = math.exp %336 : vector<7x8xf32>
    %cst_171 = arith.constant dense<0.000000e+00> : vector<7xf32>
    %338 = vector.multi_reduction <add>, %337, %cst_171 [1] : vector<7x8xf32> to vector<7xf32>
    %339 = vector.shape_cast %338 : vector<7xf32> to vector<7x1xf32>
    %340 = vector.broadcast %339 : vector<7x1xf32> to vector<7x8xf32>
    %341 = arith.divf %337, %340 : vector<7x8xf32>
    %cst_172 = arith.constant dense<0.000000e+00> : vector<7x4xf32>
    %342 = tpu.matmul %341, %331, %cst_172 {dimension_numbers = #tpu.dot_dimension_numbers<[1], [0], [0], [1], [0, 0, 1, 1], [], []>} : vector<7x8xf32>, vector<8x4xf32>, vector<7x4xf32> -> vector<7x4xf32>
    %343 = vector.extract_strided_slice %18 {offsets = [16, 0], sizes = [4, 32], strides = [1, 1]} : vector<32x32xf32> to vector<4x32xf32>
    %cst_173 = arith.constant dense<0.000000e+00> : vector<7x32xf32>
    %344 = tpu.matmul %342, %343, %cst_173 {dimension_numbers = #tpu.dot_dimension_numbers<[1], [0], [0], [1], [0, 0, 1, 1], [], []>} : vector<7x4xf32>, vector<4x32xf32>, vector<7x32xf32> -> vector<7x32xf32>
    %345 = arith.addf %328, %344 : vector<7x32xf32>
    %346 = vector.extract_strided_slice %256 {offsets = [0, 20], sizes = [7, 4], strides = [1, 1]} : vector<7x32xf32> to vector<7x4xf32>
    %347 = vector.extract_strided_slice %260 {offsets = [0, 20], sizes = [8, 4], strides = [1, 1]} : vector<8x32xf32> to vector<8x4xf32>
    %348 = vector.extract_strided_slice %261 {offsets = [0, 20], sizes = [8, 4], strides = [1, 1]} : vector<8x32xf32> to vector<8x4xf32>
    %cst_174 = arith.constant dense<0.000000e+00> : vector<7x8xf32>
    %349 = tpu.matmul %346, %347, %cst_174 {dimension_numbers = #tpu.dot_dimension_numbers<[1], [1], [0], [0], [0, 0, 1, 0], [], []>} : vector<7x4xf32>, vector<8x4xf32>, vector<7x8xf32> -> vector<7x8xf32>
    %cst_175 = arith.constant dense<0xFF800000> : vector<7xf32>
    %350 = vector.multi_reduction <maximumf>, %349, %cst_175 [1] : vector<7x8xf32> to vector<7xf32>
    %351 = vector.shape_cast %350 : vector<7xf32> to vector<7x1xf32>
    %352 = vector.broadcast %351 : vector<7x1xf32> to vector<7x8xf32>
    %353 = arith.subf %349, %352 : vector<7x8xf32>
    %354 = math.exp %353 : vector<7x8xf32>
    %cst_176 = arith.constant dense<0.000000e+00> : vector<7xf32>
    %355 = vector.multi_reduction <add>, %354, %cst_176 [1] : vector<7x8xf32> to vector<7xf32>
    %356 = vector.shape_cast %355 : vector<7xf32> to vector<7x1xf32>
    %357 = vector.broadcast %356 : vector<7x1xf32> to vector<7x8xf32>
    %358 = arith.divf %354, %357 : vector<7x8xf32>
    %cst_177 = arith.constant dense<0.000000e+00> : vector<7x4xf32>
    %359 = tpu.matmul %358, %348, %cst_177 {dimension_numbers = #tpu.dot_dimension_numbers<[1], [0], [0], [1], [0, 0, 1, 1], [], []>} : vector<7x8xf32>, vector<8x4xf32>, vector<7x4xf32> -> vector<7x4xf32>
    %360 = vector.extract_strided_slice %18 {offsets = [20, 0], sizes = [4, 32], strides = [1, 1]} : vector<32x32xf32> to vector<4x32xf32>
    %cst_178 = arith.constant dense<0.000000e+00> : vector<7x32xf32>
    %361 = tpu.matmul %359, %360, %cst_178 {dimension_numbers = #tpu.dot_dimension_numbers<[1], [0], [0], [1], [0, 0, 1, 1], [], []>} : vector<7x4xf32>, vector<4x32xf32>, vector<7x32xf32> -> vector<7x32xf32>
    %362 = arith.addf %345, %361 : vector<7x32xf32>
    %363 = vector.extract_strided_slice %256 {offsets = [0, 24], sizes = [7, 4], strides = [1, 1]} : vector<7x32xf32> to vector<7x4xf32>
    %364 = vector.extract_strided_slice %260 {offsets = [0, 24], sizes = [8, 4], strides = [1, 1]} : vector<8x32xf32> to vector<8x4xf32>
    %365 = vector.extract_strided_slice %261 {offsets = [0, 24], sizes = [8, 4], strides = [1, 1]} : vector<8x32xf32> to vector<8x4xf32>
    %cst_179 = arith.constant dense<0.000000e+00> : vector<7x8xf32>
    %366 = tpu.matmul %363, %364, %cst_179 {dimension_numbers = #tpu.dot_dimension_numbers<[1], [1], [0], [0], [0, 0, 1, 0], [], []>} : vector<7x4xf32>, vector<8x4xf32>, vector<7x8xf32> -> vector<7x8xf32>
    %cst_180 = arith.constant dense<0xFF800000> : vector<7xf32>
    %367 = vector.multi_reduction <maximumf>, %366, %cst_180 [1] : vector<7x8xf32> to vector<7xf32>
    %368 = vector.shape_cast %367 : vector<7xf32> to vector<7x1xf32>
    %369 = vector.broadcast %368 : vector<7x1xf32> to vector<7x8xf32>
    %370 = arith.subf %366, %369 : vector<7x8xf32>
    %371 = math.exp %370 : vector<7x8xf32>
    %cst_181 = arith.constant dense<0.000000e+00> : vector<7xf32>
    %372 = vector.multi_reduction <add>, %371, %cst_181 [1] : vector<7x8xf32> to vector<7xf32>
    %373 = vector.shape_cast %372 : vector<7xf32> to vector<7x1xf32>
    %374 = vector.broadcast %373 : vector<7x1xf32> to vector<7x8xf32>
    %375 = arith.divf %371, %374 : vector<7x8xf32>
    %cst_182 = arith.constant dense<0.000000e+00> : vector<7x4xf32>
    %376 = tpu.matmul %375, %365, %cst_182 {dimension_numbers = #tpu.dot_dimension_numbers<[1], [0], [0], [1], [0, 0, 1, 1], [], []>} : vector<7x8xf32>, vector<8x4xf32>, vector<7x4xf32> -> vector<7x4xf32>
    %377 = vector.extract_strided_slice %18 {offsets = [24, 0], sizes = [4, 32], strides = [1, 1]} : vector<32x32xf32> to vector<4x32xf32>
    %cst_183 = arith.constant dense<0.000000e+00> : vector<7x32xf32>
    %378 = tpu.matmul %376, %377, %cst_183 {dimension_numbers = #tpu.dot_dimension_numbers<[1], [0], [0], [1], [0, 0, 1, 1], [], []>} : vector<7x4xf32>, vector<4x32xf32>, vector<7x32xf32> -> vector<7x32xf32>
    %379 = arith.addf %362, %378 : vector<7x32xf32>
    %380 = vector.extract_strided_slice %256 {offsets = [0, 28], sizes = [7, 4], strides = [1, 1]} : vector<7x32xf32> to vector<7x4xf32>
    %381 = vector.extract_strided_slice %260 {offsets = [0, 28], sizes = [8, 4], strides = [1, 1]} : vector<8x32xf32> to vector<8x4xf32>
    %382 = vector.extract_strided_slice %261 {offsets = [0, 28], sizes = [8, 4], strides = [1, 1]} : vector<8x32xf32> to vector<8x4xf32>
    %cst_184 = arith.constant dense<0.000000e+00> : vector<7x8xf32>
    %383 = tpu.matmul %380, %381, %cst_184 {dimension_numbers = #tpu.dot_dimension_numbers<[1], [1], [0], [0], [0, 0, 1, 0], [], []>} : vector<7x4xf32>, vector<8x4xf32>, vector<7x8xf32> -> vector<7x8xf32>
    %cst_185 = arith.constant dense<0xFF800000> : vector<7xf32>
    %384 = vector.multi_reduction <maximumf>, %383, %cst_185 [1] : vector<7x8xf32> to vector<7xf32>
    %385 = vector.shape_cast %384 : vector<7xf32> to vector<7x1xf32>
    %386 = vector.broadcast %385 : vector<7x1xf32> to vector<7x8xf32>
    %387 = arith.subf %383, %386 : vector<7x8xf32>
    %388 = math.exp %387 : vector<7x8xf32>
    %cst_186 = arith.constant dense<0.000000e+00> : vector<7xf32>
    %389 = vector.multi_reduction <add>, %388, %cst_186 [1] : vector<7x8xf32> to vector<7xf32>
    %390 = vector.shape_cast %389 : vector<7xf32> to vector<7x1xf32>
    %391 = vector.broadcast %390 : vector<7x1xf32> to vector<7x8xf32>
    %392 = arith.divf %388, %391 : vector<7x8xf32>
    %cst_187 = arith.constant dense<0.000000e+00> : vector<7x4xf32>
    %393 = tpu.matmul %392, %382, %cst_187 {dimension_numbers = #tpu.dot_dimension_numbers<[1], [0], [0], [1], [0, 0, 1, 1], [], []>} : vector<7x8xf32>, vector<8x4xf32>, vector<7x4xf32> -> vector<7x4xf32>
    %394 = vector.extract_strided_slice %18 {offsets = [28, 0], sizes = [4, 32], strides = [1, 1]} : vector<32x32xf32> to vector<4x32xf32>
    %cst_188 = arith.constant dense<0.000000e+00> : vector<7x32xf32>
    %395 = tpu.matmul %393, %394, %cst_188 {dimension_numbers = #tpu.dot_dimension_numbers<[1], [0], [0], [1], [0, 0, 1, 1], [], []>} : vector<7x4xf32>, vector<4x32xf32>, vector<7x32xf32> -> vector<7x32xf32>
    %396 = arith.addf %379, %395 : vector<7x32xf32>
    %397 = vector.broadcast %5 : vector<1x32xf32> to vector<7x32xf32>
    %398 = arith.addf %396, %397 : vector<7x32xf32>
    %399 = arith.addf %231, %398 : vector<7x32xf32>
    %cst_189 = arith.constant dense<0.000000e+00> : vector<7xf32>
    %400 = vector.multi_reduction <add>, %399, %cst_189 [1] : vector<7x32xf32> to vector<7xf32>
    %401 = vector.shape_cast %400 : vector<7xf32> to vector<7x1xf32>
    %cst_190 = arith.constant 3.200000e+01 : f32
    %402 = vector.broadcast %cst_190 : f32 to vector<7x1xf32>
    %403 = arith.divf %401, %402 : vector<7x1xf32>
    %404 = vector.broadcast %403 : vector<7x1xf32> to vector<7x32xf32>
    %405 = arith.subf %399, %404 : vector<7x32xf32>
    %406 = arith.mulf %405, %405 : vector<7x32xf32>
    %cst_191 = arith.constant dense<0.000000e+00> : vector<7xf32>
    %407 = vector.multi_reduction <add>, %406, %cst_191 [1] : vector<7x32xf32> to vector<7xf32>
    %408 = vector.shape_cast %407 : vector<7xf32> to vector<7x1xf32>
    %cst_192 = arith.constant 3.200000e+01 : f32
    %409 = vector.broadcast %cst_192 : f32 to vector<7x1xf32>
    %410 = arith.divf %408, %409 : vector<7x1xf32>
    %cst_193 = arith.constant 9.99999974E-6 : f32
    %411 = vector.broadcast %cst_193 : f32 to vector<7x1xf32>
    %412 = arith.addf %410, %411 : vector<7x1xf32>
    %413 = math.rsqrt %412 : vector<7x1xf32>
    %414 = vector.broadcast %413 : vector<7x1xf32> to vector<7x32xf32>
    %415 = arith.mulf %405, %414 : vector<7x32xf32>
    %416 = vector.broadcast %14 : vector<1x32xf32> to vector<7x32xf32>
    %417 = arith.mulf %415, %416 : vector<7x32xf32>
    %418 = vector.broadcast %13 : vector<1x32xf32> to vector<7x32xf32>
    %419 = arith.addf %417, %418 : vector<7x32xf32>
    %cst_194 = arith.constant dense<0.000000e+00> : vector<7x512xf32>
    %420 = tpu.matmul %419, %15, %cst_194 {dimension_numbers = #tpu.dot_dimension_numbers<[1], [0], [0], [1], [0, 0, 1, 1], [], []>} : vector<7x32xf32>, vector<32x512xf32>, vector<7x512xf32> -> vector<7x512xf32>
    %421 = vector.broadcast %2 : vector<1x512xf32> to vector<7x512xf32>
    %422 = arith.addf %420, %421 : vector<7x512xf32>
    %cst_195 = arith.constant 5.000000e-01 : f32
    %423 = vector.broadcast %cst_195 : f32 to vector<7x512xf32>
    %424 = arith.mulf %423, %422 : vector<7x512xf32>
    %cst_196 = arith.constant 0.707106769 : f32
    %425 = vector.broadcast %cst_196 : f32 to vector<7x512xf32>
    %426 = arith.mulf %422, %425 : vector<7x512xf32>
    %cst_197 = arith.constant 0.000000e+00 : f32
    %427 = vector.broadcast %cst_197 : f32 to vector<7x512xf32>
    %428 = arith.cmpf oge, %426, %427 : vector<7x512xf32>
    %cst_198 = arith.constant 1.000000e+00 : f32
    %cst_199 = arith.constant -1.000000e+00 : f32
    %429 = vector.broadcast %cst_198 : f32 to vector<7x512xf32>
    %430 = vector.broadcast %cst_199 : f32 to vector<7x512xf32>
    %431 = arith.select %428, %429, %430 : vector<7x512xi1>, vector<7x512xf32>
    %432 = math.absf %426 : vector<7x512xf32>
    %cst_200 = arith.constant 0.327591091 : f32
    %433 = vector.broadcast %cst_200 : f32 to vector<7x512xf32>
    %434 = arith.mulf %433, %432 : vector<7x512xf32>
    %cst_201 = arith.constant 1.000000e+00 : f32
    %435 = vector.broadcast %cst_201 : f32 to vector<7x512xf32>
    %436 = arith.addf %435, %434 : vector<7x512xf32>
    %cst_202 = arith.constant 1.000000e+00 : f32
    %437 = vector.broadcast %cst_202 : f32 to vector<7x512xf32>
    %438 = arith.divf %437, %436 : vector<7x512xf32>
    %cst_203 = arith.constant 1.06140542 : f32
    %439 = vector.broadcast %cst_203 : f32 to vector<7x512xf32>
    %440 = arith.mulf %439, %438 : vector<7x512xf32>
    %cst_204 = arith.constant -1.45315206 : f32
    %441 = vector.broadcast %cst_204 : f32 to vector<7x512xf32>
    %442 = arith.addf %440, %441 : vector<7x512xf32>
    %443 = arith.mulf %442, %438 : vector<7x512xf32>
    %cst_205 = arith.constant 1.42141378 : f32
    %444 = vector.broadcast %cst_205 : f32 to vector<7x512xf32>
    %445 = arith.addf %443, %444 : vector<7x512xf32>
    %446 = arith.mulf %445, %438 : vector<7x512xf32>
    %cst_206 = arith.constant -0.284496725 : f32
    %447 = vector.broadcast %cst_206 : f32 to vector<7x512xf32>
    %448 = arith.addf %446, %447 : vector<7x512xf32>
    %449 = arith.mulf %448, %438 : vector<7x512xf32>
    %cst_207 = arith.constant 0.254829586 : f32
    %450 = vector.broadcast %cst_207 : f32 to vector<7x512xf32>
    %451 = arith.addf %449, %450 : vector<7x512xf32>
    %452 = arith.mulf %451, %438 : vector<7x512xf32>
    %453 = arith.mulf %432, %432 : vector<7x512xf32>
    %cst_208 = arith.constant 0.000000e+00 : f32
    %454 = vector.broadcast %cst_208 : f32 to vector<7x512xf32>
    %455 = arith.subf %454, %453 : vector<7x512xf32>
    %456 = math.exp %455 : vector<7x512xf32>
    %457 = arith.mulf %452, %456 : vector<7x512xf32>
    %cst_209 = arith.constant 1.000000e+00 : f32
    %458 = vector.broadcast %cst_209 : f32 to vector<7x512xf32>
    %459 = arith.subf %458, %457 : vector<7x512xf32>
    %460 = arith.mulf %431, %459 : vector<7x512xf32>
    %cst_210 = arith.constant 1.000000e+00 : f32
    %461 = vector.broadcast %cst_210 : f32 to vector<7x512xf32>
    %462 = arith.addf %461, %460 : vector<7x512xf32>
    %463 = arith.mulf %424, %462 : vector<7x512xf32>
    %cst_211 = arith.constant dense<0.000000e+00> : vector<7x32xf32>
    %464 = tpu.matmul %463, %16, %cst_211 {dimension_numbers = #tpu.dot_dimension_numbers<[1], [0], [0], [1], [0, 0, 1, 1], [], []>} : vector<7x512xf32>, vector<512x32xf32>, vector<7x32xf32> -> vector<7x32xf32>
    %465 = vector.broadcast %3 : vector<1x32xf32> to vector<7x32xf32>
    %466 = arith.addf %464, %465 : vector<7x32xf32>
    %467 = arith.addf %399, %466 : vector<7x32xf32>
    %cst_212 = arith.constant dense<0.000000e+00> : vector<7xf32>
    %468 = vector.multi_reduction <add>, %467, %cst_212 [1] : vector<7x32xf32> to vector<7xf32>
    %469 = vector.shape_cast %468 : vector<7xf32> to vector<7x1xf32>
    %cst_213 = arith.constant 3.200000e+01 : f32
    %470 = vector.broadcast %cst_213 : f32 to vector<7x1xf32>
    %471 = arith.divf %469, %470 : vector<7x1xf32>
    %472 = vector.broadcast %471 : vector<7x1xf32> to vector<7x32xf32>
    %473 = arith.subf %467, %472 : vector<7x32xf32>
    %474 = arith.mulf %473, %473 : vector<7x32xf32>
    %cst_214 = arith.constant dense<0.000000e+00> : vector<7xf32>
    %475 = vector.multi_reduction <add>, %474, %cst_214 [1] : vector<7x32xf32> to vector<7xf32>
    %476 = vector.shape_cast %475 : vector<7xf32> to vector<7x1xf32>
    %cst_215 = arith.constant 3.200000e+01 : f32
    %477 = vector.broadcast %cst_215 : f32 to vector<7x1xf32>
    %478 = arith.divf %476, %477 : vector<7x1xf32>
    %cst_216 = arith.constant 9.99999974E-6 : f32
    %479 = vector.broadcast %cst_216 : f32 to vector<7x1xf32>
    %480 = arith.addf %478, %479 : vector<7x1xf32>
    %481 = math.rsqrt %480 : vector<7x1xf32>
    %482 = vector.broadcast %481 : vector<7x1xf32> to vector<7x32xf32>
    %483 = arith.mulf %473, %482 : vector<7x32xf32>
    %484 = vector.broadcast %30 : vector<1x32xf32> to vector<7x32xf32>
    %485 = arith.mulf %483, %484 : vector<7x32xf32>
    %486 = vector.broadcast %29 : vector<1x32xf32> to vector<7x32xf32>
    %487 = arith.addf %485, %486 : vector<7x32xf32>
    %cst_217 = arith.constant dense<0.000000e+00> : vector<7x96xf32>
    %488 = tpu.matmul %487, %41, %cst_217 {dimension_numbers = #tpu.dot_dimension_numbers<[1], [0], [0], [1], [0, 0, 1, 1], [], []>} : vector<7x32xf32>, vector<32x96xf32>, vector<7x96xf32> -> vector<7x96xf32>
    %489 = vector.broadcast %28 : vector<1x96xf32> to vector<7x96xf32>
    %490 = arith.addf %488, %489 : vector<7x96xf32>
    %491 = vector.extract_strided_slice %490 {offsets = [0, 0], sizes = [7, 32], strides = [1, 1]} : vector<7x96xf32> to vector<7x32xf32>
    %cst_218 = arith.constant 5.000000e-01 : f32
    %492 = vector.broadcast %cst_218 : f32 to vector<7x32xf32>
    %493 = arith.mulf %491, %492 : vector<7x32xf32>
    %494 = vector.extract_strided_slice %490 {offsets = [0, 32], sizes = [7, 32], strides = [1, 1]} : vector<7x96xf32> to vector<7x32xf32>
    %495 = vector.extract_strided_slice %490 {offsets = [0, 64], sizes = [7, 32], strides = [1, 1]} : vector<7x96xf32> to vector<7x32xf32>
    %496 = vector.extract_strided_slice %493 {offsets = [0, 0], sizes = [7, 4], strides = [1, 1]} : vector<7x32xf32> to vector<7x4xf32>
    %497 = vector.extract_strided_slice %494 {offsets = [0, 0], sizes = [7, 4], strides = [1, 1]} : vector<7x32xf32> to vector<7x4xf32>
    %498 = vector.extract_strided_slice %495 {offsets = [0, 0], sizes = [7, 4], strides = [1, 1]} : vector<7x32xf32> to vector<7x4xf32>
    %cst_219 = arith.constant dense<0.000000e+00> : vector<7x7xf32>
    %499 = tpu.matmul %496, %497, %cst_219 {dimension_numbers = #tpu.dot_dimension_numbers<[1], [1], [0], [0], [0, 0, 1, 0], [], []>} : vector<7x4xf32>, vector<7x4xf32>, vector<7x7xf32> -> vector<7x7xf32>
    %500 = arith.addf %499, %57 : vector<7x7xf32>
    %cst_220 = arith.constant dense<0xFF800000> : vector<7xf32>
    %501 = vector.multi_reduction <maximumf>, %500, %cst_220 [1] : vector<7x7xf32> to vector<7xf32>
    %502 = vector.shape_cast %501 : vector<7xf32> to vector<7x1xf32>
    %503 = vector.broadcast %502 : vector<7x1xf32> to vector<7x7xf32>
    %504 = arith.subf %500, %503 : vector<7x7xf32>
    %505 = math.exp %504 : vector<7x7xf32>
    %cst_221 = arith.constant dense<0.000000e+00> : vector<7xf32>
    %506 = vector.multi_reduction <add>, %505, %cst_221 [1] : vector<7x7xf32> to vector<7xf32>
    %507 = vector.shape_cast %506 : vector<7xf32> to vector<7x1xf32>
    %508 = vector.broadcast %507 : vector<7x1xf32> to vector<7x7xf32>
    %509 = arith.divf %505, %508 : vector<7x7xf32>
    %cst_222 = arith.constant dense<0.000000e+00> : vector<7x4xf32>
    %510 = tpu.matmul %509, %498, %cst_222 {dimension_numbers = #tpu.dot_dimension_numbers<[1], [0], [0], [1], [0, 0, 1, 1], [], []>} : vector<7x7xf32>, vector<7x4xf32>, vector<7x4xf32> -> vector<7x4xf32>
    %511 = vector.extract_strided_slice %39 {offsets = [0, 0], sizes = [4, 32], strides = [1, 1]} : vector<32x32xf32> to vector<4x32xf32>
    %cst_223 = arith.constant dense<0.000000e+00> : vector<7x32xf32>
    %512 = tpu.matmul %510, %511, %cst_223 {dimension_numbers = #tpu.dot_dimension_numbers<[1], [0], [0], [1], [0, 0, 1, 1], [], []>} : vector<7x4xf32>, vector<4x32xf32>, vector<7x32xf32> -> vector<7x32xf32>
    %513 = vector.extract_strided_slice %493 {offsets = [0, 4], sizes = [7, 4], strides = [1, 1]} : vector<7x32xf32> to vector<7x4xf32>
    %514 = vector.extract_strided_slice %494 {offsets = [0, 4], sizes = [7, 4], strides = [1, 1]} : vector<7x32xf32> to vector<7x4xf32>
    %515 = vector.extract_strided_slice %495 {offsets = [0, 4], sizes = [7, 4], strides = [1, 1]} : vector<7x32xf32> to vector<7x4xf32>
    %cst_224 = arith.constant dense<0.000000e+00> : vector<7x7xf32>
    %516 = tpu.matmul %513, %514, %cst_224 {dimension_numbers = #tpu.dot_dimension_numbers<[1], [1], [0], [0], [0, 0, 1, 0], [], []>} : vector<7x4xf32>, vector<7x4xf32>, vector<7x7xf32> -> vector<7x7xf32>
    %517 = arith.addf %516, %57 : vector<7x7xf32>
    %cst_225 = arith.constant dense<0xFF800000> : vector<7xf32>
    %518 = vector.multi_reduction <maximumf>, %517, %cst_225 [1] : vector<7x7xf32> to vector<7xf32>
    %519 = vector.shape_cast %518 : vector<7xf32> to vector<7x1xf32>
    %520 = vector.broadcast %519 : vector<7x1xf32> to vector<7x7xf32>
    %521 = arith.subf %517, %520 : vector<7x7xf32>
    %522 = math.exp %521 : vector<7x7xf32>
    %cst_226 = arith.constant dense<0.000000e+00> : vector<7xf32>
    %523 = vector.multi_reduction <add>, %522, %cst_226 [1] : vector<7x7xf32> to vector<7xf32>
    %524 = vector.shape_cast %523 : vector<7xf32> to vector<7x1xf32>
    %525 = vector.broadcast %524 : vector<7x1xf32> to vector<7x7xf32>
    %526 = arith.divf %522, %525 : vector<7x7xf32>
    %cst_227 = arith.constant dense<0.000000e+00> : vector<7x4xf32>
    %527 = tpu.matmul %526, %515, %cst_227 {dimension_numbers = #tpu.dot_dimension_numbers<[1], [0], [0], [1], [0, 0, 1, 1], [], []>} : vector<7x7xf32>, vector<7x4xf32>, vector<7x4xf32> -> vector<7x4xf32>
    %528 = vector.extract_strided_slice %39 {offsets = [4, 0], sizes = [4, 32], strides = [1, 1]} : vector<32x32xf32> to vector<4x32xf32>
    %cst_228 = arith.constant dense<0.000000e+00> : vector<7x32xf32>
    %529 = tpu.matmul %527, %528, %cst_228 {dimension_numbers = #tpu.dot_dimension_numbers<[1], [0], [0], [1], [0, 0, 1, 1], [], []>} : vector<7x4xf32>, vector<4x32xf32>, vector<7x32xf32> -> vector<7x32xf32>
    %530 = arith.addf %512, %529 : vector<7x32xf32>
    %531 = vector.extract_strided_slice %493 {offsets = [0, 8], sizes = [7, 4], strides = [1, 1]} : vector<7x32xf32> to vector<7x4xf32>
    %532 = vector.extract_strided_slice %494 {offsets = [0, 8], sizes = [7, 4], strides = [1, 1]} : vector<7x32xf32> to vector<7x4xf32>
    %533 = vector.extract_strided_slice %495 {offsets = [0, 8], sizes = [7, 4], strides = [1, 1]} : vector<7x32xf32> to vector<7x4xf32>
    %cst_229 = arith.constant dense<0.000000e+00> : vector<7x7xf32>
    %534 = tpu.matmul %531, %532, %cst_229 {dimension_numbers = #tpu.dot_dimension_numbers<[1], [1], [0], [0], [0, 0, 1, 0], [], []>} : vector<7x4xf32>, vector<7x4xf32>, vector<7x7xf32> -> vector<7x7xf32>
    %535 = arith.addf %534, %57 : vector<7x7xf32>
    %cst_230 = arith.constant dense<0xFF800000> : vector<7xf32>
    %536 = vector.multi_reduction <maximumf>, %535, %cst_230 [1] : vector<7x7xf32> to vector<7xf32>
    %537 = vector.shape_cast %536 : vector<7xf32> to vector<7x1xf32>
    %538 = vector.broadcast %537 : vector<7x1xf32> to vector<7x7xf32>
    %539 = arith.subf %535, %538 : vector<7x7xf32>
    %540 = math.exp %539 : vector<7x7xf32>
    %cst_231 = arith.constant dense<0.000000e+00> : vector<7xf32>
    %541 = vector.multi_reduction <add>, %540, %cst_231 [1] : vector<7x7xf32> to vector<7xf32>
    %542 = vector.shape_cast %541 : vector<7xf32> to vector<7x1xf32>
    %543 = vector.broadcast %542 : vector<7x1xf32> to vector<7x7xf32>
    %544 = arith.divf %540, %543 : vector<7x7xf32>
    %cst_232 = arith.constant dense<0.000000e+00> : vector<7x4xf32>
    %545 = tpu.matmul %544, %533, %cst_232 {dimension_numbers = #tpu.dot_dimension_numbers<[1], [0], [0], [1], [0, 0, 1, 1], [], []>} : vector<7x7xf32>, vector<7x4xf32>, vector<7x4xf32> -> vector<7x4xf32>
    %546 = vector.extract_strided_slice %39 {offsets = [8, 0], sizes = [4, 32], strides = [1, 1]} : vector<32x32xf32> to vector<4x32xf32>
    %cst_233 = arith.constant dense<0.000000e+00> : vector<7x32xf32>
    %547 = tpu.matmul %545, %546, %cst_233 {dimension_numbers = #tpu.dot_dimension_numbers<[1], [0], [0], [1], [0, 0, 1, 1], [], []>} : vector<7x4xf32>, vector<4x32xf32>, vector<7x32xf32> -> vector<7x32xf32>
    %548 = arith.addf %530, %547 : vector<7x32xf32>
    %549 = vector.extract_strided_slice %493 {offsets = [0, 12], sizes = [7, 4], strides = [1, 1]} : vector<7x32xf32> to vector<7x4xf32>
    %550 = vector.extract_strided_slice %494 {offsets = [0, 12], sizes = [7, 4], strides = [1, 1]} : vector<7x32xf32> to vector<7x4xf32>
    %551 = vector.extract_strided_slice %495 {offsets = [0, 12], sizes = [7, 4], strides = [1, 1]} : vector<7x32xf32> to vector<7x4xf32>
    %cst_234 = arith.constant dense<0.000000e+00> : vector<7x7xf32>
    %552 = tpu.matmul %549, %550, %cst_234 {dimension_numbers = #tpu.dot_dimension_numbers<[1], [1], [0], [0], [0, 0, 1, 0], [], []>} : vector<7x4xf32>, vector<7x4xf32>, vector<7x7xf32> -> vector<7x7xf32>
    %553 = arith.addf %552, %57 : vector<7x7xf32>
    %cst_235 = arith.constant dense<0xFF800000> : vector<7xf32>
    %554 = vector.multi_reduction <maximumf>, %553, %cst_235 [1] : vector<7x7xf32> to vector<7xf32>
    %555 = vector.shape_cast %554 : vector<7xf32> to vector<7x1xf32>
    %556 = vector.broadcast %555 : vector<7x1xf32> to vector<7x7xf32>
    %557 = arith.subf %553, %556 : vector<7x7xf32>
    %558 = math.exp %557 : vector<7x7xf32>
    %cst_236 = arith.constant dense<0.000000e+00> : vector<7xf32>
    %559 = vector.multi_reduction <add>, %558, %cst_236 [1] : vector<7x7xf32> to vector<7xf32>
    %560 = vector.shape_cast %559 : vector<7xf32> to vector<7x1xf32>
    %561 = vector.broadcast %560 : vector<7x1xf32> to vector<7x7xf32>
    %562 = arith.divf %558, %561 : vector<7x7xf32>
    %cst_237 = arith.constant dense<0.000000e+00> : vector<7x4xf32>
    %563 = tpu.matmul %562, %551, %cst_237 {dimension_numbers = #tpu.dot_dimension_numbers<[1], [0], [0], [1], [0, 0, 1, 1], [], []>} : vector<7x7xf32>, vector<7x4xf32>, vector<7x4xf32> -> vector<7x4xf32>
    %564 = vector.extract_strided_slice %39 {offsets = [12, 0], sizes = [4, 32], strides = [1, 1]} : vector<32x32xf32> to vector<4x32xf32>
    %cst_238 = arith.constant dense<0.000000e+00> : vector<7x32xf32>
    %565 = tpu.matmul %563, %564, %cst_238 {dimension_numbers = #tpu.dot_dimension_numbers<[1], [0], [0], [1], [0, 0, 1, 1], [], []>} : vector<7x4xf32>, vector<4x32xf32>, vector<7x32xf32> -> vector<7x32xf32>
    %566 = arith.addf %548, %565 : vector<7x32xf32>
    %567 = vector.extract_strided_slice %493 {offsets = [0, 16], sizes = [7, 4], strides = [1, 1]} : vector<7x32xf32> to vector<7x4xf32>
    %568 = vector.extract_strided_slice %494 {offsets = [0, 16], sizes = [7, 4], strides = [1, 1]} : vector<7x32xf32> to vector<7x4xf32>
    %569 = vector.extract_strided_slice %495 {offsets = [0, 16], sizes = [7, 4], strides = [1, 1]} : vector<7x32xf32> to vector<7x4xf32>
    %cst_239 = arith.constant dense<0.000000e+00> : vector<7x7xf32>
    %570 = tpu.matmul %567, %568, %cst_239 {dimension_numbers = #tpu.dot_dimension_numbers<[1], [1], [0], [0], [0, 0, 1, 0], [], []>} : vector<7x4xf32>, vector<7x4xf32>, vector<7x7xf32> -> vector<7x7xf32>
    %571 = arith.addf %570, %57 : vector<7x7xf32>
    %cst_240 = arith.constant dense<0xFF800000> : vector<7xf32>
    %572 = vector.multi_reduction <maximumf>, %571, %cst_240 [1] : vector<7x7xf32> to vector<7xf32>
    %573 = vector.shape_cast %572 : vector<7xf32> to vector<7x1xf32>
    %574 = vector.broadcast %573 : vector<7x1xf32> to vector<7x7xf32>
    %575 = arith.subf %571, %574 : vector<7x7xf32>
    %576 = math.exp %575 : vector<7x7xf32>
    %cst_241 = arith.constant dense<0.000000e+00> : vector<7xf32>
    %577 = vector.multi_reduction <add>, %576, %cst_241 [1] : vector<7x7xf32> to vector<7xf32>
    %578 = vector.shape_cast %577 : vector<7xf32> to vector<7x1xf32>
    %579 = vector.broadcast %578 : vector<7x1xf32> to vector<7x7xf32>
    %580 = arith.divf %576, %579 : vector<7x7xf32>
    %cst_242 = arith.constant dense<0.000000e+00> : vector<7x4xf32>
    %581 = tpu.matmul %580, %569, %cst_242 {dimension_numbers = #tpu.dot_dimension_numbers<[1], [0], [0], [1], [0, 0, 1, 1], [], []>} : vector<7x7xf32>, vector<7x4xf32>, vector<7x4xf32> -> vector<7x4xf32>
    %582 = vector.extract_strided_slice %39 {offsets = [16, 0], sizes = [4, 32], strides = [1, 1]} : vector<32x32xf32> to vector<4x32xf32>
    %cst_243 = arith.constant dense<0.000000e+00> : vector<7x32xf32>
    %583 = tpu.matmul %581, %582, %cst_243 {dimension_numbers = #tpu.dot_dimension_numbers<[1], [0], [0], [1], [0, 0, 1, 1], [], []>} : vector<7x4xf32>, vector<4x32xf32>, vector<7x32xf32> -> vector<7x32xf32>
    %584 = arith.addf %566, %583 : vector<7x32xf32>
    %585 = vector.extract_strided_slice %493 {offsets = [0, 20], sizes = [7, 4], strides = [1, 1]} : vector<7x32xf32> to vector<7x4xf32>
    %586 = vector.extract_strided_slice %494 {offsets = [0, 20], sizes = [7, 4], strides = [1, 1]} : vector<7x32xf32> to vector<7x4xf32>
    %587 = vector.extract_strided_slice %495 {offsets = [0, 20], sizes = [7, 4], strides = [1, 1]} : vector<7x32xf32> to vector<7x4xf32>
    %cst_244 = arith.constant dense<0.000000e+00> : vector<7x7xf32>
    %588 = tpu.matmul %585, %586, %cst_244 {dimension_numbers = #tpu.dot_dimension_numbers<[1], [1], [0], [0], [0, 0, 1, 0], [], []>} : vector<7x4xf32>, vector<7x4xf32>, vector<7x7xf32> -> vector<7x7xf32>
    %589 = arith.addf %588, %57 : vector<7x7xf32>
    %cst_245 = arith.constant dense<0xFF800000> : vector<7xf32>
    %590 = vector.multi_reduction <maximumf>, %589, %cst_245 [1] : vector<7x7xf32> to vector<7xf32>
    %591 = vector.shape_cast %590 : vector<7xf32> to vector<7x1xf32>
    %592 = vector.broadcast %591 : vector<7x1xf32> to vector<7x7xf32>
    %593 = arith.subf %589, %592 : vector<7x7xf32>
    %594 = math.exp %593 : vector<7x7xf32>
    %cst_246 = arith.constant dense<0.000000e+00> : vector<7xf32>
    %595 = vector.multi_reduction <add>, %594, %cst_246 [1] : vector<7x7xf32> to vector<7xf32>
    %596 = vector.shape_cast %595 : vector<7xf32> to vector<7x1xf32>
    %597 = vector.broadcast %596 : vector<7x1xf32> to vector<7x7xf32>
    %598 = arith.divf %594, %597 : vector<7x7xf32>
    %cst_247 = arith.constant dense<0.000000e+00> : vector<7x4xf32>
    %599 = tpu.matmul %598, %587, %cst_247 {dimension_numbers = #tpu.dot_dimension_numbers<[1], [0], [0], [1], [0, 0, 1, 1], [], []>} : vector<7x7xf32>, vector<7x4xf32>, vector<7x4xf32> -> vector<7x4xf32>
    %600 = vector.extract_strided_slice %39 {offsets = [20, 0], sizes = [4, 32], strides = [1, 1]} : vector<32x32xf32> to vector<4x32xf32>
    %cst_248 = arith.constant dense<0.000000e+00> : vector<7x32xf32>
    %601 = tpu.matmul %599, %600, %cst_248 {dimension_numbers = #tpu.dot_dimension_numbers<[1], [0], [0], [1], [0, 0, 1, 1], [], []>} : vector<7x4xf32>, vector<4x32xf32>, vector<7x32xf32> -> vector<7x32xf32>
    %602 = arith.addf %584, %601 : vector<7x32xf32>
    %603 = vector.extract_strided_slice %493 {offsets = [0, 24], sizes = [7, 4], strides = [1, 1]} : vector<7x32xf32> to vector<7x4xf32>
    %604 = vector.extract_strided_slice %494 {offsets = [0, 24], sizes = [7, 4], strides = [1, 1]} : vector<7x32xf32> to vector<7x4xf32>
    %605 = vector.extract_strided_slice %495 {offsets = [0, 24], sizes = [7, 4], strides = [1, 1]} : vector<7x32xf32> to vector<7x4xf32>
    %cst_249 = arith.constant dense<0.000000e+00> : vector<7x7xf32>
    %606 = tpu.matmul %603, %604, %cst_249 {dimension_numbers = #tpu.dot_dimension_numbers<[1], [1], [0], [0], [0, 0, 1, 0], [], []>} : vector<7x4xf32>, vector<7x4xf32>, vector<7x7xf32> -> vector<7x7xf32>
    %607 = arith.addf %606, %57 : vector<7x7xf32>
    %cst_250 = arith.constant dense<0xFF800000> : vector<7xf32>
    %608 = vector.multi_reduction <maximumf>, %607, %cst_250 [1] : vector<7x7xf32> to vector<7xf32>
    %609 = vector.shape_cast %608 : vector<7xf32> to vector<7x1xf32>
    %610 = vector.broadcast %609 : vector<7x1xf32> to vector<7x7xf32>
    %611 = arith.subf %607, %610 : vector<7x7xf32>
    %612 = math.exp %611 : vector<7x7xf32>
    %cst_251 = arith.constant dense<0.000000e+00> : vector<7xf32>
    %613 = vector.multi_reduction <add>, %612, %cst_251 [1] : vector<7x7xf32> to vector<7xf32>
    %614 = vector.shape_cast %613 : vector<7xf32> to vector<7x1xf32>
    %615 = vector.broadcast %614 : vector<7x1xf32> to vector<7x7xf32>
    %616 = arith.divf %612, %615 : vector<7x7xf32>
    %cst_252 = arith.constant dense<0.000000e+00> : vector<7x4xf32>
    %617 = tpu.matmul %616, %605, %cst_252 {dimension_numbers = #tpu.dot_dimension_numbers<[1], [0], [0], [1], [0, 0, 1, 1], [], []>} : vector<7x7xf32>, vector<7x4xf32>, vector<7x4xf32> -> vector<7x4xf32>
    %618 = vector.extract_strided_slice %39 {offsets = [24, 0], sizes = [4, 32], strides = [1, 1]} : vector<32x32xf32> to vector<4x32xf32>
    %cst_253 = arith.constant dense<0.000000e+00> : vector<7x32xf32>
    %619 = tpu.matmul %617, %618, %cst_253 {dimension_numbers = #tpu.dot_dimension_numbers<[1], [0], [0], [1], [0, 0, 1, 1], [], []>} : vector<7x4xf32>, vector<4x32xf32>, vector<7x32xf32> -> vector<7x32xf32>
    %620 = arith.addf %602, %619 : vector<7x32xf32>
    %621 = vector.extract_strided_slice %493 {offsets = [0, 28], sizes = [7, 4], strides = [1, 1]} : vector<7x32xf32> to vector<7x4xf32>
    %622 = vector.extract_strided_slice %494 {offsets = [0, 28], sizes = [7, 4], strides = [1, 1]} : vector<7x32xf32> to vector<7x4xf32>
    %623 = vector.extract_strided_slice %495 {offsets = [0, 28], sizes = [7, 4], strides = [1, 1]} : vector<7x32xf32> to vector<7x4xf32>
    %cst_254 = arith.constant dense<0.000000e+00> : vector<7x7xf32>
    %624 = tpu.matmul %621, %622, %cst_254 {dimension_numbers = #tpu.dot_dimension_numbers<[1], [1], [0], [0], [0, 0, 1, 0], [], []>} : vector<7x4xf32>, vector<7x4xf32>, vector<7x7xf32> -> vector<7x7xf32>
    %625 = arith.addf %624, %57 : vector<7x7xf32>
    %cst_255 = arith.constant dense<0xFF800000> : vector<7xf32>
    %626 = vector.multi_reduction <maximumf>, %625, %cst_255 [1] : vector<7x7xf32> to vector<7xf32>
    %627 = vector.shape_cast %626 : vector<7xf32> to vector<7x1xf32>
    %628 = vector.broadcast %627 : vector<7x1xf32> to vector<7x7xf32>
    %629 = arith.subf %625, %628 : vector<7x7xf32>
    %630 = math.exp %629 : vector<7x7xf32>
    %cst_256 = arith.constant dense<0.000000e+00> : vector<7xf32>
    %631 = vector.multi_reduction <add>, %630, %cst_256 [1] : vector<7x7xf32> to vector<7xf32>
    %632 = vector.shape_cast %631 : vector<7xf32> to vector<7x1xf32>
    %633 = vector.broadcast %632 : vector<7x1xf32> to vector<7x7xf32>
    %634 = arith.divf %630, %633 : vector<7x7xf32>
    %cst_257 = arith.constant dense<0.000000e+00> : vector<7x4xf32>
    %635 = tpu.matmul %634, %623, %cst_257 {dimension_numbers = #tpu.dot_dimension_numbers<[1], [0], [0], [1], [0, 0, 1, 1], [], []>} : vector<7x7xf32>, vector<7x4xf32>, vector<7x4xf32> -> vector<7x4xf32>
    %636 = vector.extract_strided_slice %39 {offsets = [28, 0], sizes = [4, 32], strides = [1, 1]} : vector<32x32xf32> to vector<4x32xf32>
    %cst_258 = arith.constant dense<0.000000e+00> : vector<7x32xf32>
    %637 = tpu.matmul %635, %636, %cst_258 {dimension_numbers = #tpu.dot_dimension_numbers<[1], [0], [0], [1], [0, 0, 1, 1], [], []>} : vector<7x4xf32>, vector<4x32xf32>, vector<7x32xf32> -> vector<7x32xf32>
    %638 = arith.addf %620, %637 : vector<7x32xf32>
    %639 = vector.broadcast %26 : vector<1x32xf32> to vector<7x32xf32>
    %640 = arith.addf %638, %639 : vector<7x32xf32>
    %641 = arith.addf %467, %640 : vector<7x32xf32>
    %cst_259 = arith.constant dense<0.000000e+00> : vector<7xf32>
    %642 = vector.multi_reduction <add>, %641, %cst_259 [1] : vector<7x32xf32> to vector<7xf32>
    %643 = vector.shape_cast %642 : vector<7xf32> to vector<7x1xf32>
    %cst_260 = arith.constant 3.200000e+01 : f32
    %644 = vector.broadcast %cst_260 : f32 to vector<7x1xf32>
    %645 = arith.divf %643, %644 : vector<7x1xf32>
    %646 = vector.broadcast %645 : vector<7x1xf32> to vector<7x32xf32>
    %647 = arith.subf %641, %646 : vector<7x32xf32>
    %648 = arith.mulf %647, %647 : vector<7x32xf32>
    %cst_261 = arith.constant dense<0.000000e+00> : vector<7xf32>
    %649 = vector.multi_reduction <add>, %648, %cst_261 [1] : vector<7x32xf32> to vector<7xf32>
    %650 = vector.shape_cast %649 : vector<7xf32> to vector<7x1xf32>
    %cst_262 = arith.constant 3.200000e+01 : f32
    %651 = vector.broadcast %cst_262 : f32 to vector<7x1xf32>
    %652 = arith.divf %650, %651 : vector<7x1xf32>
    %cst_263 = arith.constant 9.99999974E-6 : f32
    %653 = vector.broadcast %cst_263 : f32 to vector<7x1xf32>
    %654 = arith.addf %652, %653 : vector<7x1xf32>
    %655 = math.rsqrt %654 : vector<7x1xf32>
    %656 = vector.broadcast %655 : vector<7x1xf32> to vector<7x32xf32>
    %657 = arith.mulf %647, %656 : vector<7x32xf32>
    %658 = vector.broadcast %32 : vector<1x32xf32> to vector<7x32xf32>
    %659 = arith.mulf %657, %658 : vector<7x32xf32>
    %660 = vector.broadcast %31 : vector<1x32xf32> to vector<7x32xf32>
    %661 = arith.addf %659, %660 : vector<7x32xf32>
    %cst_264 = arith.constant dense<0.000000e+00> : vector<7x32xf32>
    %662 = tpu.matmul %661, %40, %cst_264 {dimension_numbers = #tpu.dot_dimension_numbers<[1], [0], [0], [1], [0, 0, 1, 1], [], []>} : vector<7x32xf32>, vector<32x32xf32>, vector<7x32xf32> -> vector<7x32xf32>
    %663 = vector.broadcast %27 : vector<1x32xf32> to vector<7x32xf32>
    %664 = arith.addf %662, %663 : vector<7x32xf32>
    %cst_265 = arith.constant 5.000000e-01 : f32
    %665 = vector.broadcast %cst_265 : f32 to vector<7x32xf32>
    %666 = arith.mulf %664, %665 : vector<7x32xf32>
    %cst_266 = arith.constant dense<0.000000e+00> : vector<8x64xf32>
    %667 = tpu.matmul %45, %37, %cst_266 {dimension_numbers = #tpu.dot_dimension_numbers<[1], [0], [0], [1], [0, 0, 1, 1], [], []>} : vector<8x32xf32>, vector<32x64xf32>, vector<8x64xf32> -> vector<8x64xf32>
    %668 = vector.broadcast %24 : vector<1x64xf32> to vector<8x64xf32>
    %669 = arith.addf %667, %668 : vector<8x64xf32>
    %670 = vector.extract_strided_slice %669 {offsets = [0, 0], sizes = [8, 32], strides = [1, 1]} : vector<8x64xf32> to vector<8x32xf32>
    %671 = vector.extract_strided_slice %669 {offsets = [0, 32], sizes = [8, 32], strides = [1, 1]} : vector<8x64xf32> to vector<8x32xf32>
    %672 = vector.extract_strided_slice %666 {offsets = [0, 0], sizes = [7, 4], strides = [1, 1]} : vector<7x32xf32> to vector<7x4xf32>
    %673 = vector.extract_strided_slice %670 {offsets = [0, 0], sizes = [8, 4], strides = [1, 1]} : vector<8x32xf32> to vector<8x4xf32>
    %674 = vector.extract_strided_slice %671 {offsets = [0, 0], sizes = [8, 4], strides = [1, 1]} : vector<8x32xf32> to vector<8x4xf32>
    %cst_267 = arith.constant dense<0.000000e+00> : vector<7x8xf32>
    %675 = tpu.matmul %672, %673, %cst_267 {dimension_numbers = #tpu.dot_dimension_numbers<[1], [1], [0], [0], [0, 0, 1, 0], [], []>} : vector<7x4xf32>, vector<8x4xf32>, vector<7x8xf32> -> vector<7x8xf32>
    %cst_268 = arith.constant dense<0xFF800000> : vector<7xf32>
    %676 = vector.multi_reduction <maximumf>, %675, %cst_268 [1] : vector<7x8xf32> to vector<7xf32>
    %677 = vector.shape_cast %676 : vector<7xf32> to vector<7x1xf32>
    %678 = vector.broadcast %677 : vector<7x1xf32> to vector<7x8xf32>
    %679 = arith.subf %675, %678 : vector<7x8xf32>
    %680 = math.exp %679 : vector<7x8xf32>
    %cst_269 = arith.constant dense<0.000000e+00> : vector<7xf32>
    %681 = vector.multi_reduction <add>, %680, %cst_269 [1] : vector<7x8xf32> to vector<7xf32>
    %682 = vector.shape_cast %681 : vector<7xf32> to vector<7x1xf32>
    %683 = vector.broadcast %682 : vector<7x1xf32> to vector<7x8xf32>
    %684 = arith.divf %680, %683 : vector<7x8xf32>
    %cst_270 = arith.constant dense<0.000000e+00> : vector<7x4xf32>
    %685 = tpu.matmul %684, %674, %cst_270 {dimension_numbers = #tpu.dot_dimension_numbers<[1], [0], [0], [1], [0, 0, 1, 1], [], []>} : vector<7x8xf32>, vector<8x4xf32>, vector<7x4xf32> -> vector<7x4xf32>
    %686 = vector.extract_strided_slice %38 {offsets = [0, 0], sizes = [4, 32], strides = [1, 1]} : vector<32x32xf32> to vector<4x32xf32>
    %cst_271 = arith.constant dense<0.000000e+00> : vector<7x32xf32>
    %687 = tpu.matmul %685, %686, %cst_271 {dimension_numbers = #tpu.dot_dimension_numbers<[1], [0], [0], [1], [0, 0, 1, 1], [], []>} : vector<7x4xf32>, vector<4x32xf32>, vector<7x32xf32> -> vector<7x32xf32>
    %688 = vector.extract_strided_slice %666 {offsets = [0, 4], sizes = [7, 4], strides = [1, 1]} : vector<7x32xf32> to vector<7x4xf32>
    %689 = vector.extract_strided_slice %670 {offsets = [0, 4], sizes = [8, 4], strides = [1, 1]} : vector<8x32xf32> to vector<8x4xf32>
    %690 = vector.extract_strided_slice %671 {offsets = [0, 4], sizes = [8, 4], strides = [1, 1]} : vector<8x32xf32> to vector<8x4xf32>
    %cst_272 = arith.constant dense<0.000000e+00> : vector<7x8xf32>
    %691 = tpu.matmul %688, %689, %cst_272 {dimension_numbers = #tpu.dot_dimension_numbers<[1], [1], [0], [0], [0, 0, 1, 0], [], []>} : vector<7x4xf32>, vector<8x4xf32>, vector<7x8xf32> -> vector<7x8xf32>
    %cst_273 = arith.constant dense<0xFF800000> : vector<7xf32>
    %692 = vector.multi_reduction <maximumf>, %691, %cst_273 [1] : vector<7x8xf32> to vector<7xf32>
    %693 = vector.shape_cast %692 : vector<7xf32> to vector<7x1xf32>
    %694 = vector.broadcast %693 : vector<7x1xf32> to vector<7x8xf32>
    %695 = arith.subf %691, %694 : vector<7x8xf32>
    %696 = math.exp %695 : vector<7x8xf32>
    %cst_274 = arith.constant dense<0.000000e+00> : vector<7xf32>
    %697 = vector.multi_reduction <add>, %696, %cst_274 [1] : vector<7x8xf32> to vector<7xf32>
    %698 = vector.shape_cast %697 : vector<7xf32> to vector<7x1xf32>
    %699 = vector.broadcast %698 : vector<7x1xf32> to vector<7x8xf32>
    %700 = arith.divf %696, %699 : vector<7x8xf32>
    %cst_275 = arith.constant dense<0.000000e+00> : vector<7x4xf32>
    %701 = tpu.matmul %700, %690, %cst_275 {dimension_numbers = #tpu.dot_dimension_numbers<[1], [0], [0], [1], [0, 0, 1, 1], [], []>} : vector<7x8xf32>, vector<8x4xf32>, vector<7x4xf32> -> vector<7x4xf32>
    %702 = vector.extract_strided_slice %38 {offsets = [4, 0], sizes = [4, 32], strides = [1, 1]} : vector<32x32xf32> to vector<4x32xf32>
    %cst_276 = arith.constant dense<0.000000e+00> : vector<7x32xf32>
    %703 = tpu.matmul %701, %702, %cst_276 {dimension_numbers = #tpu.dot_dimension_numbers<[1], [0], [0], [1], [0, 0, 1, 1], [], []>} : vector<7x4xf32>, vector<4x32xf32>, vector<7x32xf32> -> vector<7x32xf32>
    %704 = arith.addf %687, %703 : vector<7x32xf32>
    %705 = vector.extract_strided_slice %666 {offsets = [0, 8], sizes = [7, 4], strides = [1, 1]} : vector<7x32xf32> to vector<7x4xf32>
    %706 = vector.extract_strided_slice %670 {offsets = [0, 8], sizes = [8, 4], strides = [1, 1]} : vector<8x32xf32> to vector<8x4xf32>
    %707 = vector.extract_strided_slice %671 {offsets = [0, 8], sizes = [8, 4], strides = [1, 1]} : vector<8x32xf32> to vector<8x4xf32>
    %cst_277 = arith.constant dense<0.000000e+00> : vector<7x8xf32>
    %708 = tpu.matmul %705, %706, %cst_277 {dimension_numbers = #tpu.dot_dimension_numbers<[1], [1], [0], [0], [0, 0, 1, 0], [], []>} : vector<7x4xf32>, vector<8x4xf32>, vector<7x8xf32> -> vector<7x8xf32>
    %cst_278 = arith.constant dense<0xFF800000> : vector<7xf32>
    %709 = vector.multi_reduction <maximumf>, %708, %cst_278 [1] : vector<7x8xf32> to vector<7xf32>
    %710 = vector.shape_cast %709 : vector<7xf32> to vector<7x1xf32>
    %711 = vector.broadcast %710 : vector<7x1xf32> to vector<7x8xf32>
    %712 = arith.subf %708, %711 : vector<7x8xf32>
    %713 = math.exp %712 : vector<7x8xf32>
    %cst_279 = arith.constant dense<0.000000e+00> : vector<7xf32>
    %714 = vector.multi_reduction <add>, %713, %cst_279 [1] : vector<7x8xf32> to vector<7xf32>
    %715 = vector.shape_cast %714 : vector<7xf32> to vector<7x1xf32>
    %716 = vector.broadcast %715 : vector<7x1xf32> to vector<7x8xf32>
    %717 = arith.divf %713, %716 : vector<7x8xf32>
    %cst_280 = arith.constant dense<0.000000e+00> : vector<7x4xf32>
    %718 = tpu.matmul %717, %707, %cst_280 {dimension_numbers = #tpu.dot_dimension_numbers<[1], [0], [0], [1], [0, 0, 1, 1], [], []>} : vector<7x8xf32>, vector<8x4xf32>, vector<7x4xf32> -> vector<7x4xf32>
    %719 = vector.extract_strided_slice %38 {offsets = [8, 0], sizes = [4, 32], strides = [1, 1]} : vector<32x32xf32> to vector<4x32xf32>
    %cst_281 = arith.constant dense<0.000000e+00> : vector<7x32xf32>
    %720 = tpu.matmul %718, %719, %cst_281 {dimension_numbers = #tpu.dot_dimension_numbers<[1], [0], [0], [1], [0, 0, 1, 1], [], []>} : vector<7x4xf32>, vector<4x32xf32>, vector<7x32xf32> -> vector<7x32xf32>
    %721 = arith.addf %704, %720 : vector<7x32xf32>
    %722 = vector.extract_strided_slice %666 {offsets = [0, 12], sizes = [7, 4], strides = [1, 1]} : vector<7x32xf32> to vector<7x4xf32>
    %723 = vector.extract_strided_slice %670 {offsets = [0, 12], sizes = [8, 4], strides = [1, 1]} : vector<8x32xf32> to vector<8x4xf32>
    %724 = vector.extract_strided_slice %671 {offsets = [0, 12], sizes = [8, 4], strides = [1, 1]} : vector<8x32xf32> to vector<8x4xf32>
    %cst_282 = arith.constant dense<0.000000e+00> : vector<7x8xf32>
    %725 = tpu.matmul %722, %723, %cst_282 {dimension_numbers = #tpu.dot_dimension_numbers<[1], [1], [0], [0], [0, 0, 1, 0], [], []>} : vector<7x4xf32>, vector<8x4xf32>, vector<7x8xf32> -> vector<7x8xf32>
    %cst_283 = arith.constant dense<0xFF800000> : vector<7xf32>
    %726 = vector.multi_reduction <maximumf>, %725, %cst_283 [1] : vector<7x8xf32> to vector<7xf32>
    %727 = vector.shape_cast %726 : vector<7xf32> to vector<7x1xf32>
    %728 = vector.broadcast %727 : vector<7x1xf32> to vector<7x8xf32>
    %729 = arith.subf %725, %728 : vector<7x8xf32>
    %730 = math.exp %729 : vector<7x8xf32>
    %cst_284 = arith.constant dense<0.000000e+00> : vector<7xf32>
    %731 = vector.multi_reduction <add>, %730, %cst_284 [1] : vector<7x8xf32> to vector<7xf32>
    %732 = vector.shape_cast %731 : vector<7xf32> to vector<7x1xf32>
    %733 = vector.broadcast %732 : vector<7x1xf32> to vector<7x8xf32>
    %734 = arith.divf %730, %733 : vector<7x8xf32>
    %cst_285 = arith.constant dense<0.000000e+00> : vector<7x4xf32>
    %735 = tpu.matmul %734, %724, %cst_285 {dimension_numbers = #tpu.dot_dimension_numbers<[1], [0], [0], [1], [0, 0, 1, 1], [], []>} : vector<7x8xf32>, vector<8x4xf32>, vector<7x4xf32> -> vector<7x4xf32>
    %736 = vector.extract_strided_slice %38 {offsets = [12, 0], sizes = [4, 32], strides = [1, 1]} : vector<32x32xf32> to vector<4x32xf32>
    %cst_286 = arith.constant dense<0.000000e+00> : vector<7x32xf32>
    %737 = tpu.matmul %735, %736, %cst_286 {dimension_numbers = #tpu.dot_dimension_numbers<[1], [0], [0], [1], [0, 0, 1, 1], [], []>} : vector<7x4xf32>, vector<4x32xf32>, vector<7x32xf32> -> vector<7x32xf32>
    %738 = arith.addf %721, %737 : vector<7x32xf32>
    %739 = vector.extract_strided_slice %666 {offsets = [0, 16], sizes = [7, 4], strides = [1, 1]} : vector<7x32xf32> to vector<7x4xf32>
    %740 = vector.extract_strided_slice %670 {offsets = [0, 16], sizes = [8, 4], strides = [1, 1]} : vector<8x32xf32> to vector<8x4xf32>
    %741 = vector.extract_strided_slice %671 {offsets = [0, 16], sizes = [8, 4], strides = [1, 1]} : vector<8x32xf32> to vector<8x4xf32>
    %cst_287 = arith.constant dense<0.000000e+00> : vector<7x8xf32>
    %742 = tpu.matmul %739, %740, %cst_287 {dimension_numbers = #tpu.dot_dimension_numbers<[1], [1], [0], [0], [0, 0, 1, 0], [], []>} : vector<7x4xf32>, vector<8x4xf32>, vector<7x8xf32> -> vector<7x8xf32>
    %cst_288 = arith.constant dense<0xFF800000> : vector<7xf32>
    %743 = vector.multi_reduction <maximumf>, %742, %cst_288 [1] : vector<7x8xf32> to vector<7xf32>
    %744 = vector.shape_cast %743 : vector<7xf32> to vector<7x1xf32>
    %745 = vector.broadcast %744 : vector<7x1xf32> to vector<7x8xf32>
    %746 = arith.subf %742, %745 : vector<7x8xf32>
    %747 = math.exp %746 : vector<7x8xf32>
    %cst_289 = arith.constant dense<0.000000e+00> : vector<7xf32>
    %748 = vector.multi_reduction <add>, %747, %cst_289 [1] : vector<7x8xf32> to vector<7xf32>
    %749 = vector.shape_cast %748 : vector<7xf32> to vector<7x1xf32>
    %750 = vector.broadcast %749 : vector<7x1xf32> to vector<7x8xf32>
    %751 = arith.divf %747, %750 : vector<7x8xf32>
    %cst_290 = arith.constant dense<0.000000e+00> : vector<7x4xf32>
    %752 = tpu.matmul %751, %741, %cst_290 {dimension_numbers = #tpu.dot_dimension_numbers<[1], [0], [0], [1], [0, 0, 1, 1], [], []>} : vector<7x8xf32>, vector<8x4xf32>, vector<7x4xf32> -> vector<7x4xf32>
    %753 = vector.extract_strided_slice %38 {offsets = [16, 0], sizes = [4, 32], strides = [1, 1]} : vector<32x32xf32> to vector<4x32xf32>
    %cst_291 = arith.constant dense<0.000000e+00> : vector<7x32xf32>
    %754 = tpu.matmul %752, %753, %cst_291 {dimension_numbers = #tpu.dot_dimension_numbers<[1], [0], [0], [1], [0, 0, 1, 1], [], []>} : vector<7x4xf32>, vector<4x32xf32>, vector<7x32xf32> -> vector<7x32xf32>
    %755 = arith.addf %738, %754 : vector<7x32xf32>
    %756 = vector.extract_strided_slice %666 {offsets = [0, 20], sizes = [7, 4], strides = [1, 1]} : vector<7x32xf32> to vector<7x4xf32>
    %757 = vector.extract_strided_slice %670 {offsets = [0, 20], sizes = [8, 4], strides = [1, 1]} : vector<8x32xf32> to vector<8x4xf32>
    %758 = vector.extract_strided_slice %671 {offsets = [0, 20], sizes = [8, 4], strides = [1, 1]} : vector<8x32xf32> to vector<8x4xf32>
    %cst_292 = arith.constant dense<0.000000e+00> : vector<7x8xf32>
    %759 = tpu.matmul %756, %757, %cst_292 {dimension_numbers = #tpu.dot_dimension_numbers<[1], [1], [0], [0], [0, 0, 1, 0], [], []>} : vector<7x4xf32>, vector<8x4xf32>, vector<7x8xf32> -> vector<7x8xf32>
    %cst_293 = arith.constant dense<0xFF800000> : vector<7xf32>
    %760 = vector.multi_reduction <maximumf>, %759, %cst_293 [1] : vector<7x8xf32> to vector<7xf32>
    %761 = vector.shape_cast %760 : vector<7xf32> to vector<7x1xf32>
    %762 = vector.broadcast %761 : vector<7x1xf32> to vector<7x8xf32>
    %763 = arith.subf %759, %762 : vector<7x8xf32>
    %764 = math.exp %763 : vector<7x8xf32>
    %cst_294 = arith.constant dense<0.000000e+00> : vector<7xf32>
    %765 = vector.multi_reduction <add>, %764, %cst_294 [1] : vector<7x8xf32> to vector<7xf32>
    %766 = vector.shape_cast %765 : vector<7xf32> to vector<7x1xf32>
    %767 = vector.broadcast %766 : vector<7x1xf32> to vector<7x8xf32>
    %768 = arith.divf %764, %767 : vector<7x8xf32>
    %cst_295 = arith.constant dense<0.000000e+00> : vector<7x4xf32>
    %769 = tpu.matmul %768, %758, %cst_295 {dimension_numbers = #tpu.dot_dimension_numbers<[1], [0], [0], [1], [0, 0, 1, 1], [], []>} : vector<7x8xf32>, vector<8x4xf32>, vector<7x4xf32> -> vector<7x4xf32>
    %770 = vector.extract_strided_slice %38 {offsets = [20, 0], sizes = [4, 32], strides = [1, 1]} : vector<32x32xf32> to vector<4x32xf32>
    %cst_296 = arith.constant dense<0.000000e+00> : vector<7x32xf32>
    %771 = tpu.matmul %769, %770, %cst_296 {dimension_numbers = #tpu.dot_dimension_numbers<[1], [0], [0], [1], [0, 0, 1, 1], [], []>} : vector<7x4xf32>, vector<4x32xf32>, vector<7x32xf32> -> vector<7x32xf32>
    %772 = arith.addf %755, %771 : vector<7x32xf32>
    %773 = vector.extract_strided_slice %666 {offsets = [0, 24], sizes = [7, 4], strides = [1, 1]} : vector<7x32xf32> to vector<7x4xf32>
    %774 = vector.extract_strided_slice %670 {offsets = [0, 24], sizes = [8, 4], strides = [1, 1]} : vector<8x32xf32> to vector<8x4xf32>
    %775 = vector.extract_strided_slice %671 {offsets = [0, 24], sizes = [8, 4], strides = [1, 1]} : vector<8x32xf32> to vector<8x4xf32>
    %cst_297 = arith.constant dense<0.000000e+00> : vector<7x8xf32>
    %776 = tpu.matmul %773, %774, %cst_297 {dimension_numbers = #tpu.dot_dimension_numbers<[1], [1], [0], [0], [0, 0, 1, 0], [], []>} : vector<7x4xf32>, vector<8x4xf32>, vector<7x8xf32> -> vector<7x8xf32>
    %cst_298 = arith.constant dense<0xFF800000> : vector<7xf32>
    %777 = vector.multi_reduction <maximumf>, %776, %cst_298 [1] : vector<7x8xf32> to vector<7xf32>
    %778 = vector.shape_cast %777 : vector<7xf32> to vector<7x1xf32>
    %779 = vector.broadcast %778 : vector<7x1xf32> to vector<7x8xf32>
    %780 = arith.subf %776, %779 : vector<7x8xf32>
    %781 = math.exp %780 : vector<7x8xf32>
    %cst_299 = arith.constant dense<0.000000e+00> : vector<7xf32>
    %782 = vector.multi_reduction <add>, %781, %cst_299 [1] : vector<7x8xf32> to vector<7xf32>
    %783 = vector.shape_cast %782 : vector<7xf32> to vector<7x1xf32>
    %784 = vector.broadcast %783 : vector<7x1xf32> to vector<7x8xf32>
    %785 = arith.divf %781, %784 : vector<7x8xf32>
    %cst_300 = arith.constant dense<0.000000e+00> : vector<7x4xf32>
    %786 = tpu.matmul %785, %775, %cst_300 {dimension_numbers = #tpu.dot_dimension_numbers<[1], [0], [0], [1], [0, 0, 1, 1], [], []>} : vector<7x8xf32>, vector<8x4xf32>, vector<7x4xf32> -> vector<7x4xf32>
    %787 = vector.extract_strided_slice %38 {offsets = [24, 0], sizes = [4, 32], strides = [1, 1]} : vector<32x32xf32> to vector<4x32xf32>
    %cst_301 = arith.constant dense<0.000000e+00> : vector<7x32xf32>
    %788 = tpu.matmul %786, %787, %cst_301 {dimension_numbers = #tpu.dot_dimension_numbers<[1], [0], [0], [1], [0, 0, 1, 1], [], []>} : vector<7x4xf32>, vector<4x32xf32>, vector<7x32xf32> -> vector<7x32xf32>
    %789 = arith.addf %772, %788 : vector<7x32xf32>
    %790 = vector.extract_strided_slice %666 {offsets = [0, 28], sizes = [7, 4], strides = [1, 1]} : vector<7x32xf32> to vector<7x4xf32>
    %791 = vector.extract_strided_slice %670 {offsets = [0, 28], sizes = [8, 4], strides = [1, 1]} : vector<8x32xf32> to vector<8x4xf32>
    %792 = vector.extract_strided_slice %671 {offsets = [0, 28], sizes = [8, 4], strides = [1, 1]} : vector<8x32xf32> to vector<8x4xf32>
    %cst_302 = arith.constant dense<0.000000e+00> : vector<7x8xf32>
    %793 = tpu.matmul %790, %791, %cst_302 {dimension_numbers = #tpu.dot_dimension_numbers<[1], [1], [0], [0], [0, 0, 1, 0], [], []>} : vector<7x4xf32>, vector<8x4xf32>, vector<7x8xf32> -> vector<7x8xf32>
    %cst_303 = arith.constant dense<0xFF800000> : vector<7xf32>
    %794 = vector.multi_reduction <maximumf>, %793, %cst_303 [1] : vector<7x8xf32> to vector<7xf32>
    %795 = vector.shape_cast %794 : vector<7xf32> to vector<7x1xf32>
    %796 = vector.broadcast %795 : vector<7x1xf32> to vector<7x8xf32>
    %797 = arith.subf %793, %796 : vector<7x8xf32>
    %798 = math.exp %797 : vector<7x8xf32>
    %cst_304 = arith.constant dense<0.000000e+00> : vector<7xf32>
    %799 = vector.multi_reduction <add>, %798, %cst_304 [1] : vector<7x8xf32> to vector<7xf32>
    %800 = vector.shape_cast %799 : vector<7xf32> to vector<7x1xf32>
    %801 = vector.broadcast %800 : vector<7x1xf32> to vector<7x8xf32>
    %802 = arith.divf %798, %801 : vector<7x8xf32>
    %cst_305 = arith.constant dense<0.000000e+00> : vector<7x4xf32>
    %803 = tpu.matmul %802, %792, %cst_305 {dimension_numbers = #tpu.dot_dimension_numbers<[1], [0], [0], [1], [0, 0, 1, 1], [], []>} : vector<7x8xf32>, vector<8x4xf32>, vector<7x4xf32> -> vector<7x4xf32>
    %804 = vector.extract_strided_slice %38 {offsets = [28, 0], sizes = [4, 32], strides = [1, 1]} : vector<32x32xf32> to vector<4x32xf32>
    %cst_306 = arith.constant dense<0.000000e+00> : vector<7x32xf32>
    %805 = tpu.matmul %803, %804, %cst_306 {dimension_numbers = #tpu.dot_dimension_numbers<[1], [0], [0], [1], [0, 0, 1, 1], [], []>} : vector<7x4xf32>, vector<4x32xf32>, vector<7x32xf32> -> vector<7x32xf32>
    %806 = arith.addf %789, %805 : vector<7x32xf32>
    %807 = vector.broadcast %25 : vector<1x32xf32> to vector<7x32xf32>
    %808 = arith.addf %806, %807 : vector<7x32xf32>
    %809 = arith.addf %641, %808 : vector<7x32xf32>
    %cst_307 = arith.constant dense<0.000000e+00> : vector<7xf32>
    %810 = vector.multi_reduction <add>, %809, %cst_307 [1] : vector<7x32xf32> to vector<7xf32>
    %811 = vector.shape_cast %810 : vector<7xf32> to vector<7x1xf32>
    %cst_308 = arith.constant 3.200000e+01 : f32
    %812 = vector.broadcast %cst_308 : f32 to vector<7x1xf32>
    %813 = arith.divf %811, %812 : vector<7x1xf32>
    %814 = vector.broadcast %813 : vector<7x1xf32> to vector<7x32xf32>
    %815 = arith.subf %809, %814 : vector<7x32xf32>
    %816 = arith.mulf %815, %815 : vector<7x32xf32>
    %cst_309 = arith.constant dense<0.000000e+00> : vector<7xf32>
    %817 = vector.multi_reduction <add>, %816, %cst_309 [1] : vector<7x32xf32> to vector<7xf32>
    %818 = vector.shape_cast %817 : vector<7xf32> to vector<7x1xf32>
    %cst_310 = arith.constant 3.200000e+01 : f32
    %819 = vector.broadcast %cst_310 : f32 to vector<7x1xf32>
    %820 = arith.divf %818, %819 : vector<7x1xf32>
    %cst_311 = arith.constant 9.99999974E-6 : f32
    %821 = vector.broadcast %cst_311 : f32 to vector<7x1xf32>
    %822 = arith.addf %820, %821 : vector<7x1xf32>
    %823 = math.rsqrt %822 : vector<7x1xf32>
    %824 = vector.broadcast %823 : vector<7x1xf32> to vector<7x32xf32>
    %825 = arith.mulf %815, %824 : vector<7x32xf32>
    %826 = vector.broadcast %34 : vector<1x32xf32> to vector<7x32xf32>
    %827 = arith.mulf %825, %826 : vector<7x32xf32>
    %828 = vector.broadcast %33 : vector<1x32xf32> to vector<7x32xf32>
    %829 = arith.addf %827, %828 : vector<7x32xf32>
    %cst_312 = arith.constant dense<0.000000e+00> : vector<7x512xf32>
    %830 = tpu.matmul %829, %35, %cst_312 {dimension_numbers = #tpu.dot_dimension_numbers<[1], [0], [0], [1], [0, 0, 1, 1], [], []>} : vector<7x32xf32>, vector<32x512xf32>, vector<7x512xf32> -> vector<7x512xf32>
    %831 = vector.broadcast %22 : vector<1x512xf32> to vector<7x512xf32>
    %832 = arith.addf %830, %831 : vector<7x512xf32>
    %cst_313 = arith.constant 5.000000e-01 : f32
    %833 = vector.broadcast %cst_313 : f32 to vector<7x512xf32>
    %834 = arith.mulf %833, %832 : vector<7x512xf32>
    %cst_314 = arith.constant 0.707106769 : f32
    %835 = vector.broadcast %cst_314 : f32 to vector<7x512xf32>
    %836 = arith.mulf %832, %835 : vector<7x512xf32>
    %cst_315 = arith.constant 0.000000e+00 : f32
    %837 = vector.broadcast %cst_315 : f32 to vector<7x512xf32>
    %838 = arith.cmpf oge, %836, %837 : vector<7x512xf32>
    %cst_316 = arith.constant 1.000000e+00 : f32
    %cst_317 = arith.constant -1.000000e+00 : f32
    %839 = vector.broadcast %cst_316 : f32 to vector<7x512xf32>
    %840 = vector.broadcast %cst_317 : f32 to vector<7x512xf32>
    %841 = arith.select %838, %839, %840 : vector<7x512xi1>, vector<7x512xf32>
    %842 = math.absf %836 : vector<7x512xf32>
    %cst_318 = arith.constant 0.327591091 : f32
    %843 = vector.broadcast %cst_318 : f32 to vector<7x512xf32>
    %844 = arith.mulf %843, %842 : vector<7x512xf32>
    %cst_319 = arith.constant 1.000000e+00 : f32
    %845 = vector.broadcast %cst_319 : f32 to vector<7x512xf32>
    %846 = arith.addf %845, %844 : vector<7x512xf32>
    %cst_320 = arith.constant 1.000000e+00 : f32
    %847 = vector.broadcast %cst_320 : f32 to vector<7x512xf32>
    %848 = arith.divf %847, %846 : vector<7x512xf32>
    %cst_321 = arith.constant 1.06140542 : f32
    %849 = vector.broadcast %cst_321 : f32 to vector<7x512xf32>
    %850 = arith.mulf %849, %848 : vector<7x512xf32>
    %cst_322 = arith.constant -1.45315206 : f32
    %851 = vector.broadcast %cst_322 : f32 to vector<7x512xf32>
    %852 = arith.addf %850, %851 : vector<7x512xf32>
    %853 = arith.mulf %852, %848 : vector<7x512xf32>
    %cst_323 = arith.constant 1.42141378 : f32
    %854 = vector.broadcast %cst_323 : f32 to vector<7x512xf32>
    %855 = arith.addf %853, %854 : vector<7x512xf32>
    %856 = arith.mulf %855, %848 : vector<7x512xf32>
    %cst_324 = arith.constant -0.284496725 : f32
    %857 = vector.broadcast %cst_324 : f32 to vector<7x512xf32>
    %858 = arith.addf %856, %857 : vector<7x512xf32>
    %859 = arith.mulf %858, %848 : vector<7x512xf32>
    %cst_325 = arith.constant 0.254829586 : f32
    %860 = vector.broadcast %cst_325 : f32 to vector<7x512xf32>
    %861 = arith.addf %859, %860 : vector<7x512xf32>
    %862 = arith.mulf %861, %848 : vector<7x512xf32>
    %863 = arith.mulf %842, %842 : vector<7x512xf32>
    %cst_326 = arith.constant 0.000000e+00 : f32
    %864 = vector.broadcast %cst_326 : f32 to vector<7x512xf32>
    %865 = arith.subf %864, %863 : vector<7x512xf32>
    %866 = math.exp %865 : vector<7x512xf32>
    %867 = arith.mulf %862, %866 : vector<7x512xf32>
    %cst_327 = arith.constant 1.000000e+00 : f32
    %868 = vector.broadcast %cst_327 : f32 to vector<7x512xf32>
    %869 = arith.subf %868, %867 : vector<7x512xf32>
    %870 = arith.mulf %841, %869 : vector<7x512xf32>
    %cst_328 = arith.constant 1.000000e+00 : f32
    %871 = vector.broadcast %cst_328 : f32 to vector<7x512xf32>
    %872 = arith.addf %871, %870 : vector<7x512xf32>
    %873 = arith.mulf %834, %872 : vector<7x512xf32>
    %cst_329 = arith.constant dense<0.000000e+00> : vector<7x32xf32>
    %874 = tpu.matmul %873, %36, %cst_329 {dimension_numbers = #tpu.dot_dimension_numbers<[1], [0], [0], [1], [0, 0, 1, 1], [], []>} : vector<7x512xf32>, vector<512x32xf32>, vector<7x32xf32> -> vector<7x32xf32>
    %875 = vector.broadcast %23 : vector<1x32xf32> to vector<7x32xf32>
    %876 = arith.addf %874, %875 : vector<7x32xf32>
    %877 = arith.addf %809, %876 : vector<7x32xf32>
    %cst_330 = arith.constant dense<0.000000e+00> : vector<7x64xf32>
    %878 = tpu.matmul %877, %1, %cst_330 {dimension_numbers = #tpu.dot_dimension_numbers<[1], [0], [0], [1], [0, 0, 1, 1], [], []>} : vector<7x32xf32>, vector<32x64xf32>, vector<7x64xf32> -> vector<7x64xf32>
    %879 = vector.broadcast %0 : vector<1x64xf32> to vector<7x64xf32>
    %880 = arith.addf %878, %879 : vector<7x64xf32>
    %c0_331 = arith.constant 0 : index
    %c0_332 = arith.constant 0 : index
    %c0_333 = arith.constant 0 : index
    %881 = vector.load %arg47[%c0_331, %c0_332, %c0_333] : memref<1x7x64xf32, #tpu.memory_space<vmem>>, vector<1x7x64xf32>
    %882 = vector.shape_cast %881 : vector<1x7x64xf32> to vector<7x64xf32>
    %883 = vector.shape_cast %880 : vector<7x64xf32> to vector<1x7x64xf32>
    tpu.vector_store %arg47[%c0_331, %c0_332, %c0_333], %883 {strides = array<i32>} : memref<1x7x64xf32, #tpu.memory_space<vmem>>, vector<1x7x64xf32>,
    %cst_334 = arith.constant dense<0xFF800000> : vector<7xf32>
    %884 = vector.multi_reduction <maximumf>, %880, %cst_334 [1] : vector<7x64xf32> to vector<7xf32>
    %885 = vector.shape_cast %884 : vector<7xf32> to vector<7x1xf32>
    %886 = vector.broadcast %885 : vector<7x1xf32> to vector<7x64xf32>
    %887 = arith.subf %880, %886 : vector<7x64xf32>
    %888 = math.exp %887 : vector<7x64xf32>
    %cst_335 = arith.constant dense<0.000000e+00> : vector<7xf32>
    %889 = vector.multi_reduction <add>, %888, %cst_335 [1] : vector<7x64xf32> to vector<7xf32>
    %890 = vector.shape_cast %889 : vector<7xf32> to vector<7x1xf32>
    %891 = math.log %890 : vector<7x1xf32>
    %892 = arith.addf %891, %885 : vector<7x1xf32>
    %893 = tpu.iota {dimensions = array<i32: 1>} : vector<7x64xi32>
    %c0_336 = arith.constant 0 : index
    %c0_337 = arith.constant 0 : index
    %c0_338 = arith.constant 0 : index
    %894 = vector.load %arg4[%c0_336, %c0_337, %c0_338] : memref<1x7x1xi32, #tpu.memory_space<vmem>>, vector<1x7x1xi32>
    %895 = vector.shape_cast %894 : vector<1x7x1xi32> to vector<7x1xi32>
    %896 = vector.broadcast %895 : vector<7x1xi32> to vector<7x64xi32>
    %897 = arith.cmpi eq, %893, %896 : vector<7x64xi32>
    %cst_339 = arith.constant 0.000000e+00 : f32
    %898 = vector.broadcast %cst_339 : f32 to vector<7x64xf32>
    %899 = arith.select %897, %880, %898 : vector<7x64xi1>, vector<7x64xf32>
    %cst_340 = arith.constant dense<0.000000e+00> : vector<7xf32>
    %900 = vector.multi_reduction <add>, %899, %cst_340 [1] : vector<7x64xf32> to vector<7xf32>
    %901 = vector.shape_cast %900 : vector<7xf32> to vector<7x1xf32>
    %902 = arith.subf %892, %901 : vector<7x1xf32>
    %c0_341 = arith.constant 0 : index
    %c0_342 = arith.constant 0 : index
    %c0_343 = arith.constant 0 : index
    %903 = vector.load %arg48[%c0_341, %c0_342, %c0_343] : memref<1x7x1xf32, #tpu.memory_space<vmem>>, vector<1x7x1xf32>
    %904 = vector.shape_cast %903 : vector<1x7x1xf32> to vector<7x1xf32>
    %905 = vector.shape_cast %902 : vector<7x1xf32> to vector<1x7x1xf32>
    tpu.vector_store %arg48[%c0_341, %c0_342, %c0_343], %905 {strides = array<i32>} : memref<1x7x1xf32, #tpu.memory_space<vmem>>, vector<1x7x1xf32>,
    return
  }
  func.func @transform_0(%arg0: i32) -> (i32, i32, i32) {
    %c0_i32 = arith.constant 0 : i32
    %c0_i32_0 = arith.constant 0 : i32
    %c0_i32_1 = arith.constant 0 : i32
    return %arg0, %c0_i32, %c0_i32_0 : i32, i32, i32
  }
  func.func @transform_1(%arg0: i32) -> (i32, i32, i32) {
    %c0_i32 = arith.constant 0 : i32
    %c0_i32_0 = arith.constant 0 : i32
    %c0_i32_1 = arith.constant 0 : i32
    return %arg0, %c0_i32, %c0_i32_0 : i32, i32, i32
  }
  func.func @transform_2(%arg0: i32) -> (i32, i32, i32) {
    %c0_i32 = arith.constant 0 : i32
    %c0_i32_0 = arith.constant 0 : i32
    %c0_i32_1 = arith.constant 0 : i32
    return %arg0, %c0_i32, %c0_i32_0 : i32, i32, i32
  }
  func.func @transform_3(%arg0: i32) -> (i32, i32, i32) {
    %c0_i32 = arith.constant 0 : i32
    %c0_i32_0 = arith.constant 0 : i32
    %c0_i32_1 = arith.constant 0 : i32
    return %arg0, %c0_i32, %c0_i32_0 : i32, i32, i32
  }
  func.func @transform_4(%arg0: i32) -> (i32, i32) {
    %c0_i32 = arith.constant 0 : i32
    %c0_i32_0 = arith.constant 0 : i32
    %c0_i32_1 = arith.constant 0 : i32
    return %c0_i32, %c0_i32_0 : i32, i32
  }
  func.func @transform_5(%arg0: i32) -> (i32, i32) {
    %c0_i32 = arith.constant 0 : i32
    %c0_i32_0 = arith.constant 0 : i32
    %c0_i32_1 = arith.constant 0 : i32
    return %c0_i32, %c0_i32_0 : i32, i32
  }
  func.func @transform_6(%arg0: i32) -> (i32, i32) {
    %c0_i32 = arith.constant 0 : i32
    %c0_i32_0 = arith.constant 0 : i32
    %c0_i32_1 = arith.constant 0 : i32
    return %c0_i32, %c0_i32_0 : i32, i32
  }
  func.func @transform_7(%arg0: i32) -> (i32, i32) {
    %c0_i32 = arith.constant 0 : i32
    %c0_i32_0 = arith.constant 0 : i32
    %c0_i32_1 = arith.constant 0 : i32
    return %c0_i32, %c0_i32_0 : i32, i32
  }
  func.func @transform_8(%arg0: i32) -> (i32, i32) {
    %c0_i32 = arith.constant 0 : i32
    %c0_i32_0 = arith.constant 0 : i32
    %c0_i32_1 = arith.constant 0 : i32
    return %c0_i32, %c0_i32_0 : i32, i32
  }
  func.func @transform_9(%arg0: i32) -> (i32, i32) {
    %c0_i32 = arith.constant 0 : i32
    %c0_i32_0 = arith.constant 0 : i32
    %c0_i32_1 = arith.constant 0 : i32
    return %c0_i32, %c0_i32_0 : i32, i32
  }
  func.func @transform_10(%arg0: i32) -> (i32, i32) {
    %c0_i32 = arith.constant 0 : i32
    %c0_i32_0 = arith.constant 0 : i32
    %c0_i32_1 = arith.constant 0 : i32
    return %c0_i32, %c0_i32_0 : i32, i32
  }
  func.func @transform_11(%arg0: i32) -> (i32, i32) {
    %c0_i32 = arith.constant 0 : i32
    %c0_i32_0 = arith.constant 0 : i32
    %c0_i32_1 = arith.constant 0 : i32
    return %c0_i32, %c0_i32_0 : i32, i32
  }
  func.func @transform_12(%arg0: i32) -> (i32, i32) {
    %c0_i32 = arith.constant 0 : i32
    %c0_i32_0 = arith.constant 0 : i32
    %c0_i32_1 = arith.constant 0 : i32
    return %c0_i32, %c0_i32_0 : i32, i32
  }
  func.func @transform_13(%arg0: i32) -> (i32, i32) {
    %c0_i32 = arith.constant 0 : i32
    %c0_i32_0 = arith.constant 0 : i32
    %c0_i32_1 = arith.constant 0 : i32
    return %c0_i32, %c0_i32_0 : i32, i32
  }
  func.func @transform_14(%arg0: i32) -> (i32, i32) {
    %c0_i32 = arith.constant 0 : i32
    %c0_i32_0 = arith.constant 0 : i32
    %c0_i32_1 = arith.constant 0 : i32
    return %c0_i32, %c0_i32_0 : i32, i32
  }
  func.func @transform_15(%arg0: i32) -> (i32, i32) {
    %c0_i32 = arith.constant 0 : i32
    %c0_i32_0 = arith.constant 0 : i32
    %c0_i32_1 = arith.constant 0 : i32
    return %c0_i32, %c0_i32_0 : i32, i32
  }
  func.func @transform_16(%arg0: i32) -> (i32, i32) {
    %c0_i32 = arith.constant 0 : i32
    %c0_i32_0 = arith.constant 0 : i32
    %c0_i32_1 = arith.constant 0 : i32
    return %c0_i32, %c0_i32_0 : i32, i32
  }
  func.func @transform_17(%arg0: i32) -> (i32, i32) {
    %c0_i32 = arith.constant 0 : i32
    %c0_i32_0 = arith.constant 0 : i32
    %c0_i32_1 = arith.constant 0 : i32
    return %c0_i32, %c0_i32_0 : i32, i32
  }
  func.func @transform_18(%arg0: i32) -> (i32, i32) {
    %c0_i32 = arith.constant 0 : i32
    %c0_i32_0 = arith.constant 0 : i32
    %c0_i32_1 = arith.constant 0 : i32
    return %c0_i32, %c0_i32_0 : i32, i32
  }
  func.func @transform_19(%arg0: i32) -> (i32, i32) {
    %c0_i32 = arith.constant 0 : i32
    %c0_i32_0 = arith.constant 0 : i32
    %c0_i32_1 = arith.constant 0 : i32
    return %c0_i32, %c0_i32_0 : i32, i32
  }
  func.func @transform_20(%arg0: i32) -> (i32, i32) {
    %c0_i32 = arith.constant 0 : i32
    %c0_i32_0 = arith.constant 0 : i32
    %c0_i32_1 = arith.constant 0 : i32
    return %c0_i32, %c0_i32_0 : i32, i32
  }
  func.func @transform_21(%arg0: i32) -> (i32, i32) {
    %c0_i32 = arith.constant 0 : i32
    %c0_i32_0 = arith.constant 0 : i32
    %c0_i32_1 = arith.constant 0 : i32
    return %c0_i32, %c0_i32_0 : i32, i32
  }
  func.func @transform_22(%arg0: i32) -> (i32, i32) {
    %c0_i32 = arith.constant 0 : i32
    %c0_i32_0 = arith.constant 0 : i32
    %c0_i32_1 = arith.constant 0 : i32
    return %c0_i32, %c0_i32_0 : i32, i32
  }
  func.func @transform_23(%arg0: i32) -> (i32, i32) {
    %c0_i32 = arith.constant 0 : i32
    %c0_i32_0 = arith.constant 0 : i32
    %c0_i32_1 = arith.constant 0 : i32
    return %c0_i32, %c0_i32_0 : i32, i32
  }
  func.func @transform_24(%arg0: i32) -> (i32, i32) {
    %c0_i32 = arith.constant 0 : i32
    %c0_i32_0 = arith.constant 0 : i32
    %c0_i32_1 = arith.constant 0 : i32
    return %c0_i32, %c0_i32_0 : i32, i32
  }
  func.func @transform_25(%arg0: i32) -> (i32, i32) {
    %c0_i32 = arith.constant 0 : i32
    %c0_i32_0 = arith.constant 0 : i32
    %c0_i32_1 = arith.constant 0 : i32
    return %c0_i32, %c0_i32_0 : i32, i32
  }
  func.func @transform_26(%arg0: i32) -> (i32, i32) {
    %c0_i32 = arith.constant 0 : i32
    %c0_i32_0 = arith.constant 0 : i32
    %c0_i32_1 = arith.constant 0 : i32
    return %c0_i32, %c0_i32_0 : i32, i32
  }
  func.func @transform_27(%arg0: i32) -> (i32, i32) {
    %c0_i32 = arith.constant 0 : i32
    %c0_i32_0 = arith.constant 0 : i32
    %c0_i32_1 = arith.constant 0 : i32
    return %c0_i32, %c0_i32_0 : i32, i32
  }
  func.func @transform_28(%arg0: i32) -> (i32, i32) {
    %c0_i32 = arith.constant 0 : i32
    %c0_i32_0 = arith.constant 0 : i32
    %c0_i32_1 = arith.constant 0 : i32
    return %c0_i32, %c0_i32_0 : i32, i32
  }
  func.func @transform_29(%arg0: i32) -> (i32, i32) {
    %c0_i32 = arith.constant 0 : i32
    %c0_i32_0 = arith.constant 0 : i32
    %c0_i32_1 = arith.constant 0 : i32
    return %c0_i32, %c0_i32_0 : i32, i32
  }
  func.func @transform_30(%arg0: i32) -> (i32, i32) {
    %c0_i32 = arith.constant 0 : i32
    %c0_i32_0 = arith.constant 0 : i32
    %c0_i32_1 = arith.constant 0 : i32
    return %c0_i32, %c0_i32_0 : i32, i32
  }
  func.func @transform_31(%arg0: i32) -> (i32, i32) {
    %c0_i32 = arith.constant 0 : i32
    %c0_i32_0 = arith.constant 0 : i32
    %c0_i32_1 = arith.constant 0 : i32
    return %c0_i32, %c0_i32_0 : i32, i32
  }
  func.func @transform_32(%arg0: i32) -> (i32, i32) {
    %c0_i32 = arith.constant 0 : i32
    %c0_i32_0 = arith.constant 0 : i32
    %c0_i32_1 = arith.constant 0 : i32
    return %c0_i32, %c0_i32_0 : i32, i32
  }
  func.func @transform_33(%arg0: i32) -> (i32, i32) {
    %c0_i32 = arith.constant 0 : i32
    %c0_i32_0 = arith.constant 0 : i32
    %c0_i32_1 = arith.constant 0 : i32
    return %c0_i32, %c0_i32_0 : i32, i32
  }
  func.func @transform_34(%arg0: i32) -> (i32, i32) {
    %c0_i32 = arith.constant 0 : i32
    %c0_i32_0 = arith.constant 0 : i32
    %c0_i32_1 = arith.constant 0 : i32
    return %c0_i32, %c0_i32_0 : i32, i32
  }
  func.func @transform_35(%arg0: i32) -> (i32, i32) {
    %c0_i32 = arith.constant 0 : i32
    %c0_i32_0 = arith.constant 0 : i32
    %c0_i32_1 = arith.constant 0 : i32
    return %c0_i32, %c0_i32_0 : i32, i32
  }
  func.func @transform_36(%arg0: i32) -> (i32, i32) {
    %c0_i32 = arith.constant 0 : i32
    %c0_i32_0 = arith.constant 0 : i32
    %c0_i32_1 = arith.constant 0 : i32
    return %c0_i32, %c0_i32_0 : i32, i32
  }
  func.func @transform_37(%arg0: i32) -> (i32, i32) {
    %c0_i32 = arith.constant 0 : i32
    %c0_i32_0 = arith.constant 0 : i32
    %c0_i32_1 = arith.constant 0 : i32
    return %c0_i32, %c0_i32_0 : i32, i32
  }
  func.func @transform_38(%arg0: i32) -> (i32, i32) {
    %c0_i32 = arith.constant 0 : i32
    %c0_i32_0 = arith.constant 0 : i32
    %c0_i32_1 = arith.constant 0 : i32
    return %c0_i32, %c0_i32_0 : i32, i32
  }
  func.func @transform_39(%arg0: i32) -> (i32, i32) {
    %c0_i32 = arith.constant 0 : i32
    %c0_i32_0 = arith.constant 0 : i32
    %c0_i32_1 = arith.constant 0 : i32
    return %c0_i32, %c0_i32_0 : i32, i32
  }
  func.func @transform_40(%arg0: i32) -> (i32, i32) {
    %c0_i32 = arith.constant 0 : i32
    %c0_i32_0 = arith.constant 0 : i32
    %c0_i32_1 = arith.constant 0 : i32
    return %c0_i32, %c0_i32_0 : i32, i32
  }
  func.func @transform_41(%arg0: i32) -> (i32, i32) {
    %c0_i32 = arith.constant 0 : i32
    %c0_i32_0 = arith.constant 0 : i32
    %c0_i32_1 = arith.constant 0 : i32
    return %c0_i32, %c0_i32_0 : i32, i32
  }
  func.func @transform_42(%arg0: i32) -> (i32, i32) {
    %c0_i32 = arith.constant 0 : i32
    %c0_i32_0 = arith.constant 0 : i32
    %c0_i32_1 = arith.constant 0 : i32
    return %c0_i32, %c0_i32_0 : i32, i32
  }
  func.func @transform_43(%arg0: i32) -> (i32, i32) {
    %c0_i32 = arith.constant 0 : i32
    %c0_i32_0 = arith.constant 0 : i32
    %c0_i32_1 = arith.constant 0 : i32
    return %c0_i32, %c0_i32_0 : i32, i32
  }
  func.func @transform_44(%arg0: i32) -> (i32, i32) {
    %c0_i32 = arith.constant 0 : i32
    %c0_i32_0 = arith.constant 0 : i32
    %c0_i32_1 = arith.constant 0 : i32
    return %c0_i32, %c0_i32_0 : i32, i32
  }
  func.func @transform_45(%arg0: i32) -> (i32, i32) {
    %c0_i32 = arith.constant 0 : i32
    %c0_i32_0 = arith.constant 0 : i32
    %c0_i32_1 = arith.constant 0 : i32
    return %c0_i32, %c0_i32_0 : i32, i32
  }
  func.func @transform_46(%arg0: i32) -> (i32, i32, i32) {
    %c0_i32 = arith.constant 0 : i32
    %c0_i32_0 = arith.constant 0 : i32
    %c0_i32_1 = arith.constant 0 : i32
    return %arg0, %c0_i32, %c0_i32_0 : i32, i32, i32
  }
  func.func @transform_47(%arg0: i32) -> (i32, i32, i32) {
    %c0_i32 = arith.constant 0 : i32
    %c0_i32_0 = arith.constant 0 : i32
    %c0_i32_1 = arith.constant 0 : i32
    return %arg0, %c0_i32, %c0_i32_0 : i32, i32, i32
  }
}

</mosaic_0001>

<bundles_post_ra>
// kernel: forward.2
= control target key start
LH: loop header
LB: loop body
LE: loop exit
PB: predicated region body
PF: predicated region fallthrough
CT: control target
= control target key end

     0   :  { %s4120_s27 = smov 0   ;;  %s4755_s0 = inlined_call_operand.vmem [shape: f32[2,4,192], index: 0, kind: input, shape index: {}]   ;;  %s4756_s1 = inlined_call_operand.vmem [shape: f32[2,4,32], index: 1, kind: input, shape index: {}]   ;;  %s4757_s2 = inlined_call_operand.vmem [shape: f32[1,4,32], index: 2, kind: input, shape index: {}]   ;;  %s4758_s3 = inlined_call_operand.vmem [shape: f32[1,24], index: 3, kind: input, shape index: {}]   ;;  %s4759_s4 = inlined_call_operand.vmem [shape: f32[192,24], index: 4, kind: input, shape index: {}]   ;;  %s4760_s5 = inlined_call_operand.vmem [shape: f32[24,32], index: 5, kind: input, shape index: {}]   ;;  %s4761_s6 = inlined_call_operand.vmem [shape: f32[1,512], index: 6, kind: input, shape index: {}]   ;;  %s4762_s7 = inlined_call_operand.vmem [shape: f32[1,32], index: 7, kind: input, shape index: {}]   ;;  %s4763_s8 = inlined_call_operand.vmem [shape: f32[1,32], index: 8, kind: input, shape index: {}]   ;;  %s4764_s9 = inlined_call_operand.vmem [shape: f32[1,96], index: 9, kind: input, shape index: {}]   ;;  %s4765_s10 = inlined_call_operand.vmem [shape: f32[1,32], index: 10, kind: input, shape index: {}]   ;;  %s4766_s11 = inlined_call_operand.vmem [shape: f32[1,32], index: 11, kind: input, shape index: {}]   ;;  %s4767_s12 = inlined_call_operand.vmem [shape: f32[1,32], index: 12, kind: input, shape index: {}]   ;;  %s4768_s13 = inlined_call_operand.vmem [shape: f32[1,32], index: 13, kind: input, shape index: {}]   ;;  %s4769_s14 = inlined_call_operand.vmem [shape: f32[32,512], index: 14, kind: input, shape index: {}]   ;;  %s4770_s15 = inlined_call_operand.vmem [shape: f32[512,32], index: 15, kind: input, shape index: {}]   ;;  %s4771_s16 = inlined_call_operand.vmem [shape: f32[32,32], index: 16, kind: input, shape index: {}]   ;;  %s4772_s17 = inlined_call_operand.vmem [shape: f32[32,96], index: 17, kind: input, shape index: {}]   ;;  %s4773_s18 = inlined_call_operand.vmem [shape: f32[2,8,32], index: 18, kind: output, shape index: {}]  }
   0x1   :  { %4774 = sst [smem:[#allocation3_spill]] %s4755_s0 }
   0x2   :  { %4775 = sst [smem:[#allocation4_spill]] %s4756_s1 }
   0x3   :  { %4776 = sst [smem:[#allocation5_spill]] %s4757_s2 }
   0x4 LB: > { %s3445_s28 = sadd.s32 4294967295, %s3996_s27   ;;  %p3449_p0 = scmp.ge.s32.totalorder %s3996_s27, 1  ;;  %s3996_s27 = sphi %s4120_s27, %s28_s27  }
   0x5   : > { %p521_p1 = scmp.lt.s32.totalorder %s3996_s27, 3 }
   0x7   : > { %p522_p2 = pnand %p3449_p0, %p521_p1 }
   0x8   : > { %v592_v0 = vld [vmem:[%s4759_s4] sm:$0xff] (!%p522_p2)  ;;  %v593_v1 = vld [vmem:[%s4759_s4 + $0x8] sm:$0xff] (!%p522_p2)  ;;  %v594_v2 = vld [vmem:[%s4759_s4 + $0x10] sm:$0xff] (!%p522_p2)  ;;  %p578_p3 = scmp.lt.s32.totalorder (!%p522_p2), %s3445_s28, 1  ;;  %v3998_v3 = vmov (!%p522_p2), 0.0|0.0   ;;  %s4777_s0 = sld [smem:[#allocation3_spill]] (!%p522_p2) }
   0x9   : > { %525 = sbr.rel (%p522_p2) target bundleno = 6512 (0x1970), region = 92  ;;  %3777 = vmatprep.subr.bf16.mxu0 (!%p522_p2), %v3998_v3  ;;  %v3778_v4 = vpack.c.bf16 (!%p522_p2), %v593_v1, %v592_v0  ;;  %v595_v5 = vld [vmem:[%s4759_s4 + $0x18] sm:$0xff] (!%p522_p2)  ;;  %3813 = vmatprep.subr.bf16.mxu1 (!%p522_p2), %v3998_v3  ;;  %v596_v7 = vld [vmem:[%s4759_s4 + $0x20] sm:$0xff] (!%p522_p2)  ;;  %v597_v8 = vld [vmem:[%s4759_s4 + $0x28] sm:$0xff] (!%p522_p2)  ;;  %vm724_vm0 = vcmask (!%p522_p2), 523264   ;;  %v3999_v42 = vmov (!%p522_p2), 0.0  }
   0xa   : > { %v3781_v6 = vpack.c.bf16 (!%p522_p2), %v595_v5, %v594_v2  ;;  %v3784_v9 = vpack.c.bf16 (!%p522_p2), %v597_v8, %v596_v7  ;;  %v598_v10 = vld [vmem:[%s4759_s4 + $0x30] sm:$0xff] (!%p522_p2)  ;;  %v599_v11 = vld [vmem:[%s4759_s4 + $0x38] sm:$0xff] (!%p522_p2)  ;;  %v616_v13 = vld [vmem:[%s4760_s5] sm:$0xff] (!%p522_p2)  ;;  %vm4000_vm1 = vmmov (!%p522_p2), 0   ;;  %vm798_vm2 = vcmask (!%p522_p2), 195584   ;;  %s4779_s22 = sld [smem:[#allocation5_spill]] (!%p522_p2) }
   0xb   : > { %3779 = vmatpush1.bf16.msra.mxu0 (!%p522_p2), %v3778_v4  ;;  %v617_v14 = vld [vmem:[%s4760_s5 + $0x8] sm:$0xff] (!%p522_p2)  ;;  %v3787_v17 = vpack.c.bf16 (!%p522_p2), %v599_v11, %v598_v10  ;;  %v600_v18 = vld [vmem:[%s4759_s4 + $0x40] sm:$0xff] (!%p522_p2)  ;;  %v602_v21 = vld [vmem:[%s4759_s4 + $0x50] sm:$0xff] (!%p522_p2)  ;;  %3643 = vmatprep.mubr.msk.f32.mxu1 (!%p522_p2), %vm4000_vm1, %v3999_v42  ;;  %vm872_vm3 = vcmask (!%p522_p2), 257024   ;;  %vm877_vm4 = vcmask (!%p522_p2), 261120   ;;  %s4001_s24 = smov (!%p522_p2), 64  }
   0xc   : > { %3780 = vmatprep.subr.bf16.mxu0 (!%p522_p2), %v3998_v3  ;;  %v3814_v16 = vpack.c.bf16 (!%p522_p2), %v617_v14, %v616_v13  ;;  %v601_v19 = vld [vmem:[%s4759_s4 + $0x48] sm:$0xff] (!%p522_p2)  ;;  %v603_v22 = vld [vmem:[%s4759_s4 + $0x58] sm:$0xff] (!%p522_p2)  ;;  %v604_v24 = vld [vmem:[%s4759_s4 + $0x60] sm:$0xff] (!%p522_p2)  ;;  %s4002_s25 = smov (!%p522_p2), 96   ;;  %vm989_vm5 = vcmask (!%p522_p2), 31744   ;;  %vm1065_vm6 = vcmask (!%p522_p2), 64512  }
   0xd   : > { %v3790_v20 = vpack.c.bf16 (!%p522_p2), %v601_v19, %v600_v18  ;;  %v3793_v23 = vpack.c.bf16 (!%p522_p2), %v603_v22, %v602_v21  ;;  %v605_v25 = vld [vmem:[%s4759_s4 + $0x68] sm:$0xff] (!%p522_p2)  ;;  %v606_v27 = vld [vmem:[%s4759_s4 + $0x70] sm:$0xff] (!%p522_p2)  ;;  %v607_v28 = vld [vmem:[%s4759_s4 + $0x78] sm:$0xff] (!%p522_p2)  ;;  %s4004_s30 = smov (!%p522_p2), 124   ;;  %s4008_s20 = smov (!%p522_p2), 84   ;;  %vm1323_vm7 = vcmask (!%p522_p2), 1043456  }
   0xe   : > { %3815 = vmatpush3.bf16.msra.mxu1 (!%p522_p2), %v3814_v16  ;;  %v3796_v26 = vpack.c.bf16 (!%p522_p2), %v605_v25, %v604_v24  ;;  %v3799_v29 = vpack.c.bf16 (!%p522_p2), %v607_v28, %v606_v27  ;;  %v608_v30 = vld [vmem:[%s4759_s4 + $0x80] sm:$0xff] (!%p522_p2)  ;;  %v609_v31 = vld [vmem:[%s4759_s4 + $0x88] sm:$0xff] (!%p522_p2)  ;;  %v610_v33 = vld [vmem:[%s4759_s4 + $0x90] sm:$0xff] (!%p522_p2)  ;;  %s4009_s21 = smov (!%p522_p2), 116   ;;  %s4010_s23 = smov (!%p522_p2), 56  }
   0xf   : > { %3782 = vmatpush1.bf16.msra.mxu0 (!%p522_p2), %v3781_v6  ;;  %v3802_v32 = vpack.c.bf16 (!%p522_p2), %v609_v31, %v608_v30  ;;  %v611_v34 = vld [vmem:[%s4759_s4 + $0x98] sm:$0xff] (!%p522_p2)  ;;  %v612_v36 = vld [vmem:[%s4759_s4 + $0xa0] sm:$0xff] (!%p522_p2)  ;;  %v613_v37 = vld [vmem:[%s4759_s4 + $0xa8] sm:$0xff] (!%p522_p2)  ;;  %3641 = vmatprep.subr.mxu1 (!%p522_p2), %v3999_v42  ;;  %s4017_s2 = smov (!%p522_p2), 44  }
  0x10   : > { %s4781_s28 = smov (!%p578_p3, %s3445_s28), 1  ;;  %3783 = vmatprep.subr.bf16.mxu0 %v3998_v3  ;;  %v3805_v35 = vpack.c.bf16 %v611_v34, %v610_v33  ;;  %v3808_v38 = vpack.c.bf16 %v613_v37, %v612_v36  ;;  %v614_v39 = vld [vmem:[%s4759_s4 + $0xb0] sm:$0xff]  ;;  %v615_v40 = vld [vmem:[%s4759_s4 + $0xb8] sm:$0xff]  ;;  %v3454_v44 = vld [vmem:[%s4758_s3] ss:$0 sm:$0xff] }
  0x11   : > { %s3509_s26 = sshll.u32 %s4781_s28, 3  ;;  %v3811_v41 = vpack.c.bf16 %v615_v40, %v614_v39  ;;  %v618_v43 = vld [vmem:[%s4760_s5 + $0x10] sm:$0xff]  ;;  %s3452_s29 = sshll.u32 %s4781_s28, 2  ;;  %v797_v49 = vld [vmem:[%s4779_s22] sm:$0xf]  ;;  %v712_v61 = vld [vmem:[%s4772_s17 + $0x8] sm:$0xff] }
  0x12   : > { %s582_s19 = scalar_lea.vmem %s4777_s0, %s3509_s26  ;;  %3642 = vmatpush3.msra.mxu1 %v618_v43  ;;  %v711_v60 = vld [vmem:[%s4772_s17] sm:$0xff]  ;;  %v713_v63 = vld [vmem:[%s4772_s17 + $0x10] sm:$0xff]  ;;  %v714_v0 = vld [vmem:[%s4772_s17 + $0x18] sm:$0xff]  ;;  %s4005_s0 = smov 60  }
  0x13   : > { %v715_v12 = vld [vmem:[%s582_s19] sm:$0xff]  ;;  %3785 = vmatpush1.bf16.msra.mxu0 %v3784_v9  ;;  %3816 = vmatprep.subr.bf16.mxu1 %v3998_v3  ;;  %s4778_s19 = sld [smem:[#allocation4_spill]]  ;;  %v3817_v62 = vpack.c.bf16 %v712_v61, %v711_v60  ;;  %v3820_v1 = vpack.c.bf16 %v714_v0, %v713_v63 }
  0x14   : > { %v723_v15 = vcombine.high %v715_v12, %v715_v12  ;;  %3786 = vmatprep.subr.bf16.mxu0 %v3998_v3  ;;  %v3458_v8 = vld [vmem:[%s4765_s10] ss:$0 sm:$0xff] }
  0x15   : > { %v3459_v11 = vld [vmem:[%s4764_s9] ss:$0 sm:$0xff] }
  0x16   : > { %3455 = vmatprep.mubr.msk.f32.mxu0 %vm724_vm0, %v723_v15 }
  0x17   : > { %3788 = vmatpush1.bf16.msra.mxu0 %v3787_v17 }
  0x18   : > { %3789 = vmatprep.subr.bf16.mxu0 %v3998_v3 }
  0x19   : > { %s586_s1 = scalar_lea.vmem %s4778_s19, %s3452_s29  ;;  %s4003_s29 = smov 92  }
  0x1a   : > { %v874_v48 = vld [vmem:[%s586_s1] sm:$0xf]  ;;  %s4006_s19 = smov 88   ;;  %s4007_s1 = smov 120  }
  0x1b   : > { %3791 = vmatpush1.bf16.msra.mxu0 %v3790_v20  ;;  %875 = vst.msk [vmem:[#allocation2 + $0x4] sm:$0xf] %vm872_vm3, %v874_v48 }
  0x1c   : > { %3792 = vmatprep.subr.bf16.mxu0 %v3998_v3 }
  0x1f   : > { %3794 = vmatpush1.bf16.msra.mxu0 %v3793_v23 }
  0x20   : > { %3795 = vmatprep.subr.bf16.mxu0 %v3998_v3 }
  0x23   : > { %3797 = vmatpush1.bf16.msra.mxu0 %v3796_v26 }
  0x24   : > { %3798 = vmatprep.subr.bf16.mxu0 %v3998_v3 }
  0x27   : > { %3800 = vmatpush1.bf16.msra.mxu0 %v3799_v29 }
  0x28   : > { %3801 = vmatprep.subr.bf16.mxu0 %v3998_v3 }
  0x2b   : > { %3803 = vmatpush1.bf16.msra.mxu0 %v3802_v32 }
  0x2c   : > { %3804 = vmatprep.subr.bf16.mxu0 %v3998_v3 }
  0x2f   : > { %3806 = vmatpush1.bf16.msra.mxu0 %v3805_v35 }
  0x30   : > { %3807 = vmatprep.subr.bf16.mxu0 %v3998_v3 }
  0x33   : > { %3809 = vmatpush1.bf16.msra.mxu0 %v3808_v38 }
  0x34   : > { %3810 = vmatprep.subr.bf16.mxu0 %v3998_v3 }
  0x37   : > { %3812 = vmatpush1.bf16.msra.mxu0 %v3811_v41 }
  0x38   : > { %3702 = vmatprep.subr.mxu0 %v3999_v42 }
  0x3a   : > { %792 = vmatmul.mubr.f32.vlgmr.msra.gmra.mrb[0].mxu0 %v715_v12 }
  0x3b   : > { %3704 = vmatprep.mubr.msk.f32.mxu0 %vm4000_vm1, %v3999_v42 }
 0x10d   : > { %v793_v45 = vpop.f32.mrb[0].mxu0 }
 0x10e   : > { %v794_v46 = vadd.f32 %v3454_v44, %v793_v45  ;;  %v795_v47 = vpop.f32.mrb[1].mxu0 }
 0x110   : > { %3644 = vmatmul.mubr.msk.f32.vlgmr.msra.gmra.mrb[0].mxu1 %vm798_vm2, %v794_v46 }
 0x111   : > { %3654 = vmatprep.mubr.msk.f32.mxu1 %vm4000_vm1, %v3999_v42  ;;  %3818 = vmatpush3.bf16.msra.mxu1 %v3817_v62 }
 0x112   : > { %3819 = vmatprep.subr.bf16.mxu1 %v3998_v3  ;;  %v3457_v3 = vld [vmem:[%s4766_s11] ss:$0 sm:$0xff] }
 0x115   : > { %3821 = vmatpush3.bf16.msra.mxu1 %v3820_v1 }
 0x116   : > { %3657 = vmatprep.subr.mxu1 %v3999_v42 }
 0x1e3   : > { %v868_v50 = vpop.f32.mrb[0].mxu1 }
 0x1e4   : > { %v869_v51 = vadd.f32 %v868_v50, %v797_v49  ;;  %v3645_v52 = vpop.f32.mrb[1].mxu1  ;;  %v707_v50 = vld [vmem:[%s4771_s16] sm:$0xff] }
 0x1e6   : > { %873 = vst.msk [vmem:[#allocation2] sm:$0xf] %vm872_vm3, %v869_v51  ;;  %v1319_v51 = vrot.slane %v707_v50, 4 }
 0x1ed   : > { %v4249_v53 = vld [vmem:[#allocation2] sm:$0xff] }
 0x1ee   : > { %v878_v54 = vsel %vm877_vm4, %v4249_v53, 0.0 }
 0x1ef   : > { %879 = vadd.xlane.f32.xlu0 %v878_v54 }
 0x27c   : > { %v880_v55 = vpop.xlane.xlu0 %879 }
 0x27d   : > { %v882_v56 = vmul.f32 0.03125, %v880_v55 }
 0x27f   : > { %v883_v57 = vsub.f32 %v4249_v53, %v882_v56 }
 0x281   : > { %v884_v58 = vmul.f32 %v883_v57, %v883_v57 }
 0x283   : > { %v885_v59 = vsel %vm877_vm4, %v884_v58, 0.0 }
 0x284   : > { %886 = vadd.xlane.f32.xlu0 %v885_v59 }
 0x311   : > { %v887_v2 = vpop.xlane.xlu0 %886 }
 0x312   : > { %v888_v4 = vmul.f32 0.03125, %v887_v2 }
 0x314   : > { %v889_v5 = vadd.f32 1e-05, %v888_v4 }
 0x316   : > { %3938 = vrsqrt.f32 %v889_v5 }
 0x320   : > { %v3939_v6 = vpop.eup %3938 }
 0x321   : > { %v891_v7 = vmul.f32 %v3939_v6, %v883_v57 }
 0x323   : > { %v898_v9 = vmul.f32 %v3457_v3, %v891_v7 }
 0x325   : > { %v905_v10 = vadd.f32 %v3458_v8, %v898_v9 }
 0x327   : > { %3655 = vmatmul.mubr.msk.f32.vlgmr.msra.gmra.mrb[2].mxu1 %vm877_vm4, %v905_v10 }
 0x328   : > { %3659 = vmatprep.mubr.msk.f32.mxu1 %vm4000_vm1, %v3999_v42 }
 0x3fa   : > { %v981_v12 = vpop.f32.mrb[2].mxu1 }
 0x3fb   : > { %v4281_v13 = vadd.f32 %v3459_v11, %v981_v12  ;;  %v3656_v14 = vpop.f32.mrb[3].mxu1 }
 0x3fd   : > { %1077 = vrot.lane.b32.xlu0 %v4281_v13, %s4001_s24  ;;  %987 = vrot.lane.b32.xlu1 %v4281_v13, %s4002_s25  ;;  %v4288_v16 = vmul.f32 0.5, %v4281_v13  ;;  %s4011_s24 = smov 52   ;;  %s4012_s25 = smov 80  }
 0x401   : > { %1155 = vrot.lane.b32.xlu0 %v4281_v13, %s4003_s29  ;;  %s4013_s29 = smov 112  }
 0x46f   : > { %v988_v15 = vpop.permute.xlu1 %987  ;;  %v1078_v17 = vpop.permute.xlu0 %1077 }
 0x470   : > { %3658 = vmatpush3.xpose.msk.msra.mxu1 %vm989_vm5, %v988_v15 }
 0x471   : > { %3662 = vmatprep.subr.mxu1 %v3999_v42 }
 0x473   : > { %3660 = vmatmul.mubr.msk.f32.vlgmr.msra.gmra.mrb[4].mxu1 %vm989_vm5, %v4288_v16  ;;  %v1156_v26 = vpop.permute.xlu0 %1155 }
 0x474   : > { %3663 = vmatpush3.msra.mxu1 %v1078_v17  ;;  %3664 = vmatprep.mubr.msk.f32.mxu1 %vm4000_vm1, %v3999_v42 }
 0x475   : > { %3667 = vmatprep.subr.mxu1 %v3999_v42 }
 0x546   : > { %v1061_v18 = vpop.f32.mrb[4].mxu1 }
 0x547   : > { %v3661_v19 = vpop.f32.mrb[5].mxu1  ;;  %v1066_v20 = vsel %vm1065_vm6, %v1061_v18, -inf }
 0x548   : > { %1067 = vmax.xlane.f32.xlu1 %v1066_v20 }
 0x5d5   : > { %v1068_v21 = vpop.xlane.xlu1 %1067 }
 0x5d6   : > { %v1069_v22 = vsub.f32 %v1061_v18, %v1068_v21  ;;  %v708_v18 = vld [vmem:[%s4771_s16 + $0x8] sm:$0xff] }
 0x5d7   : > { %v1878_v19 = vrot.slane %v708_v18, 4 }
 0x5d8   : > { %v1070_v23 = vmul.f32 1.442695, %v1069_v22 }
 0x5da   : > { %3940 = vpow2.f32 %v1070_v23 }
 0x5e4   : > { %v3941_v24 = vpop.eup %3940 }
 0x5e5   : > { %v1072_v25 = vsel %vm1065_vm6, %v3941_v24, 0.0 }
 0x5e6   : > { %1073 = vadd.xlane.f32.xlu0 %v1072_v25 }
 0x5fc   : > { %1153 = vrot.lane.b32.xlu0 %v4288_v16, %s4004_s30  ;;  %s4014_s30 = smov 48  }
 0x673   : > { %v1074_v27 = vpop.xlane.xlu0 %1073 }
 0x674   : > { %3942 = vrcp.f32 %v1074_v27 }
 0x677   : > { %v1154_v30 = vpop.permute.xlu0 %1153 }
 0x67e   : > { %v3943_v28 = vpop.eup %3942 }
 0x67f   : > { %v1076_v29 = vmul.f32 %v3943_v28, %v3941_v24 }
 0x681   : > { %3665 = vmatmul.mubr.msk.f32.vlgmr.msra.gmra.mrb[6].mxu1 %vm1065_vm6, %v1076_v29 }
 0x682   : > { %3668 = vmatpush3.xpose.msk.msra.mxu1 %vm989_vm5, %v1156_v26  ;;  %3669 = vmatprep.mubr.msk.f32.mxu1 %vm4000_vm1, %v3999_v42 }
 0x683   : > { %3672 = vmatprep.subr.mxu1 %v3999_v42 }
 0x685   : > { %3670 = vmatmul.mubr.msk.f32.vlgmr.msra.gmra.mrb[8].mxu1 %vm989_vm5, %v1154_v30 }
 0x686   : > { %3674 = vmatprep.mubr.msk.f32.mxu1 %vm4000_vm1, %v3999_v42 }
 0x754   : > { %v1149_v31 = vpop.f32.mrb[6].mxu1 }
 0x755   : > { %v3666_v32 = vpop.f32.mrb[7].mxu1 }
 0x758   : > { %v1227_v33 = vpop.f32.mrb[8].mxu1 }
 0x759   : > { %v3671_v34 = vpop.f32.mrb[9].mxu1  ;;  %v1231_v35 = vsel %vm1065_vm6, %v1227_v33, -inf }
 0x75a   : > { %1232 = vmax.xlane.f32.xlu1 %v1231_v35 }
 0x76b   : > { %1242 = vrot.lane.b32.xlu1 %v4281_v13, %s4005_s0  ;;  %s4015_s0 = smov 76  }
 0x76f   : > { %1473 = vrot.lane.b32.xlu1 %v4281_v13, %s4006_s19 }
 0x773   : > { %1471 = vrot.lane.b32.xlu1 %v4288_v16, %s4007_s1  ;;  %s4023_s1 = smov 36  }
 0x777   : > { %1715 = vrot.lane.b32.xlu1 %v4281_v13, %s4008_s20  ;;  %s4016_s20 = smov 108  }
 0x7e7   : > { %v1233_v36 = vpop.xlane.xlu1 %1232 }
 0x7e8   : > { %v1234_v37 = vsub.f32 %v1227_v33, %v1233_v36 }
 0x7ea   : > { %v1235_v38 = vmul.f32 1.442695, %v1234_v37 }
 0x7eb   : > { %v1243_v39 = vpop.permute.xlu1 %1242 }
 0x7ec   : > { %3944 = vpow2.f32 %v1235_v38  ;;  %3673 = vmatpush3.msra.mxu1 %v1243_v39 }
 0x7ed   : > { %3677 = vmatprep.subr.mxu1 %v3999_v42 }
 0x7ef   : > { %v1474_v40 = vpop.permute.xlu1 %1473 }
 0x7f3   : > { %v1472_v41 = vpop.permute.xlu1 %1471 }
 0x7f6   : > { %v3945_v43 = vpop.eup %3944 }
 0x7f7   : > { %v1716_v44 = vpop.permute.xlu1 %1715  ;;  %v1237_v45 = vsel %vm1065_vm6, %v3945_v43, 0.0 }
 0x7f8   : > { %1238 = vadd.xlane.f32.xlu0 %v1237_v45  ;;  %3703 = vmatpush3.xpose.msk.msra.mxu0 %vm989_vm5, %v1716_v44 }
 0x7f9   : > { %3712 = vmatprep.subr.mxu0 %v3999_v42 }
 0x80e   : > { %1713 = vrot.lane.b32.xlu0 %v4288_v16, %s4009_s21 }
 0x885   : > { %v1239_v46 = vpop.xlane.xlu0 %1238 }
 0x886   : > { %3946 = vrcp.f32 %v1239_v46 }
 0x889   : > { %v1714_v47 = vpop.permute.xlu0 %1713 }
 0x88a   : > { %3705 = vmatmul.mubr.msk.f32.vlgmr.msra.gmra.mrb[2].mxu0 %vm989_vm5, %v1714_v47 }
 0x88b   : > { %3714 = vmatprep.mubr.msk.f32.mxu0 %vm4000_vm1, %v3999_v42  ;;  %3713 = vmatpush3.msk.msra.mxu0 %vm1323_vm7, %v1878_v19 }
 0x88c   : > { %3722 = vmatprep.subr.mxu0 %v3999_v42 }
 0x890   : > { %v3947_v48 = vpop.eup %3946 }
 0x891   : > { %v1241_v49 = vmul.f32 %v3947_v48, %v3945_v43 }
 0x893   : > { %3675 = vmatmul.mubr.msk.f32.vlgmr.msra.gmra.mrb[10].mxu1 %vm1065_vm6, %v1241_v49 }
 0x894   : > { %3679 = vmatprep.mubr.msk.f32.mxu1 %vm4000_vm1, %v3999_v42  ;;  %3678 = vmatpush3.msk.msra.mxu1 %vm1323_vm7, %v1319_v51  ;;  %v709_v51 = vld [vmem:[%s4771_s16 + $0x10] sm:$0xff] }
 0x895   : > { %3682 = vmatprep.subr.mxu1 %v3999_v42 }
 0x95d   : > { %v1787_v52 = vpop.f32.mrb[2].mxu0 }
 0x95e   : > { %v3706_v54 = vpop.f32.mrb[3].mxu0  ;;  %v1791_v7 = vsel %vm1065_vm6, %v1787_v52, -inf }
 0x966   : > { %v1314_v55 = vpop.f32.mrb[10].mxu1 }
 0x967   : > { %v3676_v56 = vpop.f32.mrb[11].mxu1  ;;  %3680 = vmatmul.mubr.msk.f32.vlgmr.msra.gmra.mrb[12].mxu1 %vm989_vm5, %v1314_v55 }
 0x968   : > { %3683 = vmatpush3.msk.msra.mxu1 %vm1323_vm7, %v707_v50  ;;  %3684 = vmatprep.mubr.msk.f32.mxu1 %vm4000_vm1, %v3999_v42 }
 0x969   : > { %3687 = vmatprep.subr.mxu1 %v3999_v42 }
 0x96b   : > { %3685 = vmatmul.mubr.msk.f32.vlgmr.msra.gmra.mrb[14].mxu1 %vm989_vm5, %v1149_v31 }
 0x96c   : > { %3689 = vmatprep.mubr.msk.f32.mxu1 %vm4000_vm1, %v3999_v42 }
 0x96f   : > { %3688 = vmatpush3.xpose.msk.msra.mxu1 %vm989_vm5, %v1474_v40 }
 0x970   : > { %3692 = vmatprep.subr.mxu1 %v3999_v42 }
 0x972   : > { %3690 = vmatmul.mubr.msk.f32.vlgmr.msra.gmra.mrb[16].mxu1 %vm989_vm5, %v1472_v41 }
 0x973   : > { %3694 = vmatprep.mubr.msk.f32.mxu1 %vm4000_vm1, %v3999_v42 }
 0xa3a   : > { %v1392_v57 = vpop.f32.mrb[12].mxu1 }
 0xa3b   : > { %v3681_v58 = vpop.f32.mrb[13].mxu1 }
 0xa3e   : > { %v1467_v59 = vpop.f32.mrb[14].mxu1 }
 0xa3f   : > { %v4341_v60 = vadd.f32 %v1467_v59, %v1392_v57  ;;  %v3686_v61 = vpop.f32.mrb[15].mxu1 }
 0xa45   : > { %v1545_v62 = vpop.f32.mrb[16].mxu1 }
 0xa46   : > { %v3691_v63 = vpop.f32.mrb[17].mxu1  ;;  %v1549_v0 = vsel %vm1065_vm6, %v1545_v62, -inf }
 0xa47   : > { %1550 = vmax.xlane.f32.xlu1 %v1549_v0 }
 0xa58   : > { %1560 = vrot.lane.b32.xlu1 %v4281_v13, %s4010_s23  ;;  %s4018_s23 = smov 72  }
 0xad4   : > { %v1551_v1 = vpop.xlane.xlu1 %1550 }
 0xad5   : > { %v1552_v2 = vsub.f32 %v1545_v62, %v1551_v1 }
 0xad7   : > { %v1553_v4 = vmul.f32 1.442695, %v1552_v2 }
 0xad8   : > { %v1561_v5 = vpop.permute.xlu1 %1560 }
 0xad9   : > { %3948 = vpow2.f32 %v1553_v4  ;;  %3693 = vmatpush3.msra.mxu1 %v1561_v5 }
 0xada   : > { %3697 = vmatprep.subr.mxu1 %v3999_v42 }
 0xae3   : > { %v3949_v6 = vpop.eup %3948 }
 0xae4   : > { %v1555_v3 = vsel %vm1065_vm6, %v3949_v6, 0.0 }
 0xae5   : > { %1556 = vadd.xlane.f32.xlu0 %v1555_v3 }
 0xae9   : > { %1792 = vmax.xlane.f32.xlu0 %v1791_v7 }
 0xaff   : > { %1802 = vrot.lane.b32.xlu0 %v4281_v13, %s4011_s24  ;;  %s4019_s24 = smov 104  }
 0xb03   : > { %1957 = vrot.lane.b32.xlu0 %v4281_v13, %s4012_s25  ;;  %s4020_s25 = smov 40  }
 0xb07   : > { %1955 = vrot.lane.b32.xlu0 %v4288_v16, %s4013_s29  ;;  %s4021_s29 = smov 68  }
 0xb72   : > { %v1557_v8 = vpop.xlane.xlu0 %1556 }
 0xb73   : > { %3950 = vrcp.f32 %v1557_v8 }
 0xb76   : > { %v1793_v9 = vpop.xlane.xlu0 %1792 }
 0xb77   : > { %v1794_v10 = vsub.f32 %v1787_v52, %v1793_v9  ;;  %v2362_v52 = vrot.slane %v709_v51, 4 }
 0xb79   : > { %v1795_v11 = vmul.f32 1.442695, %v1794_v10 }
 0xb7a   : > { %v1803_v21 = vpop.permute.xlu0 %1802 }
 0xb7b   : > { %3952 = vpow2.f32 %v1795_v11 }
 0xb7d   : > { %v3951_v12 = vpop.eup %3950 }
 0xb7e   : > { %v1559_v14 = vmul.f32 %v3951_v12, %v3949_v6  ;;  %v1958_v26 = vpop.permute.xlu0 %1957 }
 0xb80   : > { %3695 = vmatmul.mubr.msk.f32.vlgmr.msra.gmra.mrb[18].mxu1 %vm1065_vm6, %v1559_v14 }
 0xb81   : > { %3699 = vmatprep.mubr.msk.f32.mxu1 %vm4000_vm1, %v3999_v42  ;;  %3698 = vmatpush3.msk.msra.mxu1 %vm1323_vm7, %v708_v18 }
 0xb82   : > { %3707 = vmatprep.subr.mxu1 %v3999_v42  ;;  %v1956_v27 = vpop.permute.xlu0 %1955 }
 0xb85   : > { %v3953_v15 = vpop.eup %3952 }
 0xb86   : > { %v1797_v17 = vsel %vm1065_vm6, %v3953_v15, 0.0 }
 0xb87   : > { %1798 = vadd.xlane.f32.xlu1 %v1797_v17 }
 0xb98   : > { %2044 = vrot.lane.b32.xlu1 %v4281_v13, %s4014_s30  ;;  %s4022_s30 = smov 100  }
 0xb9c   : > { %2199 = vrot.lane.b32.xlu1 %v4281_v13, %s4015_s0 }
 0xc14   : > { %v1799_v20 = vpop.xlane.xlu1 %1798 }
 0xc15   : > { %3954 = vrcp.f32 %v1799_v20 }
 0xc18   : > { %v2045_v32 = vpop.permute.xlu1 %2044 }
 0xc1c   : > { %v2200_v46 = vpop.permute.xlu1 %2199 }
 0xc1f   : > { %v3955_v22 = vpop.eup %3954 }
 0xc20   : > { %v1801_v25 = vmul.f32 %v3955_v22, %v3953_v15 }
 0xc53   : > { %v1632_v23 = vpop.f32.mrb[18].mxu1 }
 0xc54   : > { %v3696_v24 = vpop.f32.mrb[19].mxu1  ;;  %3700 = vmatmul.mubr.msk.f32.vlgmr.msra.gmra.mrb[20].mxu1 %vm989_vm5, %v1632_v23 }
 0xc55   : > { %3708 = vmatpush3.msra.mxu1 %v1803_v21  ;;  %3709 = vmatprep.mubr.msk.f32.mxu1 %vm4000_vm1, %v3999_v42 }
 0xc56   : > { %3717 = vmatprep.subr.mxu1 %v3999_v42 }
 0xc58   : > { %3710 = vmatmul.mubr.msk.f32.vlgmr.msra.gmra.mrb[22].mxu1 %vm1065_vm6, %v1801_v25 }
 0xc59   : > { %3719 = vmatprep.mubr.msk.f32.mxu1 %vm4000_vm1, %v3999_v42 }
 0xc5c   : > { %3718 = vmatpush3.xpose.msk.msra.mxu1 %vm989_vm5, %v1958_v26 }
 0xc5d   : > { %3727 = vmatprep.subr.mxu1 %v3999_v42 }
 0xc5f   : > { %3720 = vmatmul.mubr.msk.f32.vlgmr.msra.gmra.mrb[24].mxu1 %vm989_vm5, %v1956_v27 }
 0xc60   : > { %3729 = vmatprep.mubr.msk.f32.mxu1 %vm4000_vm1, %v3999_v42  ;;  %3728 = vmatpush3.msk.msra.mxu1 %vm1323_vm7, %v709_v51 }
 0xc61   : > { %3737 = vmatprep.subr.mxu1 %v3999_v42 }
 0xd27   : > { %v1708_v28 = vpop.f32.mrb[20].mxu1 }
 0xd28   : > { %v1712_v29 = vadd.f32 %v1708_v28, %v4341_v60  ;;  %v3701_v30 = vpop.f32.mrb[21].mxu1 }
 0xd2b   : > { %v1874_v31 = vpop.f32.mrb[22].mxu1 }
 0xd2c   : > { %v3711_v33 = vpop.f32.mrb[23].mxu1  ;;  %3715 = vmatmul.mubr.msk.f32.vlgmr.msra.gmra.mrb[4].mxu0 %vm989_vm5, %v1874_v31 }
 0xd2d   : > { %3723 = vmatpush3.msra.mxu0 %v2045_v32  ;;  %3724 = vmatprep.mubr.msk.f32.mxu0 %vm4000_vm1, %v3999_v42 }
 0xd2e   : > { %3732 = vmatprep.subr.mxu0 %v3999_v42 }
 0xd32   : > { %v2029_v34 = vpop.f32.mrb[24].mxu1 }
 0xd33   : > { %v3721_v35 = vpop.f32.mrb[25].mxu1  ;;  %v2033_v36 = vsel %vm1065_vm6, %v2029_v34, -inf }
 0xd34   : > { %2034 = vmax.xlane.f32.xlu0 %v2033_v36 }
 0xdc1   : > { %v2035_v37 = vpop.xlane.xlu0 %2034 }
 0xdc2   : > { %v2036_v38 = vsub.f32 %v2029_v34, %v2035_v37 }
 0xdc4   : > { %v2037_v39 = vmul.f32 1.442695, %v2036_v38 }
 0xdc6   : > { %3956 = vpow2.f32 %v2037_v39 }
 0xdd0   : > { %v3957_v40 = vpop.eup %3956 }
 0xdd1   : > { %v2039_v41 = vsel %vm1065_vm6, %v3957_v40, 0.0 }
 0xdd2   : > { %2040 = vadd.xlane.f32.xlu1 %v2039_v41 }
 0xde3   : > { %2197 = vrot.lane.b32.xlu1 %v4288_v16, %s4016_s20 }
 0xdff   : > { %v1950_v43 = vpop.f32.mrb[4].mxu0 }
 0xe00   : > { %v1954_v44 = vadd.f32 %v1950_v43, %v1712_v29  ;;  %v3716_v45 = vpop.f32.mrb[5].mxu0 }
 0xe5f   : > { %v2041_v47 = vpop.xlane.xlu1 %2040 }
 0xe60   : > { %3958 = vrcp.f32 %v2041_v47 }
 0xe63   : > { %v2198_v50 = vpop.permute.xlu1 %2197 }
 0xe6a   : > { %v3959_v48 = vpop.eup %3958 }
 0xe6b   : > { %v2043_v49 = vmul.f32 %v3959_v48, %v3957_v40 }
 0xe6d   : > { %3725 = vmatmul.mubr.msk.f32.vlgmr.msra.gmra.mrb[6].mxu0 %vm1065_vm6, %v2043_v49 }
 0xe6e   : > { %3733 = vmatpush3.xpose.msk.msra.mxu0 %vm989_vm5, %v2200_v46  ;;  %3734 = vmatprep.mubr.msk.f32.mxu0 %vm4000_vm1, %v3999_v42 }
 0xe6f   : > { %3742 = vmatprep.subr.mxu0 %v3999_v42 }
 0xe71   : > { %3735 = vmatmul.mubr.msk.f32.vlgmr.msra.gmra.mrb[8].mxu0 %vm989_vm5, %v2198_v50  ;;  %v3501_v50 = vld [vmem:[%s4763_s8] ss:$0 sm:$0xff] }
 0xe72   : > { %3744 = vmatprep.mubr.msk.f32.mxu0 %vm4000_vm1, %v3999_v42  ;;  %3743 = vmatpush3.msk.msra.mxu0 %vm1323_vm7, %v2362_v52 }
 0xe73   : > { %3752 = vmatprep.subr.mxu0 %v3999_v42 }
 0xf40   : > { %v2116_v54 = vpop.f32.mrb[6].mxu0 }
 0xf41   : > { %v3726_v55 = vpop.f32.mrb[7].mxu0  ;;  %3730 = vmatmul.mubr.msk.f32.vlgmr.msra.gmra.mrb[26].mxu1 %vm989_vm5, %v2116_v54 }
 0xf42   : > { %3739 = vmatprep.mubr.msk.f32.mxu1 %vm4000_vm1, %v3999_v42 }
 0xf44   : > { %v2271_v56 = vpop.f32.mrb[8].mxu0 }
 0xf45   : > { %v3736_v57 = vpop.f32.mrb[9].mxu0  ;;  %v2275_v58 = vsel %vm1065_vm6, %v2271_v56, -inf }
 0xf46   : > { %2276 = vmax.xlane.f32.xlu0 %v2275_v58 }
 0xf5c   : > { %2286 = vrot.lane.b32.xlu0 %v4281_v13, %s4017_s2 }
 0xf60   : > { %2441 = vrot.lane.b32.xlu0 %v4281_v13, %s4018_s23  ;;  %s590_s23 = scalar_lea.vmem %s4773_s18, %s3509_s26 }
 0xf64   : > { %2439 = vrot.lane.b32.xlu0 %v4288_v16, %s4019_s24 }
 0xfd3   : > { %v2277_v59 = vpop.xlane.xlu0 %2276 }
 0xfd4   : > { %v2278_v60 = vsub.f32 %v2271_v56, %v2277_v59 }
 0xfd6   : > { %v2279_v61 = vmul.f32 1.442695, %v2278_v60 }
 0xfd7   : > { %v2287_v62 = vpop.permute.xlu0 %2286 }
 0xfd8   : > { %3960 = vpow2.f32 %v2279_v61  ;;  %3738 = vmatpush3.msra.mxu1 %v2287_v62  ;;  %v628_v62 = vld [vmem:[%s4769_s14 + $0x8] sm:$0xff] }
 0xfd9   : > { %3747 = vmatprep.subr.mxu1 %v3999_v42 }
 0xfdb   : > { %v2442_v3 = vpop.permute.xlu0 %2441 }
 0xfdf   : > { %v2440_v8 = vpop.permute.xlu0 %2439 }
 0xfe2   : > { %v3961_v63 = vpop.eup %3960 }
 0xfe3   : > { %v2281_v0 = vsel %vm1065_vm6, %v3961_v63, 0.0 }
 0xfe4   : > { %2282 = vadd.xlane.f32.xlu1 %v2281_v0 }
 0xff5   : > { %2528 = vrot.lane.b32.xlu1 %v4281_v13, %s4020_s25 }
 0xff9   : > { %2683 = vrot.lane.b32.xlu1 %v4281_v13, %s4021_s29 }
0x1014   : > { %v2192_v1 = vpop.f32.mrb[26].mxu1 }
0x1015   : > { %v2196_v2 = vadd.f32 %v2192_v1, %v1954_v44  ;;  %v3731_v4 = vpop.f32.mrb[27].mxu1  ;;  %v634_v1 = vld [vmem:[%s4769_s14 + $0x38] sm:$0xff] }
0x1016   : > { %v631_v4 = vld [vmem:[%s4769_s14 + $0x20] sm:$0xff] }
0x1071   : > { %v2283_v5 = vpop.xlane.xlu1 %2282 }
0x1072   : > { %3962 = vrcp.f32 %v2283_v5 }
0x1075   : > { %v2529_v10 = vpop.permute.xlu1 %2528 }
0x1079   : > { %v2684_v25 = vpop.permute.xlu1 %2683 }
0x107c   : > { %v3963_v6 = vpop.eup %3962 }
0x107d   : > { %v2285_v7 = vmul.f32 %v3963_v6, %v3961_v63  ;;  %v630_v63 = vld [vmem:[%s4769_s14 + $0x18] sm:$0xff] }
0x107e   : > { %v3830_v5 = vpack.c.bf16 %v634_v1, %v630_v63  ;;  %v680_v1 = vld [vmem:[%s4770_s15 + $0x128] sm:$0xff] }
0x107f   : > { %3740 = vmatmul.mubr.msk.f32.vlgmr.msra.gmra.mrb[28].mxu1 %vm1065_vm6, %v2285_v7  ;;  %v633_v7 = vld [vmem:[%s4769_s14 + $0x30] sm:$0xff] }
0x1080   : > { %3748 = vmatpush3.xpose.msk.msra.mxu1 %vm989_vm5, %v2442_v3  ;;  %3749 = vmatprep.mubr.msk.f32.mxu1 %vm4000_vm1, %v3999_v42  ;;  %v629_v3 = vld [vmem:[%s4769_s14 + $0x10] sm:$0xff] }
0x1081   : > { %3757 = vmatprep.subr.mxu1 %v3999_v42 }
0x1083   : > { %3750 = vmatmul.mubr.msk.f32.vlgmr.msra.gmra.mrb[30].mxu1 %vm989_vm5, %v2440_v8  ;;  %v3832_v8 = vpack.c.bf16 %v633_v7, %v629_v3  ;;  %v698_v7 = vld [vmem:[%s4770_s15 + $0x1b8] sm:$0xff] }
0x1084   : > { %3759 = vmatprep.mubr.msk.f32.mxu1 %vm4000_vm1, %v3999_v42 }
0x1152   : > { %v2358_v9 = vpop.f32.mrb[28].mxu1 }
0x1153   : > { %v3741_v11 = vpop.f32.mrb[29].mxu1  ;;  %3745 = vmatmul.mubr.msk.f32.vlgmr.msra.gmra.mrb[10].mxu0 %vm989_vm5, %v2358_v9  ;;  %v636_v9 = vld [vmem:[%s4769_s14 + $0x48] sm:$0xff] }
0x1154   : > { %3753 = vmatpush3.msra.mxu0 %v2529_v10  ;;  %3754 = vmatprep.mubr.msk.f32.mxu0 %vm4000_vm1, %v3999_v42  ;;  %v640_v10 = vld [vmem:[%s4769_s14 + $0x68] sm:$0xff]  ;;  %v638_v11 = vld [vmem:[%s4769_s14 + $0x58] sm:$0xff] }
0x1155   : > { %3762 = vmatprep.subr.mxu0 %v3999_v42 }
0x1156   : > { %v2513_v12 = vpop.f32.mrb[30].mxu1 }
0x1157   : > { %v3751_v14 = vpop.f32.mrb[31].mxu1  ;;  %v2517_v15 = vsel %vm1065_vm6, %v2513_v12, -inf }
0x1158   : > { %2518 = vmax.xlane.f32.xlu0 %v2517_v15  ;;  %v642_v14 = vld [vmem:[%s4769_s14 + $0x78] sm:$0xff]  ;;  %v635_v15 = vld [vmem:[%s4769_s14 + $0x40] sm:$0xff] }
0x11e5   : > { %v2519_v17 = vpop.xlane.xlu0 %2518 }
0x11e6   : > { %v2520_v18 = vsub.f32 %v2513_v12, %v2519_v17  ;;  %v3826_v12 = vpack.c.bf16 %v640_v10, %v636_v9  ;;  %v639_v17 = vld [vmem:[%s4769_s14 + $0x60] sm:$0xff]  ;;  %v650_v9 = vld [vmem:[%s4770_s15 + $0x38] sm:$0xff] }
0x11e8   : > { %v2521_v19 = vmul.f32 1.442695, %v2520_v18  ;;  %v3834_v18 = vpack.c.bf16 %v642_v14, %v638_v11  ;;  %v682_v14 = vld [vmem:[%s4770_s15 + $0x138] sm:$0xff] }
0x11ea   : > { %3964 = vpow2.f32 %v2521_v19  ;;  %v3828_v19 = vpack.c.bf16 %v639_v17, %v635_v15  ;;  %v667_v17 = vld [vmem:[%s4770_s15 + $0xc0] sm:$0xff] }
0x11f4   : > { %v3965_v20 = vpop.eup %3964 }
0x11f5   : > { %v2523_v21 = vsel %vm1065_vm6, %v3965_v20, 0.0 }
0x11f6   : > { %2524 = vadd.xlane.f32.xlu1 %v2523_v21  ;;  %v641_v21 = vld [vmem:[%s4769_s14 + $0x70] sm:$0xff] }
0x1207   : > { %2681 = vrot.lane.b32.xlu1 %v4288_v16, %s4022_s30  ;;  %v710_v16 = vld [vmem:[%s4771_s16 + $0x18] sm:$0xff] }
0x1208   : > { %3758 = vmatpush3.msk.msra.mxu1 %vm1323_vm7, %v710_v16  ;;  %v2846_v30 = vrot.slane %v710_v16, 4 }
0x1209   : > { %3767 = vmatprep.subr.mxu1 %v3999_v42 }
0x1226   : > { %v2434_v22 = vpop.f32.mrb[10].mxu0 }
0x1227   : > { %v2438_v23 = vadd.f32 %v2434_v22, %v2196_v2  ;;  %v3746_v24 = vpop.f32.mrb[11].mxu0  ;;  %v627_v2 = vld [vmem:[%s4769_s14] sm:$0xff] }
0x1228   : > { %v3824_v6 = vpack.c.bf16 %v631_v4, %v627_v2  ;;  %v665_v4 = vld [vmem:[%s4770_s15 + $0xb0] sm:$0xff] }
0x1283   : > { %v2525_v26 = vpop.xlane.xlu1 %2524 }
0x1284   : > { %3966 = vrcp.f32 %v2525_v26 }
0x1287   : > { %v2682_v29 = vpop.permute.xlu1 %2681 }
0x128e   : > { %v3967_v27 = vpop.eup %3966 }
0x128f   : > { %v2527_v28 = vmul.f32 %v3967_v27, %v3965_v20  ;;  %v637_v20 = vld [vmem:[%s4769_s14 + $0x50] sm:$0xff]  ;;  %v3502_v27 = vld [vmem:[%s4768_s13] ss:$0 sm:$0xff] }
0x1290   : > { %v3836_v22 = vpack.c.bf16 %v641_v21, %v637_v20  ;;  %v700_v21 = vld [vmem:[%s4770_s15 + $0x1c8] sm:$0xff] }
0x1291   : > { %3755 = vmatmul.mubr.msk.f32.vlgmr.msra.gmra.mrb[12].mxu0 %vm1065_vm6, %v2527_v28 }
0x1292   : > { %3763 = vmatpush3.xpose.msk.msra.mxu0 %vm989_vm5, %v2684_v25  ;;  %3764 = vmatprep.mubr.msk.f32.mxu0 %vm4000_vm1, %v3999_v42 }
0x1293   : > { %3772 = vmatprep.subr.mxu0 %v3999_v42 }
0x1295   : > { %3765 = vmatmul.mubr.msk.f32.vlgmr.msra.gmra.mrb[14].mxu0 %vm989_vm5, %v2682_v29  ;;  %v3503_v29 = vld [vmem:[%s4767_s12] ss:$0 sm:$0xff] }
0x1296   : > { %3774 = vmatprep.mubr.msk.f32.mxu0 %vm4000_vm1, %v3999_v42  ;;  %3773 = vmatpush3.msk.msra.mxu0 %vm1323_vm7, %v2846_v30 }
0x1297   : > { %3831 = vmatprep.subr.bf16.mxu0 %v3830_v5  ;;  %v666_v5 = vld [vmem:[%s4770_s15 + $0xb8] sm:$0xff] }
0x1298   : > { %v3850_v3 = vpack.c.bf16 %v666_v5, %v665_v4  ;;  %v619_v5 = vld [vmem:[%s4761_s6] sm:$0xf] }
0x1364   : > { %v2600_v31 = vpop.f32.mrb[12].mxu0 }
0x1365   : > { %v3756_v32 = vpop.f32.mrb[13].mxu0  ;;  %3760 = vmatmul.mubr.msk.f32.vlgmr.msra.gmra.mrb[32].mxu1 %vm989_vm5, %v2600_v31  ;;  %v659_v31 = vld [vmem:[%s4770_s15 + $0x80] sm:$0xff] }
0x1366   : > { %3769 = vmatprep.mubr.msk.f32.mxu1 %vm4000_vm1, %v3999_v42  ;;  %v660_v32 = vld [vmem:[%s4770_s15 + $0x88] sm:$0xff] }
0x1368   : > { %v2755_v33 = vpop.f32.mrb[14].mxu0 }
0x1369   : > { %v3766_v34 = vpop.f32.mrb[15].mxu0  ;;  %v2759_v35 = vsel %vm1065_vm6, %v2755_v33, -inf }
0x136a   : > { %2760 = vmax.xlane.f32.xlu0 %v2759_v35  ;;  %v3838_v34 = vpack.c.bf16 %v660_v32, %v659_v31  ;;  %v692_v35 = vld [vmem:[%s4770_s15 + $0x188] sm:$0xff]  ;;  %v702_v32 = vld [vmem:[%s4770_s15 + $0x1d8] sm:$0xff] }
0x1380   : > { %2770 = vrot.lane.b32.xlu0 %v4281_v13, %s4023_s1 }
0x13f7   : > { %v2761_v36 = vpop.xlane.xlu0 %2760 }
0x13f8   : > { %v2762_v37 = vsub.f32 %v2755_v33, %v2761_v36  ;;  %v691_v33 = vld [vmem:[%s4770_s15 + $0x180] sm:$0xff] }
0x13f9   : > { %v643_v36 = vld [vmem:[%s4770_s15] sm:$0xff] }
0x13fa   : > { %v2763_v38 = vmul.f32 1.442695, %v2762_v37  ;;  %v644_v37 = vld [vmem:[%s4770_s15 + $0x8] sm:$0xff] }
0x13fb   : > { %v2771_v39 = vpop.permute.xlu0 %2770 }
0x13fc   : > { %3968 = vpow2.f32 %v2763_v38  ;;  %3768 = vmatpush3.msra.mxu1 %v2771_v39  ;;  %v3870_v38 = vpack.c.bf16 %v692_v35, %v691_v33  ;;  %v3840_v39 = vpack.c.bf16 %v644_v37, %v643_v36  ;;  %v653_v33 = vld [vmem:[%s4770_s15 + $0x50] sm:$0xff] }
0x13fd   : > { %v685_v37 = vld [vmem:[%s4770_s15 + $0x150] sm:$0xff] }
0x1406   : > { %v3969_v40 = vpop.eup %3968 }
0x1407   : > { %v2765_v41 = vsel %vm1065_vm6, %v3969_v40, 0.0 }
0x1408   : > { %2766 = vadd.xlane.f32.xlu1 %v2765_v41  ;;  %v676_v41 = vld [vmem:[%s4770_s15 + $0x108] sm:$0xff] }
0x1438   : > { %v2676_v43 = vpop.f32.mrb[32].mxu1 }
0x1439   : > { %v2680_v44 = vadd.f32 %v2676_v43, %v2438_v23  ;;  %v3761_v45 = vpop.f32.mrb[33].mxu1 }
0x143a   : > { %v662_v45 = vld [vmem:[%s4770_s15 + $0x98] sm:$0xff] }
0x1495   : > { %v2767_v46 = vpop.xlane.xlu1 %2766 }
0x1496   : > { %3970 = vrcp.f32 %v2767_v46  ;;  %v693_v46 = vld [vmem:[%s4770_s15 + $0x190] sm:$0xff] }
0x14a0   : > { %v3971_v47 = vpop.eup %3970 }
0x14a1   : > { %v2769_v48 = vmul.f32 %v3971_v47, %v3969_v40  ;;  %v675_v40 = vld [vmem:[%s4770_s15 + $0x100] sm:$0xff] }
0x14a2   : > { %v3872_v43 = vpack.c.bf16 %v676_v41, %v675_v40  ;;  %v671_v40 = vld [vmem:[%s4770_s15 + $0xe0] sm:$0xff]  ;;  %v672_v41 = vld [vmem:[%s4770_s15 + $0xe8] sm:$0xff] }
0x14a3   : > { %3770 = vmatmul.mubr.msk.f32.vlgmr.msra.gmra.mrb[34].mxu1 %vm1065_vm6, %v2769_v48  ;;  %v694_v48 = vld [vmem:[%s4770_s15 + $0x198] sm:$0xff] }
0x14a4   : > { %3046 = vmatprep.mubr.f32.mxu1 %v3999_v42 }
0x1576   : > { %v2842_v13 = vpop.f32.mrb[34].mxu1 }
0x1577   : > { %v3771_v49 = vpop.f32.mrb[35].mxu1  ;;  %3775 = vmatmul.mubr.msk.f32.vlgmr.msra.gmra.mrb[16].mxu0 %vm989_vm5, %v2842_v13  ;;  %v645_v13 = vld [vmem:[%s4770_s15 + $0x10] sm:$0xff] }
0x1578   : > { %3117 = vmatprep.mubr.f32.mxu0 %v3999_v42  ;;  %3833 = vmatpush1.bf16.msra.mxu0 %v3832_v8  ;;  %v646_v49 = vld [vmem:[%s4770_s15 + $0x18] sm:$0xff]  ;;  %v649_v8 = vld [vmem:[%s4770_s15 + $0x30] sm:$0xff] }
0x1579   : > { %3835 = vmatprep.subr.bf16.mxu0 %v3834_v18  ;;  %v3852_v11 = vpack.c.bf16 %v650_v9, %v649_v8  ;;  %v668_v18 = vld [vmem:[%s4770_s15 + $0xc8] sm:$0xff] }
0x157a   : > { %v3854_v20 = vpack.c.bf16 %v668_v18, %v667_v17 }
0x157c   : > { %3837 = vmatpush1.bf16.msra.mxu0 %v3836_v22  ;;  %v651_v22 = vld [vmem:[%s4770_s15 + $0x40] sm:$0xff] }
0x157d   : > { %3871 = vmatprep.subr.bf16.mxu0 %v3870_v38  ;;  %v686_v38 = vld [vmem:[%s4770_s15 + $0x158] sm:$0xff] }
0x164a   : > { %v2918_v51 = vpop.f32.mrb[16].mxu0 }
0x164b   : > { %v2922_v52 = vadd.f32 %v2918_v51, %v2680_v44  ;;  %v3776_v54 = vpop.f32.mrb[17].mxu0  ;;  %v661_v44 = vld [vmem:[%s4770_s15 + $0x90] sm:$0xff]  ;;  %v3844_v51 = vpack.c.bf16 %v646_v49, %v645_v13  ;;  %v687_v49 = vld [vmem:[%s4770_s15 + $0x160] sm:$0xff] }
0x164c   : > { %v3842_v47 = vpack.c.bf16 %v662_v45, %v661_v44  ;;  %v678_v54 = vld [vmem:[%s4770_s15 + $0x118] sm:$0xff]  ;;  %v3862_v44 = vpack.c.bf16 %v672_v41, %v671_v40  ;;  %v704_v45 = vld [vmem:[%s4770_s15 + $0x1e8] sm:$0xff] }
0x164d   : > { %v2929_v55 = vadd.f32 %v3501_v50, %v2922_v52  ;;  %v3874_v50 = vpack.c.bf16 %v694_v48, %v693_v46  ;;  %v677_v52 = vld [vmem:[%s4770_s15 + $0x110] sm:$0xff]  ;;  %v655_v46 = vld [vmem:[%s4770_s15 + $0x60] sm:$0xff] }
0x164f   : > { %v4453_v56 = vadd.f32 %v2929_v55, %v4249_v53  ;;  %v632_v53 = vld [vmem:[%s4769_s14 + $0x28] sm:$0xff]  ;;  %v3876_v55 = vpack.c.bf16 %v678_v54, %v677_v52  ;;  %v673_v52 = vld [vmem:[%s4770_s15 + $0xf0] sm:$0xff]  ;;  %v674_v54 = vld [vmem:[%s4770_s15 + $0xf8] sm:$0xff] }
0x1650   : > { %v3822_v0 = vpack.c.bf16 %v632_v53, %v628_v62  ;;  %v648_v62 = vld [vmem:[%s4770_s15 + $0x28] sm:$0xff] }
0x1651   : > { %v2931_v57 = vsel %vm877_vm4, %v4453_v56, 0.0 }
0x1652   : > { %2932 = vadd.xlane.f32.xlu0 %v2931_v57  ;;  %3823 = vmatprep.subr.bf16.mxu1 %v3822_v0  ;;  %v663_v57 = vld [vmem:[%s4770_s15 + $0xa0] sm:$0xff] }
0x1653   : > { %3825 = vmatpush1.bf16.msra.mxu1 %v3824_v6  ;;  %v679_v0 = vld [vmem:[%s4770_s15 + $0x120] sm:$0xff]  ;;  %v697_v6 = vld [vmem:[%s4770_s15 + $0x1b0] sm:$0xff] }
0x1654   : > { %3827 = vmatprep.subr.bf16.mxu1 %v3826_v12  ;;  %v3880_v2 = vpack.c.bf16 %v680_v1, %v679_v0  ;;  %v3882_v10 = vpack.c.bf16 %v698_v7, %v697_v6  ;;  %v681_v12 = vld [vmem:[%s4770_s15 + $0x130] sm:$0xff]  ;;  %v2959_v0 = vlaneseq }
0x1655   : > { %v3884_v15 = vpack.c.bf16 %v682_v14, %v681_v12 }
0x1656   : > { %v2960_v1 = vshrl.u32 %v2959_v0, 7 }
0x1657   : > { %3829 = vmatpush1.bf16.msra.mxu1 %v3828_v19  ;;  %v699_v19 = vld [vmem:[%s4770_s15 + $0x1c0] sm:$0xff] }
0x1658   : > { %3839 = vmatprep.subr.bf16.mxu1 %v3838_v34  ;;  %v654_v34 = vld [vmem:[%s4770_s15 + $0x58] sm:$0xff]  ;;  %v2969_v4 = vsub.s32 2, %v2960_v1  ;;  %v2965_v6 = vsub.s32 1, %v2960_v1 }
0x1659   : > { %v3860_v36 = vpack.c.bf16 %v654_v34, %v653_v33 }
0x165a   : > { %v2970_v8 = vrot.slane %v619_v5, %v2969_v4  ;;  %v2966_v9 = vrot.slane %v619_v5, %v2965_v6 }
0x16df   : > { %v2933_v58 = vpop.xlane.xlu0 %2932 }
0x16e0   : > { %v2934_v59 = vmul.f32 0.03125, %v2933_v58  ;;  %v664_v58 = vld [vmem:[%s4770_s15 + $0xa8] sm:$0xff] }
0x16e2   : > { %v2935_v60 = vsub.f32 %v4453_v56, %v2934_v59  ;;  %v695_v59 = vld [vmem:[%s4770_s15 + $0x1a0] sm:$0xff] }
0x16e4   : > { %v2936_v42 = vmul.f32 %v2935_v60, %v2935_v60 }
0x16e6   : > { %v2937_v61 = vsel %vm877_vm4, %v2936_v42, 0.0  ;;  %v696_v42 = vld [vmem:[%s4770_s15 + $0x1a8] sm:$0xff] }
0x16e7   : > { %2938 = vadd.xlane.f32.xlu1 %v2937_v61  ;;  %v647_v61 = vld [vmem:[%s4770_s15 + $0x20] sm:$0xff]  ;;  %v3878_v53 = vpack.c.bf16 %v696_v42, %v695_v59  ;;  %v657_v59 = vld [vmem:[%s4770_s15 + $0x70] sm:$0xff] }
0x16e8   : > { %v3848_v63 = vpack.c.bf16 %v648_v62, %v647_v61  ;;  %v689_v62 = vld [vmem:[%s4770_s15 + $0x170] sm:$0xff] }
0x1774   : > { %v2939_v23 = vpop.xlane.xlu1 %2938 }
0x1775   : > { %v2940_v24 = vmul.f32 0.03125, %v2939_v23  ;;  %v652_v23 = vld [vmem:[%s4770_s15 + $0x48] sm:$0xff] }
0x1777   : > { %v2941_v25 = vadd.f32 1e-05, %v2940_v24  ;;  %v3886_v24 = vpack.c.bf16 %v700_v21, %v699_v19 }
0x1779   : > { %3972 = vrsqrt.f32 %v2941_v25  ;;  %v3856_v25 = vpack.c.bf16 %v652_v23, %v651_v22 }
0x1783   : > { %v3973_v26 = vpop.eup %3972 }
0x1784   : > { %v2943_v28 = vmul.f32 %v3973_v26, %v2935_v60  ;;  %v3846_v60 = vpack.c.bf16 %v664_v58, %v663_v57  ;;  %v683_v26 = vld [vmem:[%s4770_s15 + $0x140] sm:$0xff]  ;;  %v3866_v57 = vpack.c.bf16 %v674_v54, %v673_v52  ;;  %v706_v58 = vld [vmem:[%s4770_s15 + $0x1f8] sm:$0xff] }
0x1786   : > { %v2950_v16 = vmul.f32 %v3502_v27, %v2943_v28  ;;  %v684_v27 = vld [vmem:[%s4770_s15 + $0x148] sm:$0xff] }
0x1787   : > { %v3888_v28 = vpack.c.bf16 %v684_v27, %v683_v26 }
0x1788   : > { %v2957_v30 = vadd.f32 %v3503_v29, %v2950_v16  ;;  %v669_v29 = vld [vmem:[%s4770_s15 + $0xd0] sm:$0xff]  ;;  %v670_v16 = vld [vmem:[%s4770_s15 + $0xd8] sm:$0xff] }
0x1789   : > { %v3858_v31 = vpack.c.bf16 %v670_v16, %v669_v29 }
0x178a   : > { %3504 = vmatmul.mubr.msk.f32.vlgmr.msra.gmra.mrb[36].mxu1 %vm877_vm4, %v2957_v30  ;;  %3505 = vmatmul.mubr.msk.f32.vlgmr.msra.gmra.mrb[18].mxu0 %vm877_vm4, %v2957_v30  ;;  %v701_v30 = vld [vmem:[%s4770_s15 + $0x1d0] sm:$0xff] }
0x178b   : > { %3841 = vmatpush3.bf16.msra.mxu1 %v3840_v39  ;;  %3873 = vmatpush3.bf16.msra.mxu0 %v3872_v43  ;;  %v3890_v35 = vpack.c.bf16 %v702_v32, %v701_v30  ;;  %v3892_v39 = vpack.c.bf16 %v686_v38, %v685_v37  ;;  %v703_v43 = vld [vmem:[%s4770_s15 + $0x1e0] sm:$0xff] }
0x178c   : > { %3843 = vmatprep.subr.bf16.mxu1 %v3842_v47  ;;  %3875 = vmatprep.subr.bf16.mxu0 %v3874_v50  ;;  %v656_v47 = vld [vmem:[%s4770_s15 + $0x68] sm:$0xff]  ;;  %v3894_v48 = vpack.c.bf16 %v704_v45, %v703_v43 }
0x178d   : > { %v3864_v13 = vpack.c.bf16 %v656_v47, %v655_v46  ;;  %v688_v50 = vld [vmem:[%s4770_s15 + $0x168] sm:$0xff] }
0x178f   : > { %3845 = vmatpush3.bf16.msra.mxu1 %v3844_v51  ;;  %3877 = vmatpush3.bf16.msra.mxu0 %v3876_v55  ;;  %v3896_v51 = vpack.c.bf16 %v688_v50, %v687_v49  ;;  %v705_v55 = vld [vmem:[%s4770_s15 + $0x1f0] sm:$0xff] }
0x1790   : > { %3847 = vmatprep.subr.bf16.mxu1 %v3846_v60  ;;  %3879 = vmatprep.subr.bf16.mxu0 %v3878_v53  ;;  %v658_v60 = vld [vmem:[%s4770_s15 + $0x78] sm:$0xff]  ;;  %v3898_v42 = vpack.c.bf16 %v706_v58, %v705_v55 }
0x1791   : > { %v3868_v61 = vpack.c.bf16 %v658_v60, %v657_v59  ;;  %v690_v53 = vld [vmem:[%s4770_s15 + $0x178] sm:$0xff] }
0x1793   : > { %3849 = vmatpush3.bf16.msra.mxu1 %v3848_v63  ;;  %3881 = vmatpush3.bf16.msra.mxu0 %v3880_v2  ;;  %v3900_v63 = vpack.c.bf16 %v690_v53, %v689_v62  ;;  %v2961_v2 = vsub.s32 0, %v2960_v1 }
0x1794   : > { %3851 = vmatprep.subr.bf16.mxu1 %v3850_v3  ;;  %3883 = vmatprep.subr.bf16.mxu0 %v3882_v10  ;;  %v2973_v3 = vsub.s32 3, %v2960_v1 }
0x1795   : > { %v2962_v7 = vrot.slane %v619_v5, %v2961_v2 }
0x1796   : > { %v2974_v10 = vrot.slane %v619_v5, %v2973_v3 }
0x1797   : > { %3853 = vmatpush3.bf16.msra.mxu1 %v3852_v11  ;;  %3885 = vmatpush3.bf16.msra.mxu0 %v3884_v15 }
0x1798   : > { %3855 = vmatprep.subr.bf16.mxu1 %v3854_v20  ;;  %3887 = vmatprep.subr.bf16.mxu0 %v3886_v24 }
0x179b   : > { %3857 = vmatpush3.bf16.msra.mxu1 %v3856_v25  ;;  %3889 = vmatpush3.bf16.msra.mxu0 %v3888_v28 }
0x179c   : > { %3859 = vmatprep.subr.bf16.mxu1 %v3858_v31  ;;  %3891 = vmatprep.subr.bf16.mxu0 %v3890_v35 }
0x179f   : > { %3861 = vmatpush3.bf16.msra.mxu1 %v3860_v36  ;;  %3893 = vmatpush3.bf16.msra.mxu0 %v3892_v39 }
0x17a0   : > { %3863 = vmatprep.subr.bf16.mxu1 %v3862_v44  ;;  %3895 = vmatprep.subr.bf16.mxu0 %v3894_v48 }
0x17a3   : > { %3865 = vmatpush3.bf16.msra.mxu1 %v3864_v13  ;;  %3897 = vmatpush3.bf16.msra.mxu0 %v3896_v51 }
0x17a4   : > { %3867 = vmatprep.subr.bf16.mxu1 %v3866_v57  ;;  %3899 = vmatprep.subr.bf16.mxu0 %v3898_v42 }
0x17a7   : > { %3869 = vmatpush3.bf16.msra.mxu1 %v3868_v61  ;;  %3901 = vmatpush3.bf16.msra.mxu0 %v3900_v63 }
0x185d   : > { %v3048_v11 = vpop.f32.mrb[36].mxu1  ;;  %v3119_v12 = vpop.f32.mrb[18].mxu0 }
0x185e   : > { %v4710_v14 = vadd.f32 %v3048_v11, %v2962_v7  ;;  %v4712_v15 = vadd.f32 %v3119_v12, %v2970_v8  ;;  %v3050_v17 = vpop.f32.mrb[37].mxu1  ;;  %v3121_v18 = vpop.f32.mrb[19].mxu0 }
0x185f   : > { %v4714_v19 = vadd.f32 %v3050_v17, %v2966_v9  ;;  %v4716_v20 = vadd.f32 %v3121_v18, %v2974_v10 }
0x1860   : > { %v4719_v21 = vmul.f32 0.70710677, %v4710_v14  ;;  %v4722_v22 = vmul.f32 0.70710677, %v4712_v15 }
0x1861   : > { %v4725_v23 = vmul.f32 0.70710677, %v4714_v19  ;;  %v4731_v27 = vmul.f32 0.70710677, %v4716_v20 }
0x1862   : > { %v3140_v24 = vand.u32 2147483647, %v4719_v21  ;;  %v3142_v25 = vand.u32 2147483647, %v4722_v22  ;;  %vm3132_vm8 = vcmp.ge.f32.partialorder %v4719_v21, 0.0  ;;  %vm3134_vm9 = vcmp.ge.f32.partialorder %v4722_v22, 0.0 }
0x1863   : > { %v3141_v26 = vand.u32 2147483647, %v4725_v23  ;;  %v3143_v32 = vand.u32 2147483647, %v4731_v27  ;;  %vm3133_vm10 = vcmp.ge.f32.partialorder %v4725_v23, 0.0  ;;  %vm3135_vm11 = vcmp.ge.f32.partialorder %v4731_v27, 0.0 }
0x1864   : > { %v3144_v28 = vmul.f32 0.3275911, %v3140_v24  ;;  %v3146_v29 = vmul.f32 0.3275911, %v3142_v25  ;;  %v3196_v36 = vmul.f32 %v3140_v24, %v3140_v24  ;;  %v3198_v37 = vmul.f32 %v3142_v25, %v3142_v25 }
0x1865   : > { %v3145_v16 = vmul.f32 0.3275911, %v3141_v26  ;;  %v3147_v34 = vmul.f32 0.3275911, %v3143_v32  ;;  %v3197_v40 = vmul.f32 %v3141_v26, %v3141_v26  ;;  %v3199_v46 = vmul.f32 %v3143_v32, %v3143_v32 }
0x1866   : > { %v3148_v30 = vadd.f32 1.0, %v3144_v28  ;;  %v3150_v31 = vadd.f32 1.0, %v3146_v29  ;;  %v3200_v39 = vsub.f32 0.0, %v3196_v36  ;;  %v3202_v44 = vsub.f32 0.0, %v3198_v37 }
0x1867   : > { %v3149_v33 = vadd.f32 1.0, %v3145_v16  ;;  %v3151_v35 = vadd.f32 1.0, %v3147_v34  ;;  %v3201_v50 = vsub.f32 0.0, %v3197_v40  ;;  %v3203_v58 = vsub.f32 0.0, %v3199_v46 }
0x1868   : > { %3974 = vrcp.f32 %v3148_v30  ;;  %v3204_v13 = vmul.f32 1.442695, %v3200_v39  ;;  %v3208_v52 = vmul.f32 1.442695, %v3202_v44  ;;  %v4024_v40 = vmov -1.0  }
0x1869   : > { %3976 = vrcp.f32 %v3150_v31  ;;  %v3206_v62 = vmul.f32 1.442695, %v3201_v50  ;;  %v3210_v2 = vmul.f32 1.442695, %v3203_v58  ;;  %v3138_v46 = vsel %vm3134_vm9, 1.0, %v4024_v40 }
0x186a   : > { %3978 = vrcp.f32 %v3149_v33  ;;  %v3139_v22 = vsel %vm3135_vm11, 1.0, %v4024_v40  ;;  %v3124_v23 = vmul.f32 0.5, %v4710_v14  ;;  %v3127_v58 = vmul.f32 0.5, %v4716_v20  ;;  %v3506_v14 = vld [vmem:[%s4762_s7] ss:$0 sm:$0xff] }
0x186b   : > { %3980 = vrcp.f32 %v3151_v35 }
0x186c   : > { %3982 = vpow2.f32 %v3204_v13 }
0x186d   : > { %3984 = vpow2.f32 %v3208_v52  ;;  %v3125_v52 = vmul.f32 0.5, %v4714_v19 }
0x186e   : > { %3986 = vpow2.f32 %v3206_v62 }
0x186f   : > { %3988 = vpow2.f32 %v3210_v2 }
0x1872   : > { %v3975_v38 = vpop.eup %3974 }
0x1873   : > { %v3977_v41 = vpop.eup %3976  ;;  %v3160_v43 = vmul.f32 1.0614054, %v3975_v38 }
0x1874   : > { %v3162_v45 = vmul.f32 1.0614054, %v3977_v41  ;;  %v3979_v48 = vpop.eup %3978 }
0x1875   : > { %v3164_v47 = vadd.f32 -1.4531521, %v3160_v43  ;;  %v3161_v54 = vmul.f32 1.0614054, %v3979_v48  ;;  %v3981_v55 = vpop.eup %3980 }
0x1876   : > { %v3166_v49 = vadd.f32 -1.4531521, %v3162_v45  ;;  %v3163_v42 = vmul.f32 1.0614054, %v3981_v55  ;;  %v3983_v28 = vpop.eup %3982 }
0x1877   : > { %v3168_v51 = vmul.f32 %v3975_v38, %v3164_v47  ;;  %v3165_v60 = vadd.f32 -1.4531521, %v3161_v54  ;;  %v3985_v16 = vpop.eup %3984 }
0x1878   : > { %v3170_v57 = vmul.f32 %v3977_v41, %v3166_v49  ;;  %v3167_v0 = vadd.f32 -1.4531521, %v3163_v42  ;;  %v3987_v37 = vpop.eup %3986  ;;  %v3126_v42 = vmul.f32 0.5, %v4712_v15 }
0x1879   : > { %v3172_v59 = vadd.f32 1.4214138, %v3168_v51  ;;  %v3169_v63 = vmul.f32 %v3979_v48, %v3165_v60  ;;  %v3989_v44 = vpop.eup %3988 }
0x187a   : > { %v3174_v61 = vadd.f32 1.4214138, %v3170_v57  ;;  %v3171_v6 = vmul.f32 %v3981_v55, %v3167_v0 }
0x187b   : > { %v3176_v53 = vmul.f32 %v3975_v38, %v3172_v59  ;;  %v3173_v5 = vadd.f32 1.4214138, %v3169_v63 }
0x187c   : > { %v3178_v1 = vmul.f32 %v3977_v41, %v3174_v61  ;;  %v3175_v9 = vadd.f32 1.4214138, %v3171_v6 }
0x187d   : > { %v3180_v4 = vadd.f32 -0.28449672, %v3176_v53  ;;  %v3177_v8 = vmul.f32 %v3979_v48, %v3173_v5 }
0x187e   : > { %v3182_v3 = vadd.f32 -0.28449672, %v3178_v1  ;;  %v3179_v17 = vmul.f32 %v3981_v55, %v3175_v9 }
0x187f   : > { %v3184_v7 = vmul.f32 %v3975_v38, %v3180_v4  ;;  %v3181_v12 = vadd.f32 -0.28449672, %v3177_v8 }
0x1880   : > { %v3186_v10 = vmul.f32 %v3977_v41, %v3182_v3  ;;  %v3183_v26 = vadd.f32 -0.28449672, %v3179_v17 }
0x1881   : > { %v3188_v11 = vadd.f32 0.2548296, %v3184_v7  ;;  %v3185_v25 = vmul.f32 %v3979_v48, %v3181_v12 }
0x1882   : > { %v3190_v18 = vadd.f32 0.2548296, %v3186_v10  ;;  %v3187_v32 = vmul.f32 %v3981_v55, %v3183_v26 }
0x1883   : > { %v3192_v24 = vmul.f32 %v3975_v38, %v3188_v11  ;;  %v3189_v31 = vadd.f32 0.2548296, %v3185_v25  ;;  %v3136_v38 = vsel %vm3132_vm8, 1.0, %v4024_v40 }
0x1884   : > { %v3194_v29 = vmul.f32 %v3977_v41, %v3190_v18  ;;  %v3191_v36 = vadd.f32 0.2548296, %v3187_v32 }
0x1885   : > { %v3212_v30 = vmul.f32 %v3983_v28, %v3192_v24  ;;  %v3193_v35 = vmul.f32 %v3979_v48, %v3189_v31  ;;  %v3137_v48 = vsel %vm3133_vm10, 1.0, %v4024_v40 }
0x1886   : > { %v3214_v33 = vmul.f32 %v3985_v16, %v3194_v29  ;;  %v3195_v41 = vmul.f32 %v3981_v55, %v3191_v36 }
0x1887   : > { %v3216_v34 = vsub.f32 1.0, %v3212_v30  ;;  %v3213_v43 = vmul.f32 %v3987_v37, %v3193_v35 }
0x1888   : > { %v3218_v39 = vsub.f32 1.0, %v3214_v33  ;;  %v3215_v47 = vmul.f32 %v3989_v44, %v3195_v41 }
0x1889   : > { %v3220_v45 = vmul.f32 %v3216_v34, %v3136_v38  ;;  %v3217_v21 = vsub.f32 1.0, %v3213_v43 }
0x188a   : > { %v3222_v13 = vmul.f32 %v3218_v39, %v3138_v46  ;;  %v3219_v50 = vsub.f32 1.0, %v3215_v47 }
0x188b   : > { %v3221_v49 = vmul.f32 %v3217_v21, %v3137_v48  ;;  %v3224_v51 = vadd.f32 1.0, %v3220_v45 }
0x188c   : > { %v3223_v57 = vmul.f32 %v3219_v50, %v3139_v22  ;;  %v3226_v55 = vadd.f32 1.0, %v3222_v13 }
0x188d   : > { %v3225_v54 = vadd.f32 1.0, %v3221_v49  ;;  %v3228_v27 = vmul.f32 %v3224_v51, %v3124_v23 }
0x188e   : > { %v3227_v60 = vadd.f32 1.0, %v3223_v57  ;;  %v3230_v62 = vmul.f32 %v3226_v55, %v3126_v42 }
0x188f   : > { %v3229_v59 = vmul.f32 %v3225_v54, %v3125_v52 }
0x1890   : > { %v3231_v61 = vmul.f32 %v3227_v60, %v3127_v58 }
0x1891   : > { %3302 = vmatprep.mubr.f32.mxu1 %v3229_v59 }
0x1892   : > { %3303 = vmatmul.mubr.f32.vlgmr.msra.gmra.mrb[38].mxu1 %v3228_v27  ;;  %3372 = vmatprep.mubr.f32.mxu0 %v3231_v61 }
0x1893   : > { %3373 = vmatmul.mubr.f32.vlgmr.msra.gmra.mrb[20].mxu0 %v3230_v62 }
0x1965   : > { %v3599_v19 = vpop.f32.mrb[38].mxu1 }
0x1966   : > { %v3600_v53 = vpop.f32.mrb[39].mxu1  ;;  %v3634_v63 = vpop.f32.mrb[20].mxu0 }
0x1967   : > { %v3601_v20 = vadd.f32 %v3600_v53, %v3599_v19  ;;  %v3635_v0 = vpop.f32.mrb[21].mxu0 }
0x1968   : > { %v3636_v2 = vadd.f32 %v3635_v0, %v3634_v63 }
0x1969   : > { %v3305_v1 = vadd.f32 %v3601_v20, %v3506_v14 }
0x196b   : > { %v3375_v4 = vadd.f32 %v3636_v2, %v3305_v1 }
0x196d   : > { %v3378_v15 = vadd.f32 %v3375_v4, %v4453_v56 }
0x196f   : > { %3379 = vst.msk [vmem:[%s590_s23] sm:$0xff] %vm877_vm4, %v3378_v15 }
0x1970 PF: > { %s28_s27 = sadd.s32 1, %s3996_s27  }
0x1971   : > { %p25_p4 = scmp.ge.s32.totalorder %s28_s27, 4  }
0x1973   :  { %27 = sbr.rel (!%p25_p4) target bundleno = 4 (0x4), region = 125 }

// kernel: forward.3
= control target key start
LH: loop header
LB: loop body
LE: loop exit
PB: predicated region body
PF: predicated region fallthrough
CT: control target
= control target key end

     0   :  { %s13004_s6 = smov 1   ;;  %s13005_s10 = smov 2   ;;  %s14591_s0 = inlined_call_operand.smem [shape: u32[48], index: -1, kind: input, shape index: {}] }
   0x1   :  { %s13089_s5 = sld [smem:[%s14591_s0]]   ;;  %s13006_s14 = smov 3  }
   0x2   :  { %s13094_s9 = sld [smem:[%s14591_s0 + %s13004_s6]]   ;;  %s13007_s18 = smov 4  }
   0x3   :  { %s13099_s13 = sld [smem:[%s14591_s0 + %s13005_s10]]   ;;  %s13008_s22 = smov 5  }
   0x4   :  { %s13104_s17 = sld [smem:[%s14591_s0 + %s13006_s14]]   ;;  %s13009_s26 = smov 6  }
   0x5   :  { %s13109_s21 = sld [smem:[%s14591_s0 + %s13007_s18]]   ;;  %s13010_s30 = smov 7  }
   0x6   :  { %s13114_s25 = sld [smem:[%s14591_s0 + %s13008_s22]]   ;;  %s13011_s4 = smov 8  }
   0x7   :  { %14650 = sst [smem:[#allocation8_spill]] %s13089_s5  ;;  %s13012_s10 = smov 9  }
   0x8   :  { %14651 = sst [smem:[#allocation9_spill]] %s13094_s9  ;;  %s13013_s15 = smov 10  }
   0x9   :  { %14652 = sst [smem:[#allocation10_spill]] %s13099_s13  ;;  %s13014_s20 = smov 11  }
   0xa   :  { %14653 = sst [smem:[#allocation11_spill]] %s13104_s17  ;;  %s13016_s1 = smov 13  }
   0xb   :  { %14654 = sst [smem:[#allocation12_spill]] %s13109_s21  ;;  %s13017_s7 = smov 14  }
   0xc   :  { %14655 = sst [smem:[#allocation13_spill]] %s13114_s25  ;;  %s13019_s22 = smov 16  }
   0xd   :  { %s13119_s29 = sld [smem:[%s14591_s0 + %s13009_s26]]   ;;  %s13015_s26 = smov 12  }
   0xe   :  { %s13124_s3 = sld [smem:[%s14591_s0 + %s13010_s30]]   ;;  %s13020_s28 = smov 17  }
   0xf   :  { %s13129_s8 = sld [smem:[%s14591_s0 + %s13011_s4]]  }
  0x10   :  { %s13134_s14 = sld [smem:[%s14591_s0 + %s13012_s10]]  }
  0x11   :  { %s13139_s19 = sld [smem:[%s14591_s0 + %s13013_s15]]   ;;  %s13018_s15 = smov 15  }
  0x12   :  { %s13144_s24 = sld [smem:[%s14591_s0 + %s13014_s20]]  }
  0x13   :  { %14656 = sst [smem:[#allocation14_spill]] %s13119_s29 }
  0x14   :  { %14657 = sst [smem:[#allocation15_spill]] %s13124_s3 }
  0x15   :  { %14658 = sst [smem:[#allocation16_spill]] %s13129_s8 }
  0x16   :  { %14659 = sst [smem:[#allocation17_spill]] %s13134_s14 }
  0x17   :  { %s13149_s30 = sld [smem:[%s14591_s0 + %s13015_s26]]  }
  0x18   :  { %14660 = sst [smem:[#allocation18_spill]] %s13144_s24 }
  0x19   :  { %s13154_s6 = sld [smem:[%s14591_s0 + %s13016_s1]]  }
  0x1a   :  { %s13159_s12 = sld [smem:[%s14591_s0 + %s13017_s7]]   ;;  %s13021_s7 = smov 18  }
  0x1b   :  { %s13164_s20 = sld [smem:[%s14591_s0 + %s13018_s15]]   ;;  %s13022_s15 = smov 19  }
  0x1c   :  { %s13169_s27 = sld [smem:[%s14591_s0 + %s13019_s22]]   ;;  %s13023_s22 = smov 20  }
  0x1d   :  { %s13174_s4 = sld [smem:[%s14591_s0 + %s13020_s28]]   ;;  %s13024_s28 = smov 21  }
  0x1e   :  { %s13179_s17 = sld [smem:[%s14591_s0 + %s13021_s7]]   ;;  %s13025_s7 = smov 22  }
  0x1f   :  { %14661 = sst [smem:[#allocation19_spill]] %s13154_s6 }
  0x20   :  { %14662 = sst [smem:[#allocation20_spill]] %s13159_s12 }
  0x21   :  { %14663 = sst [smem:[#allocation21_spill]] %s13164_s20 }
  0x22   :  { %s13184_s21 = sld [smem:[%s14591_s0 + %s13022_s15]]   ;;  %s13026_s15 = smov 23  }
  0x23   :  { %14664 = sst [smem:[#allocation22_spill]] %s13174_s4 }
  0x24   :  { %14665 = sst [smem:[#allocation23_spill]] %s13179_s17 }
  0x25   :  { %s13189_s25 = sld [smem:[%s14591_s0 + %s13023_s22]]   ;;  %s13027_s22 = smov 24  }
  0x26   :  { %s13194_s3 = sld [smem:[%s14591_s0 + %s13024_s28]]   ;;  %s13028_s28 = smov 25  }
  0x27   :  { %s13199_s29 = sld [smem:[%s14591_s0 + %s13025_s7]]   ;;  %s13029_s7 = smov 26  }
  0x28   :  { %14666 = sst [smem:[#allocation24_spill]] %s13184_s21 }
  0x29   :  { %s13204_s4 = sld [smem:[%s14591_s0 + %s13026_s15]]   ;;  %s13030_s15 = smov 27  }
  0x2a   :  { %s13214_s17 = sld [smem:[%s14591_s0 + %s13028_s28]]   ;;  %s13032_s28 = smov 29  }
  0x2b   :  { %14667 = sst [smem:[#allocation25_spill]] %s13189_s25 }
  0x2c   :  { %14668 = sst [smem:[#allocation26_spill]] %s13194_s3 }
  0x2d   :  { %14669 = sst [smem:[#allocation27_spill]] %s13199_s29 }
  0x2e   :  { %s13209_s25 = sld [smem:[%s14591_s0 + %s13027_s22]]   ;;  %s13031_s22 = smov 28  }
  0x2f   :  { %14670 = sst [smem:[#allocation28_spill]] %s13204_s4 }
  0x30   :  { %14671 = sst [smem:[#allocation29_spill]] %s13214_s17 }
  0x31   :  { %s13219_s21 = sld [smem:[%s14591_s0 + %s13029_s7]]   ;;  %s13033_s7 = smov 30  }
  0x32   :  { %s13224_s14 = sld [smem:[%s14591_s0 + %s13030_s15]]   ;;  %s13034_s15 = smov 31  }
  0x33   :  { %s13229_s29 = sld [smem:[%s14591_s0 + %s13031_s22]]   ;;  %s13035_s22 = smov 32  }
  0x34   :  { %s13234_s24 = sld [smem:[%s14591_s0 + %s13032_s28]]   ;;  %s13036_s28 = smov 33  }
  0x37   :  { %14672 = sst [smem:[#allocation30_spill]] %s13219_s21 }
  0x38   :  { %14673 = sst [smem:[#allocation31_spill]] %s13224_s14 }
  0x39   :  { %14674 = sst [smem:[#allocation32_spill]] %s13229_s29 }
  0x3a   :  { %14675 = sst [smem:[#allocation33_spill]] %s13234_s24 }
  0x3b   :  { %s13239_s21 = sld [smem:[%s14591_s0 + %s13033_s7]]   ;;  %s13037_s7 = smov 34  }
  0x3c   :  { %s13244_s14 = sld [smem:[%s14591_s0 + %s13034_s15]]   ;;  %s13038_s15 = smov 35  }
  0x3d   :  { %s13249_s29 = sld [smem:[%s14591_s0 + %s13035_s22]]   ;;  %s13039_s22 = smov 36  }
  0x3e   :  { %s13254_s24 = sld [smem:[%s14591_s0 + %s13036_s28]]   ;;  %s13040_s28 = smov 37  }
  0x41   :  { %14676 = sst [smem:[#allocation34_spill]] %s13239_s21 }
  0x42   :  { %14677 = sst [smem:[#allocation35_spill]] %s13244_s14 }
  0x43   :  { %14678 = sst [smem:[#allocation36_spill]] %s13249_s29 }
  0x44   :  { %14679 = sst [smem:[#allocation37_spill]] %s13254_s24 }
  0x45   :  { %s13259_s21 = sld [smem:[%s14591_s0 + %s13037_s7]]   ;;  %s13041_s7 = smov 38  }
  0x46   :  { %s13264_s14 = sld [smem:[%s14591_s0 + %s13038_s15]]   ;;  %s13042_s15 = smov 39  }
  0x47   :  { %s13269_s29 = sld [smem:[%s14591_s0 + %s13039_s22]]   ;;  %s13043_s22 = smov 40  }
  0x48   :  { %s13274_s24 = sld [smem:[%s14591_s0 + %s13040_s28]]   ;;  %s13044_s28 = smov 41  }
  0x49   :  { %s13294_s8 = sld [smem:[%s14591_s0 + %s13044_s28]]   ;;  %s13048_s28 = smov 45  }
  0x4b   :  { %14680 = sst [smem:[#allocation38_spill]] %s13259_s21 }
  0x4c   :  { %14681 = sst [smem:[#allocation39_spill]] %s13264_s14 }
  0x4d   :  { %14682 = sst [smem:[#allocation40_spill]] %s13269_s29 }
  0x4e   :  { %s13279_s21 = sld [smem:[%s14591_s0 + %s13041_s7]]   ;;  %s13045_s7 = smov 42  }
  0x4f   :  { %s13284_s14 = sld [smem:[%s14591_s0 + %s13042_s15]]   ;;  %s13046_s15 = smov 43  }
  0x50   :  { %s13289_s29 = sld [smem:[%s14591_s0 + %s13043_s22]]   ;;  %s13047_s22 = smov 44  }
  0x51   :  { %14685 = sst [smem:[#allocation43_spill]] %s13294_s8 }
  0x52   :  { %s13299_s20 = sld [smem:[%s14591_s0 + %s13045_s7]]   ;;  %s13049_s7 = smov 46  }
  0x53   :  { %s13314_s8 = sld [smem:[%s14591_s0 + %s13048_s28]]  }
  0x55   :  { %14683 = sst [smem:[#allocation41_spill]] %s13284_s14 }
  0x56   :  { %14684 = sst [smem:[#allocation42_spill]] %s13289_s29 }
  0x57   :  { %s13304_s14 = sld [smem:[%s14591_s0 + %s13046_s15]]   ;;  %s13050_s15 = smov 47  }
  0x58   :  { %14686 = sst [smem:[#allocation44_spill]] %s13299_s20 }
  0x59   :  { %s13309_s29 = sld [smem:[%s14591_s0 + %s13047_s22]]  }
  0x5a   :  { %14688 = sst [smem:[#allocation46_spill]] %s13314_s8 }
  0x5b   :  { %s13319_s20 = sld [smem:[%s14591_s0 + %s13049_s7]]  }
  0x5d   :  { %14687 = sst [smem:[#allocation45_spill]] %s13304_s14 }
  0x5e   :  { %s13324_s14 = sld [smem:[%s14591_s0 + %s13050_s15]]  }
  0x5f   :  { %101 = vsyncpa [#allocation3], 0 }
  0x60   :  { %102 = vsyncpa [#allocation5], 0  ;;  %s13326_s22 = smov 0  }
  0x61 LB: > { %s14689_s17 = sld [smem:[#allocation29_spill]]  ;;  %s14690_s8 = sld [smem:[#allocation46_spill]]  ;;  %s13002_s22 = sphi %s13326_s22, %s108_s22  }
  0x62   : > { %s14691_s4 = sld [smem:[#allocation28_spill]]  ;;  %s14692_s3 = sld [smem:[#allocation26_spill]] }
  0x63   : > { %s13332_s23 = sadd.s32 4294967295, %s13002_s22   ;;  %p11297_p0 = scmp.ge.s32.totalorder %s13002_s22, 1 }
  0x64   : > { %p1151_p1 = scmp.lt.s32.totalorder %s13002_s22, 3  ;;  %p14601_p2 = scmp.eq.s32.totalorder %s13332_s23, 0 }
  0x65   : > { %s13051_s26 = smov [#allocation2]   ;;  %s13052_s1 = smov [#allocation4]  }
  0x66   : > { %p13337_p3 = pnand %p11297_p0, %p1151_p1  ;;  %s1263_s28 = sshll.u32 %s13051_s26, 4  ;;  %s1264_s28 = int_to_ptr.vmem [resolvable:$true] %s1263_s28 }
  0x67   : > { %s1274_s2 = sshll.u32 %s13052_s1, 4  ;;  %s12932_s10 = scalar_lea.hbm %s13274_s24, 16  ;;  %s13349_s2 = int_to_ptr.vmem [resolvable:$true] %s1274_s2 }
  0x68   : > { %s14693_s0 = scalar_select %p13337_p3, 1, 0 }
  0x69   : > { %p12657_p4 = pneg %p13337_p3  ;;  %p12933_p6 = scmp.ne.s32.totalorder %s13274_s24, %s12932_s10 }
  0x6a   : > { %p12939_p10 = scmp.lt.u32.totalorder %s12932_s10, %s13274_s24 }
  0x6b   : > { %p13345_p5 = pnand %p14601_p2, %p12657_p4 }
  0x6d   : > { %p12934_p7 = pneg %p13345_p5 }
  0x6f   : > { %p12935_p8 = pnand %p12934_p7, %p12933_p6 }
  0x71   : > { %p12936_p9 = pneg %p12935_p8 }
  0x73   : > { %p12941_p11 = pnand %p12939_p10, %p12936_p9 }
  0x75   : > { %12944 = shalt.err (!%p12941_p11)
}
  0x76   : > { %s12945_s11 = scalar_lea.vmem %s1264_s28, 16  ;;  %s12952_s15 = scalar_lea.vmem %s1264_s28, 32 }
  0x77   : > { %p12946_p12 = scmp.ne.s32.totalorder %s1264_s28, %s12945_s11  ;;  %p12953_p1 = scmp.lt.s32.totalorder %s1264_s28, %s1264_s28 }
  0x78   : > { %p12954_p4 = scmp.lt.s32.totalorder %s12952_s15, %s12945_s11 }
  0x79   : > { %p12948_p13 = pnand %p12946_p12, %p12934_p7 }
  0x7a   : > { %p12955_p2 = por %p12954_p4, %p12953_p1 }
  0x7b   : > { %p12949_p0 = pneg %p12948_p13 }
  0x7d   : > { %p12956_p3 = pnand %p12955_p2, %p12949_p0 }
  0x7f   : > { %12959 = shalt.err (!%p12956_p3)
}
  0x80   : > { %12660 = dma.hbm_to_vmem [thread:$0]  (!%p13345_p5), %s13274_s24, 16, %s1264_s28, [#allocation3]  }
  0x81   : > { %s12960_s16 = scalar_lea.hbm %s13279_s21, 16 }
  0x82   : > { %p12961_p6 = scmp.ne.s32.totalorder %s13279_s21, %s12960_s16  ;;  %p12967_p10 = scmp.lt.u32.totalorder %s12960_s16, %s13279_s21 }
  0x84   : > { %p12963_p8 = pnand %p12961_p6, %p12934_p7 }
  0x86   : > { %p12964_p9 = pneg %p12963_p8 }
  0x88   : > { %p12969_p11 = pnand %p12967_p10, %p12964_p9 }
  0x8a   : > { %12972 = shalt.err (!%p12969_p11)
}
  0x8b   : > { %s12973_s18 = scalar_lea.vmem %s13349_s2, 16  ;;  %s12980_s26 = scalar_lea.vmem %s13349_s2, 32 }
  0x8c   : > { %p12974_p2 = scmp.ne.s32.totalorder %s13349_s2, %s12973_s18  ;;  %p12981_p13 = scmp.lt.s32.totalorder %s13349_s2, %s13349_s2 }
  0x8d   : > { %p12982_p0 = scmp.lt.s32.totalorder %s12980_s26, %s12973_s18 }
  0x8e   : > { %p12976_p3 = pnand %p12974_p2, %p12934_p7 }
  0x8f   : > { %p12983_p1 = por %p12982_p0, %p12981_p13 }
  0x90   : > { %p12977_p12 = pneg %p12976_p3 }
  0x92   : > { %p12984_p4 = pnand %p12983_p1, %p12977_p12 }
  0x94   : > { %12987 = shalt.err (!%p12984_p4)
}
  0x95   : > { %12663 = dma.hbm_to_vmem [thread:$0]  (!%p13345_p5), %s13279_s21, 16, %s13349_s2, [#allocation5]  }
  0x96   : > { %p14695_p6 = scmp.ne.s32.totalorder %s14693_s0, 0 }
  0x97   : > { %p14696_p8 = scmp.eq.s32.totalorder (!%p14695_p6), %s13332_s23, 0 }
  0x98   : > { %1335 = sbr.rel (%p14695_p6) target bundleno = 22835 (0x5933), region = 204 }
  0x9f   : > { %12993 = dma.done.wait (%p14696_p8), [#allocation3], 16   ;;  %p14697_p7 = pmov %p14696_p8 }
  0xa1   : > { %12995 = vsyncadd (%p14697_p7), [#allocation3], 4294967280  ;;  %p14698_p9 = pmov %p14697_p7 }
  0xa2   : > { %p14699_p10 = pmov %p14697_p7 }
  0xa3   : > { %12997 = dma.done.wait (%p14698_p9), [#allocation5], 16  }
  0xa4   : > { %12999 = vsyncadd (%p14699_p10), [#allocation5], 4294967280  ;;  %s14700_s5 = sld [smem:[#allocation8_spill]]  ;;  %p1464_p11 = scmp.lt.s32.totalorder %s13332_s23, 1  ;;  %v13053_v0 = vmov 0.0   ;;  %vm1735_vm0 = vcmask 260096   ;;  %v1720_v31 = vlaneseq }
  0xa5   : > { %11901 = vmatprep.subr.mxu1 %v13053_v0  ;;  %v1601_v8 = vld [vmem:[%s14689_s17] sm:$0xff]  ;;  %v1602_v9 = vld [vmem:[%s14689_s17 + $0x8] sm:$0xff]  ;;  %v1603_v10 = vld [vmem:[%s14689_s17 + $0x10] sm:$0xff]  ;;  %v13054_v11 = vmov 0.0|0.0   ;;  %s14701_s12 = sld [smem:[#allocation20_spill]]  ;;  %s14702_s6 = sld [smem:[#allocation19_spill]] }
  0xa6   : > { %s14759_s23 = smov (!%p1464_p11, %s13332_s23), 1  ;;  %12447 = vmatprep.subr.bf16.mxu0 %v13054_v11  ;;  %v12448_v12 = vpack.c.bf16 %v1602_v9, %v1601_v8  ;;  %v1604_v13 = vld [vmem:[%s14689_s17 + $0x18] sm:$0xff]  ;;  %vm13055_vm1 = vmmov 0   ;;  %vm1770_vm2 = vcmask 261120   ;;  %v11311_v24 = vld [vmem:[%s13149_s30] ss:$0 sm:$0xff] }
  0xa7   : > { %s13399_s0 = sshll.u32 %s14759_s23, 3  ;;  %11898 = vmatprep.mubr.msk.f32.mxu0 %vm13055_vm1, %v13053_v0  ;;  %11903 = vmatprep.mubr.msk.f32.mxu1 %vm13055_vm1, %v13053_v0  ;;  %v12451_v14 = vpack.c.bf16 %v1604_v13, %v1603_v10  ;;  %s14604_s1 = smov 64   ;;  %vm1848_vm3 = vcmask 31744   ;;  %vm1942_vm4 = vcmask 1046528   ;;  %v13447_v32 = vshrl.u32 %v1720_v31, 7 }
  0xa8   : > { %12449 = vmatpush3.bf16.msra.mxu0 %v12448_v12  ;;  %s14637_s2 = smov 96   ;;  %s14703_s13 = sld [smem:[#allocation10_spill]]  ;;  %v13449_v34 = vand.u32 127, %v1720_v31  ;;  %vm1924_vm6 = vcmask 55296   ;;  %vm1938_vm7 = vcmask 56320   ;;  %vm2186_vm8 = vcmask 1043456  }
  0xa9   : > { %12450 = vmatprep.subr.bf16.mxu0 %v13054_v11  ;;  %s14639_s7 = smov 92   ;;  %v13452_v36 = vsub.s32 0, %v13447_v32  ;;  %s14606_s11 = smov 60   ;;  %vm4062_vm9 = vcmask 63488   ;;  %vm4077_vm10 = vcmask 64512  }
  0xaa   : > { %s1467_s28 = scalar_lea.vmem %s14700_s5, %s13399_s0  ;;  %vm1724_vm5 = vcmp.gt.s32.totalorder %v13449_v34, %v13447_v32  ;;  %s14631_s15 = smov 88  }
  0xab   : > { %v13403_v1 = vld [vmem:[%s1467_s28] sm:$0x7f]  ;;  %v1725_v38 = vsel %vm1724_vm5, -1e+30, %v13053_v0  ;;  %s14633_s16 = smov 120   ;;  %s14603_s18 = smov 56  }
  0xac   : > { %v1736_v2 = vsel %vm1735_vm0, %v13403_v1, 0.0  ;;  %12452 = vmatpush3.bf16.msra.mxu0 %v12451_v14  ;;  %v11309_v19 = vld [vmem:[%s14701_s12] ss:$0 sm:$0xff]  ;;  %s14627_s26 = smov 84   ;;  %s14629_s28 = smov 116   ;;  %vm11107_vm5 = vcmask 6144  }
  0xad   : > { %1737 = vadd.xlane.f32.xlu0 %v1736_v2  ;;  %11921 = vmatprep.subr.mxu0 %v13053_v0  ;;  %v11310_v21 = vld [vmem:[%s14702_s6] ss:$0 sm:$0xff]  ;;  %s14704_s9 = sld [smem:[#allocation9_spill]]  ;;  %s14728_s5 = smov 96  }
  0xae   : > { %s1474_s10 = scalar_lea.vmem %s14703_s13, %s14759_s23  ;;  %s14635_s23 = smov 124  }
  0xaf   : > { %v1726_v33 = vld [vmem:[%s1474_s10] sm:$0x1]  ;;  %s14605_s10 = smov 52   ;;  %s14732_s6 = sld [smem:[#allocation45_spill]] }
  0xb0   : > { %v1727_v35 = vmul.f32 -1e+30, %v1726_v33  ;;  %s14737_s12 = smov 84   ;;  %s14746_s13 = sld [smem:[#allocation39_spill]] }
  0xb1   : > { %s14747_s17 = sld [smem:[#allocation32_spill]] }
  0xb2   : > { %v1732_v37 = vrot.slane %v1727_v35, %v13452_v36 }
  0xb4   : > { %v13458_v39 = vadd.f32 %v1732_v37, %v1725_v38 }
 0x13a   : > { %v1738_v3 = vpop.xlane.xlu0 %1737 }
 0x13b   : > { %v1740_v4 = vmul.f32 0.03125, %v1738_v3 }
 0x13d   : > { %v1741_v5 = vsub.f32 %v13403_v1, %v1740_v4  ;;  %v1593_v4 = vld [vmem:[%s14691_s4] sm:$0xff] }
 0x13f   : > { %v1742_v6 = vmul.f32 %v1741_v5, %v1741_v5 }
 0x141   : > { %v1743_v7 = vsel %vm1735_vm0, %v1742_v6, 0.0 }
 0x142   : > { %1744 = vadd.xlane.f32.xlu0 %v1743_v7 }
 0x1cf   : > { %v1745_v15 = vpop.xlane.xlu0 %1744 }
 0x1d0   : > { %v1746_v16 = vmul.f32 0.03125, %v1745_v15 }
 0x1d2   : > { %v1747_v17 = vadd.f32 1e-05, %v1746_v16 }
 0x1d4   : > { %12755 = vrsqrt.f32 %v1747_v17 }
 0x1de   : > { %v12756_v18 = vpop.eup %12755 }
 0x1df   : > { %v1749_v20 = vmul.f32 %v12756_v18, %v1741_v5  ;;  %v2182_v5 = vrot.slane %v1593_v4, 4 }
 0x1e1   : > { %v1756_v22 = vmul.f32 %v11309_v19, %v1749_v20 }
 0x1e3   : > { %v1763_v23 = vadd.f32 %v11310_v21, %v1756_v22 }
 0x1e5   : > { %11899 = vmatmul.mubr.msk.f32.vlgmr.msra.gmra.mrb[0].mxu0 %vm1770_vm2, %v1763_v23 }
 0x1e6   : > { %11923 = vmatprep.mubr.msk.f32.mxu0 %vm13055_vm1, %v13053_v0  ;;  %11922 = vmatpush3.msk.msra.mxu0 %vm2186_vm8, %v2182_v5 }
 0x1e7   : > { %11931 = vmatprep.subr.mxu0 %v13053_v0 }
 0x2b8   : > { %v1840_v25 = vpop.f32.mrb[0].mxu0 }
 0x2b9   : > { %v13426_v26 = vadd.f32 %v11311_v24, %v1840_v25  ;;  %v11900_v27 = vpop.f32.mrb[1].mxu0 }
 0x2bb   : > { %1936 = vrot.lane.b32.xlu0 %v13426_v26, %s14604_s1  ;;  %1846 = vrot.lane.b32.xlu1 %v13426_v26, %s14637_s2  ;;  %v13436_v29 = vmul.f32 0.5, %v13426_v26  ;;  %s14625_s1 = smov 112  }
 0x2bf   : > { %2017 = vrot.lane.b32.xlu0 %v13426_v26, %s14639_s7 }
 0x32d   : > { %v1847_v28 = vpop.permute.xlu1 %1846  ;;  %v1937_v30 = vpop.permute.xlu0 %1936 }
 0x32e   : > { %11902 = vmatpush3.xpose.msk.msra.mxu1 %vm1848_vm3, %v1847_v28 }
 0x32f   : > { %11906 = vmatprep.subr.mxu1 %v13053_v0 }
 0x331   : > { %11904 = vmatmul.mubr.msk.f32.vlgmr.msra.gmra.mrb[0].mxu1 %vm1848_vm3, %v13436_v29  ;;  %v2018_v49 = vpop.permute.xlu0 %2017 }
 0x332   : > { %11907 = vmatpush3.msk.msra.mxu1 %vm1942_vm4, %v1937_v30  ;;  %11908 = vmatprep.mubr.msk.f32.mxu1 %vm13055_vm1, %v13053_v0 }
 0x333   : > { %11911 = vmatprep.subr.mxu1 %v13053_v0 }
 0x404   : > { %v1920_v40 = vpop.f32.mrb[0].mxu1 }
 0x405   : > { %v1921_v41 = vadd.f32 %v1920_v40, %v13458_v39  ;;  %v11905_v42 = vpop.f32.mrb[1].mxu1  ;;  %v1594_v40 = vld [vmem:[%s14691_s4 + $0x8] sm:$0xff] }
 0x407   : > { %v1925_v43 = vsel %vm1924_vm6, %v1921_v41, -inf }
 0x408   : > { %1926 = vmax.xlane.f32.xlu1 %v1925_v43 }
 0x495   : > { %v1927_v44 = vpop.xlane.xlu1 %1926 }
 0x496   : > { %v1928_v45 = vsub.f32 %v1921_v41, %v1927_v44  ;;  %v2743_v41 = vrot.slane %v1594_v40, 4 }
 0x498   : > { %v1929_v46 = vmul.f32 1.442695, %v1928_v45 }
 0x49a   : > { %12757 = vpow2.f32 %v1929_v46 }
 0x4a4   : > { %v12758_v47 = vpop.eup %12757 }
 0x4a5   : > { %v1931_v48 = vsel %vm1924_vm6, %v12758_v47, 0.0 }
 0x4a6   : > { %1932 = vadd.xlane.f32.xlu0 %v1931_v48 }
 0x4bc   : > { %2015 = vrot.lane.b32.xlu0 %v13436_v29, %s14635_s23 }
 0x533   : > { %v1933_v50 = vpop.xlane.xlu0 %1932 }
 0x534   : > { %12759 = vrcp.f32 %v1933_v50 }
 0x537   : > { %v2016_v53 = vpop.permute.xlu0 %2015 }
 0x53e   : > { %v12760_v51 = vpop.eup %12759 }
 0x53f   : > { %v1935_v52 = vmul.f32 %v12760_v51, %v12758_v47 }
 0x541   : > { %11909 = vmatmul.mubr.msk.f32.vlgmr.msra.gmra.mrb[2].mxu1 %vm1938_vm7, %v1935_v52 }
 0x542   : > { %11912 = vmatpush3.xpose.msk.msra.mxu1 %vm1848_vm3, %v2018_v49  ;;  %11913 = vmatprep.mubr.msk.f32.mxu1 %vm13055_vm1, %v13053_v0 }
 0x543   : > { %11916 = vmatprep.subr.mxu1 %v13053_v0 }
 0x545   : > { %11914 = vmatmul.mubr.msk.f32.vlgmr.msra.gmra.mrb[4].mxu1 %vm1848_vm3, %v2016_v53 }
 0x546   : > { %11918 = vmatprep.mubr.msk.f32.mxu1 %vm13055_vm1, %v13053_v0 }
 0x614   : > { %v2011_v54 = vpop.f32.mrb[2].mxu1 }
 0x615   : > { %v11910_v55 = vpop.f32.mrb[3].mxu1 }
 0x618   : > { %v2089_v56 = vpop.f32.mrb[4].mxu1 }
 0x619   : > { %v2090_v57 = vadd.f32 %v2089_v56, %v13458_v39  ;;  %v11915_v58 = vpop.f32.mrb[5].mxu1 }
 0x61b   : > { %v2093_v59 = vsel %vm1924_vm6, %v2090_v57, -inf }
 0x61c   : > { %2094 = vmax.xlane.f32.xlu1 %v2093_v59 }
 0x62d   : > { %2104 = vrot.lane.b32.xlu1 %v13426_v26, %s14606_s11  ;;  %s14608_s11 = smov 76  }
 0x631   : > { %2336 = vrot.lane.b32.xlu1 %v13426_v26, %s14631_s15 }
 0x635   : > { %2334 = vrot.lane.b32.xlu1 %v13436_v29, %s14633_s16 }
 0x6a9   : > { %v2095_v60 = vpop.xlane.xlu1 %2094 }
 0x6aa   : > { %v2096_v61 = vsub.f32 %v2090_v57, %v2095_v60 }
 0x6ac   : > { %v2097_v62 = vmul.f32 1.442695, %v2096_v61 }
 0x6ad   : > { %v2105_v63 = vpop.permute.xlu1 %2104 }
 0x6ae   : > { %12761 = vpow2.f32 %v2097_v62  ;;  %11917 = vmatpush3.msk.msra.mxu1 %vm1942_vm4, %v2105_v63 }
 0x6af   : > { %11926 = vmatprep.subr.mxu1 %v13053_v0 }
 0x6b1   : > { %v2337_v10 = vpop.permute.xlu1 %2336 }
 0x6b5   : > { %v2335_v14 = vpop.permute.xlu1 %2334 }
 0x6b8   : > { %v12762_v2 = vpop.eup %12761 }
 0x6b9   : > { %v2099_v3 = vsel %vm1924_vm6, %v12762_v2, 0.0 }
 0x6ba   : > { %2100 = vadd.xlane.f32.xlu0 %v2099_v3 }
 0x6d0   : > { %2423 = vrot.lane.b32.xlu0 %v13426_v26, %s14603_s18  ;;  %s14610_s18 = smov 80  }
 0x6d4   : > { %2579 = vrot.lane.b32.xlu0 %v13426_v26, %s14627_s26 }
 0x747   : > { %v2101_v6 = vpop.xlane.xlu0 %2100 }
 0x748   : > { %12763 = vrcp.f32 %v2101_v6 }
 0x74b   : > { %v2424_v9 = vpop.permute.xlu0 %2423 }
 0x74f   : > { %v2580_v31 = vpop.permute.xlu0 %2579 }
 0x752   : > { %v12764_v7 = vpop.eup %12763 }
 0x753   : > { %v2103_v8 = vmul.f32 %v12764_v7, %v12762_v2 }
 0x755   : > { %11919 = vmatmul.mubr.msk.f32.vlgmr.msra.gmra.mrb[6].mxu1 %vm1938_vm7, %v2103_v8 }
 0x756   : > { %11927 = vmatpush3.msk.msra.mxu1 %vm2186_vm8, %v1593_v4  ;;  %11928 = vmatprep.mubr.msk.f32.mxu1 %vm13055_vm1, %v13053_v0 }
 0x757   : > { %11936 = vmatprep.subr.mxu1 %v13053_v0 }
 0x759   : > { %11929 = vmatmul.mubr.msk.f32.vlgmr.msra.gmra.mrb[8].mxu1 %vm1848_vm3, %v2011_v54 }
 0x75a   : > { %11937 = vmatpush3.msk.msra.mxu1 %vm1942_vm4, %v2424_v9  ;;  %11938 = vmatprep.mubr.msk.f32.mxu1 %vm13055_vm1, %v13053_v0 }
 0x75b   : > { %11946 = vmatprep.subr.mxu1 %v13053_v0 }
 0x828   : > { %v2177_v12 = vpop.f32.mrb[6].mxu1 }
 0x829   : > { %v11920_v13 = vpop.f32.mrb[7].mxu1  ;;  %11924 = vmatmul.mubr.msk.f32.vlgmr.msra.gmra.mrb[2].mxu0 %vm1848_vm3, %v2177_v12 }
 0x82a   : > { %11932 = vmatpush3.xpose.msk.msra.mxu0 %vm1848_vm3, %v2337_v10  ;;  %11933 = vmatprep.mubr.msk.f32.mxu0 %vm13055_vm1, %v13053_v0 }
 0x82b   : > { %11941 = vmatprep.subr.mxu0 %v13053_v0 }
 0x82c   : > { %v2330_v15 = vpop.f32.mrb[8].mxu1 }
 0x82d   : > { %v11930_v16 = vpop.f32.mrb[9].mxu1  ;;  %11934 = vmatmul.mubr.msk.f32.vlgmr.msra.gmra.mrb[4].mxu0 %vm1848_vm3, %v2335_v14 }
 0x82e   : > { %11943 = vmatprep.mubr.msk.f32.mxu0 %vm13055_vm1, %v13053_v0  ;;  %11942 = vmatpush3.msk.msra.mxu0 %vm2186_vm8, %v1594_v40 }
 0x82f   : > { %11951 = vmatprep.subr.mxu0 %v13053_v0 }
 0x8fc   : > { %v2255_v17 = vpop.f32.mrb[2].mxu0 }
 0x8fd   : > { %v13509_v18 = vadd.f32 %v2330_v15, %v2255_v17  ;;  %v11925_v19 = vpop.f32.mrb[3].mxu0 }
 0x900   : > { %v2408_v20 = vpop.f32.mrb[4].mxu0 }
 0x901   : > { %v2409_v21 = vadd.f32 %v2408_v20, %v13458_v39  ;;  %v11935_v22 = vpop.f32.mrb[5].mxu0 }
 0x903   : > { %v2412_v23 = vsel %vm1924_vm6, %v2409_v21, -inf }
 0x904   : > { %2413 = vmax.xlane.f32.xlu1 %v2412_v23 }
 0x991   : > { %v2414_v24 = vpop.xlane.xlu1 %2413 }
 0x992   : > { %v2415_v25 = vsub.f32 %v2409_v21, %v2414_v24  ;;  %v1595_v21 = vld [vmem:[%s14691_s4 + $0x10] sm:$0xff] }
 0x993   : > { %v3229_v22 = vrot.slane %v1595_v21, 4 }
 0x994   : > { %v2416_v27 = vmul.f32 1.442695, %v2415_v25 }
 0x996   : > { %12765 = vpow2.f32 %v2416_v27 }
 0x9a0   : > { %v12766_v28 = vpop.eup %12765 }
 0x9a1   : > { %v2418_v30 = vsel %vm1924_vm6, %v12766_v28, 0.0 }
 0x9a2   : > { %2419 = vadd.xlane.f32.xlu0 %v2418_v30 }
 0x9b8   : > { %2577 = vrot.lane.b32.xlu0 %v13436_v29, %s14629_s28 }
 0xa2f   : > { %v2420_v33 = vpop.xlane.xlu0 %2419 }
 0xa30   : > { %12767 = vrcp.f32 %v2420_v33 }
 0xa33   : > { %v2578_v38 = vpop.permute.xlu0 %2577 }
 0xa3a   : > { %v12768_v35 = vpop.eup %12767 }
 0xa3b   : > { %v2422_v37 = vmul.f32 %v12768_v35, %v12766_v28 }
 0xa3d   : > { %11939 = vmatmul.mubr.msk.f32.vlgmr.msra.gmra.mrb[10].mxu1 %vm1938_vm7, %v2422_v37 }
 0xa3e   : > { %11947 = vmatpush3.xpose.msk.msra.mxu1 %vm1848_vm3, %v2580_v31  ;;  %11948 = vmatprep.mubr.msk.f32.mxu1 %vm13055_vm1, %v13053_v0 }
 0xa3f   : > { %11956 = vmatprep.subr.mxu1 %v13053_v0 }
 0xa41   : > { %11949 = vmatmul.mubr.msk.f32.vlgmr.msra.gmra.mrb[12].mxu1 %vm1848_vm3, %v2578_v38 }
 0xa42   : > { %11958 = vmatprep.mubr.msk.f32.mxu1 %vm13055_vm1, %v13053_v0  ;;  %11957 = vmatpush3.msk.msra.mxu1 %vm2186_vm8, %v2743_v41 }
 0xa43   : > { %11966 = vmatprep.subr.mxu1 %v13053_v0 }
 0xb10   : > { %v2496_v42 = vpop.f32.mrb[10].mxu1 }
 0xb11   : > { %v11940_v43 = vpop.f32.mrb[11].mxu1  ;;  %11944 = vmatmul.mubr.msk.f32.vlgmr.msra.gmra.mrb[6].mxu0 %vm1848_vm3, %v2496_v42 }
 0xb12   : > { %11953 = vmatprep.mubr.msk.f32.mxu0 %vm13055_vm1, %v13053_v0 }
 0xb14   : > { %v2651_v44 = vpop.f32.mrb[12].mxu1 }
 0xb15   : > { %v2652_v45 = vadd.f32 %v2651_v44, %v13458_v39  ;;  %v11950_v46 = vpop.f32.mrb[13].mxu1 }
 0xb17   : > { %v2655_v47 = vsel %vm1924_vm6, %v2652_v45, -inf }
 0xb18   : > { %2656 = vmax.xlane.f32.xlu1 %v2655_v47 }
 0xb29   : > { %2666 = vrot.lane.b32.xlu1 %v13426_v26, %s14605_s10  ;;  %s14607_s10 = smov 48  }
 0xb2d   : > { %2822 = vrot.lane.b32.xlu1 %v13426_v26, %s14610_s18  ;;  %s14615_s18 = smov 72  }
 0xb31   : > { %2820 = vrot.lane.b32.xlu1 %v13436_v29, %s14625_s1  ;;  %s14707_s1 = sld [smem:[#allocation18_spill]] }
 0xba5   : > { %v2657_v48 = vpop.xlane.xlu1 %2656 }
 0xba6   : > { %v2658_v49 = vsub.f32 %v2652_v45, %v2657_v48 }
 0xba8   : > { %v2659_v50 = vmul.f32 1.442695, %v2658_v49 }
 0xba9   : > { %v2667_v51 = vpop.permute.xlu1 %2666 }
 0xbaa   : > { %12769 = vpow2.f32 %v2659_v50  ;;  %11952 = vmatpush3.msk.msra.mxu0 %vm1942_vm4, %v2667_v51 }
 0xbab   : > { %11961 = vmatprep.subr.mxu0 %v13053_v0 }
 0xbad   : > { %v2823_v59 = vpop.permute.xlu1 %2822 }
 0xbb1   : > { %v2821_v61 = vpop.permute.xlu1 %2820 }
 0xbb4   : > { %v12770_v52 = vpop.eup %12769 }
 0xbb5   : > { %v2661_v53 = vsel %vm1924_vm6, %v12770_v52, 0.0 }
 0xbb6   : > { %2662 = vadd.xlane.f32.xlu0 %v2661_v53 }
 0xbcc   : > { %2909 = vrot.lane.b32.xlu0 %v13426_v26, %s14607_s10  ;;  %s14612_s10 = smov 108  }
 0xbd0   : > { %3065 = vrot.lane.b32.xlu0 %v13426_v26, %s14608_s11  ;;  %s14614_s11 = smov 44  }
 0xbe4   : > { %v2572_v54 = vpop.f32.mrb[6].mxu0 }
 0xbe5   : > { %v2576_v55 = vadd.f32 %v2572_v54, %v13509_v18  ;;  %v11945_v56 = vpop.f32.mrb[7].mxu0 }
 0xc43   : > { %v2663_v57 = vpop.xlane.xlu0 %2662 }
 0xc44   : > { %12771 = vrcp.f32 %v2663_v57 }
 0xc47   : > { %v2910_v63 = vpop.permute.xlu0 %2909 }
 0xc4b   : > { %v3066_v16 = vpop.permute.xlu0 %3065 }
 0xc4e   : > { %v12772_v58 = vpop.eup %12771 }
 0xc4f   : > { %v2665_v60 = vmul.f32 %v12772_v58, %v12770_v52 }
 0xc51   : > { %11954 = vmatmul.mubr.msk.f32.vlgmr.msra.gmra.mrb[8].mxu0 %vm1938_vm7, %v2665_v60 }
 0xc52   : > { %11962 = vmatpush3.xpose.msk.msra.mxu0 %vm1848_vm3, %v2823_v59  ;;  %11963 = vmatprep.mubr.msk.f32.mxu0 %vm13055_vm1, %v13053_v0 }
 0xc53   : > { %11971 = vmatprep.subr.mxu0 %v13053_v0 }
 0xc55   : > { %11964 = vmatmul.mubr.msk.f32.vlgmr.msra.gmra.mrb[10].mxu0 %vm1848_vm3, %v2821_v61 }
 0xc56   : > { %11973 = vmatprep.mubr.msk.f32.mxu0 %vm13055_vm1, %v13053_v0  ;;  %11972 = vmatpush3.msk.msra.mxu0 %vm2186_vm8, %v1595_v21 }
 0xc57   : > { %11981 = vmatprep.subr.mxu0 %v13053_v0 }
 0xd24   : > { %v2739_v62 = vpop.f32.mrb[8].mxu0 }
 0xd25   : > { %v11955_v2 = vpop.f32.mrb[9].mxu0  ;;  %11959 = vmatmul.mubr.msk.f32.vlgmr.msra.gmra.mrb[14].mxu1 %vm1848_vm3, %v2739_v62 }
 0xd26   : > { %11967 = vmatpush3.msk.msra.mxu1 %vm1942_vm4, %v2910_v63  ;;  %11968 = vmatprep.mubr.msk.f32.mxu1 %vm13055_vm1, %v13053_v0 }
 0xd27   : > { %11976 = vmatprep.subr.mxu1 %v13053_v0 }
 0xd28   : > { %v2894_v3 = vpop.f32.mrb[10].mxu0 }
 0xd29   : > { %v2895_v4 = vadd.f32 %v2894_v3, %v13458_v39  ;;  %v11965_v5 = vpop.f32.mrb[11].mxu0 }
 0xd2b   : > { %v2898_v6 = vsel %vm1924_vm6, %v2895_v4, -inf }
 0xd2c   : > { %2899 = vmax.xlane.f32.xlu1 %v2898_v6 }
 0xdb9   : > { %v2900_v7 = vpop.xlane.xlu1 %2899 }
 0xdba   : > { %v2901_v8 = vsub.f32 %v2895_v4, %v2900_v7 }
 0xdbc   : > { %v2902_v9 = vmul.f32 1.442695, %v2901_v8 }
 0xdbe   : > { %12773 = vpow2.f32 %v2902_v9 }
 0xdc8   : > { %v12774_v10 = vpop.eup %12773 }
 0xdc9   : > { %v2904_v12 = vsel %vm1924_vm6, %v12774_v10, 0.0 }
 0xdca   : > { %2905 = vadd.xlane.f32.xlu0 %v2904_v12 }
 0xde0   : > { %3063 = vrot.lane.b32.xlu0 %v13436_v29, %s14612_s10  ;;  %s14623_s10 = smov 104  }
 0xdf8   : > { %v2815_v13 = vpop.f32.mrb[14].mxu1 }
 0xdf9   : > { %v2819_v14 = vadd.f32 %v2815_v13, %v2576_v55  ;;  %v11960_v15 = vpop.f32.mrb[15].mxu1 }
 0xe57   : > { %v2906_v17 = vpop.xlane.xlu0 %2905 }
 0xe58   : > { %12775 = vrcp.f32 %v2906_v17 }
 0xe5b   : > { %v3064_v20 = vpop.permute.xlu0 %3063 }
 0xe62   : > { %v12776_v18 = vpop.eup %12775 }
 0xe63   : > { %v2908_v19 = vmul.f32 %v12776_v18, %v12774_v10 }
 0xe65   : > { %11969 = vmatmul.mubr.msk.f32.vlgmr.msra.gmra.mrb[16].mxu1 %vm1938_vm7, %v2908_v19 }
 0xe66   : > { %11977 = vmatpush3.xpose.msk.msra.mxu1 %vm1848_vm3, %v3066_v16  ;;  %11978 = vmatprep.mubr.msk.f32.mxu1 %vm13055_vm1, %v13053_v0 }
 0xe67   : > { %11986 = vmatprep.subr.mxu1 %v13053_v0 }
 0xe69   : > { %11979 = vmatmul.mubr.msk.f32.vlgmr.msra.gmra.mrb[18].mxu1 %vm1848_vm3, %v3064_v20 }
 0xe6a   : > { %11988 = vmatprep.mubr.msk.f32.mxu1 %vm13055_vm1, %v13053_v0  ;;  %11987 = vmatpush3.msk.msra.mxu1 %vm2186_vm8, %v3229_v22 }
 0xe6b   : > { %11996 = vmatprep.subr.mxu1 %v13053_v0 }
 0xf38   : > { %v2982_v23 = vpop.f32.mrb[16].mxu1 }
 0xf39   : > { %v11970_v24 = vpop.f32.mrb[17].mxu1  ;;  %11974 = vmatmul.mubr.msk.f32.vlgmr.msra.gmra.mrb[12].mxu0 %vm1848_vm3, %v2982_v23 }
 0xf3a   : > { %11983 = vmatprep.mubr.msk.f32.mxu0 %vm13055_vm1, %v13053_v0 }
 0xf3c   : > { %v3137_v25 = vpop.f32.mrb[18].mxu1 }
 0xf3d   : > { %v3138_v27 = vadd.f32 %v3137_v25, %v13458_v39  ;;  %v11980_v28 = vpop.f32.mrb[19].mxu1 }
 0xf3f   : > { %v3141_v30 = vsel %vm1924_vm6, %v3138_v27, -inf }
 0xf40   : > { %3142 = vmax.xlane.f32.xlu1 %v3141_v30  ;;  %v11361_v30 = vld [vmem:[%s13139_s19] ss:$0 sm:$0xff] }
 0xf51   : > { %3152 = vrot.lane.b32.xlu1 %v13426_v26, %s14614_s11  ;;  %s14617_s11 = smov 40  }
 0xf55   : > { %3308 = vrot.lane.b32.xlu1 %v13426_v26, %s14615_s18  ;;  %s14618_s18 = smov 68  }
 0xf59   : > { %3306 = vrot.lane.b32.xlu1 %v13436_v29, %s14623_s10  ;;  %s14706_s10 = sld [smem:[#allocation16_spill]] }
 0xfcd   : > { %v3143_v31 = vpop.xlane.xlu1 %3142 }
 0xfce   : > { %v3144_v33 = vsub.f32 %v3138_v27, %v3143_v31 }
 0xfd0   : > { %v3145_v35 = vmul.f32 1.442695, %v3144_v33 }
 0xfd1   : > { %v3153_v37 = vpop.permute.xlu1 %3152 }
 0xfd2   : > { %12777 = vpow2.f32 %v3145_v35  ;;  %11982 = vmatpush3.msk.msra.mxu0 %vm1942_vm4, %v3153_v37 }
 0xfd3   : > { %11991 = vmatprep.subr.mxu0 %v13053_v0 }
 0xfd5   : > { %v3309_v46 = vpop.permute.xlu1 %3308 }
 0xfd9   : > { %v3307_v48 = vpop.permute.xlu1 %3306 }
 0xfdc   : > { %v12778_v38 = vpop.eup %12777 }
 0xfdd   : > { %v3147_v40 = vsel %vm1924_vm6, %v12778_v38, 0.0 }
 0xfde   : > { %3148 = vadd.xlane.f32.xlu0 %v3147_v40 }
 0xff4   : > { %3395 = vrot.lane.b32.xlu0 %v13426_v26, %s14617_s11  ;;  %s14621_s11 = smov 100  }
 0xff8   : > { %3551 = vrot.lane.b32.xlu0 %v13426_v26, %s14618_s18  ;;  %s14620_s18 = smov 36  }
0x100c   : > { %v3058_v41 = vpop.f32.mrb[12].mxu0 }
0x100d   : > { %v3062_v42 = vadd.f32 %v3058_v41, %v2819_v14  ;;  %v11975_v43 = vpop.f32.mrb[13].mxu0 }
0x106b   : > { %v3149_v44 = vpop.xlane.xlu0 %3148 }
0x106c   : > { %12779 = vrcp.f32 %v3149_v44 }
0x106f   : > { %v3396_v50 = vpop.permute.xlu0 %3395 }
0x1073   : > { %v3552_v2 = vpop.permute.xlu0 %3551 }
0x1076   : > { %v12780_v45 = vpop.eup %12779 }
0x1077   : > { %v3151_v47 = vmul.f32 %v12780_v45, %v12778_v38 }
0x1079   : > { %11984 = vmatmul.mubr.msk.f32.vlgmr.msra.gmra.mrb[14].mxu0 %vm1938_vm7, %v3151_v47 }
0x107a   : > { %11992 = vmatpush3.xpose.msk.msra.mxu0 %vm1848_vm3, %v3309_v46  ;;  %11993 = vmatprep.mubr.msk.f32.mxu0 %vm13055_vm1, %v13053_v0  ;;  %v1586_v46 = vld [vmem:[%s14692_s3 + $0x8] sm:$0xff] }
0x107b   : > { %12001 = vmatprep.subr.mxu0 %v13053_v0 }
0x107d   : > { %11994 = vmatmul.mubr.msk.f32.vlgmr.msra.gmra.mrb[16].mxu0 %vm1848_vm3, %v3307_v48  ;;  %v1597_v48 = vld [vmem:[%s13209_s25] sm:$0xff] }
0x107e   : > { %12003 = vmatprep.mubr.msk.f32.mxu0 %vm13055_vm1, %v13053_v0 }
0x114c   : > { %v3225_v49 = vpop.f32.mrb[14].mxu0 }
0x114d   : > { %v11985_v51 = vpop.f32.mrb[15].mxu0  ;;  %11989 = vmatmul.mubr.msk.f32.vlgmr.msra.gmra.mrb[20].mxu1 %vm1848_vm3, %v3225_v49  ;;  %v1598_v49 = vld [vmem:[%s13209_s25 + $0x8] sm:$0xff] }
0x114e   : > { %11997 = vmatpush3.msk.msra.mxu1 %vm1942_vm4, %v3396_v50  ;;  %11998 = vmatprep.mubr.msk.f32.mxu1 %vm13055_vm1, %v13053_v0  ;;  %v12454_v50 = vpack.c.bf16 %v1598_v49, %v1597_v48  ;;  %v1587_v51 = vld [vmem:[%s14692_s3 + $0x10] sm:$0xff] }
0x114f   : > { %12006 = vmatprep.subr.mxu1 %v13053_v0 }
0x1150   : > { %v3380_v52 = vpop.f32.mrb[16].mxu0 }
0x1151   : > { %v3381_v53 = vadd.f32 %v3380_v52, %v13458_v39  ;;  %v11995_v54 = vpop.f32.mrb[17].mxu0  ;;  %v1588_v52 = vld [vmem:[%s14692_s3 + $0x18] sm:$0xff] }
0x1152   : > { %v1599_v54 = vld [vmem:[%s13209_s25 + $0x10] sm:$0xff] }
0x1153   : > { %v3384_v55 = vsel %vm1924_vm6, %v3381_v53, -inf }
0x1154   : > { %3385 = vmax.xlane.f32.xlu1 %v3384_v55  ;;  %v1600_v55 = vld [vmem:[%s13209_s25 + $0x18] sm:$0xff] }
0x11e1   : > { %v3386_v56 = vpop.xlane.xlu1 %3385 }
0x11e2   : > { %v3387_v57 = vsub.f32 %v3381_v53, %v3386_v56  ;;  %v12463_v53 = vpack.c.bf16 %v1588_v52, %v1587_v51  ;;  %v12457_v56 = vpack.c.bf16 %v1600_v55, %v1599_v54 }
0x11e4   : > { %v3388_v58 = vmul.f32 1.442695, %v3387_v57 }
0x11e6   : > { %12781 = vpow2.f32 %v3388_v58 }
0x11f0   : > { %v12782_v59 = vpop.eup %12781 }
0x11f1   : > { %v3390_v60 = vsel %vm1924_vm6, %v12782_v59, 0.0 }
0x11f2   : > { %3391 = vadd.xlane.f32.xlu0 %v3390_v60 }
0x1208   : > { %3549 = vrot.lane.b32.xlu0 %v13436_v29, %s14621_s11  ;;  %v1596_v29 = vld [vmem:[%s14691_s4 + $0x18] sm:$0xff]  ;;  %s14705_s11 = sld [smem:[#allocation21_spill]]  ;;  %s14721_s4 = sld [smem:[#allocation25_spill]] }
0x1209   : > { %12002 = vmatpush3.msk.msra.mxu0 %vm2186_vm8, %v1596_v29  ;;  %v3715_v7 = vrot.slane %v1596_v29, 4 }
0x120a   : > { %12011 = vmatprep.subr.mxu0 %v13053_v0 }
0x1220   : > { %v3301_v61 = vpop.f32.mrb[20].mxu1 }
0x1221   : > { %v3305_v62 = vadd.f32 %v3301_v61, %v3062_v42  ;;  %v11990_v63 = vpop.f32.mrb[21].mxu1 }
0x127f   : > { %v3392_v3 = vpop.xlane.xlu0 %3391 }
0x1280   : > { %12783 = vrcp.f32 %v3392_v3 }
0x1283   : > { %v3550_v6 = vpop.permute.xlu0 %3549 }
0x128a   : > { %v12784_v4 = vpop.eup %12783 }
0x128b   : > { %v3394_v5 = vmul.f32 %v12784_v4, %v12782_v59 }
0x128d   : > { %11999 = vmatmul.mubr.msk.f32.vlgmr.msra.gmra.mrb[22].mxu1 %vm1938_vm7, %v3394_v5  ;;  %v11366_v5 = vld [vmem:[%s14706_s10] ss:$0 sm:$0xff]  ;;  %s14710_s10 = smov 108  }
0x128e   : > { %12007 = vmatpush3.xpose.msk.msra.mxu1 %vm1848_vm3, %v3552_v2  ;;  %12008 = vmatprep.mubr.msk.f32.mxu1 %vm13055_vm1, %v13053_v0  ;;  %v11363_v2 = vld [vmem:[%s14705_s11] ss:$0 sm:$0xff]  ;;  %s14709_s11 = smov 112  }
0x128f   : > { %12016 = vmatprep.subr.mxu1 %v13053_v0 }
0x1291   : > { %12009 = vmatmul.mubr.msk.f32.vlgmr.msra.gmra.mrb[24].mxu1 %vm1848_vm3, %v3550_v6 }
0x1292   : > { %12018 = vmatprep.mubr.msk.f32.mxu1 %vm13055_vm1, %v13053_v0  ;;  %12017 = vmatpush3.msk.msra.mxu1 %vm2186_vm8, %v3715_v7 }
0x1293   : > { %12459 = vmatprep.subr.bf16.mxu1 %v13054_v11 }
0x1360   : > { %v3468_v8 = vpop.f32.mrb[22].mxu1 }
0x1361   : > { %v12000_v9 = vpop.f32.mrb[23].mxu1  ;;  %12004 = vmatmul.mubr.msk.f32.vlgmr.msra.gmra.mrb[18].mxu0 %vm1848_vm3, %v3468_v8  ;;  %v11364_v8 = vld [vmem:[%s14707_s1] ss:$0 sm:$0xff]  ;;  %s14708_s1 = sld [smem:[#allocation27_spill]] }
0x1362   : > { %12013 = vmatprep.mubr.msk.f32.mxu0 %vm13055_vm1, %v13053_v0 }
0x1364   : > { %v3623_v10 = vpop.f32.mrb[24].mxu1 }
0x1365   : > { %v3624_v12 = vadd.f32 %v3623_v10, %v13458_v39  ;;  %v12010_v13 = vpop.f32.mrb[25].mxu1 }
0x1367   : > { %v3627_v14 = vsel %vm1924_vm6, %v3624_v12, -inf }
0x1368   : > { %3628 = vmax.xlane.f32.xlu1 %v3627_v14 }
0x1379   : > { %3638 = vrot.lane.b32.xlu1 %v13426_v26, %s14620_s18  ;;  %s13663_s18 = scalar_lea.vmem %s14704_s9, %s13399_s0  ;;  %s14736_s9 = smov 116  }
0x137a   : > { %v1719_v57 = vld [vmem:[%s13663_s18] sm:$0xff] }
0x13f5   : > { %v3629_v15 = vpop.xlane.xlu1 %3628 }
0x13f6   : > { %v3630_v16 = vsub.f32 %v3624_v12, %v3629_v15 }
0x13f8   : > { %v3631_v17 = vmul.f32 1.442695, %v3630_v16 }
0x13f9   : > { %v3639_v18 = vpop.permute.xlu1 %3638 }
0x13fa   : > { %12785 = vpow2.f32 %v3631_v17  ;;  %12012 = vmatpush3.msk.msra.mxu0 %vm1942_vm4, %v3639_v18 }
0x13fb   : > { %12453 = vmatprep.subr.bf16.mxu0 %v13054_v11 }
0x1404   : > { %v12786_v19 = vpop.eup %12785 }
0x1405   : > { %v3633_v20 = vsel %vm1924_vm6, %v12786_v19, 0.0 }
0x1406   : > { %3634 = vadd.xlane.f32.xlu0 %v3633_v20 }
0x1434   : > { %v3544_v21 = vpop.f32.mrb[18].mxu0 }
0x1435   : > { %v3548_v22 = vadd.f32 %v3544_v21, %v3305_v62  ;;  %v12005_v23 = vpop.f32.mrb[19].mxu0  ;;  %v11362_v62 = vld [vmem:[%s13169_s27] ss:$0 sm:$0xff] }
0x1493   : > { %v3635_v24 = vpop.xlane.xlu0 %3634 }
0x1494   : > { %12787 = vrcp.f32 %v3635_v24 }
0x149e   : > { %v12788_v26 = vpop.eup %12787 }
0x149f   : > { %v3637_v25 = vmul.f32 %v12788_v26, %v12786_v19 }
0x14a1   : > { %12014 = vmatmul.mubr.msk.f32.vlgmr.msra.gmra.mrb[20].mxu0 %vm1938_vm7, %v3637_v25 }
0x14a2   : > { %12029 = vmatprep.mubr.msk.f32.mxu0 %vm13055_vm1, %v13053_v0  ;;  %12455 = vmatpush3.bf16.msra.mxu0 %v12454_v50 }
0x14a3   : > { %12456 = vmatprep.subr.bf16.mxu0 %v13054_v11 }
0x14a6   : > { %12458 = vmatpush3.bf16.msra.mxu0 %v12457_v56 }
0x14a7   : > { %12043 = vmatprep.subr.mxu0 %v13053_v0 }
0x1574   : > { %v3711_v27 = vpop.f32.mrb[20].mxu0 }
0x1575   : > { %v12015_v28 = vpop.f32.mrb[21].mxu0  ;;  %12019 = vmatmul.mubr.msk.f32.vlgmr.msra.gmra.mrb[26].mxu1 %vm1848_vm3, %v3711_v27 }
0x1576   : > { %12040 = vmatprep.mubr.msk.f32.mxu1 %vm13055_vm1, %v13053_v0 }
0x1648   : > { %v3787_v31 = vpop.f32.mrb[26].mxu1 }
0x1649   : > { %v3791_v33 = vadd.f32 %v3787_v31, %v3548_v22  ;;  %v12020_v35 = vpop.f32.mrb[27].mxu1 }
0x164b   : > { %v3798_v37 = vadd.f32 %v11361_v30, %v3791_v33 }
0x164d   : > { %v13646_v38 = vadd.f32 %v3798_v37, %v13403_v1  ;;  %v1585_v1 = vld [vmem:[%s14692_s3] sm:$0xff]  ;;  %s14720_s3 = sld [smem:[#allocation22_spill]] }
0x164e   : > { %v12460_v47 = vpack.c.bf16 %v1586_v46, %v1585_v1  ;;  %v1589_v1 = vld [vmem:[%s14708_s1] sm:$0xff] }
0x164f   : > { %v3800_v40 = vsel %vm1735_vm0, %v13646_v38, 0.0  ;;  %v4317_v46 = vrot.slane %v1589_v1, 4 }
0x1650   : > { %3801 = vadd.xlane.f32.xlu1 %v3800_v40  ;;  %12461 = vmatpush3.bf16.msra.mxu1 %v12460_v47 }
0x1651   : > { %12462 = vmatprep.subr.bf16.mxu1 %v13054_v11 }
0x1654   : > { %12464 = vmatpush3.bf16.msra.mxu1 %v12463_v53 }
0x1655   : > { %12048 = vmatprep.subr.mxu1 %v13053_v0 }
0x1657   : > { %12041 = vmatmul.mubr.msk.f32.vlgmr.msra.gmra.mrb[28].mxu1 %vm1770_vm2, %v1719_v57 }
0x1658   : > { %12050 = vmatprep.mubr.msk.f32.mxu1 %vm13055_vm1, %v13053_v0 }
0x16dd   : > { %v3802_v41 = vpop.xlane.xlu1 %3801 }
0x16de   : > { %v3803_v42 = vmul.f32 0.03125, %v3802_v41 }
0x16e0   : > { %v3804_v43 = vsub.f32 %v13646_v38, %v3803_v42 }
0x16e2   : > { %v3805_v44 = vmul.f32 %v3804_v43, %v3804_v43 }
0x16e4   : > { %v3806_v45 = vsel %vm1735_vm0, %v3805_v44, 0.0 }
0x16e5   : > { %3807 = vadd.xlane.f32.xlu0 %v3806_v45 }
0x172a   : > { %v3982_v6 = vpop.f32.mrb[28].mxu1 }
0x172b   : > { %v13678_v29 = vadd.f32 %v11366_v5, %v3982_v6  ;;  %v12042_v7 = vpop.f32.mrb[29].mxu1 }
0x172d   : > { %4153 = vrot.lane.b32.xlu0 %v13678_v29, %s14635_s23 }
0x1772   : > { %v3808_v58 = vpop.xlane.xlu0 %3807 }
0x1773   : > { %v3809_v59 = vmul.f32 0.03125, %v3808_v58 }
0x1775   : > { %v3810_v60 = vadd.f32 1e-05, %v3809_v59 }
0x1777   : > { %12789 = vrsqrt.f32 %v3810_v60 }
0x1781   : > { %v12790_v61 = vpop.eup %12789 }
0x1782   : > { %v3812_v63 = vmul.f32 %v12790_v61, %v3804_v43 }
0x1784   : > { %v3819_v3 = vmul.f32 %v11362_v62, %v3812_v63 }
0x1786   : > { %v3826_v4 = vadd.f32 %v11363_v2, %v3819_v3 }
0x1788   : > { %12030 = vmatmul.mubr.msk.f32.vlgmr.msra.gmra.mrb[22].mxu0 %vm1770_vm2, %v3826_v4 }
0x1789   : > { %12045 = vmatprep.mubr.msk.f32.mxu0 %vm13055_vm1, %v13053_v0  ;;  %12044 = vmatpush3.xpose.msk.msra.mxu0 %vm1848_vm3, %v13678_v29 }
0x178a   : > { %12053 = vmatprep.subr.mxu0 %v13053_v0 }
0x179f   : > { %v4154_v14 = vpop.permute.xlu0 %4153 }
0x185b   : > { %v3902_v9 = vpop.f32.mrb[22].mxu0 }
0x185c   : > { %v3903_v10 = vadd.f32 %v11364_v8, %v3902_v9  ;;  %v12031_v12 = vpop.f32.mrb[23].mxu0 }
0x185e   : > { %v13686_v13 = vmul.f32 0.5, %v3903_v10  ;;  %v1590_v10 = vld [vmem:[%s14708_s1 + $0x8] sm:$0xff] }
0x185f   : > { %v4875_v12 = vrot.slane %v1590_v10, 4 }
0x1860   : > { %4151 = vrot.lane.b32.xlu1 %v13686_v13, %s14635_s23  ;;  %12046 = vmatmul.mubr.msk.f32.vlgmr.msra.gmra.mrb[24].mxu0 %vm1848_vm3, %v13686_v13  ;;  %s14715_s23 = smov 72  }
0x1861   : > { %12054 = vmatpush3.xpose.msk.msra.mxu0 %vm1848_vm3, %v4154_v14  ;;  %12055 = vmatprep.mubr.msk.f32.mxu0 %vm13055_vm1, %v13053_v0 }
0x1862   : > { %12063 = vmatprep.subr.mxu0 %v13053_v0 }
0x18d2   : > { %v4152_v15 = vpop.permute.xlu1 %4151 }
0x18d3   : > { %12056 = vmatmul.mubr.msk.f32.vlgmr.msra.gmra.mrb[26].mxu0 %vm1848_vm3, %v4152_v15 }
0x18d4   : > { %12065 = vmatprep.mubr.msk.f32.mxu0 %vm13055_vm1, %v13053_v0  ;;  %12064 = vmatpush3.msk.msra.mxu0 %vm2186_vm8, %v4317_v46 }
0x18d5   : > { %12073 = vmatprep.subr.mxu0 %v13053_v0 }
0x1933   : > { %v4058_v16 = vpop.f32.mrb[24].mxu0 }
0x1934   : > { %v12047_v17 = vpop.f32.mrb[25].mxu0  ;;  %v4063_v18 = vsel %vm4062_vm9, %v4058_v16, -inf }
0x1935   : > { %4064 = vmax.xlane.f32.xlu0 %v4063_v18 }
0x19a6   : > { %v4225_v19 = vpop.f32.mrb[26].mxu0 }
0x19a7   : > { %v12057_v20 = vpop.f32.mrb[27].mxu0  ;;  %v4229_v21 = vsel %vm4062_vm9, %v4225_v19, -inf }
0x19a8   : > { %4230 = vmax.xlane.f32.xlu1 %v4229_v21 }
0x19b9   : > { %4240 = vrot.lane.b32.xlu1 %v13678_v29, %s14639_s7  ;;  %s14717_s7 = sld [smem:[#allocation17_spill]] }
0x19c2   : > { %v4065_v22 = vpop.xlane.xlu0 %4064 }
0x19c3   : > { %v4066_v23 = vsub.f32 %v4058_v16, %v4065_v22 }
0x19c5   : > { %v4067_v24 = vmul.f32 1.442695, %v4066_v23 }
0x19c7   : > { %12791 = vpow2.f32 %v4067_v24 }
0x19d1   : > { %v12792_v26 = vpop.eup %12791 }
0x19d2   : > { %v4069_v25 = vsel %vm4062_vm9, %v12792_v26, 0.0 }
0x19d3   : > { %4070 = vadd.xlane.f32.xlu0 %v4069_v25 }
0x1a35   : > { %v4231_v27 = vpop.xlane.xlu1 %4230 }
0x1a36   : > { %v4232_v28 = vsub.f32 %v4225_v19, %v4231_v27 }
0x1a38   : > { %v4233_v30 = vmul.f32 1.442695, %v4232_v28 }
0x1a39   : > { %v4241_v43 = vpop.permute.xlu1 %4240 }
0x1a3a   : > { %12793 = vpow2.f32 %v4233_v30 }
0x1a44   : > { %v12794_v31 = vpop.eup %12793 }
0x1a45   : > { %v4235_v33 = vsel %vm4062_vm9, %v12794_v31, 0.0 }
0x1a46   : > { %4236 = vadd.xlane.f32.xlu0 %v4235_v33 }
0x1a5c   : > { %4074 = vrot.lane.b32.xlu0 %v13678_v29, %s14637_s2  ;;  %s14716_s2 = smov 68  }
0x1a60   : > { %4470 = vrot.lane.b32.xlu0 %v13678_v29, %s14633_s16  ;;  %v4071_v35 = vpop.xlane.xlu0 %4070 }
0x1a61   : > { %12795 = vrcp.f32 %v4071_v35 }
0x1a64   : > { %4468 = vrot.lane.b32.xlu0 %v13686_v13, %s14633_s16  ;;  %s14714_s16 = smov 100  }
0x1a6b   : > { %v12796_v40 = vpop.eup %12795 }
0x1a6c   : > { %v4073_v42 = vmul.f32 %v12796_v40, %v12792_v26 }
0x1ad3   : > { %v4237_v37 = vpop.xlane.xlu0 %4236 }
0x1ad4   : > { %12797 = vrcp.f32 %v4237_v37 }
0x1ad7   : > { %v4075_v41 = vpop.permute.xlu0 %4074 }
0x1ad8   : > { %12049 = vmatpush3.msra.mxu1 %v4075_v41 }
0x1ad9   : > { %12051 = vmatmul.mubr.msk.f32.vlgmr.msra.gmra.mrb[30].mxu1 %vm4077_vm10, %v4073_v42  ;;  %12058 = vmatprep.subr.mxu1 %v13053_v0 }
0x1ada   : > { %12059 = vmatpush3.msra.mxu1 %v4241_v43  ;;  %12060 = vmatprep.mubr.msk.f32.mxu1 %vm13055_vm1, %v13053_v0 }
0x1adb   : > { %12068 = vmatprep.subr.mxu1 %v13053_v0  ;;  %v4471_v49 = vpop.permute.xlu0 %4470 }
0x1ade   : > { %v12798_v44 = vpop.eup %12797 }
0x1adf   : > { %v4239_v45 = vmul.f32 %v12798_v44, %v12794_v31  ;;  %v4469_v52 = vpop.permute.xlu0 %4468 }
0x1ae1   : > { %12061 = vmatmul.mubr.msk.f32.vlgmr.msra.gmra.mrb[32].mxu1 %vm4077_vm10, %v4239_v45 }
0x1ae2   : > { %12070 = vmatprep.mubr.msk.f32.mxu1 %vm13055_vm1, %v13053_v0  ;;  %12069 = vmatpush3.msk.msra.mxu1 %vm2186_vm8, %v1589_v1 }
0x1ae3   : > { %12078 = vmatprep.subr.mxu1 %v13053_v0 }
0x1bac   : > { %v4147_v47 = vpop.f32.mrb[30].mxu1 }
0x1bad   : > { %v12052_v48 = vpop.f32.mrb[31].mxu1  ;;  %12071 = vmatmul.mubr.msk.f32.vlgmr.msra.gmra.mrb[34].mxu1 %vm1848_vm3, %v4147_v47 }
0x1bae   : > { %12080 = vmatprep.mubr.msk.f32.mxu1 %vm13055_vm1, %v13053_v0 }
0x1bb4   : > { %v4312_v50 = vpop.f32.mrb[32].mxu1 }
0x1bb5   : > { %v12062_v51 = vpop.f32.mrb[33].mxu1  ;;  %12066 = vmatmul.mubr.msk.f32.vlgmr.msra.gmra.mrb[28].mxu0 %vm1848_vm3, %v4312_v50 }
0x1bb6   : > { %12074 = vmatpush3.xpose.msk.msra.mxu0 %vm1848_vm3, %v4471_v49  ;;  %12075 = vmatprep.mubr.msk.f32.mxu0 %vm13055_vm1, %v13053_v0 }
0x1bb7   : > { %12083 = vmatprep.subr.mxu0 %v13053_v0 }
0x1bb9   : > { %12076 = vmatmul.mubr.msk.f32.vlgmr.msra.gmra.mrb[30].mxu0 %vm1848_vm3, %v4469_v52 }
0x1bba   : > { %12085 = vmatprep.mubr.msk.f32.mxu0 %vm13055_vm1, %v13053_v0  ;;  %12084 = vmatpush3.msk.msra.mxu0 %vm2186_vm8, %v1590_v10 }
0x1bbb   : > { %12093 = vmatprep.subr.mxu0 %v13053_v0 }
0x1c80   : > { %v4464_v53 = vpop.f32.mrb[34].mxu1 }
0x1c81   : > { %v12072_v54 = vpop.f32.mrb[35].mxu1 }
0x1c88   : > { %v4389_v55 = vpop.f32.mrb[28].mxu0 }
0x1c89   : > { %v4465_v56 = vadd.f32 %v4464_v53, %v4389_v55  ;;  %v12067_v57 = vpop.f32.mrb[29].mxu0 }
0x1c8a   : > { %v1591_v57 = vld [vmem:[%s14708_s1 + $0x10] sm:$0xff] }
0x1c8c   : > { %v4542_v58 = vpop.f32.mrb[30].mxu0 }
0x1c8d   : > { %v12077_v59 = vpop.f32.mrb[31].mxu0  ;;  %v4546_v60 = vsel %vm4062_vm9, %v4542_v58, -inf }
0x1c8e   : > { %4547 = vmax.xlane.f32.xlu1 %v4546_v60 }
0x1c9f   : > { %4712 = vrot.lane.b32.xlu1 %v13678_v29, %s14629_s28 }
0x1ca3   : > { %4710 = vrot.lane.b32.xlu1 %v13686_v13, %s14629_s28  ;;  %s14712_s28 = smov 76  }
0x1d1b   : > { %v4548_v61 = vpop.xlane.xlu1 %4547 }
0x1d1c   : > { %v4549_v62 = vsub.f32 %v4542_v58, %v4548_v61  ;;  %v5359_v58 = vrot.slane %v1591_v57, 4 }
0x1d1e   : > { %v4550_v63 = vmul.f32 1.442695, %v4549_v62 }
0x1d1f   : > { %v4713_v7 = vpop.permute.xlu1 %4712 }
0x1d20   : > { %12799 = vpow2.f32 %v4550_v63 }
0x1d23   : > { %v4711_v9 = vpop.permute.xlu1 %4710 }
0x1d2a   : > { %v12800_v2 = vpop.eup %12799 }
0x1d2b   : > { %v4552_v3 = vsel %vm4062_vm9, %v12800_v2, 0.0 }
0x1d2c   : > { %4553 = vadd.xlane.f32.xlu0 %v4552_v3 }
0x1d42   : > { %4557 = vrot.lane.b32.xlu0 %v13678_v29, %s14631_s15  ;;  %s14713_s15 = smov 104  }
0x1db9   : > { %v4554_v4 = vpop.xlane.xlu0 %4553 }
0x1dba   : > { %12801 = vrcp.f32 %v4554_v4 }
0x1dbd   : > { %v4558_v5 = vpop.permute.xlu0 %4557 }
0x1dbe   : > { %12079 = vmatpush3.msra.mxu1 %v4558_v5 }
0x1dbf   : > { %12088 = vmatprep.subr.mxu1 %v13053_v0 }
0x1dc4   : > { %v12802_v6 = vpop.eup %12801 }
0x1dc5   : > { %v4556_v8 = vmul.f32 %v12802_v6, %v12800_v2 }
0x1dc7   : > { %12081 = vmatmul.mubr.msk.f32.vlgmr.msra.gmra.mrb[36].mxu1 %vm4077_vm10, %v4556_v8 }
0x1dc8   : > { %12089 = vmatpush3.xpose.msk.msra.mxu1 %vm1848_vm3, %v4713_v7  ;;  %12090 = vmatprep.mubr.msk.f32.mxu1 %vm13055_vm1, %v13053_v0 }
0x1dc9   : > { %12098 = vmatprep.subr.mxu1 %v13053_v0 }
0x1dcb   : > { %12091 = vmatmul.mubr.msk.f32.vlgmr.msra.gmra.mrb[38].mxu1 %vm1848_vm3, %v4711_v9 }
0x1dcc   : > { %12100 = vmatprep.mubr.msk.f32.mxu1 %vm13055_vm1, %v13053_v0  ;;  %12099 = vmatpush3.msk.msra.mxu1 %vm2186_vm8, %v4875_v12 }
0x1dcd   : > { %12108 = vmatprep.subr.mxu1 %v13053_v0 }
0x1e9a   : > { %v4629_v14 = vpop.f32.mrb[36].mxu1 }
0x1e9b   : > { %v12082_v15 = vpop.f32.mrb[37].mxu1  ;;  %12086 = vmatmul.mubr.msk.f32.vlgmr.msra.gmra.mrb[32].mxu0 %vm1848_vm3, %v4629_v14 }
0x1e9c   : > { %12095 = vmatprep.mubr.msk.f32.mxu0 %vm13055_vm1, %v13053_v0 }
0x1e9e   : > { %v4784_v16 = vpop.f32.mrb[38].mxu1 }
0x1e9f   : > { %v12092_v17 = vpop.f32.mrb[39].mxu1  ;;  %v4788_v18 = vsel %vm4062_vm9, %v4784_v16, -inf }
0x1ea0   : > { %4789 = vmax.xlane.f32.xlu0 %v4788_v18 }
0x1eb6   : > { %4799 = vrot.lane.b32.xlu0 %v13678_v29, %s14627_s26  ;;  %s14711_s26 = smov 80  }
0x1eba   : > { %4952 = vrot.lane.b32.xlu0 %v13686_v13, %s14709_s11 }
0x1f2d   : > { %v4790_v19 = vpop.xlane.xlu0 %4789 }
0x1f2e   : > { %v4791_v20 = vsub.f32 %v4784_v16, %v4790_v19 }
0x1f30   : > { %v4792_v21 = vmul.f32 1.442695, %v4791_v20 }
0x1f31   : > { %v4800_v22 = vpop.permute.xlu0 %4799 }
0x1f32   : > { %12803 = vpow2.f32 %v4792_v21  ;;  %12094 = vmatpush3.msra.mxu0 %v4800_v22 }
0x1f33   : > { %12103 = vmatprep.subr.mxu0 %v13053_v0 }
0x1f35   : > { %v4953_v35 = vpop.permute.xlu0 %4952 }
0x1f3c   : > { %v12804_v23 = vpop.eup %12803 }
0x1f3d   : > { %v4794_v24 = vsel %vm4062_vm9, %v12804_v23, 0.0 }
0x1f3e   : > { %4795 = vadd.xlane.f32.xlu1 %v4794_v24 }
0x1f4f   : > { %4954 = vrot.lane.b32.xlu1 %v13678_v29, %s14709_s11 }
0x1f6e   : > { %v4705_v26 = vpop.f32.mrb[32].mxu0 }
0x1f6f   : > { %v4709_v25 = vadd.f32 %v4705_v26, %v4465_v56  ;;  %v12087_v27 = vpop.f32.mrb[33].mxu0 }
0x1fcb   : > { %v4796_v28 = vpop.xlane.xlu1 %4795 }
0x1fcc   : > { %12805 = vrcp.f32 %v4796_v28 }
0x1fcf   : > { %v4955_v33 = vpop.permute.xlu1 %4954 }
0x1fd6   : > { %v12806_v30 = vpop.eup %12805 }
0x1fd7   : > { %v4798_v31 = vmul.f32 %v12806_v30, %v12804_v23 }
0x1fd9   : > { %12096 = vmatmul.mubr.msk.f32.vlgmr.msra.gmra.mrb[34].mxu0 %vm4077_vm10, %v4798_v31 }
0x1fda   : > { %12104 = vmatpush3.xpose.msk.msra.mxu0 %vm1848_vm3, %v4955_v33  ;;  %12105 = vmatprep.mubr.msk.f32.mxu0 %vm13055_vm1, %v13053_v0 }
0x1fdb   : > { %12113 = vmatprep.subr.mxu0 %v13053_v0 }
0x1fdd   : > { %12106 = vmatmul.mubr.msk.f32.vlgmr.msra.gmra.mrb[36].mxu0 %vm1848_vm3, %v4953_v35 }
0x1fde   : > { %12115 = vmatprep.mubr.msk.f32.mxu0 %vm13055_vm1, %v13053_v0  ;;  %12114 = vmatpush3.msk.msra.mxu0 %vm2186_vm8, %v1591_v57 }
0x1fdf   : > { %12123 = vmatprep.subr.mxu0 %v13053_v0 }
0x20ac   : > { %v4871_v37 = vpop.f32.mrb[34].mxu0 }
0x20ad   : > { %v12097_v40 = vpop.f32.mrb[35].mxu0  ;;  %12101 = vmatmul.mubr.msk.f32.vlgmr.msra.gmra.mrb[40].mxu1 %vm1848_vm3, %v4871_v37 }
0x20ae   : > { %12110 = vmatprep.mubr.msk.f32.mxu1 %vm13055_vm1, %v13053_v0 }
0x20b0   : > { %v5026_v41 = vpop.f32.mrb[36].mxu0 }
0x20b1   : > { %v12107_v42 = vpop.f32.mrb[37].mxu0  ;;  %v5030_v43 = vsel %vm4062_vm9, %v5026_v41, -inf }
0x20b2   : > { %5031 = vmax.xlane.f32.xlu1 %v5030_v43  ;;  %v1592_v42 = vld [vmem:[%s14708_s1 + $0x18] sm:$0xff]  ;;  %s14718_s1 = sld [smem:[#allocation24_spill]] }
0x20b3   : > { %v5843_v43 = vrot.slane %v1592_v42, 4 }
0x20c3   : > { %5196 = vrot.lane.b32.xlu1 %v13678_v29, %s14710_s10 }
0x20c7   : > { %5194 = vrot.lane.b32.xlu1 %v13686_v13, %s14710_s10 }
0x213f   : > { %v5032_v44 = vpop.xlane.xlu1 %5031 }
0x2140   : > { %v5033_v45 = vsub.f32 %v5026_v41, %v5032_v44 }
0x2142   : > { %v5034_v1 = vmul.f32 1.442695, %v5033_v45 }
0x2143   : > { %v5197_v54 = vpop.permute.xlu1 %5196 }
0x2144   : > { %12807 = vpow2.f32 %v5034_v1 }
0x2147   : > { %v5195_v56 = vpop.permute.xlu1 %5194 }
0x214e   : > { %v12808_v46 = vpop.eup %12807 }
0x214f   : > { %v5036_v47 = vsel %vm4062_vm9, %v12808_v46, 0.0 }
0x2150   : > { %5037 = vadd.xlane.f32.xlu0 %v5036_v47 }
0x2166   : > { %5041 = vrot.lane.b32.xlu0 %v13678_v29, %s14711_s26 }
0x2180   : > { %v4947_v48 = vpop.f32.mrb[40].mxu1 }
0x2181   : > { %v4951_v49 = vadd.f32 %v4947_v48, %v4709_v25  ;;  %v12102_v50 = vpop.f32.mrb[41].mxu1 }
0x21dd   : > { %v5038_v51 = vpop.xlane.xlu0 %5037 }
0x21de   : > { %12809 = vrcp.f32 %v5038_v51 }
0x21e1   : > { %v5042_v52 = vpop.permute.xlu0 %5041 }
0x21e2   : > { %12109 = vmatpush3.msra.mxu1 %v5042_v52 }
0x21e3   : > { %12118 = vmatprep.subr.mxu1 %v13053_v0 }
0x21e8   : > { %v12810_v53 = vpop.eup %12809 }
0x21e9   : > { %v5040_v55 = vmul.f32 %v12810_v53, %v12808_v46 }
0x21eb   : > { %12111 = vmatmul.mubr.msk.f32.vlgmr.msra.gmra.mrb[42].mxu1 %vm4077_vm10, %v5040_v55 }
0x21ec   : > { %12119 = vmatpush3.xpose.msk.msra.mxu1 %vm1848_vm3, %v5197_v54  ;;  %12120 = vmatprep.mubr.msk.f32.mxu1 %vm13055_vm1, %v13053_v0 }
0x21ed   : > { %12128 = vmatprep.subr.mxu1 %v13053_v0 }
0x21ef   : > { %12121 = vmatmul.mubr.msk.f32.vlgmr.msra.gmra.mrb[44].mxu1 %vm1848_vm3, %v5195_v56 }
0x21f0   : > { %12130 = vmatprep.mubr.msk.f32.mxu1 %vm13055_vm1, %v13053_v0  ;;  %12129 = vmatpush3.msk.msra.mxu1 %vm2186_vm8, %v5359_v58 }
0x21f1   : > { %12138 = vmatprep.subr.mxu1 %v13053_v0 }
0x22be   : > { %v5113_v59 = vpop.f32.mrb[42].mxu1 }
0x22bf   : > { %v12112_v60 = vpop.f32.mrb[43].mxu1  ;;  %12116 = vmatmul.mubr.msk.f32.vlgmr.msra.gmra.mrb[38].mxu0 %vm1848_vm3, %v5113_v59 }
0x22c0   : > { %12125 = vmatprep.mubr.msk.f32.mxu0 %vm13055_vm1, %v13053_v0 }
0x22c2   : > { %v5268_v61 = vpop.f32.mrb[44].mxu1 }
0x22c3   : > { %v12122_v62 = vpop.f32.mrb[45].mxu1  ;;  %v5272_v63 = vsel %vm4062_vm9, %v5268_v61, -inf }
0x22c4   : > { %5273 = vmax.xlane.f32.xlu0 %v5272_v63 }
0x22da   : > { %5283 = vrot.lane.b32.xlu0 %v13678_v29, %s14712_s28 }
0x22de   : > { %5436 = vrot.lane.b32.xlu0 %v13686_v13, %s14713_s15 }
0x2351   : > { %v5274_v2 = vpop.xlane.xlu0 %5273 }
0x2352   : > { %v5275_v3 = vsub.f32 %v5268_v61, %v5274_v2  ;;  %v11408_v61 = vld [vmem:[%s14717_s7] ss:$0 sm:$0xff]  ;;  %s14719_s7 = sld [smem:[#allocation23_spill]] }
0x2354   : > { %v5276_v4 = vmul.f32 1.442695, %v5275_v3 }
0x2355   : > { %v5284_v5 = vpop.permute.xlu0 %5283 }
0x2356   : > { %12811 = vpow2.f32 %v5276_v4  ;;  %12124 = vmatpush3.msra.mxu0 %v5284_v5 }
0x2357   : > { %12133 = vmatprep.subr.mxu0 %v13053_v0 }
0x2359   : > { %v5437_v17 = vpop.permute.xlu0 %5436 }
0x2360   : > { %v12812_v6 = vpop.eup %12811 }
0x2361   : > { %v5278_v7 = vsel %vm4062_vm9, %v12812_v6, 0.0 }
0x2362   : > { %5279 = vadd.xlane.f32.xlu1 %v5278_v7 }
0x2373   : > { %5438 = vrot.lane.b32.xlu1 %v13678_v29, %s14713_s15 }
0x2392   : > { %v5189_v8 = vpop.f32.mrb[38].mxu0 }
0x2393   : > { %v5193_v9 = vadd.f32 %v5189_v8, %v4951_v49  ;;  %v12117_v10 = vpop.f32.mrb[39].mxu0 }
0x23ef   : > { %v5280_v12 = vpop.xlane.xlu1 %5279 }
0x23f0   : > { %12813 = vrcp.f32 %v5280_v12  ;;  %v1506_v12 = vld [vmem:[%s14718_s1 + $0x8] sm:$0xff] }
0x23f3   : > { %v5439_v16 = vpop.permute.xlu1 %5438 }
0x23fa   : > { %v12814_v14 = vpop.eup %12813 }
0x23fb   : > { %v5282_v15 = vmul.f32 %v12814_v14, %v12812_v6  ;;  %v1510_v14 = vld [vmem:[%s14718_s1 + $0x28] sm:$0xff] }
0x23fd   : > { %12126 = vmatmul.mubr.msk.f32.vlgmr.msra.gmra.mrb[40].mxu0 %vm4077_vm10, %v5282_v15  ;;  %v12465_v15 = vpack.c.bf16 %v1510_v14, %v1506_v12  ;;  %v1541_v12 = vld [vmem:[%s14721_s4 + $0xa0] sm:$0xff]  ;;  %v1542_v14 = vld [vmem:[%s14721_s4 + $0xa8] sm:$0xff] }
0x23fe   : > { %12134 = vmatpush3.xpose.msk.msra.mxu0 %vm1848_vm3, %v5439_v16  ;;  %12135 = vmatprep.mubr.msk.f32.mxu0 %vm13055_vm1, %v13053_v0  ;;  %v1512_v16 = vld [vmem:[%s14718_s1 + $0x38] sm:$0xff] }
0x23ff   : > { %12143 = vmatprep.subr.mxu0 %v13053_v0 }
0x2401   : > { %12136 = vmatmul.mubr.msk.f32.vlgmr.msra.gmra.mrb[42].mxu0 %vm1848_vm3, %v5437_v17  ;;  %v1505_v17 = vld [vmem:[%s14718_s1] sm:$0xff] }
0x2402   : > { %12145 = vmatprep.mubr.msk.f32.mxu0 %vm13055_vm1, %v13053_v0  ;;  %12144 = vmatpush3.msk.msra.mxu0 %vm2186_vm8, %v1592_v42 }
0x2403   : > { %12153 = vmatprep.subr.mxu0 %v13053_v0 }
0x24d0   : > { %v5355_v18 = vpop.f32.mrb[40].mxu0 }
0x24d1   : > { %v12127_v19 = vpop.f32.mrb[41].mxu0  ;;  %12131 = vmatmul.mubr.msk.f32.vlgmr.msra.gmra.mrb[46].mxu1 %vm1848_vm3, %v5355_v18  ;;  %v1509_v18 = vld [vmem:[%s14718_s1 + $0x20] sm:$0xff] }
0x24d2   : > { %12140 = vmatprep.mubr.msk.f32.mxu1 %vm13055_vm1, %v13053_v0 }
0x24d4   : > { %v5510_v20 = vpop.f32.mrb[42].mxu0 }
0x24d5   : > { %v12137_v21 = vpop.f32.mrb[43].mxu0  ;;  %v5514_v22 = vsel %vm4062_vm9, %v5510_v20, -inf }
0x24d6   : > { %5515 = vmax.xlane.f32.xlu1 %v5514_v22  ;;  %v1507_v21 = vld [vmem:[%s14718_s1 + $0x10] sm:$0xff] }
0x24d7   : > { %v1511_v22 = vld [vmem:[%s14718_s1 + $0x30] sm:$0xff] }
0x24e7   : > { %5680 = vrot.lane.b32.xlu1 %v13678_v29, %s14714_s16 }
0x24eb   : > { %5678 = vrot.lane.b32.xlu1 %v13686_v13, %s14714_s16 }
0x2563   : > { %v5516_v23 = vpop.xlane.xlu1 %5515 }
0x2564   : > { %v5517_v24 = vsub.f32 %v5510_v20, %v5516_v23  ;;  %v12467_v20 = vpack.c.bf16 %v1509_v18, %v1505_v17  ;;  %v12475_v23 = vpack.c.bf16 %v1511_v22, %v1507_v21  ;;  %v1525_v17 = vld [vmem:[%s14721_s4 + $0x20] sm:$0xff]  ;;  %v1526_v18 = vld [vmem:[%s14721_s4 + $0x28] sm:$0xff] }
0x2565   : > { %v1557_v21 = vld [vmem:[%s14721_s4 + $0x120] sm:$0xff]  ;;  %v1558_v22 = vld [vmem:[%s14721_s4 + $0x128] sm:$0xff] }
0x2566   : > { %v5518_v26 = vmul.f32 1.442695, %v5517_v24  ;;  %v1514_v24 = vld [vmem:[%s14718_s1 + $0x48] sm:$0xff] }
0x2567   : > { %v5681_v37 = vpop.permute.xlu1 %5680 }
0x2568   : > { %12815 = vpow2.f32 %v5518_v26  ;;  %v1518_v26 = vld [vmem:[%s14718_s1 + $0x68] sm:$0xff] }
0x256b   : > { %v5679_v41 = vpop.permute.xlu1 %5678 }
0x2572   : > { %v12816_v25 = vpop.eup %12815 }
0x2573   : > { %v5520_v27 = vsel %vm4062_vm9, %v12816_v25, 0.0 }
0x2574   : > { %5521 = vadd.xlane.f32.xlu0 %v5520_v27  ;;  %v12469_v27 = vpack.c.bf16 %v1518_v26, %v1514_v24  ;;  %v1543_v24 = vld [vmem:[%s14721_s4 + $0xb0] sm:$0xff]  ;;  %v1544_v26 = vld [vmem:[%s14721_s4 + $0xb8] sm:$0xff] }
0x258a   : > { %5525 = vrot.lane.b32.xlu0 %v13678_v29, %s14715_s23 }
0x25a4   : > { %v5431_v28 = vpop.f32.mrb[46].mxu1 }
0x25a5   : > { %v5435_v30 = vadd.f32 %v5431_v28, %v5193_v9  ;;  %v12132_v31 = vpop.f32.mrb[47].mxu1  ;;  %v1520_v28 = vld [vmem:[%s14718_s1 + $0x78] sm:$0xff] }
0x25a6   : > { %v1517_v31 = vld [vmem:[%s14718_s1 + $0x60] sm:$0xff] }
0x2601   : > { %v5522_v33 = vpop.xlane.xlu0 %5521 }
0x2602   : > { %12817 = vrcp.f32 %v5522_v33 }
0x2605   : > { %v5526_v35 = vpop.permute.xlu0 %5525 }
0x2606   : > { %12139 = vmatpush3.msra.mxu1 %v5526_v35 }
0x2607   : > { %12148 = vmatprep.subr.mxu1 %v13053_v0 }
0x260c   : > { %v12818_v13 = vpop.eup %12817 }
0x260d   : > { %v5524_v40 = vmul.f32 %v12818_v13, %v12816_v25  ;;  %v1516_v25 = vld [vmem:[%s14718_s1 + $0x58] sm:$0xff]  ;;  %v1515_v13 = vld [vmem:[%s14718_s1 + $0x50] sm:$0xff] }
0x260e   : > { %v12477_v33 = vpack.c.bf16 %v1520_v28, %v1516_v25  ;;  %v1575_v25 = vld [vmem:[%s14721_s4 + $0x1b0] sm:$0xff]  ;;  %v1576_v28 = vld [vmem:[%s14721_s4 + $0x1b8] sm:$0xff] }
0x260f   : > { %12141 = vmatmul.mubr.msk.f32.vlgmr.msra.gmra.mrb[48].mxu1 %vm4077_vm10, %v5524_v40 }
0x2610   : > { %12149 = vmatpush3.xpose.msk.msra.mxu1 %vm1848_vm3, %v5681_v37  ;;  %12150 = vmatprep.mubr.msk.f32.mxu1 %vm13055_vm1, %v13053_v0  ;;  %v1519_v37 = vld [vmem:[%s14718_s1 + $0x70] sm:$0xff] }
0x2611   : > { %12158 = vmatprep.subr.mxu1 %v13053_v0  ;;  %v12479_v40 = vpack.c.bf16 %v1519_v37, %v1515_v13  ;;  %v1559_v13 = vld [vmem:[%s14721_s4 + $0x130] sm:$0xff]  ;;  %v1560_v37 = vld [vmem:[%s14721_s4 + $0x138] sm:$0xff] }
0x2613   : > { %12151 = vmatmul.mubr.msk.f32.vlgmr.msra.gmra.mrb[50].mxu1 %vm1848_vm3, %v5679_v41 }
0x2614   : > { %12160 = vmatprep.mubr.msk.f32.mxu1 %vm13055_vm1, %v13053_v0  ;;  %12159 = vmatpush3.msk.msra.mxu1 %vm2186_vm8, %v5843_v43 }
0x26e2   : > { %v5597_v44 = vpop.f32.mrb[48].mxu1 }
0x26e3   : > { %v12142_v45 = vpop.f32.mrb[49].mxu1  ;;  %12146 = vmatmul.mubr.msk.f32.vlgmr.msra.gmra.mrb[44].mxu0 %vm1848_vm3, %v5597_v44 }
0x26e4   : > { %12155 = vmatprep.mubr.msk.f32.mxu0 %vm13055_vm1, %v13053_v0  ;;  %v11409_v45 = vld [vmem:[%s14719_s7] ss:$0 sm:$0xff]  ;;  %s14723_s7 = sld [smem:[#allocation15_spill]] }
0x26e6   : > { %v5752_v1 = vpop.f32.mrb[50].mxu1 }
0x26e7   : > { %v12152_v46 = vpop.f32.mrb[51].mxu1  ;;  %v5756_v47 = vsel %vm4062_vm9, %v5752_v1, -inf }
0x26e8   : > { %5757 = vmax.xlane.f32.xlu0 %v5756_v47  ;;  %v11410_v46 = vld [vmem:[%s14720_s3] ss:$0 sm:$0xff]  ;;  %s14722_s3 = sld [smem:[#allocation14_spill]] }
0x26fe   : > { %5767 = vrot.lane.b32.xlu0 %v13678_v29, %s14716_s2 }
0x2775   : > { %v5758_v48 = vpop.xlane.xlu0 %5757 }
0x2776   : > { %v5759_v49 = vsub.f32 %v5752_v1, %v5758_v48 }
0x2778   : > { %v5760_v50 = vmul.f32 1.442695, %v5759_v49  ;;  %v1537_v49 = vld [vmem:[%s14721_s4 + $0x80] sm:$0xff] }
0x2779   : > { %v5768_v51 = vpop.permute.xlu0 %5767 }
0x277a   : > { %12819 = vpow2.f32 %v5760_v50  ;;  %12154 = vmatpush3.msra.mxu0 %v5768_v51  ;;  %v1538_v50 = vld [vmem:[%s14721_s4 + $0x88] sm:$0xff]  ;;  %v1569_v51 = vld [vmem:[%s14721_s4 + $0x180] sm:$0xff] }
0x277b   : > { %12466 = vmatprep.subr.bf16.mxu0 %v12465_v15  ;;  %v12489_v15 = vpack.c.bf16 %v1542_v14, %v1541_v12  ;;  %v1565_v12 = vld [vmem:[%s14721_s4 + $0x160] sm:$0xff]  ;;  %v1566_v14 = vld [vmem:[%s14721_s4 + $0x168] sm:$0xff] }
0x2784   : > { %v12820_v52 = vpop.eup %12819 }
0x2785   : > { %v5762_v53 = vsel %vm4062_vm9, %v12820_v52, 0.0 }
0x2786   : > { %5763 = vadd.xlane.f32.xlu1 %v5762_v53  ;;  %v1570_v53 = vld [vmem:[%s14721_s4 + $0x188] sm:$0xff] }
0x27b6   : > { %v5673_v54 = vpop.f32.mrb[44].mxu0 }
0x27b7   : > { %v5677_v55 = vadd.f32 %v5673_v54, %v5435_v30  ;;  %v12147_v56 = vpop.f32.mrb[45].mxu0  ;;  %v1513_v30 = vld [vmem:[%s14718_s1 + $0x40] sm:$0xff] }
0x27b8   : > { %v12471_v35 = vpack.c.bf16 %v1517_v31, %v1513_v30  ;;  %v1521_v54 = vld [vmem:[%s14721_s4] sm:$0xff]  ;;  %v12513_v56 = vpack.c.bf16 %v1570_v53, %v1569_v51  ;;  %v1527_v30 = vld [vmem:[%s14721_s4 + $0x30] sm:$0xff]  ;;  %v1528_v31 = vld [vmem:[%s14721_s4 + $0x38] sm:$0xff] }
0x27b9   : > { %v1548_v53 = vld [vmem:[%s14721_s4 + $0xd8] sm:$0xff] }
0x2813   : > { %v5764_v57 = vpop.xlane.xlu1 %5763 }
0x2814   : > { %12821 = vrcp.f32 %v5764_v57 }
0x281e   : > { %v12822_v58 = vpop.eup %12821 }
0x281f   : > { %v5766_v59 = vmul.f32 %v12822_v58, %v12820_v52  ;;  %v12481_v52 = vpack.c.bf16 %v1538_v50, %v1537_v49  ;;  %v1553_v58 = vld [vmem:[%s14721_s4 + $0x100] sm:$0xff]  ;;  %v1562_v50 = vld [vmem:[%s14721_s4 + $0x148] sm:$0xff] }
0x2820   : > { %v1561_v49 = vld [vmem:[%s14721_s4 + $0x140] sm:$0xff] }
0x2821   : > { %12156 = vmatmul.mubr.msk.f32.vlgmr.msra.gmra.mrb[46].mxu0 %vm4077_vm10, %v5766_v59  ;;  %v1554_v59 = vld [vmem:[%s14721_s4 + $0x108] sm:$0xff]  ;;  %v12531_v51 = vpack.c.bf16 %v1562_v50, %v1561_v49 }
0x2822   : > { %6043 = vmatprep.mubr.f32.mxu0 %v13053_v0  ;;  %12468 = vmatpush1.bf16.msra.mxu0 %v12467_v20  ;;  %v12491_v20 = vpack.c.bf16 %v1526_v18, %v1525_v17  ;;  %v1583_v17 = vld [vmem:[%s14721_s4 + $0x1f0] sm:$0xff] }
0x2823   : > { %12470 = vmatprep.subr.bf16.mxu0 %v12469_v27  ;;  %v12493_v27 = vpack.c.bf16 %v1544_v26, %v1543_v24  ;;  %v1567_v24 = vld [vmem:[%s14721_s4 + $0x170] sm:$0xff]  ;;  %v1568_v26 = vld [vmem:[%s14721_s4 + $0x178] sm:$0xff] }
0x2826   : > { %12472 = vmatpush1.bf16.msra.mxu0 %v12471_v35  ;;  %v12495_v35 = vpack.c.bf16 %v1528_v31, %v1527_v30  ;;  %v5962_v30 = vsub.s32 1, %v13447_v32  ;;  %v5970_v31 = vsub.s32 3, %v13447_v32 }
0x2827   : > { %12482 = vmatprep.subr.bf16.mxu0 %v12481_v52  ;;  %v1547_v52 = vld [vmem:[%s14721_s4 + $0xd0] sm:$0xff] }
0x28f4   : > { %v5839_v29 = vpop.f32.mrb[46].mxu0 }
0x28f5   : > { %v12157_v60 = vpop.f32.mrb[47].mxu0  ;;  %12161 = vmatmul.mubr.msk.f32.vlgmr.msra.gmra.mrb[52].mxu1 %vm1848_vm3, %v5839_v29  ;;  %v12515_v29 = vpack.c.bf16 %v1554_v59, %v1553_v58  ;;  %v1532_v58 = vld [vmem:[%s14721_s4 + $0x58] sm:$0xff] }
0x28f6   : > { %6114 = vmatprep.mubr.f32.mxu1 %v13053_v0  ;;  %v1539_v60 = vld [vmem:[%s14721_s4 + $0x90] sm:$0xff] }
0x29c8   : > { %v5915_v62 = vpop.f32.mrb[52].mxu1 }
0x29c9   : > { %v5919_v63 = vadd.f32 %v5915_v62, %v5677_v55  ;;  %v12162_v2 = vpop.f32.mrb[53].mxu1  ;;  %v1522_v55 = vld [vmem:[%s14721_s4 + $0x8] sm:$0xff]  ;;  %v1571_v62 = vld [vmem:[%s14721_s4 + $0x190] sm:$0xff] }
0x29ca   : > { %v12483_v57 = vpack.c.bf16 %v1522_v55, %v1521_v54  ;;  %v1572_v2 = vld [vmem:[%s14721_s4 + $0x198] sm:$0xff]  ;;  %v1579_v54 = vld [vmem:[%s14721_s4 + $0x1d0] sm:$0xff]  ;;  %v12501_v55 = vpack.c.bf16 %v1548_v53, %v1547_v52 }
0x29cb   : > { %v5926_v3 = vadd.f32 %v11408_v61, %v5919_v63  ;;  %v1540_v61 = vld [vmem:[%s14721_s4 + $0x98] sm:$0xff] }
0x29cc   : > { %v12485_v63 = vpack.c.bf16 %v1540_v61, %v1539_v60  ;;  %v1563_v60 = vld [vmem:[%s14721_s4 + $0x150] sm:$0xff]  ;;  %v1564_v61 = vld [vmem:[%s14721_s4 + $0x158] sm:$0xff] }
0x29cd   : > { %v13859_v4 = vadd.f32 %v5926_v3, %v13646_v38  ;;  %v1508_v38 = vld [vmem:[%s14718_s1 + $0x18] sm:$0xff]  ;;  %v1523_v3 = vld [vmem:[%s14721_s4 + $0x10] sm:$0xff]  ;;  %s14726_s1 = sld [smem:[#allocation36_spill]] }
0x29ce   : > { %v12473_v19 = vpack.c.bf16 %v1512_v16, %v1508_v38  ;;  %v1573_v38 = vld [vmem:[%s14721_s4 + $0x1a0] sm:$0xff]  ;;  %v1574_v16 = vld [vmem:[%s14721_s4 + $0x1a8] sm:$0xff] }
0x29cf   : > { %v5928_v5 = vsel %vm1735_vm0, %v13859_v4, 0.0 }
0x29d0   : > { %5929 = vadd.xlane.f32.xlu1 %v5928_v5  ;;  %12474 = vmatprep.subr.bf16.mxu1 %v12473_v19  ;;  %v1524_v5 = vld [vmem:[%s14721_s4 + $0x18] sm:$0xff]  ;;  %v12521_v19 = vpack.c.bf16 %v1574_v16, %v1573_v38  ;;  %v12539_v38 = vpack.c.bf16 %v1566_v14, %v1565_v12 }
0x29d1   : > { %12476 = vmatpush1.bf16.msra.mxu1 %v12475_v23  ;;  %v12523_v23 = vpack.c.bf16 %v1558_v22, %v1557_v21  ;;  %v1552_v16 = vld [vmem:[%s14721_s4 + $0xf8] sm:$0xff] }
0x29d2   : > { %12478 = vmatprep.subr.bf16.mxu1 %v12477_v33  ;;  %v12525_v33 = vpack.c.bf16 %v1576_v28, %v1575_v25  ;;  %v1536_v21 = vld [vmem:[%s14721_s4 + $0x78] sm:$0xff]  ;;  %v12543_v25 = vpack.c.bf16 %v1568_v26, %v1567_v24  ;;  %v1492_v28 = vld [vmem:[%s14722_s3] sm:$0xf]  ;;  %s14724_s3 = sld [smem:[#allocation38_spill]] }
0x29d5   : > { %12480 = vmatpush1.bf16.msra.mxu1 %v12479_v40  ;;  %v12527_v40 = vpack.c.bf16 %v1560_v37, %v1559_v13  ;;  %v5963_v13 = vrot.slane %v1492_v28, %v5962_v30  ;;  %v5971_v37 = vrot.slane %v1492_v28, %v5970_v31 }
0x29d6   : > { %12514 = vmatprep.subr.bf16.mxu1 %v12513_v56  ;;  %v1580_v56 = vld [vmem:[%s14721_s4 + $0x1d8] sm:$0xff] }
0x29d7   : > { %v12533_v59 = vpack.c.bf16 %v1580_v56, %v1579_v54 }
0x2a5d   : > { %v5930_v6 = vpop.xlane.xlu1 %5929 }
0x2a5e   : > { %v5931_v7 = vmul.f32 0.03125, %v5930_v6  ;;  %v12517_v6 = vpack.c.bf16 %v1572_v2, %v1571_v62  ;;  %v12535_v62 = vpack.c.bf16 %v1564_v61, %v1563_v60  ;;  %v1550_v2 = vld [vmem:[%s14721_s4 + $0xe8] sm:$0xff] }
0x2a60   : > { %v5932_v8 = vsub.f32 %v13859_v4, %v5931_v7  ;;  %v12487_v7 = vpack.c.bf16 %v1524_v5, %v1523_v3  ;;  %v1581_v3 = vld [vmem:[%s14721_s4 + $0x1e0] sm:$0xff] }
0x2a62   : > { %v5933_v9 = vmul.f32 %v5932_v8, %v5932_v8 }
0x2a64   : > { %v5934_v10 = vsel %vm1735_vm0, %v5933_v9, 0.0  ;;  %v1556_v9 = vld [vmem:[%s14721_s4 + $0x118] sm:$0xff] }
0x2a65   : > { %5935 = vadd.xlane.f32.xlu1 %v5934_v10 }
0x2af2   : > { %v5936_v41 = vpop.xlane.xlu1 %5935 }
0x2af3   : > { %v5937_v42 = vmul.f32 0.03125, %v5936_v41  ;;  %v1545_v41 = vld [vmem:[%s14721_s4 + $0xc0] sm:$0xff] }
0x2af5   : > { %v5938_v43 = vadd.f32 1e-05, %v5937_v42  ;;  %v1546_v42 = vld [vmem:[%s14721_s4 + $0xc8] sm:$0xff] }
0x2af7   : > { %12823 = vrsqrt.f32 %v5938_v43  ;;  %v1577_v43 = vld [vmem:[%s14721_s4 + $0x1c0] sm:$0xff] }
0x2b01   : > { %v12824_v44 = vpop.eup %12823 }
0x2b02   : > { %v5940_v1 = vmul.f32 %v12824_v44, %v5932_v8  ;;  %v1555_v8 = vld [vmem:[%s14721_s4 + $0x110] sm:$0xff]  ;;  %v12497_v44 = vpack.c.bf16 %v1546_v42, %v1545_v41 }
0x2b03   : > { %v12519_v10 = vpack.c.bf16 %v1556_v9, %v1555_v8  ;;  %v1534_v8 = vld [vmem:[%s14721_s4 + $0x68] sm:$0xff] }
0x2b04   : > { %v5947_v47 = vmul.f32 %v11409_v45, %v5940_v1  ;;  %v1578_v45 = vld [vmem:[%s14721_s4 + $0x1c8] sm:$0xff]  ;;  %v1529_v1 = vld [vmem:[%s14721_s4 + $0x40] sm:$0xff] }
0x2b06   : > { %v5954_v48 = vadd.f32 %v11410_v46, %v5947_v47  ;;  %v1530_v46 = vld [vmem:[%s14721_s4 + $0x48] sm:$0xff]  ;;  %v12529_v47 = vpack.c.bf16 %v1578_v45, %v1577_v43 }
0x2b08   : > { %11411 = vmatmul.mubr.msk.f32.vlgmr.msra.gmra.mrb[48].mxu0 %vm1770_vm2, %v5954_v48  ;;  %11412 = vmatmul.mubr.msk.f32.vlgmr.msra.gmra.mrb[54].mxu1 %vm1770_vm2, %v5954_v48  ;;  %v12499_v48 = vpack.c.bf16 %v1530_v46, %v1529_v1 }
0x2b09   : > { %12484 = vmatpush3.bf16.msra.mxu0 %v12483_v57  ;;  %12516 = vmatpush3.bf16.msra.mxu1 %v12515_v29  ;;  %v1531_v57 = vld [vmem:[%s14721_s4 + $0x50] sm:$0xff] }
0x2b0a   : > { %12486 = vmatprep.subr.bf16.mxu0 %v12485_v63  ;;  %12518 = vmatprep.subr.bf16.mxu1 %v12517_v6  ;;  %v12503_v29 = vpack.c.bf16 %v1532_v58, %v1531_v57  ;;  %v1549_v63 = vld [vmem:[%s14721_s4 + $0xe0] sm:$0xff]  ;;  %v1582_v6 = vld [vmem:[%s14721_s4 + $0x1e8] sm:$0xff] }
0x2b0b   : > { %v12505_v5 = vpack.c.bf16 %v1550_v2, %v1549_v63  ;;  %v12537_v9 = vpack.c.bf16 %v1582_v6, %v1581_v3 }
0x2b0d   : > { %12488 = vmatpush3.bf16.msra.mxu0 %v12487_v7  ;;  %12520 = vmatpush3.bf16.msra.mxu1 %v12519_v10  ;;  %v1533_v7 = vld [vmem:[%s14721_s4 + $0x60] sm:$0xff] }
0x2b0e   : > { %12490 = vmatprep.subr.bf16.mxu0 %v12489_v15  ;;  %12522 = vmatprep.subr.bf16.mxu1 %v12521_v19  ;;  %v12507_v10 = vpack.c.bf16 %v1534_v8, %v1533_v7  ;;  %v1551_v15 = vld [vmem:[%s14721_s4 + $0xf0] sm:$0xff]  ;;  %v1584_v19 = vld [vmem:[%s14721_s4 + $0x1f8] sm:$0xff] }
0x2b0f   : > { %v12509_v18 = vpack.c.bf16 %v1552_v16, %v1551_v15  ;;  %v12541_v22 = vpack.c.bf16 %v1584_v19, %v1583_v17 }
0x2b11   : > { %12492 = vmatpush3.bf16.msra.mxu0 %v12491_v20  ;;  %12524 = vmatpush3.bf16.msra.mxu1 %v12523_v23  ;;  %v1535_v20 = vld [vmem:[%s14721_s4 + $0x70] sm:$0xff]  ;;  %s14727_s4 = smov 92  }
0x2b12   : > { %12494 = vmatprep.subr.bf16.mxu0 %v12493_v27  ;;  %12526 = vmatprep.subr.bf16.mxu1 %v12525_v33  ;;  %v12511_v23 = vpack.c.bf16 %v1536_v21, %v1535_v20  ;;  %v5966_v27 = vsub.s32 2, %v13447_v32  ;;  %v5959_v33 = vrot.slane %v1492_v28, %v13452_v36 }
0x2b15   : > { %12496 = vmatpush3.bf16.msra.mxu0 %v12495_v35  ;;  %12528 = vmatpush3.bf16.msra.mxu1 %v12527_v40  ;;  %v5967_v35 = vrot.slane %v1492_v28, %v5966_v27 }
0x2b16   : > { %12498 = vmatprep.subr.bf16.mxu0 %v12497_v44  ;;  %12530 = vmatprep.subr.bf16.mxu1 %v12529_v47 }
0x2b19   : > { %12500 = vmatpush3.bf16.msra.mxu0 %v12499_v48  ;;  %12532 = vmatpush3.bf16.msra.mxu1 %v12531_v51 }
0x2b1a   : > { %12502 = vmatprep.subr.bf16.mxu0 %v12501_v55  ;;  %12534 = vmatprep.subr.bf16.mxu1 %v12533_v59 }
0x2b1d   : > { %12504 = vmatpush3.bf16.msra.mxu0 %v12503_v29  ;;  %12536 = vmatpush3.bf16.msra.mxu1 %v12535_v62 }
0x2b1e   : > { %12506 = vmatprep.subr.bf16.mxu0 %v12505_v5  ;;  %12538 = vmatprep.subr.bf16.mxu1 %v12537_v9 }
0x2b21   : > { %12508 = vmatpush3.bf16.msra.mxu0 %v12507_v10  ;;  %12540 = vmatpush3.bf16.msra.mxu1 %v12539_v38 }
0x2b22   : > { %12510 = vmatprep.subr.bf16.mxu0 %v12509_v18  ;;  %12542 = vmatprep.subr.bf16.mxu1 %v12541_v22 }
0x2b25   : > { %12512 = vmatpush3.bf16.msra.mxu0 %v12511_v23  ;;  %12544 = vmatpush3.bf16.msra.mxu1 %v12543_v25 }
0x2b26   : > { %12545 = vmatprep.subr.bf16.mxu0 %v13054_v11  ;;  %12174 = vmatprep.subr.mxu1 %v13053_v0 }
0x2bdb   : > { %v6045_v40 = vpop.f32.mrb[48].mxu0  ;;  %v6116_v41 = vpop.f32.mrb[54].mxu1 }
0x2bdc   : > { %v13962_v42 = vadd.f32 %v6045_v40, %v5959_v33  ;;  %v13964_v43 = vadd.f32 %v6116_v41, %v5967_v35  ;;  %v6047_v44 = vpop.f32.mrb[49].mxu0  ;;  %v6118_v45 = vpop.f32.mrb[55].mxu1 }
0x2bdd   : > { %v13966_v1 = vadd.f32 %v6047_v44, %v5963_v13  ;;  %v13968_v46 = vadd.f32 %v6118_v45, %v5971_v37 }
0x2bde   : > { %v13971_v47 = vmul.f32 0.70710677, %v13962_v42  ;;  %v13974_v48 = vmul.f32 0.70710677, %v13964_v43 }
0x2bdf   : > { %v13977_v49 = vmul.f32 0.70710677, %v13966_v1  ;;  %v13983_v53 = vmul.f32 0.70710677, %v13968_v46 }
0x2be0   : > { %v6137_v50 = vand.u32 2147483647, %v13971_v47  ;;  %v6139_v51 = vand.u32 2147483647, %v13974_v48  ;;  %vm6129_vm11 = vcmp.ge.f32.partialorder %v13971_v47, 0.0  ;;  %vm6131_vm12 = vcmp.ge.f32.partialorder %v13974_v48, 0.0 }
0x2be1   : > { %v6138_v52 = vand.u32 2147483647, %v13977_v49  ;;  %v6140_v59 = vand.u32 2147483647, %v13983_v53  ;;  %vm6130_vm13 = vcmp.ge.f32.partialorder %v13977_v49, 0.0  ;;  %vm6132_vm14 = vcmp.ge.f32.partialorder %v13983_v53, 0.0 }
0x2be2   : > { %v6141_v54 = vmul.f32 0.3275911, %v6137_v50  ;;  %v6143_v55 = vmul.f32 0.3275911, %v6139_v51  ;;  %v6193_v62 = vmul.f32 %v6137_v50, %v6137_v50  ;;  %v6195_v63 = vmul.f32 %v6139_v51, %v6139_v51 }
0x2be3   : > { %v6142_v56 = vmul.f32 0.3275911, %v6138_v52  ;;  %v6144_v60 = vmul.f32 0.3275911, %v6140_v59  ;;  %v6194_v5 = vmul.f32 %v6138_v52, %v6138_v52  ;;  %v6196_v10 = vmul.f32 %v6140_v59, %v6140_v59 }
0x2be4   : > { %v6145_v57 = vadd.f32 1.0, %v6141_v54  ;;  %v6147_v58 = vadd.f32 1.0, %v6143_v55  ;;  %v6197_v3 = vsub.f32 0.0, %v6193_v62  ;;  %v6199_v8 = vsub.f32 0.0, %v6195_v63 }
0x2be5   : > { %v6146_v29 = vadd.f32 1.0, %v6142_v56  ;;  %v6148_v61 = vadd.f32 1.0, %v6144_v60  ;;  %v6198_v16 = vsub.f32 0.0, %v6194_v5  ;;  %v6200_v22 = vsub.f32 0.0, %v6196_v10 }
0x2be6   : > { %12825 = vrcp.f32 %v6145_v57  ;;  %v6201_v38 = vmul.f32 1.442695, %v6197_v3  ;;  %v6205_v18 = vmul.f32 1.442695, %v6199_v8  ;;  %v6122_v49 = vmul.f32 0.5, %v13966_v1 }
0x2be7   : > { %12827 = vrcp.f32 %v6147_v58  ;;  %v6203_v28 = vmul.f32 1.442695, %v6198_v16  ;;  %v6207_v40 = vmul.f32 1.442695, %v6200_v22  ;;  %v6124_v53 = vmul.f32 0.5, %v13968_v46 }
0x2be8   : > { %12829 = vrcp.f32 %v6146_v29  ;;  %v11413_v1 = vld [vmem:[%s14723_s7] ss:$0 sm:$0xff]  ;;  %s14725_s7 = sld [smem:[#allocation37_spill]] }
0x2be9   : > { %12831 = vrcp.f32 %v6148_v61 }
0x2bea   : > { %12833 = vpow2.f32 %v6201_v38 }
0x2beb   : > { %12835 = vpow2.f32 %v6205_v18 }
0x2bec   : > { %12837 = vpow2.f32 %v6203_v28 }
0x2bed   : > { %12839 = vpow2.f32 %v6207_v40 }
0x2bf0   : > { %v12826_v2 = vpop.eup %12825 }
0x2bf1   : > { %v12828_v6 = vpop.eup %12827  ;;  %v6157_v7 = vmul.f32 1.0614054, %v12826_v2 }
0x2bf2   : > { %v6159_v9 = vmul.f32 1.0614054, %v12828_v6  ;;  %v12830_v14 = vpop.eup %12829 }
0x2bf3   : > { %v6161_v12 = vadd.f32 -1.4531521, %v6157_v7  ;;  %v6158_v19 = vmul.f32 1.0614054, %v12830_v14  ;;  %v12832_v20 = vpop.eup %12831 }
0x2bf4   : > { %v6163_v15 = vadd.f32 -1.4531521, %v6159_v9  ;;  %v6160_v26 = vmul.f32 1.0614054, %v12832_v20  ;;  %v12834_v62 = vpop.eup %12833 }
0x2bf5   : > { %v6165_v17 = vmul.f32 %v12826_v2, %v6161_v12  ;;  %v6162_v24 = vadd.f32 -1.4531521, %v6158_v19  ;;  %v12836_v3 = vpop.eup %12835 }
0x2bf6   : > { %v6167_v21 = vmul.f32 %v12828_v6, %v6163_v15  ;;  %v6164_v13 = vadd.f32 -1.4531521, %v6160_v26  ;;  %v12838_v15 = vpop.eup %12837 }
0x2bf7   : > { %v6169_v23 = vadd.f32 1.4214138, %v6165_v17  ;;  %v6166_v35 = vmul.f32 %v12830_v14, %v6162_v24  ;;  %v13079_v17 = vmov -1.0   ;;  %v12840_v19 = vpop.eup %12839 }
0x2bf8   : > { %v6171_v25 = vadd.f32 1.4214138, %v6167_v21  ;;  %v6168_v45 = vmul.f32 %v12832_v20, %v6164_v13  ;;  %v6135_v22 = vsel %vm6131_vm12, 1.0, %v13079_v17  ;;  %v6134_v24 = vsel %vm6130_vm13, 1.0, %v13079_v17 }
0x2bf9   : > { %v6173_v33 = vmul.f32 %v12826_v2, %v6169_v23  ;;  %v6170_v44 = vadd.f32 1.4214138, %v6166_v35  ;;  %v6136_v28 = vsel %vm6132_vm14, 1.0, %v13079_v17  ;;  %v6121_v35 = vmul.f32 0.5, %v13962_v42 }
0x2bfa   : > { %v6175_v37 = vmul.f32 %v12828_v6, %v6171_v25  ;;  %v6172_v54 = vadd.f32 1.4214138, %v6168_v45 }
0x2bfb   : > { %v6177_v41 = vadd.f32 -0.28449672, %v6173_v33  ;;  %v6174_v52 = vmul.f32 %v12830_v14, %v6170_v44  ;;  %v6123_v44 = vmul.f32 0.5, %v13964_v43 }
0x2bfc   : > { %v6179_v50 = vadd.f32 -0.28449672, %v6175_v37  ;;  %v6176_v58 = vmul.f32 %v12832_v20, %v6172_v54 }
0x2bfd   : > { %v6181_v51 = vmul.f32 %v12826_v2, %v6177_v41  ;;  %v6178_v57 = vadd.f32 -0.28449672, %v6174_v52 }
0x2bfe   : > { %v6183_v55 = vmul.f32 %v12828_v6, %v6179_v50  ;;  %v6180_v61 = vadd.f32 -0.28449672, %v6176_v58 }
0x2bff   : > { %v6185_v56 = vadd.f32 0.2548296, %v6181_v51  ;;  %v6182_v60 = vmul.f32 %v12830_v14, %v6178_v57 }
0x2c00   : > { %v6187_v59 = vadd.f32 0.2548296, %v6183_v55  ;;  %v6184_v8 = vmul.f32 %v12832_v20, %v6180_v61 }
0x2c01   : > { %v6189_v29 = vmul.f32 %v12826_v2, %v6185_v56  ;;  %v6186_v7 = vadd.f32 0.2548296, %v6182_v60  ;;  %v6133_v2 = vsel %vm6129_vm11, 1.0, %v13079_v17 }
0x2c02   : > { %v6191_v63 = vmul.f32 %v12828_v6, %v6187_v59  ;;  %v6188_v38 = vadd.f32 0.2548296, %v6184_v8 }
0x2c03   : > { %v6209_v5 = vmul.f32 %v12834_v62, %v6189_v29  ;;  %v6190_v12 = vmul.f32 %v12830_v14, %v6186_v7  ;;  %v1716_v7 = vld [vmem:[%s14690_s8 + $0x10] sm:$0xff] }
0x2c04   : > { %v6211_v9 = vmul.f32 %v12836_v3, %v6191_v63  ;;  %v6192_v18 = vmul.f32 %v12832_v20, %v6188_v38  ;;  %v1714_v63 = vld [vmem:[%s14690_s8] sm:$0xff]  ;;  %v1715_v3 = vld [vmem:[%s14690_s8 + $0x8] sm:$0xff] }
0x2c05   : > { %v6213_v10 = vsub.f32 1.0, %v6209_v5  ;;  %v6210_v6 = vmul.f32 %v12838_v15, %v6190_v12  ;;  %v12546_v5 = vpack.c.bf16 %v1715_v3, %v1714_v63  ;;  %v11414_v15 = vld [vmem:[%s14724_s3] ss:$0 sm:$0xff]  ;;  %s14729_s3 = smov 124  }
0x2c06   : > { %v6215_v16 = vsub.f32 1.0, %v6211_v9  ;;  %v6212_v14 = vmul.f32 %v12840_v19, %v6192_v18  ;;  %v11416_v19 = vld [vmem:[%s14726_s1] ss:$0 sm:$0xff]  ;;  %s14730_s1 = smov 60  }
0x2c07   : > { %v6217_v21 = vmul.f32 %v6213_v10, %v6133_v2  ;;  %v6214_v47 = vsub.f32 1.0, %v6210_v6  ;;  %v11415_v2 = vld [vmem:[%s14725_s7] ss:$0 sm:$0xff]  ;;  %s14731_s7 = smov 120  }
0x2c08   : > { %v6219_v23 = vmul.f32 %v6215_v16, %v6135_v22  ;;  %v6216_v26 = vsub.f32 1.0, %v6212_v14 }
0x2c09   : > { %v6218_v48 = vmul.f32 %v6214_v47, %v6134_v24  ;;  %v6221_v25 = vadd.f32 1.0, %v6217_v21 }
0x2c0a   : > { %v6220_v20 = vmul.f32 %v6216_v26, %v6136_v28  ;;  %v6223_v13 = vadd.f32 1.0, %v6219_v23 }
0x2c0b   : > { %v6222_v33 = vadd.f32 1.0, %v6218_v48  ;;  %v6225_v41 = vmul.f32 %v6221_v25, %v6121_v35 }
0x2c0c   : > { %v6224_v40 = vadd.f32 1.0, %v6220_v20  ;;  %v6227_v50 = vmul.f32 %v6223_v13, %v6123_v44 }
0x2c0d   : > { %v6226_v37 = vmul.f32 %v6222_v33, %v6122_v49 }
0x2c0e   : > { %v6228_v45 = vmul.f32 %v6224_v40, %v6124_v53 }
0x2c0f   : > { %6299 = vmatprep.mubr.f32.mxu0 %v6226_v37 }
0x2c10   : > { %6300 = vmatmul.mubr.f32.vlgmr.msra.gmra.mrb[50].mxu0 %v6225_v41  ;;  %6369 = vmatprep.mubr.f32.mxu1 %v6228_v45 }
0x2c11   : > { %12171 = vmatprep.mubr.msk.f32.mxu0 %vm13055_vm1, %v13053_v0  ;;  %6370 = vmatmul.mubr.f32.vlgmr.msra.gmra.mrb[56].mxu1 %v6227_v50 }
0x2c12   : > { %12176 = vmatprep.mubr.msk.f32.mxu1 %vm13055_vm1, %v13053_v0  ;;  %12547 = vmatpush3.bf16.msra.mxu0 %v12546_v5 }
0x2c13   : > { %12548 = vmatprep.subr.bf16.mxu0 %v13054_v11 }
0x2ce3   : > { %v11666_v42 = vpop.f32.mrb[50].mxu0 }
0x2ce4   : > { %v11667_v46 = vpop.f32.mrb[51].mxu0  ;;  %v11701_v51 = vpop.f32.mrb[56].mxu1 }
0x2ce5   : > { %v11668_v52 = vadd.f32 %v11667_v46, %v11666_v42  ;;  %v11702_v43 = vpop.f32.mrb[57].mxu1 }
0x2ce6   : > { %v11703_v55 = vadd.f32 %v11702_v43, %v11701_v51  ;;  %v1706_v51 = vld [vmem:[%s14732_s6] sm:$0xff] }
0x2ce7   : > { %v6302_v54 = vadd.f32 %v11668_v52, %v11413_v1  ;;  %v6816_v52 = vrot.slane %v1706_v51, 4 }
0x2ce9   : > { %v6372_v56 = vadd.f32 %v11703_v55, %v6302_v54 }
0x2ceb   : > { %v14004_v57 = vadd.f32 %v6372_v56, %v13859_v4  ;;  %v1717_v4 = vld [vmem:[%s14690_s8 + $0x18] sm:$0xff]  ;;  %s14734_s8 = smov 88  }
0x2cec   : > { %v12549_v8 = vpack.c.bf16 %v1717_v4, %v1716_v7 }
0x2ced   : > { %v6376_v58 = vsel %vm1735_vm0, %v14004_v57, 0.0 }
0x2cee   : > { %6377 = vadd.xlane.f32.xlu1 %v6376_v58  ;;  %12550 = vmatpush3.bf16.msra.mxu0 %v12549_v8 }
0x2cef   : > { %12184 = vmatprep.subr.mxu0 %v13053_v0 }
0x2d7b   : > { %v6378_v59 = vpop.xlane.xlu1 %6377 }
0x2d7c   : > { %v6379_v29 = vmul.f32 0.03125, %v6378_v59 }
0x2d7e   : > { %v6380_v60 = vsub.f32 %v14004_v57, %v6379_v29 }
0x2d80   : > { %v6381_v61 = vmul.f32 %v6380_v60, %v6380_v60 }
0x2d82   : > { %v6382_v62 = vsel %vm1735_vm0, %v6381_v61, 0.0 }
0x2d83   : > { %6383 = vadd.xlane.f32.xlu1 %v6382_v62 }
0x2e10   : > { %v6384_v9 = vpop.xlane.xlu1 %6383 }
0x2e11   : > { %v6385_v10 = vmul.f32 0.03125, %v6384_v9 }
0x2e13   : > { %v6386_v12 = vadd.f32 1e-05, %v6385_v10 }
0x2e15   : > { %12841 = vrsqrt.f32 %v6386_v12 }
0x2e1f   : > { %v12842_v38 = vpop.eup %12841 }
0x2e20   : > { %v6388_v16 = vmul.f32 %v12842_v38, %v6380_v60 }
0x2e22   : > { %v6395_v6 = vmul.f32 %v11414_v15, %v6388_v16 }
0x2e24   : > { %v6402_v18 = vadd.f32 %v11415_v2, %v6395_v6 }
0x2e26   : > { %12172 = vmatmul.mubr.msk.f32.vlgmr.msra.gmra.mrb[52].mxu0 %vm1770_vm2, %v6402_v18 }
0x2e27   : > { %12186 = vmatprep.mubr.msk.f32.mxu0 %vm13055_vm1, %v13053_v0 }
0x2ef9   : > { %v6478_v21 = vpop.f32.mrb[52].mxu0 }
0x2efa   : > { %v14022_v22 = vadd.f32 %v11416_v19, %v6478_v21  ;;  %v12173_v47 = vpop.f32.mrb[53].mxu0 }
0x2efc   : > { %6651 = vrot.lane.b32.xlu1 %v14022_v22, %s14727_s4  ;;  %6484 = vrot.lane.b32.xlu0 %v14022_v22, %s14728_s5  ;;  %v14029_v14 = vmul.f32 0.5, %v14022_v22 }
0x2f00   : > { %6649 = vrot.lane.b32.xlu0 %v14029_v14, %s14729_s3 }
0x2f6e   : > { %v6652_v23 = vpop.permute.xlu1 %6651  ;;  %v6485_v24 = vpop.permute.xlu0 %6484 }
0x2f6f   : > { %12175 = vmatpush3.xpose.msk.msra.mxu1 %vm1848_vm3, %v6485_v24  ;;  %12185 = vmatpush3.xpose.msk.msra.mxu0 %vm1848_vm3, %v6652_v23 }
0x2f70   : > { %12179 = vmatprep.subr.mxu1 %v13053_v0  ;;  %12194 = vmatprep.subr.mxu0 %v13053_v0 }
0x2f72   : > { %v6650_v48 = vpop.permute.xlu0 %6649  ;;  %12177 = vmatmul.mubr.msk.f32.vlgmr.msra.gmra.mrb[58].mxu1 %vm1848_vm3, %v14029_v14 }
0x2f73   : > { %12187 = vmatmul.mubr.msk.f32.vlgmr.msra.gmra.mrb[54].mxu0 %vm1848_vm3, %v6650_v48  ;;  %12181 = vmatprep.mubr.msk.f32.mxu1 %vm13055_vm1, %v13053_v0 }
0x2f74   : > { %12196 = vmatprep.mubr.msk.f32.mxu0 %vm13055_vm1, %v13053_v0  ;;  %12195 = vmatpush3.msk.msra.mxu0 %vm2186_vm8, %v6816_v52 }
0x2f75   : > { %12204 = vmatprep.subr.mxu0 %v13053_v0 }
0x3045   : > { %v6557_v26 = vpop.f32.mrb[58].mxu1 }
0x3046   : > { %v6558_v25 = vadd.f32 %v6557_v26, %v13458_v39  ;;  %v12178_v28 = vpop.f32.mrb[59].mxu1  ;;  %v6723_v49 = vpop.f32.mrb[54].mxu0 }
0x3047   : > { %v6724_v33 = vadd.f32 %v6723_v49, %v13458_v39  ;;  %v12188_v20 = vpop.f32.mrb[55].mxu0  ;;  %v1707_v49 = vld [vmem:[%s14732_s6 + $0x8] sm:$0xff] }
0x3048   : > { %v6561_v35 = vsel %vm1924_vm6, %v6558_v25, -inf }
0x3049   : > { %6562 = vmax.xlane.f32.xlu0 %v6561_v35  ;;  %v6727_v13 = vsel %vm1924_vm6, %v6724_v33, -inf }
0x304a   : > { %6728 = vmax.xlane.f32.xlu1 %v6727_v13 }
0x305b   : > { %6738 = vrot.lane.b32.xlu1 %v14022_v22, %s14730_s1  ;;  %s14733_s1 = smov 64  }
0x305f   : > { %6967 = vrot.lane.b32.xlu1 %v14029_v14, %s14731_s7 }
0x30d6   : > { %v6563_v53 = vpop.xlane.xlu0 %6562 }
0x30d7   : > { %v6564_v37 = vsub.f32 %v6558_v25, %v6563_v53  ;;  %v6729_v40 = vpop.xlane.xlu1 %6728 }
0x30d8   : > { %v6730_v41 = vsub.f32 %v6724_v33, %v6729_v40  ;;  %v7376_v33 = vrot.slane %v1707_v49, 4 }
0x30d9   : > { %v6565_v44 = vmul.f32 1.442695, %v6564_v37 }
0x30da   : > { %v6731_v45 = vmul.f32 1.442695, %v6730_v41 }
0x30db   : > { %12843 = vpow2.f32 %v6565_v44  ;;  %v6739_v59 = vpop.permute.xlu1 %6738 }
0x30dc   : > { %12845 = vpow2.f32 %v6731_v45 }
0x30df   : > { %v6968_v7 = vpop.permute.xlu1 %6967 }
0x30e5   : > { %v12844_v50 = vpop.eup %12843 }
0x30e6   : > { %v6567_v42 = vsel %vm1924_vm6, %v12844_v50, 0.0  ;;  %v12846_v1 = vpop.eup %12845 }
0x30e7   : > { %6568 = vadd.xlane.f32.xlu0 %v6567_v42  ;;  %v6733_v46 = vsel %vm1924_vm6, %v12846_v1, 0.0 }
0x30eb   : > { %6734 = vadd.xlane.f32.xlu0 %v6733_v46 }
0x3101   : > { %6572 = vrot.lane.b32.xlu0 %v14022_v22, %s14733_s1  ;;  %s14735_s1 = smov 56  }
0x3105   : > { %6969 = vrot.lane.b32.xlu0 %v14022_v22, %s14734_s8 }
0x3174   : > { %v6569_v43 = vpop.xlane.xlu0 %6568 }
0x3175   : > { %12847 = vrcp.f32 %v6569_v43 }
0x3178   : > { %v6735_v54 = vpop.xlane.xlu0 %6734 }
0x3179   : > { %12849 = vrcp.f32 %v6735_v54 }
0x317c   : > { %v6573_v55 = vpop.permute.xlu0 %6572 }
0x317d   : > { %12180 = vmatpush3.msk.msra.mxu1 %vm1942_vm4, %v6573_v55 }
0x317e   : > { %12189 = vmatprep.subr.mxu1 %v13053_v0 }
0x317f   : > { %v12848_v56 = vpop.eup %12847 }
0x3180   : > { %v6571_v58 = vmul.f32 %v12848_v56, %v12844_v50  ;;  %v6970_v3 = vpop.permute.xlu0 %6969 }
0x3182   : > { %12182 = vmatmul.mubr.msk.f32.vlgmr.msra.gmra.mrb[60].mxu1 %vm1938_vm7, %v6571_v58 }
0x3183   : > { %v12850_v29 = vpop.eup %12849  ;;  %12190 = vmatpush3.msk.msra.mxu1 %vm1942_vm4, %v6739_v59  ;;  %12191 = vmatprep.mubr.msk.f32.mxu1 %vm13055_vm1, %v13053_v0 }
0x3184   : > { %v6737_v60 = vmul.f32 %v12850_v29, %v12846_v1  ;;  %12199 = vmatprep.subr.mxu1 %v13053_v0 }
0x3186   : > { %12192 = vmatmul.mubr.msk.f32.vlgmr.msra.gmra.mrb[62].mxu1 %vm1938_vm7, %v6737_v60 }
0x3187   : > { %12200 = vmatpush3.msk.msra.mxu1 %vm2186_vm8, %v1706_v51  ;;  %12201 = vmatprep.mubr.msk.f32.mxu1 %vm13055_vm1, %v13053_v0 }
0x3188   : > { %12209 = vmatprep.subr.mxu1 %v13053_v0 }
0x3255   : > { %v6645_v61 = vpop.f32.mrb[60].mxu1 }
0x3256   : > { %v12183_v62 = vpop.f32.mrb[61].mxu1  ;;  %12202 = vmatmul.mubr.msk.f32.vlgmr.msra.gmra.mrb[64].mxu1 %vm1848_vm3, %v6645_v61 }
0x3257   : > { %12211 = vmatprep.mubr.msk.f32.mxu1 %vm13055_vm1, %v13053_v0 }
0x3259   : > { %v6811_v63 = vpop.f32.mrb[62].mxu1 }
0x325a   : > { %v12193_v5 = vpop.f32.mrb[63].mxu1  ;;  %12197 = vmatmul.mubr.msk.f32.vlgmr.msra.gmra.mrb[56].mxu0 %vm1848_vm3, %v6811_v63 }
0x325b   : > { %12205 = vmatpush3.xpose.msk.msra.mxu0 %vm1848_vm3, %v6970_v3  ;;  %12206 = vmatprep.mubr.msk.f32.mxu0 %vm13055_vm1, %v13053_v0 }
0x325c   : > { %12214 = vmatprep.subr.mxu0 %v13053_v0 }
0x325e   : > { %12207 = vmatmul.mubr.msk.f32.vlgmr.msra.gmra.mrb[58].mxu0 %vm1848_vm3, %v6968_v7 }
0x325f   : > { %12216 = vmatprep.mubr.msk.f32.mxu0 %vm13055_vm1, %v13053_v0  ;;  %12215 = vmatpush3.msk.msra.mxu0 %vm2186_vm8, %v1707_v49 }
0x3260   : > { %12224 = vmatprep.subr.mxu0 %v13053_v0 }
0x3329   : > { %v6963_v4 = vpop.f32.mrb[64].mxu1 }
0x332a   : > { %v12203_v8 = vpop.f32.mrb[65].mxu1 }
0x332d   : > { %v6888_v9 = vpop.f32.mrb[56].mxu0 }
0x332e   : > { %v6964_v10 = vadd.f32 %v6963_v4, %v6888_v9  ;;  %v12198_v12 = vpop.f32.mrb[57].mxu0 }
0x3331   : > { %v7041_v38 = vpop.f32.mrb[58].mxu0 }
0x3332   : > { %v7042_v15 = vadd.f32 %v7041_v38, %v13458_v39  ;;  %v12208_v16 = vpop.f32.mrb[59].mxu0 }
0x3334   : > { %v7045_v2 = vsel %vm1924_vm6, %v7042_v15, -inf }
0x3335   : > { %7046 = vmax.xlane.f32.xlu0 %v7045_v2 }
0x334b   : > { %7056 = vrot.lane.b32.xlu0 %v14022_v22, %s14735_s1  ;;  %s14738_s1 = smov 52  }
0x334f   : > { %7210 = vrot.lane.b32.xlu0 %v14029_v14, %s14736_s9 }
0x33c2   : > { %v7047_v6 = vpop.xlane.xlu0 %7046 }
0x33c3   : > { %v7048_v18 = vsub.f32 %v7042_v15, %v7047_v6 }
0x33c5   : > { %v7049_v19 = vmul.f32 1.442695, %v7048_v18 }
0x33c6   : > { %v7057_v21 = vpop.permute.xlu0 %7056 }
0x33c7   : > { %12851 = vpow2.f32 %v7049_v19  ;;  %12210 = vmatpush3.msk.msra.mxu1 %vm1942_vm4, %v7057_v21  ;;  %v1708_v19 = vld [vmem:[%s14732_s6 + $0x10] sm:$0xff] }
0x33c8   : > { %12219 = vmatprep.subr.mxu1 %v13053_v0  ;;  %v7862_v21 = vrot.slane %v1708_v19, 4 }
0x33ca   : > { %v7211_v28 = vpop.permute.xlu0 %7210 }
0x33d1   : > { %v12852_v47 = vpop.eup %12851 }
0x33d2   : > { %v7051_v23 = vsel %vm1924_vm6, %v12852_v47, 0.0 }
0x33d3   : > { %7052 = vadd.xlane.f32.xlu1 %v7051_v23 }
0x33e4   : > { %7212 = vrot.lane.b32.xlu1 %v14022_v22, %s14737_s12 }
0x3460   : > { %v7053_v24 = vpop.xlane.xlu1 %7052 }
0x3461   : > { %12853 = vrcp.f32 %v7053_v24 }
0x3464   : > { %v7213_v25 = vpop.permute.xlu1 %7212 }
0x346b   : > { %v12854_v48 = vpop.eup %12853 }
0x346c   : > { %v7055_v26 = vmul.f32 %v12854_v48, %v12852_v47 }
0x346e   : > { %12212 = vmatmul.mubr.msk.f32.vlgmr.msra.gmra.mrb[66].mxu1 %vm1938_vm7, %v7055_v26 }
0x346f   : > { %12220 = vmatpush3.xpose.msk.msra.mxu1 %vm1848_vm3, %v7213_v25  ;;  %12221 = vmatprep.mubr.msk.f32.mxu1 %vm13055_vm1, %v13053_v0 }
0x3470   : > { %12229 = vmatprep.subr.mxu1 %v13053_v0 }
0x3472   : > { %12222 = vmatmul.mubr.msk.f32.vlgmr.msra.gmra.mrb[68].mxu1 %vm1848_vm3, %v7211_v28 }
0x3473   : > { %12231 = vmatprep.mubr.msk.f32.mxu1 %vm13055_vm1, %v13053_v0  ;;  %12230 = vmatpush3.msk.msra.mxu1 %vm2186_vm8, %v7376_v33 }
0x3474   : > { %12239 = vmatprep.subr.mxu1 %v13053_v0 }
0x3541   : > { %v7129_v20 = vpop.f32.mrb[66].mxu1 }
0x3542   : > { %v12213_v35 = vpop.f32.mrb[67].mxu1  ;;  %12217 = vmatmul.mubr.msk.f32.vlgmr.msra.gmra.mrb[60].mxu0 %vm1848_vm3, %v7129_v20 }
0x3543   : > { %12226 = vmatprep.mubr.msk.f32.mxu0 %vm13055_vm1, %v13053_v0 }
0x3545   : > { %v7284_v13 = vpop.f32.mrb[68].mxu1 }
0x3546   : > { %v7285_v53 = vadd.f32 %v7284_v13, %v13458_v39  ;;  %v12223_v37 = vpop.f32.mrb[69].mxu1 }
0x3548   : > { %v7288_v40 = vsel %vm1924_vm6, %v7285_v53, -inf }
0x3549   : > { %7289 = vmax.xlane.f32.xlu1 %v7288_v40 }
0x355a   : > { %7455 = vrot.lane.b32.xlu1 %v14022_v22, %s14711_s26 }
0x355e   : > { %7453 = vrot.lane.b32.xlu1 %v14029_v14, %s14709_s11 }
0x35d6   : > { %v7290_v41 = vpop.xlane.xlu1 %7289 }
0x35d7   : > { %v7291_v44 = vsub.f32 %v7285_v53, %v7290_v41 }
0x35d9   : > { %v7292_v45 = vmul.f32 1.442695, %v7291_v44 }
0x35da   : > { %v7456_v55 = vpop.permute.xlu1 %7455 }
0x35db   : > { %12855 = vpow2.f32 %v7292_v45 }
0x35de   : > { %v7454_v58 = vpop.permute.xlu1 %7453 }
0x35e5   : > { %v12856_v50 = vpop.eup %12855 }
0x35e6   : > { %v7294_v42 = vsel %vm1924_vm6, %v12856_v50, 0.0 }
0x35e7   : > { %7295 = vadd.xlane.f32.xlu0 %v7294_v42 }
0x35fd   : > { %7299 = vrot.lane.b32.xlu0 %v14022_v22, %s14738_s1  ;;  %s14739_s1 = smov 48  }
0x3615   : > { %v7205_v1 = vpop.f32.mrb[60].mxu0 }
0x3616   : > { %v7209_v46 = vadd.f32 %v7205_v1, %v6964_v10  ;;  %v12218_v51 = vpop.f32.mrb[61].mxu0 }
0x3674   : > { %v7296_v52 = vpop.xlane.xlu0 %7295 }
0x3675   : > { %12857 = vrcp.f32 %v7296_v52 }
0x3678   : > { %v7300_v43 = vpop.permute.xlu0 %7299 }
0x3679   : > { %12225 = vmatpush3.msk.msra.mxu0 %vm1942_vm4, %v7300_v43 }
0x367a   : > { %12234 = vmatprep.subr.mxu0 %v13053_v0 }
0x367f   : > { %v12858_v54 = vpop.eup %12857 }
0x3680   : > { %v7298_v56 = vmul.f32 %v12858_v54, %v12856_v50 }
0x3682   : > { %12227 = vmatmul.mubr.msk.f32.vlgmr.msra.gmra.mrb[62].mxu0 %vm1938_vm7, %v7298_v56 }
0x3683   : > { %12235 = vmatpush3.xpose.msk.msra.mxu0 %vm1848_vm3, %v7456_v55  ;;  %12236 = vmatprep.mubr.msk.f32.mxu0 %vm13055_vm1, %v13053_v0 }
0x3684   : > { %12244 = vmatprep.subr.mxu0 %v13053_v0 }
0x3686   : > { %12237 = vmatmul.mubr.msk.f32.vlgmr.msra.gmra.mrb[64].mxu0 %vm1848_vm3, %v7454_v58 }
0x3687   : > { %12246 = vmatprep.mubr.msk.f32.mxu0 %vm13055_vm1, %v13053_v0  ;;  %12245 = vmatpush3.msk.msra.mxu0 %vm2186_vm8, %v1708_v19 }
0x3688   : > { %12254 = vmatprep.subr.mxu0 %v13053_v0 }
0x3755   : > { %v7372_v59 = vpop.f32.mrb[62].mxu0 }
0x3756   : > { %v12228_v29 = vpop.f32.mrb[63].mxu0  ;;  %12232 = vmatmul.mubr.msk.f32.vlgmr.msra.gmra.mrb[70].mxu1 %vm1848_vm3, %v7372_v59 }
0x3757   : > { %12241 = vmatprep.mubr.msk.f32.mxu1 %vm13055_vm1, %v13053_v0 }
0x3759   : > { %v7527_v60 = vpop.f32.mrb[64].mxu0 }
0x375a   : > { %v7528_v61 = vadd.f32 %v7527_v60, %v13458_v39  ;;  %v12238_v62 = vpop.f32.mrb[65].mxu0 }
0x375c   : > { %v7531_v63 = vsel %vm1924_vm6, %v7528_v61, -inf }
0x375d   : > { %7532 = vmax.xlane.f32.xlu0 %v7531_v63 }
0x3773   : > { %7542 = vrot.lane.b32.xlu0 %v14022_v22, %s14739_s1  ;;  %s14740_s1 = smov 44  }
0x3777   : > { %7696 = vrot.lane.b32.xlu0 %v14029_v14, %s14710_s10 }
0x37ea   : > { %v7533_v3 = vpop.xlane.xlu0 %7532 }
0x37eb   : > { %v7534_v5 = vsub.f32 %v7528_v61, %v7533_v3 }
0x37ed   : > { %v7535_v7 = vmul.f32 1.442695, %v7534_v5 }
0x37ee   : > { %v7543_v4 = vpop.permute.xlu0 %7542 }
0x37ef   : > { %12859 = vpow2.f32 %v7535_v7  ;;  %12240 = vmatpush3.msk.msra.mxu1 %vm1942_vm4, %v7543_v4 }
0x37f0   : > { %12249 = vmatprep.subr.mxu1 %v13053_v0 }
0x37f2   : > { %v7697_v18 = vpop.permute.xlu0 %7696 }
0x37f9   : > { %v12860_v8 = vpop.eup %12859 }
0x37fa   : > { %v7537_v9 = vsel %vm1924_vm6, %v12860_v8, 0.0 }
0x37fb   : > { %7538 = vadd.xlane.f32.xlu1 %v7537_v9 }
0x380c   : > { %7698 = vrot.lane.b32.xlu1 %v14022_v22, %s14712_s28 }
0x3829   : > { %v7448_v10 = vpop.f32.mrb[70].mxu1 }
0x382a   : > { %v7452_v12 = vadd.f32 %v7448_v10, %v7209_v46  ;;  %v12233_v38 = vpop.f32.mrb[71].mxu1 }
0x3888   : > { %v7539_v15 = vpop.xlane.xlu1 %7538 }
0x3889   : > { %12861 = vrcp.f32 %v7539_v15 }
0x388c   : > { %v7699_v6 = vpop.permute.xlu1 %7698 }
0x3893   : > { %v12862_v16 = vpop.eup %12861 }
0x3894   : > { %v7541_v2 = vmul.f32 %v12862_v16, %v12860_v8  ;;  %v1709_v8 = vld [vmem:[%s14732_s6 + $0x18] sm:$0xff]  ;;  %s14743_s6 = sld [smem:[#allocation34_spill]] }
0x3895   : > { %v8348_v9 = vrot.slane %v1709_v8, 4 }
0x3896   : > { %12242 = vmatmul.mubr.msk.f32.vlgmr.msra.gmra.mrb[72].mxu1 %vm1938_vm7, %v7541_v2 }
0x3897   : > { %12250 = vmatpush3.xpose.msk.msra.mxu1 %vm1848_vm3, %v7699_v6  ;;  %12251 = vmatprep.mubr.msk.f32.mxu1 %vm13055_vm1, %v13053_v0 }
0x3898   : > { %12259 = vmatprep.subr.mxu1 %v13053_v0 }
0x389a   : > { %12252 = vmatmul.mubr.msk.f32.vlgmr.msra.gmra.mrb[74].mxu1 %vm1848_vm3, %v7697_v18 }
0x389b   : > { %12261 = vmatprep.mubr.msk.f32.mxu1 %vm13055_vm1, %v13053_v0  ;;  %12260 = vmatpush3.msk.msra.mxu1 %vm2186_vm8, %v7862_v21 }
0x389c   : > { %12269 = vmatprep.subr.mxu1 %v13053_v0 }
0x3969   : > { %v7615_v47 = vpop.f32.mrb[72].mxu1 }
0x396a   : > { %v12243_v23 = vpop.f32.mrb[73].mxu1  ;;  %12247 = vmatmul.mubr.msk.f32.vlgmr.msra.gmra.mrb[66].mxu0 %vm1848_vm3, %v7615_v47 }
0x396b   : > { %12256 = vmatprep.mubr.msk.f32.mxu0 %vm13055_vm1, %v13053_v0 }
0x396d   : > { %v7770_v24 = vpop.f32.mrb[74].mxu1 }
0x396e   : > { %v7771_v48 = vadd.f32 %v7770_v24, %v13458_v39  ;;  %v12253_v26 = vpop.f32.mrb[75].mxu1 }
0x3970   : > { %v7774_v25 = vsel %vm1924_vm6, %v7771_v48, -inf }
0x3971   : > { %7775 = vmax.xlane.f32.xlu1 %v7774_v25 }
0x3982   : > { %7941 = vrot.lane.b32.xlu1 %v14022_v22, %s14715_s23 }
0x3986   : > { %7939 = vrot.lane.b32.xlu1 %v14029_v14, %s14713_s15 }
0x39fe   : > { %v7776_v28 = vpop.xlane.xlu1 %7775 }
0x39ff   : > { %v7777_v49 = vsub.f32 %v7771_v48, %v7776_v28 }
0x3a01   : > { %v7778_v33 = vmul.f32 1.442695, %v7777_v49 }
0x3a02   : > { %v7942_v45 = vpop.permute.xlu1 %7941 }
0x3a03   : > { %12863 = vpow2.f32 %v7778_v33  ;;  %v11466_v33 = vld [vmem:[%s14743_s6] ss:$0 sm:$0xff]  ;;  %s14745_s6 = sld [smem:[#allocation40_spill]] }
0x3a06   : > { %v7940_v42 = vpop.permute.xlu1 %7939 }
0x3a0d   : > { %v12864_v20 = vpop.eup %12863 }
0x3a0e   : > { %v7780_v35 = vsel %vm1924_vm6, %v12864_v20, 0.0 }
0x3a0f   : > { %7781 = vadd.xlane.f32.xlu0 %v7780_v35 }
0x3a25   : > { %7785 = vrot.lane.b32.xlu0 %v14022_v22, %s14740_s1  ;;  %s14741_s1 = smov 40  }
0x3a3d   : > { %v7691_v13 = vpop.f32.mrb[66].mxu0 }
0x3a3e   : > { %v7695_v53 = vadd.f32 %v7691_v13, %v7452_v12  ;;  %v12248_v37 = vpop.f32.mrb[67].mxu0 }
0x3a9c   : > { %v7782_v40 = vpop.xlane.xlu0 %7781 }
0x3a9d   : > { %12865 = vrcp.f32 %v7782_v40 }
0x3aa0   : > { %v7786_v41 = vpop.permute.xlu0 %7785 }
0x3aa1   : > { %12255 = vmatpush3.msk.msra.mxu0 %vm1942_vm4, %v7786_v41 }
0x3aa2   : > { %12264 = vmatprep.subr.mxu0 %v13053_v0 }
0x3aa7   : > { %v12866_v44 = vpop.eup %12865 }
0x3aa8   : > { %v7784_v50 = vmul.f32 %v12866_v44, %v12864_v20 }
0x3aaa   : > { %12257 = vmatmul.mubr.msk.f32.vlgmr.msra.gmra.mrb[68].mxu0 %vm1938_vm7, %v7784_v50 }
0x3aab   : > { %12265 = vmatpush3.xpose.msk.msra.mxu0 %vm1848_vm3, %v7942_v45  ;;  %12266 = vmatprep.mubr.msk.f32.mxu0 %vm13055_vm1, %v13053_v0 }
0x3aac   : > { %12274 = vmatprep.subr.mxu0 %v13053_v0 }
0x3aae   : > { %12267 = vmatmul.mubr.msk.f32.vlgmr.msra.gmra.mrb[70].mxu0 %vm1848_vm3, %v7940_v42 }
0x3aaf   : > { %12276 = vmatprep.mubr.msk.f32.mxu0 %vm13055_vm1, %v13053_v0  ;;  %12275 = vmatpush3.msk.msra.mxu0 %vm2186_vm8, %v1709_v8 }
0x3ab0   : > { %12284 = vmatprep.subr.mxu0 %v13053_v0 }
0x3b7d   : > { %v7858_v1 = vpop.f32.mrb[68].mxu0 }
0x3b7e   : > { %v12258_v46 = vpop.f32.mrb[69].mxu0  ;;  %12262 = vmatmul.mubr.msk.f32.vlgmr.msra.gmra.mrb[76].mxu1 %vm1848_vm3, %v7858_v1 }
0x3b7f   : > { %12271 = vmatprep.mubr.msk.f32.mxu1 %vm13055_vm1, %v13053_v0 }
0x3b81   : > { %v8013_v51 = vpop.f32.mrb[70].mxu0 }
0x3b82   : > { %v8014_v52 = vadd.f32 %v8013_v51, %v13458_v39  ;;  %v12268_v43 = vpop.f32.mrb[71].mxu0  ;;  %v1710_v51 = vld [vmem:[%s13309_s29] sm:$0xff] }
0x3b84   : > { %v8017_v54 = vsel %vm1924_vm6, %v8014_v52, -inf }
0x3b85   : > { %8018 = vmax.xlane.f32.xlu0 %v8017_v54 }
0x3b9b   : > { %8028 = vrot.lane.b32.xlu0 %v14022_v22, %s14741_s1  ;;  %s14742_s1 = smov 36  }
0x3b9f   : > { %8182 = vrot.lane.b32.xlu0 %v14029_v14, %s14714_s16 }
0x3c12   : > { %v8019_v55 = vpop.xlane.xlu0 %8018 }
0x3c13   : > { %v8020_v56 = vsub.f32 %v8014_v52, %v8019_v55  ;;  %v1711_v52 = vld [vmem:[%s13309_s29 + $0x8] sm:$0xff] }
0x3c14   : > { %v12552_v43 = vpack.c.bf16 %v1711_v52, %v1710_v51 }
0x3c15   : > { %v8021_v58 = vmul.f32 1.442695, %v8020_v56  ;;  %v1712_v56 = vld [vmem:[%s13309_s29 + $0x10] sm:$0xff] }
0x3c16   : > { %v8029_v59 = vpop.permute.xlu0 %8028 }
0x3c17   : > { %12867 = vpow2.f32 %v8021_v58  ;;  %12270 = vmatpush3.msk.msra.mxu1 %vm1942_vm4, %v8029_v59  ;;  %v1713_v59 = vld [vmem:[%s13309_s29 + $0x18] sm:$0xff] }
0x3c18   : > { %12279 = vmatprep.subr.mxu1 %v13053_v0 }
0x3c1a   : > { %v8183_v4 = vpop.permute.xlu0 %8182 }
0x3c21   : > { %v12868_v29 = vpop.eup %12867 }
0x3c22   : > { %v8023_v60 = vsel %vm1924_vm6, %v12868_v29, 0.0 }
0x3c23   : > { %8024 = vadd.xlane.f32.xlu1 %v8023_v60  ;;  %v12931_v60 = vld [vmem:[%s13663_s18] sm:$0xff]  ;;  %s1486_s18 = scalar_lea.vmem %s13324_s14, %s13399_s0 }
0x3c34   : > { %8184 = vrot.lane.b32.xlu1 %v14022_v22, %s14716_s2 }
0x3c51   : > { %v7934_v61 = vpop.f32.mrb[76].mxu1 }
0x3c52   : > { %v7938_v62 = vadd.f32 %v7934_v61, %v7695_v53  ;;  %v12263_v14 = vpop.f32.mrb[77].mxu1 }
0x3cb0   : > { %v8025_v63 = vpop.xlane.xlu1 %8024 }
0x3cb1   : > { %12869 = vrcp.f32 %v8025_v63 }
0x3cb4   : > { %v8185_v7 = vpop.permute.xlu1 %8184 }
0x3cbb   : > { %v12870_v3 = vpop.eup %12869 }
0x3cbc   : > { %v8027_v5 = vmul.f32 %v12870_v3, %v12868_v29  ;;  %v12555_v29 = vpack.c.bf16 %v1713_v59, %v1712_v56  ;;  %v11467_v3 = vld [vmem:[%s14745_s6] ss:$0 sm:$0xff] }
0x3cbe   : > { %12272 = vmatmul.mubr.msk.f32.vlgmr.msra.gmra.mrb[78].mxu1 %vm1938_vm7, %v8027_v5 }
0x3cbf   : > { %12280 = vmatpush3.xpose.msk.msra.mxu1 %vm1848_vm3, %v8185_v7  ;;  %12281 = vmatprep.mubr.msk.f32.mxu1 %vm13055_vm1, %v13053_v0  ;;  %v11468_v7 = vld [vmem:[%s14746_s13] ss:$0 sm:$0xff]  ;;  %s14749_s13 = sld [smem:[#allocation44_spill]] }
0x3cc0   : > { %12289 = vmatprep.subr.mxu1 %v13053_v0 }
0x3cc2   : > { %12282 = vmatmul.mubr.msk.f32.vlgmr.msra.gmra.mrb[80].mxu1 %vm1848_vm3, %v8183_v4 }
0x3cc3   : > { %12291 = vmatprep.mubr.msk.f32.mxu1 %vm13055_vm1, %v13053_v0  ;;  %12290 = vmatpush3.msk.msra.mxu1 %vm2186_vm8, %v8348_v9  ;;  %v11471_v9 = vld [vmem:[%s14747_s17] ss:$0 sm:$0xff]  ;;  %s14752_s17 = sld [smem:[#allocation42_spill]] }
0x3cc4   : > { %12557 = vmatprep.subr.bf16.mxu1 %v13054_v11 }
0x3cc5   : > { %v1702_v51 = vld [vmem:[%s14749_s13] sm:$0xff] }
0x3cc6   : > { %v8945_v52 = vrot.slane %v1702_v51, 4 }
0x3d91   : > { %v8101_v10 = vpop.f32.mrb[78].mxu1 }
0x3d92   : > { %v12273_v12 = vpop.f32.mrb[79].mxu1  ;;  %12277 = vmatmul.mubr.msk.f32.vlgmr.msra.gmra.mrb[72].mxu0 %vm1848_vm3, %v8101_v10 }
0x3d93   : > { %12286 = vmatprep.mubr.msk.f32.mxu0 %vm13055_vm1, %v13053_v0 }
0x3d95   : > { %v8256_v38 = vpop.f32.mrb[80].mxu1 }
0x3d96   : > { %v8257_v15 = vadd.f32 %v8256_v38, %v13458_v39  ;;  %v12283_v16 = vpop.f32.mrb[81].mxu1 }
0x3d98   : > { %v8260_v2 = vsel %vm1924_vm6, %v8257_v15, -inf }
0x3d99   : > { %8261 = vmax.xlane.f32.xlu1 %v8260_v2 }
0x3e26   : > { %v8262_v6 = vpop.xlane.xlu1 %8261 }
0x3e27   : > { %v8263_v18 = vsub.f32 %v8257_v15, %v8262_v6 }
0x3e29   : > { %v8264_v19 = vmul.f32 1.442695, %v8263_v18 }
0x3e2b   : > { %12871 = vpow2.f32 %v8264_v19 }
0x3e35   : > { %v12872_v21 = vpop.eup %12871 }
0x3e36   : > { %v8266_v47 = vsel %vm1924_vm6, %v12872_v21, 0.0 }
0x3e37   : > { %8267 = vadd.xlane.f32.xlu0 %v8266_v47 }
0x3e4d   : > { %8271 = vrot.lane.b32.xlu0 %v14022_v22, %s14742_s1  ;;  %s14744_s1 = sld [smem:[#allocation43_spill]] }
0x3e53   : > { %v1698_v1 = vld [vmem:[%s14744_s1] sm:$0xff]  ;;  %v1699_v46 = vld [vmem:[%s14744_s1 + $0x8] sm:$0xff]  ;;  %v1700_v54 = vld [vmem:[%s14744_s1 + $0x10] sm:$0xff] }
0x3e54   : > { %v1701_v55 = vld [vmem:[%s14744_s1 + $0x18] sm:$0xff]  ;;  %s14748_s1 = sld [smem:[#allocation35_spill]] }
0x3e55   : > { %v12561_v58 = vpack.c.bf16 %v1701_v55, %v1700_v54 }
0x3e5a   : > { %v11469_v15 = vld [vmem:[%s14748_s1] ss:$0 sm:$0xff] }
0x3e65   : > { %v8177_v23 = vpop.f32.mrb[72].mxu0 }
0x3e66   : > { %v8181_v24 = vadd.f32 %v8177_v23, %v7938_v62  ;;  %v12278_v48 = vpop.f32.mrb[73].mxu0 }
0x3ec4   : > { %v8268_v39 = vpop.xlane.xlu0 %8267 }
0x3ec5   : > { %12873 = vrcp.f32 %v8268_v39 }
0x3ec8   : > { %v8272_v26 = vpop.permute.xlu0 %8271 }
0x3ec9   : > { %12285 = vmatpush3.msk.msra.mxu0 %vm1942_vm4, %v8272_v26 }
0x3eca   : > { %12551 = vmatprep.subr.bf16.mxu0 %v13054_v11 }
0x3ecf   : > { %v12874_v25 = vpop.eup %12873 }
0x3ed0   : > { %v8270_v28 = vmul.f32 %v12874_v25, %v12872_v21 }
0x3ed2   : > { %12287 = vmatmul.mubr.msk.f32.vlgmr.msra.gmra.mrb[74].mxu0 %vm1938_vm7, %v8270_v28 }
0x3ed3   : > { %12302 = vmatprep.mubr.msk.f32.mxu0 %vm13055_vm1, %v13053_v0  ;;  %12553 = vmatpush3.bf16.msra.mxu0 %v12552_v43 }
0x3ed4   : > { %12554 = vmatprep.subr.bf16.mxu0 %v13054_v11 }
0x3ed7   : > { %12556 = vmatpush3.bf16.msra.mxu0 %v12555_v29 }
0x3ed8   : > { %12316 = vmatprep.subr.mxu0 %v13053_v0 }
0x3fa5   : > { %v8344_v49 = vpop.f32.mrb[74].mxu0 }
0x3fa6   : > { %v12288_v22 = vpop.f32.mrb[75].mxu0  ;;  %12292 = vmatmul.mubr.msk.f32.vlgmr.msra.gmra.mrb[82].mxu1 %vm1848_vm3, %v8344_v49 }
0x3fa7   : > { %12313 = vmatprep.mubr.msk.f32.mxu1 %vm13055_vm1, %v13053_v0 }
0x4079   : > { %v8420_v20 = vpop.f32.mrb[82].mxu1 }
0x407a   : > { %v8424_v35 = vadd.f32 %v8420_v20, %v8181_v24  ;;  %v12293_v13 = vpop.f32.mrb[83].mxu1 }
0x407c   : > { %v8431_v53 = vadd.f32 %v11466_v33, %v8424_v35 }
0x407e   : > { %v14224_v37 = vadd.f32 %v8431_v53, %v14004_v57  ;;  %v12558_v57 = vpack.c.bf16 %v1699_v46, %v1698_v1 }
0x4080   : > { %v8433_v40 = vsel %vm1735_vm0, %v14224_v37, 0.0  ;;  %12559 = vmatpush3.bf16.msra.mxu1 %v12558_v57 }
0x4081   : > { %8434 = vadd.xlane.f32.xlu1 %v8433_v40  ;;  %12560 = vmatprep.subr.bf16.mxu1 %v13054_v11 }
0x4084   : > { %12562 = vmatpush3.bf16.msra.mxu1 %v12561_v58 }
0x4085   : > { %12321 = vmatprep.subr.mxu1 %v13053_v0 }
0x4087   : > { %12314 = vmatmul.mubr.msk.f32.vlgmr.msra.gmra.mrb[84].mxu1 %vm1770_vm2, %v12931_v60 }
0x4088   : > { %12323 = vmatprep.mubr.msk.f32.mxu1 %vm13055_vm1, %v13053_v0 }
0x410e   : > { %v8435_v41 = vpop.xlane.xlu1 %8434 }
0x410f   : > { %v8436_v44 = vmul.f32 0.03125, %v8435_v41 }
0x4111   : > { %v8437_v45 = vsub.f32 %v14224_v37, %v8436_v44 }
0x4113   : > { %v8438_v50 = vmul.f32 %v8437_v45, %v8437_v45 }
0x4115   : > { %v8439_v42 = vsel %vm1735_vm0, %v8438_v50, 0.0 }
0x4116   : > { %8440 = vadd.xlane.f32.xlu1 %v8439_v42 }
0x415a   : > { %v8612_v10 = vpop.f32.mrb[84].mxu1 }
0x415b   : > { %v14252_v12 = vadd.f32 %v11471_v9, %v8612_v10  ;;  %v12315_v38 = vpop.f32.mrb[85].mxu1 }
0x415d   : > { %8781 = vrot.lane.b32.xlu1 %v14252_v12, %s14729_s3 }
0x41a3   : > { %v8441_v61 = vpop.xlane.xlu1 %8440 }
0x41a4   : > { %v8442_v62 = vmul.f32 0.03125, %v8441_v61 }
0x41a6   : > { %v8443_v14 = vadd.f32 1e-05, %v8442_v62 }
0x41a8   : > { %12875 = vrsqrt.f32 %v8443_v14 }
0x41b2   : > { %v12876_v63 = vpop.eup %12875 }
0x41b3   : > { %v8445_v5 = vmul.f32 %v12876_v63, %v8437_v45 }
0x41b5   : > { %v8452_v4 = vmul.f32 %v11467_v3, %v8445_v5 }
0x41b7   : > { %v8459_v8 = vadd.f32 %v11468_v7, %v8452_v4 }
0x41b9   : > { %12303 = vmatmul.mubr.msk.f32.vlgmr.msra.gmra.mrb[76].mxu0 %vm1770_vm2, %v8459_v8 }
0x41ba   : > { %12318 = vmatprep.mubr.msk.f32.mxu0 %vm13055_vm1, %v13053_v0  ;;  %12317 = vmatpush3.xpose.msk.msra.mxu0 %vm1848_vm3, %v14252_v12 }
0x41bb   : > { %12326 = vmatprep.subr.mxu0 %v13053_v0 }
0x41cf   : > { %v8782_v19 = vpop.permute.xlu1 %8781 }
0x428c   : > { %v8535_v16 = vpop.f32.mrb[76].mxu0 }
0x428d   : > { %v8536_v2 = vadd.f32 %v11469_v15, %v8535_v16  ;;  %v12304_v6 = vpop.f32.mrb[77].mxu0 }
0x428f   : > { %v14260_v18 = vmul.f32 0.5, %v8536_v2 }
0x4291   : > { %8779 = vrot.lane.b32.xlu0 %v14260_v18, %s14729_s3  ;;  %12319 = vmatmul.mubr.msk.f32.vlgmr.msra.gmra.mrb[78].mxu0 %vm1848_vm3, %v14260_v18 }
0x4292   : > { %12327 = vmatpush3.xpose.msk.msra.mxu0 %vm1848_vm3, %v8782_v19  ;;  %12328 = vmatprep.mubr.msk.f32.mxu0 %vm13055_vm1, %v13053_v0 }
0x4293   : > { %12336 = vmatprep.subr.mxu0 %v13053_v0 }
0x4303   : > { %v8780_v21 = vpop.permute.xlu0 %8779 }
0x4304   : > { %12329 = vmatmul.mubr.msk.f32.vlgmr.msra.gmra.mrb[80].mxu0 %vm1848_vm3, %v8780_v21  ;;  %v1703_v21 = vld [vmem:[%s14749_s13 + $0x8] sm:$0xff] }
0x4305   : > { %12338 = vmatprep.mubr.msk.f32.mxu0 %vm13055_vm1, %v13053_v0  ;;  %12337 = vmatpush3.msk.msra.mxu0 %vm2186_vm8, %v8945_v52 }
0x4306   : > { %12346 = vmatprep.subr.mxu0 %v13053_v0 }
0x4364   : > { %v8688_v47 = vpop.f32.mrb[78].mxu0 }
0x4365   : > { %v12320_v23 = vpop.f32.mrb[79].mxu0  ;;  %v8692_v24 = vsel %vm4062_vm9, %v8688_v47, -inf }
0x4366   : > { %8693 = vmax.xlane.f32.xlu0 %v8692_v24 }
0x43d7   : > { %v8853_v48 = vpop.f32.mrb[80].mxu0 }
0x43d8   : > { %v12330_v39 = vpop.f32.mrb[81].mxu0  ;;  %v8857_v26 = vsel %vm4062_vm9, %v8853_v48, -inf }
0x43d9   : > { %8858 = vmax.xlane.f32.xlu1 %v8857_v26 }
0x43ea   : > { %8868 = vrot.lane.b32.xlu1 %v14252_v12, %s14727_s4  ;;  %s14755_s4 = sld [smem:[#allocation31_spill]] }
0x43ee   : > { %9098 = vrot.lane.b32.xlu1 %v14252_v12, %s14731_s7 }
0x43f2   : > { %9096 = vrot.lane.b32.xlu1 %v14260_v18, %s14731_s7 }
0x43f3   : > { %v8694_v25 = vpop.xlane.xlu0 %8693 }
0x43f4   : > { %v8695_v28 = vsub.f32 %v8688_v47, %v8694_v25  ;;  %v9503_v47 = vrot.slane %v1703_v21, 4 }
0x43f6   : > { %v8696_v49 = vmul.f32 1.442695, %v8695_v28 }
0x43f8   : > { %12877 = vpow2.f32 %v8696_v49 }
0x4402   : > { %v12878_v22 = vpop.eup %12877 }
0x4403   : > { %v8698_v33 = vsel %vm4062_vm9, %v12878_v22, 0.0 }
0x4404   : > { %8699 = vadd.xlane.f32.xlu0 %v8698_v33 }
0x4466   : > { %v8859_v20 = vpop.xlane.xlu1 %8858 }
0x4467   : > { %v8860_v35 = vsub.f32 %v8853_v48, %v8859_v20 }
0x4469   : > { %v8861_v13 = vmul.f32 1.442695, %v8860_v35 }
0x446a   : > { %v8869_v1 = vpop.permute.xlu1 %8868 }
0x446b   : > { %12879 = vpow2.f32 %v8861_v13 }
0x446e   : > { %v9099_v55 = vpop.permute.xlu1 %9098 }
0x4472   : > { %v9097_v59 = vpop.permute.xlu1 %9096 }
0x4475   : > { %v12880_v53 = vpop.eup %12879 }
0x4476   : > { %v8863_v40 = vsel %vm4062_vm9, %v12880_v53, 0.0 }
0x4477   : > { %8864 = vadd.xlane.f32.xlu0 %v8863_v40 }
0x448d   : > { %8703 = vrot.lane.b32.xlu0 %v14252_v12, %s14728_s5  ;;  %s14750_s5 = sld [smem:[#allocation33_spill]] }
0x4491   : > { %v8700_v41 = vpop.xlane.xlu0 %8699 }
0x4492   : > { %12881 = vrcp.f32 %v8700_v41 }
0x449c   : > { %v12882_v45 = vpop.eup %12881 }
0x449d   : > { %v8702_v50 = vmul.f32 %v12882_v45, %v12878_v22 }
0x4504   : > { %v8865_v44 = vpop.xlane.xlu0 %8864 }
0x4505   : > { %12883 = vrcp.f32 %v8865_v44 }
0x4508   : > { %v8704_v42 = vpop.permute.xlu0 %8703 }
0x4509   : > { %12322 = vmatpush3.msra.mxu1 %v8704_v42 }
0x450a   : > { %12324 = vmatmul.mubr.msk.f32.vlgmr.msra.gmra.mrb[86].mxu1 %vm4077_vm10, %v8702_v50  ;;  %12331 = vmatprep.subr.mxu1 %v13053_v0 }
0x450b   : > { %12332 = vmatpush3.msra.mxu1 %v8869_v1  ;;  %12333 = vmatprep.mubr.msk.f32.mxu1 %vm13055_vm1, %v13053_v0 }
0x450c   : > { %12341 = vmatprep.subr.mxu1 %v13053_v0 }
0x450f   : > { %v12884_v46 = vpop.eup %12883 }
0x4510   : > { %v8867_v57 = vmul.f32 %v12884_v46, %v12880_v53 }
0x4512   : > { %12334 = vmatmul.mubr.msk.f32.vlgmr.msra.gmra.mrb[88].mxu1 %vm4077_vm10, %v8867_v57 }
0x4513   : > { %12343 = vmatprep.mubr.msk.f32.mxu1 %vm13055_vm1, %v13053_v0  ;;  %12342 = vmatpush3.msk.msra.mxu1 %vm2186_vm8, %v1702_v51 }
0x4514   : > { %12351 = vmatprep.subr.mxu1 %v13053_v0 }
0x45dd   : > { %v8775_v43 = vpop.f32.mrb[86].mxu1 }
0x45de   : > { %v12325_v54 = vpop.f32.mrb[87].mxu1  ;;  %12344 = vmatmul.mubr.msk.f32.vlgmr.msra.gmra.mrb[90].mxu1 %vm1848_vm3, %v8775_v43 }
0x45df   : > { %12353 = vmatprep.mubr.msk.f32.mxu1 %vm13055_vm1, %v13053_v0 }
0x45e5   : > { %v8940_v56 = vpop.f32.mrb[88].mxu1 }
0x45e6   : > { %v12335_v58 = vpop.f32.mrb[89].mxu1  ;;  %12339 = vmatmul.mubr.msk.f32.vlgmr.msra.gmra.mrb[82].mxu0 %vm1848_vm3, %v8940_v56 }
0x45e7   : > { %12347 = vmatpush3.xpose.msk.msra.mxu0 %vm1848_vm3, %v9099_v55  ;;  %12348 = vmatprep.mubr.msk.f32.mxu0 %vm13055_vm1, %v13053_v0 }
0x45e8   : > { %12356 = vmatprep.subr.mxu0 %v13053_v0 }
0x45ea   : > { %12349 = vmatmul.mubr.msk.f32.vlgmr.msra.gmra.mrb[84].mxu0 %vm1848_vm3, %v9097_v59 }
0x45eb   : > { %12358 = vmatprep.mubr.msk.f32.mxu0 %vm13055_vm1, %v13053_v0  ;;  %12357 = vmatpush3.msk.msra.mxu0 %vm2186_vm8, %v1703_v21 }
0x45ec   : > { %12366 = vmatprep.subr.mxu0 %v13053_v0 }
0x46b1   : > { %v9092_v29 = vpop.f32.mrb[90].mxu1 }
0x46b2   : > { %v12345_v60 = vpop.f32.mrb[91].mxu1 }
0x46b9   : > { %v9017_v61 = vpop.f32.mrb[82].mxu0 }
0x46ba   : > { %v9093_v62 = vadd.f32 %v9092_v29, %v9017_v61  ;;  %v12340_v14 = vpop.f32.mrb[83].mxu0 }
0x46bd   : > { %v9170_v63 = vpop.f32.mrb[84].mxu0 }
0x46be   : > { %v12350_v3 = vpop.f32.mrb[85].mxu0  ;;  %v9174_v5 = vsel %vm4062_vm9, %v9170_v63, -inf }
0x46bf   : > { %9175 = vmax.xlane.f32.xlu0 %v9174_v5  ;;  %v1704_v5 = vld [vmem:[%s14749_s13 + $0x10] sm:$0xff] }
0x46d5   : > { %9185 = vrot.lane.b32.xlu0 %v14252_v12, %s14734_s8  ;;  %s14753_s8 = sld [smem:[#allocation30_spill]] }
0x46d9   : > { %9338 = vrot.lane.b32.xlu0 %v14260_v18, %s14736_s9 }
0x474c   : > { %v9176_v7 = vpop.xlane.xlu0 %9175 }
0x474d   : > { %v9177_v4 = vsub.f32 %v9170_v63, %v9176_v7  ;;  %v9987_v7 = vrot.slane %v1704_v5, 4 }
0x474f   : > { %v9178_v8 = vmul.f32 1.442695, %v9177_v4 }
0x4750   : > { %v9186_v9 = vpop.permute.xlu0 %9185 }
0x4751   : > { %12885 = vpow2.f32 %v9178_v8  ;;  %12352 = vmatpush3.msra.mxu1 %v9186_v9 }
0x4752   : > { %12361 = vmatprep.subr.mxu1 %v13053_v0 }
0x4754   : > { %v9339_v19 = vpop.permute.xlu0 %9338 }
0x475b   : > { %v12886_v10 = vpop.eup %12885 }
0x475c   : > { %v9180_v38 = vsel %vm4062_vm9, %v12886_v10, 0.0 }
0x475d   : > { %9181 = vadd.xlane.f32.xlu1 %v9180_v38 }
0x476e   : > { %9340 = vrot.lane.b32.xlu1 %v14252_v12, %s14736_s9  ;;  %s14751_s9 = sld [smem:[#allocation41_spill]] }
0x47ea   : > { %v9182_v15 = vpop.xlane.xlu1 %9181 }
0x47eb   : > { %12887 = vrcp.f32 %v9182_v15 }
0x47ee   : > { %v9341_v6 = vpop.permute.xlu1 %9340 }
0x47f5   : > { %v12888_v16 = vpop.eup %12887 }
0x47f6   : > { %v9184_v2 = vmul.f32 %v12888_v16, %v12886_v10 }
0x47f8   : > { %12354 = vmatmul.mubr.msk.f32.vlgmr.msra.gmra.mrb[92].mxu1 %vm4077_vm10, %v9184_v2 }
0x47f9   : > { %12362 = vmatpush3.xpose.msk.msra.mxu1 %vm1848_vm3, %v9341_v6  ;;  %12363 = vmatprep.mubr.msk.f32.mxu1 %vm13055_vm1, %v13053_v0 }
0x47fa   : > { %12371 = vmatprep.subr.mxu1 %v13053_v0 }
0x47fc   : > { %12364 = vmatmul.mubr.msk.f32.vlgmr.msra.gmra.mrb[94].mxu1 %vm1848_vm3, %v9339_v19 }
0x47fd   : > { %12373 = vmatprep.mubr.msk.f32.mxu1 %vm13055_vm1, %v13053_v0  ;;  %12372 = vmatpush3.msk.msra.mxu1 %vm2186_vm8, %v9503_v47 }
0x47fe   : > { %12381 = vmatprep.subr.mxu1 %v13053_v0 }
0x48cb   : > { %v9257_v23 = vpop.f32.mrb[92].mxu1 }
0x48cc   : > { %v12355_v24 = vpop.f32.mrb[93].mxu1  ;;  %12359 = vmatmul.mubr.msk.f32.vlgmr.msra.gmra.mrb[86].mxu0 %vm1848_vm3, %v9257_v23 }
0x48cd   : > { %12368 = vmatprep.mubr.msk.f32.mxu0 %vm13055_vm1, %v13053_v0 }
0x48cf   : > { %v9412_v48 = vpop.f32.mrb[94].mxu1 }
0x48d0   : > { %v12365_v39 = vpop.f32.mrb[95].mxu1  ;;  %v9416_v26 = vsel %vm4062_vm9, %v9412_v48, -inf }
0x48d1   : > { %9417 = vmax.xlane.f32.xlu1 %v9416_v26 }
0x48e2   : > { %9582 = vrot.lane.b32.xlu1 %v14252_v12, %s14709_s11 }
0x48e6   : > { %9580 = vrot.lane.b32.xlu1 %v14260_v18, %s14709_s11 }
0x495e   : > { %v9418_v25 = vpop.xlane.xlu1 %9417 }
0x495f   : > { %v9419_v28 = vsub.f32 %v9412_v48, %v9418_v25 }
0x4961   : > { %v9420_v49 = vmul.f32 1.442695, %v9419_v28 }
0x4962   : > { %v9583_v44 = vpop.permute.xlu1 %9582 }
0x4963   : > { %12889 = vpow2.f32 %v9420_v49 }
0x4966   : > { %v9581_v50 = vpop.permute.xlu1 %9580 }
0x496d   : > { %v12890_v22 = vpop.eup %12889 }
0x496e   : > { %v9422_v33 = vsel %vm4062_vm9, %v12890_v22, 0.0 }
0x496f   : > { %9423 = vadd.xlane.f32.xlu0 %v9422_v33 }
0x4985   : > { %9427 = vrot.lane.b32.xlu0 %v14252_v12, %s14737_s12  ;;  %s14754_s12 = sld [smem:[#allocation13_spill]] }
0x499f   : > { %v9333_v20 = vpop.f32.mrb[86].mxu0 }
0x49a0   : > { %v9337_v35 = vadd.f32 %v9333_v20, %v9093_v62  ;;  %v12360_v13 = vpop.f32.mrb[87].mxu0 }
0x49fc   : > { %v9424_v53 = vpop.xlane.xlu0 %9423 }
0x49fd   : > { %12891 = vrcp.f32 %v9424_v53 }
0x4a00   : > { %v9428_v40 = vpop.permute.xlu0 %9427 }
0x4a01   : > { %12367 = vmatpush3.msra.mxu0 %v9428_v40 }
0x4a02   : > { %12376 = vmatprep.subr.mxu0 %v13053_v0 }
0x4a07   : > { %v12892_v41 = vpop.eup %12891 }
0x4a08   : > { %v9426_v45 = vmul.f32 %v12892_v41, %v12890_v22 }
0x4a0a   : > { %12369 = vmatmul.mubr.msk.f32.vlgmr.msra.gmra.mrb[88].mxu0 %vm4077_vm10, %v9426_v45 }
0x4a0b   : > { %12377 = vmatpush3.xpose.msk.msra.mxu0 %vm1848_vm3, %v9583_v44  ;;  %12378 = vmatprep.mubr.msk.f32.mxu0 %vm13055_vm1, %v13053_v0 }
0x4a0c   : > { %12386 = vmatprep.subr.mxu0 %v13053_v0 }
0x4a0e   : > { %12379 = vmatmul.mubr.msk.f32.vlgmr.msra.gmra.mrb[90].mxu0 %vm1848_vm3, %v9581_v50 }
0x4a0f   : > { %12388 = vmatprep.mubr.msk.f32.mxu0 %vm13055_vm1, %v13053_v0  ;;  %12387 = vmatpush3.msk.msra.mxu0 %vm2186_vm8, %v1704_v5 }
0x4a10   : > { %12396 = vmatprep.subr.mxu0 %v13053_v0 }
0x4add   : > { %v9499_v42 = vpop.f32.mrb[88].mxu0 }
0x4ade   : > { %v12370_v1 = vpop.f32.mrb[89].mxu0  ;;  %12374 = vmatmul.mubr.msk.f32.vlgmr.msra.gmra.mrb[96].mxu1 %vm1848_vm3, %v9499_v42 }
0x4adf   : > { %12383 = vmatprep.mubr.msk.f32.mxu1 %vm13055_vm1, %v13053_v0 }
0x4ae1   : > { %v9654_v46 = vpop.f32.mrb[90].mxu0 }
0x4ae2   : > { %v12380_v57 = vpop.f32.mrb[91].mxu0  ;;  %v9658_v51 = vsel %vm4062_vm9, %v9654_v46, -inf }
0x4ae3   : > { %9659 = vmax.xlane.f32.xlu0 %v9658_v51 }
0x4af9   : > { %9669 = vrot.lane.b32.xlu0 %v14252_v12, %s14711_s26 }
0x4afd   : > { %9822 = vrot.lane.b32.xlu0 %v14260_v18, %s14710_s10 }
0x4b70   : > { %v9660_v52 = vpop.xlane.xlu0 %9659 }
0x4b71   : > { %v9661_v43 = vsub.f32 %v9654_v46, %v9660_v52 }
0x4b73   : > { %v9662_v54 = vmul.f32 1.442695, %v9661_v43  ;;  %v1705_v43 = vld [vmem:[%s14749_s13 + $0x18] sm:$0xff] }
0x4b74   : > { %v9670_v55 = vpop.permute.xlu0 %9669 }
0x4b75   : > { %12893 = vpow2.f32 %v9662_v54  ;;  %12382 = vmatpush3.msra.mxu1 %v9670_v55  ;;  %v10471_v54 = vrot.slane %v1705_v43, 4 }
0x4b76   : > { %12391 = vmatprep.subr.mxu1 %v13053_v0 }
0x4b78   : > { %v9823_v3 = vpop.permute.xlu0 %9822 }
0x4b7f   : > { %v12894_v56 = vpop.eup %12893 }
0x4b80   : > { %v9664_v58 = vsel %vm4062_vm9, %v12894_v56, 0.0 }
0x4b81   : > { %9665 = vadd.xlane.f32.xlu1 %v9664_v58 }
0x4b92   : > { %9824 = vrot.lane.b32.xlu1 %v14252_v12, %s14710_s10 }
0x4bb1   : > { %v9575_v59 = vpop.f32.mrb[96].mxu1 }
0x4bb2   : > { %v9579_v29 = vadd.f32 %v9575_v59, %v9337_v35  ;;  %v12375_v60 = vpop.f32.mrb[97].mxu1 }
0x4c0e   : > { %v9666_v61 = vpop.xlane.xlu1 %9665 }
0x4c0f   : > { %12895 = vrcp.f32 %v9666_v61 }
0x4c12   : > { %v9825_v63 = vpop.permute.xlu1 %9824 }
0x4c19   : > { %v12896_v62 = vpop.eup %12895 }
0x4c1a   : > { %v9668_v14 = vmul.f32 %v12896_v62, %v12894_v56 }
0x4c1c   : > { %12384 = vmatmul.mubr.msk.f32.vlgmr.msra.gmra.mrb[98].mxu1 %vm4077_vm10, %v9668_v14 }
0x4c1d   : > { %12392 = vmatpush3.xpose.msk.msra.mxu1 %vm1848_vm3, %v9825_v63  ;;  %12393 = vmatprep.mubr.msk.f32.mxu1 %vm13055_vm1, %v13053_v0 }
0x4c1e   : > { %12401 = vmatprep.subr.mxu1 %v13053_v0 }
0x4c20   : > { %12394 = vmatmul.mubr.msk.f32.vlgmr.msra.gmra.mrb[100].mxu1 %vm1848_vm3, %v9823_v3 }
0x4c21   : > { %12403 = vmatprep.mubr.msk.f32.mxu1 %vm13055_vm1, %v13053_v0  ;;  %12402 = vmatpush3.msk.msra.mxu1 %vm2186_vm8, %v9987_v7 }
0x4c22   : > { %12411 = vmatprep.subr.mxu1 %v13053_v0 }
0x4cef   : > { %v9741_v4 = vpop.f32.mrb[98].mxu1 }
0x4cf0   : > { %v12385_v8 = vpop.f32.mrb[99].mxu1  ;;  %12389 = vmatmul.mubr.msk.f32.vlgmr.msra.gmra.mrb[92].mxu0 %vm1848_vm3, %v9741_v4 }
0x4cf1   : > { %12398 = vmatprep.mubr.msk.f32.mxu0 %vm13055_vm1, %v13053_v0 }
0x4cf3   : > { %v9896_v9 = vpop.f32.mrb[100].mxu1 }
0x4cf4   : > { %v12395_v10 = vpop.f32.mrb[101].mxu1  ;;  %v9900_v38 = vsel %vm4062_vm9, %v9896_v9, -inf }
0x4cf5   : > { %9901 = vmax.xlane.f32.xlu1 %v9900_v38 }
0x4d06   : > { %10066 = vrot.lane.b32.xlu1 %v14252_v12, %s14713_s15 }
0x4d0a   : > { %10064 = vrot.lane.b32.xlu1 %v14260_v18, %s14713_s15  ;;  %s1482_s15 = scalar_lea.vmem %s13319_s20, %s13399_s0 }
0x4d82   : > { %v9902_v15 = vpop.xlane.xlu1 %9901 }
0x4d83   : > { %v9903_v16 = vsub.f32 %v9896_v9, %v9902_v15 }
0x4d85   : > { %v9904_v2 = vmul.f32 1.442695, %v9903_v16 }
0x4d86   : > { %v10067_v26 = vpop.permute.xlu1 %10066 }
0x4d87   : > { %12897 = vpow2.f32 %v9904_v2 }
0x4d8a   : > { %v10065_v28 = vpop.permute.xlu1 %10064 }
0x4d91   : > { %v12898_v6 = vpop.eup %12897 }
0x4d92   : > { %v9906_v19 = vsel %vm4062_vm9, %v12898_v6, 0.0 }
0x4d93   : > { %9907 = vadd.xlane.f32.xlu0 %v9906_v19 }
0x4da9   : > { %9911 = vrot.lane.b32.xlu0 %v14252_v12, %s14712_s28 }
0x4dc3   : > { %v9817_v21 = vpop.f32.mrb[92].mxu0 }
0x4dc4   : > { %v9821_v47 = vadd.f32 %v9817_v21, %v9579_v29  ;;  %v12390_v23 = vpop.f32.mrb[93].mxu0 }
0x4e20   : > { %v9908_v24 = vpop.xlane.xlu0 %9907 }
0x4e21   : > { %12899 = vrcp.f32 %v9908_v24 }
0x4e24   : > { %v9912_v48 = vpop.permute.xlu0 %9911 }
0x4e25   : > { %12397 = vmatpush3.msra.mxu0 %v9912_v48 }
0x4e26   : > { %12406 = vmatprep.subr.mxu0 %v13053_v0 }
0x4e2b   : > { %v12900_v39 = vpop.eup %12899 }
0x4e2c   : > { %v9910_v25 = vmul.f32 %v12900_v39, %v12898_v6 }
0x4e2e   : > { %12399 = vmatmul.mubr.msk.f32.vlgmr.msra.gmra.mrb[94].mxu0 %vm4077_vm10, %v9910_v25  ;;  %v1619_v25 = vld [vmem:[%s14751_s9 + $0x8] sm:$0xff] }
0x4e2f   : > { %12407 = vmatpush3.xpose.msk.msra.mxu0 %vm1848_vm3, %v10067_v26  ;;  %12408 = vmatprep.mubr.msk.f32.mxu0 %vm13055_vm1, %v13053_v0 }
0x4e30   : > { %12416 = vmatprep.subr.mxu0 %v13053_v0 }
0x4e32   : > { %12409 = vmatmul.mubr.msk.f32.vlgmr.msra.gmra.mrb[96].mxu0 %vm1848_vm3, %v10065_v28  ;;  %v1621_v28 = vld [vmem:[%s14751_s9 + $0x18] sm:$0xff] }
0x4e33   : > { %12418 = vmatprep.mubr.msk.f32.mxu0 %vm13055_vm1, %v13053_v0  ;;  %12417 = vmatpush3.msk.msra.mxu0 %vm2186_vm8, %v1705_v43  ;;  %v1632_v43 = vld [vmem:[%s14751_s9 + $0x70] sm:$0xff] }
0x4e34   : > { %12426 = vmatprep.subr.mxu0 %v13053_v0 }
0x4f01   : > { %v9983_v49 = vpop.f32.mrb[94].mxu0 }
0x4f02   : > { %v12400_v22 = vpop.f32.mrb[95].mxu0  ;;  %12404 = vmatmul.mubr.msk.f32.vlgmr.msra.gmra.mrb[102].mxu1 %vm1848_vm3, %v9983_v49 }
0x4f03   : > { %12413 = vmatprep.mubr.msk.f32.mxu1 %vm13055_vm1, %v13053_v0  ;;  %v1625_v22 = vld [vmem:[%s14751_s9 + $0x38] sm:$0xff] }
0x4f05   : > { %v10138_v33 = vpop.f32.mrb[96].mxu0 }
0x4f06   : > { %v12410_v20 = vpop.f32.mrb[97].mxu0  ;;  %v10142_v35 = vsel %vm4062_vm9, %v10138_v33, -inf }
0x4f07   : > { %10143 = vmax.xlane.f32.xlu0 %v10142_v35  ;;  %v1622_v20 = vld [vmem:[%s14751_s9 + $0x20] sm:$0xff]  ;;  %v12571_v35 = vpack.c.bf16 %v1625_v22, %v1621_v28  ;;  %v1655_v22 = vld [vmem:[%s14752_s17 + $0xa8] sm:$0xff] }
0x4f1d   : > { %10153 = vrot.lane.b32.xlu0 %v14252_v12, %s14715_s23  ;;  %s14757_s23 = sld [smem:[#allocation11_spill]] }
0x4f21   : > { %10306 = vrot.lane.b32.xlu0 %v14260_v18, %s14714_s16 }
0x4f94   : > { %v10144_v13 = vpop.xlane.xlu0 %10143 }
0x4f95   : > { %v10145_v53 = vsub.f32 %v10138_v33, %v10144_v13  ;;  %v1618_v33 = vld [vmem:[%s14751_s9] sm:$0xff] }
0x4f96   : > { %v12565_v13 = vpack.c.bf16 %v1622_v20, %v1618_v33  ;;  %v1686_v33 = vld [vmem:[%s14752_s17 + $0x1a0] sm:$0xff] }
0x4f97   : > { %v10146_v40 = vmul.f32 1.442695, %v10145_v53  ;;  %v1620_v53 = vld [vmem:[%s14751_s9 + $0x10] sm:$0xff] }
0x4f98   : > { %v10154_v41 = vpop.permute.xlu0 %10153 }
0x4f99   : > { %12901 = vpow2.f32 %v10146_v40  ;;  %12412 = vmatpush3.msra.mxu1 %v10154_v41  ;;  %v1624_v40 = vld [vmem:[%s14751_s9 + $0x30] sm:$0xff] }
0x4f9a   : > { %12421 = vmatprep.subr.mxu1 %v13053_v0  ;;  %v12573_v41 = vpack.c.bf16 %v1624_v40, %v1620_v53  ;;  %v1639_v53 = vld [vmem:[%s14752_s17 + $0x28] sm:$0xff] }
0x4f9c   : > { %v10307_v52 = vpop.permute.xlu0 %10306 }
0x4fa3   : > { %v12902_v44 = vpop.eup %12901 }
0x4fa4   : > { %v10148_v45 = vsel %vm4062_vm9, %v12902_v44, 0.0 }
0x4fa5   : > { %10149 = vadd.xlane.f32.xlu1 %v10148_v45  ;;  %v1631_v45 = vld [vmem:[%s14751_s9 + $0x68] sm:$0xff] }
0x4fb6   : > { %10308 = vrot.lane.b32.xlu1 %v14252_v12, %s14714_s16  ;;  %s1478_s16 = scalar_lea.vmem %s14757_s23, %s13399_s0 }
0x4fd5   : > { %v10059_v50 = vpop.f32.mrb[102].mxu1 }
0x4fd6   : > { %v10063_v42 = vadd.f32 %v10059_v50, %v9821_v47  ;;  %v12405_v1 = vpop.f32.mrb[103].mxu1  ;;  %v1629_v50 = vld [vmem:[%s14751_s9 + $0x58] sm:$0xff] }
0x4fd7   : > { %v1633_v1 = vld [vmem:[%s14751_s9 + $0x78] sm:$0xff] }
0x5032   : > { %v10150_v18 = vpop.xlane.xlu1 %10149 }
0x5033   : > { %12903 = vrcp.f32 %v10150_v18  ;;  %v1626_v18 = vld [vmem:[%s14751_s9 + $0x40] sm:$0xff] }
0x5036   : > { %v10309_v51 = vpop.permute.xlu1 %10308 }
0x503d   : > { %v12904_v46 = vpop.eup %12903 }
0x503e   : > { %v10152_v57 = vmul.f32 %v12904_v46, %v12902_v44  ;;  %v1627_v44 = vld [vmem:[%s14751_s9 + $0x48] sm:$0xff]  ;;  %v1630_v46 = vld [vmem:[%s14751_s9 + $0x60] sm:$0xff] }
0x5040   : > { %12414 = vmatmul.mubr.msk.f32.vlgmr.msra.gmra.mrb[104].mxu1 %vm4077_vm10, %v10152_v57  ;;  %v12575_v57 = vpack.c.bf16 %v1633_v1, %v1629_v50  ;;  %v1657_v1 = vld [vmem:[%s14752_s17 + $0xb8] sm:$0xff] }
0x5041   : > { %12422 = vmatpush3.xpose.msk.msra.mxu1 %vm1848_vm3, %v10309_v51  ;;  %12423 = vmatprep.mubr.msk.f32.mxu1 %vm13055_vm1, %v13053_v0  ;;  %v12569_v51 = vpack.c.bf16 %v1630_v46, %v1626_v18  ;;  %v1688_v18 = vld [vmem:[%s14752_s17 + $0x1b0] sm:$0xff] }
0x5042   : > { %12431 = vmatprep.subr.mxu1 %v13053_v0 }
0x5044   : > { %12424 = vmatmul.mubr.msk.f32.vlgmr.msra.gmra.mrb[106].mxu1 %vm1848_vm3, %v10307_v52  ;;  %v1628_v52 = vld [vmem:[%s14751_s9 + $0x50] sm:$0xff] }
0x5045   : > { %12433 = vmatprep.mubr.msk.f32.mxu1 %vm13055_vm1, %v13053_v0  ;;  %12432 = vmatpush3.msk.msra.mxu1 %vm2186_vm8, %v10471_v54  ;;  %v12577_v54 = vpack.c.bf16 %v1632_v43, %v1628_v52  ;;  %v1641_v52 = vld [vmem:[%s14752_s17 + $0x38] sm:$0xff] }
0x5046   : > { %12572 = vmatprep.subr.bf16.mxu1 %v12571_v35  ;;  %v1687_v35 = vld [vmem:[%s14752_s17 + $0x1a8] sm:$0xff] }
0x5047   : > { %v12619_v40 = vpack.c.bf16 %v1687_v35, %v1686_v33  ;;  %v1679_v35 = vld [vmem:[%s14752_s17 + $0x168] sm:$0xff] }
0x5113   : > { %v10225_v55 = vpop.f32.mrb[104].mxu1 }
0x5114   : > { %v12415_v56 = vpop.f32.mrb[105].mxu1  ;;  %12419 = vmatmul.mubr.msk.f32.vlgmr.msra.gmra.mrb[98].mxu0 %vm1848_vm3, %v10225_v55 }
0x5115   : > { %12428 = vmatprep.mubr.msk.f32.mxu0 %vm13055_vm1, %v13053_v0 }
0x5117   : > { %v10380_v58 = vpop.f32.mrb[106].mxu1 }
0x5118   : > { %v12425_v59 = vpop.f32.mrb[107].mxu1  ;;  %v10384_v29 = vsel %vm4062_vm9, %v10380_v58, -inf }
0x5119   : > { %10385 = vmax.xlane.f32.xlu1 %v10384_v29  ;;  %v11514_v29 = vld [vmem:[#allocation4] ss:$0 sm:$0xff] }
0x51a6   : > { %v10386_v60 = vpop.xlane.xlu1 %10385 }
0x51a7   : > { %v10387_v61 = vsub.f32 %v10380_v58, %v10386_v60 }
0x51a9   : > { %v10388_v62 = vmul.f32 1.442695, %v10387_v61  ;;  %v11515_v61 = vld [vmem:[#allocation2] ss:$0 sm:$0xff] }
0x51ab   : > { %12905 = vpow2.f32 %v10388_v62 }
0x51b5   : > { %v12906_v14 = vpop.eup %12905 }
0x51b6   : > { %v10390_v63 = vsel %vm4062_vm9, %v12906_v14, 0.0 }
0x51b7   : > { %10391 = vadd.xlane.f32.xlu0 %v10390_v63  ;;  %v1650_v63 = vld [vmem:[%s14752_s17 + $0x80] sm:$0xff] }
0x51cd   : > { %10395 = vrot.lane.b32.xlu0 %v14252_v12, %s14716_s2  ;;  %v11513_v12 = vld [vmem:[%s14750_s5] ss:$0 sm:$0xff]  ;;  %s14756_s2 = sld [smem:[#allocation12_spill]] }
0x51e7   : > { %v10301_v3 = vpop.f32.mrb[98].mxu0 }
0x51e8   : > { %v10305_v5 = vadd.f32 %v10301_v3, %v10063_v42  ;;  %v12420_v7 = vpop.f32.mrb[99].mxu0  ;;  %v12567_v42 = vpack.c.bf16 %v1631_v45, %v1627_v44  ;;  %v1651_v3 = vld [vmem:[%s14752_s17 + $0x88] sm:$0xff]  ;;  %v1670_v44 = vld [vmem:[%s14752_s17 + $0x120] sm:$0xff] }
0x51e9   : > { %v12579_v7 = vpack.c.bf16 %v1651_v3, %v1650_v63  ;;  %v1671_v45 = vld [vmem:[%s14752_s17 + $0x128] sm:$0xff] }
0x51ea   : > { %v12621_v50 = vpack.c.bf16 %v1671_v45, %v1670_v44  ;;  %v1643_v63 = vld [vmem:[%s14752_s17 + $0x48] sm:$0xff]  ;;  %v1697_v45 = vld [vmem:[%s14752_s17 + $0x1f8] sm:$0xff] }
0x5244   : > { %v10392_v4 = vpop.xlane.xlu0 %10391 }
0x5245   : > { %12907 = vrcp.f32 %v10392_v4  ;;  %v1683_v4 = vld [vmem:[%s14752_s17 + $0x188] sm:$0xff] }
0x5248   : > { %v10396_v8 = vpop.permute.xlu0 %10395 }
0x5249   : > { %12427 = vmatpush3.msra.mxu0 %v10396_v8  ;;  %v1634_v8 = vld [vmem:[%s14752_s17] sm:$0xff] }
0x524f   : > { %v12908_v9 = vpop.eup %12907 }
0x5250   : > { %v10394_v10 = vmul.f32 %v12908_v9, %v12906_v14  ;;  %v1635_v9 = vld [vmem:[%s14752_s17 + $0x8] sm:$0xff] }
0x5252   : > { %12429 = vmatmul.mubr.msk.f32.vlgmr.msra.gmra.mrb[100].mxu0 %vm4077_vm10, %v10394_v10 }
0x5253   : > { %10671 = vmatprep.mubr.f32.mxu0 %v13053_v0 }
0x5325   : > { %v10467_v38 = vpop.f32.mrb[100].mxu0 }
0x5326   : > { %v12430_v15 = vpop.f32.mrb[101].mxu0  ;;  %12434 = vmatmul.mubr.msk.f32.vlgmr.msra.gmra.mrb[108].mxu1 %vm1848_vm3, %v10467_v38  ;;  %v12581_v38 = vpack.c.bf16 %v1635_v9, %v1634_v8  ;;  %v1660_v9 = vld [vmem:[%s14752_s17 + $0xd0] sm:$0xff] }
0x5327   : > { %10742 = vmatprep.mubr.f32.mxu1 %v13053_v0  ;;  %12574 = vmatpush1.bf16.msra.mxu1 %v12573_v41  ;;  %v1666_v15 = vld [vmem:[%s14752_s17 + $0x100] sm:$0xff] }
0x5328   : > { %12576 = vmatprep.subr.bf16.mxu1 %v12575_v57  ;;  %v1689_v57 = vld [vmem:[%s14752_s17 + $0x1b8] sm:$0xff] }
0x5329   : > { %v12623_v43 = vpack.c.bf16 %v1689_v57, %v1688_v18  ;;  %v1681_v57 = vld [vmem:[%s14752_s17 + $0x178] sm:$0xff] }
0x532b   : > { %12578 = vmatpush1.bf16.msra.mxu1 %v12577_v54 }
0x53f9   : > { %v10543_v16 = vpop.f32.mrb[108].mxu1 }
0x53fa   : > { %v10547_v2 = vadd.f32 %v10543_v16, %v10305_v5  ;;  %v12435_v6 = vpop.f32.mrb[109].mxu1  ;;  %v1682_v5 = vld [vmem:[%s14752_s17 + $0x180] sm:$0xff] }
0x53fb   : > { %v12611_v10 = vpack.c.bf16 %v1683_v4, %v1682_v5  ;;  %v1653_v6 = vld [vmem:[%s14752_s17 + $0x98] sm:$0xff]  ;;  %v1675_v4 = vld [vmem:[%s14752_s17 + $0x148] sm:$0xff] }
0x53fc   : > { %v10554_v19 = vadd.f32 %v11513_v12, %v10547_v2  ;;  %v1667_v12 = vld [vmem:[%s14752_s17 + $0x108] sm:$0xff]  ;;  %v1652_v2 = vld [vmem:[%s14752_s17 + $0x90] sm:$0xff] }
0x53fd   : > { %v12613_v16 = vpack.c.bf16 %v1667_v12, %v1666_v15  ;;  %12612 = vmatprep.subr.bf16.mxu1 %v12611_v10  ;;  %v1661_v10 = vld [vmem:[%s14752_s17 + $0xd8] sm:$0xff] }
0x53fe   : > { %v14433_v21 = vadd.f32 %v10554_v19, %v14224_v37  ;;  %v1623_v37 = vld [vmem:[%s14751_s9 + $0x28] sm:$0xff]  ;;  %v1684_v19 = vld [vmem:[%s14752_s17 + $0x190] sm:$0xff]  ;;  %v12599_v15 = vpack.c.bf16 %v1661_v10, %v1660_v9  ;;  %v1693_v12 = vld [vmem:[%s14752_s17 + $0x1d8] sm:$0xff] }
0x53ff   : > { %v12563_v49 = vpack.c.bf16 %v1623_v37, %v1619_v25  ;;  %v1668_v25 = vld [vmem:[%s14752_s17 + $0x110] sm:$0xff]  ;;  %v1669_v37 = vld [vmem:[%s14752_s17 + $0x118] sm:$0xff] }
0x5400   : > { %v10556_v47 = vsel %vm1735_vm0, %v14433_v21, 0.0  ;;  %v12617_v28 = vpack.c.bf16 %v1669_v37, %v1668_v25  ;;  %v1695_v37 = vld [vmem:[%s14752_s17 + $0x1e8] sm:$0xff] }
0x5401   : > { %10557 = vadd.xlane.f32.xlu1 %v10556_v47  ;;  %12564 = vmatprep.subr.bf16.mxu0 %v12563_v49  ;;  %v12583_v47 = vpack.c.bf16 %v1653_v6, %v1652_v2  ;;  %v1654_v49 = vld [vmem:[%s14752_s17 + $0xa0] sm:$0xff]  ;;  %v1645_v2 = vld [vmem:[%s14752_s17 + $0x58] sm:$0xff] }
0x5402   : > { %12566 = vmatpush1.bf16.msra.mxu0 %v12565_v13  ;;  %v12587_v20 = vpack.c.bf16 %v1655_v22, %v1654_v49  ;;  %v1638_v13 = vld [vmem:[%s14752_s17 + $0x20] sm:$0xff]  ;;  %v1647_v49 = vld [vmem:[%s14752_s17 + $0x68] sm:$0xff] }
0x5403   : > { %12568 = vmatprep.subr.bf16.mxu0 %v12567_v42  ;;  %v12589_v41 = vpack.c.bf16 %v1639_v53, %v1638_v13  ;;  %v1656_v42 = vld [vmem:[%s14752_s17 + $0xb0] sm:$0xff] }
0x5404   : > { %v12591_v46 = vpack.c.bf16 %v1657_v1, %v1656_v42  ;;  %v1664_v53 = vld [vmem:[%s14752_s17 + $0xf0] sm:$0xff]  ;;  %v1649_v42 = vld [vmem:[%s14752_s17 + $0x78] sm:$0xff] }
0x5406   : > { %12570 = vmatpush1.bf16.msra.mxu0 %v12569_v51  ;;  %v1640_v51 = vld [vmem:[%s14752_s17 + $0x30] sm:$0xff] }
0x5407   : > { %12580 = vmatprep.subr.bf16.mxu0 %v12579_v7  ;;  %v12593_v54 = vpack.c.bf16 %v1641_v52, %v1640_v51  ;;  %v1674_v7 = vld [vmem:[%s14752_s17 + $0x140] sm:$0xff] }
0x5408   : > { %v12629_v8 = vpack.c.bf16 %v1675_v4, %v1674_v7  ;;  %v1605_v52 = vld [vmem:[%s14753_s8] sm:$0xf] }
0x548e   : > { %v10558_v23 = vpop.xlane.xlu1 %10557 }
0x548f   : > { %v10559_v24 = vmul.f32 0.03125, %v10558_v23  ;;  %v1685_v23 = vld [vmem:[%s14752_s17 + $0x198] sm:$0xff] }
0x5491   : > { %v10560_v48 = vsub.f32 %v14433_v21, %v10559_v24  ;;  %v1636_v24 = vld [vmem:[%s14752_s17 + $0x10] sm:$0xff] }
0x5493   : > { %v10561_v39 = vmul.f32 %v10560_v48, %v10560_v48 }
0x5495   : > { %v10562_v26 = vsel %vm1735_vm0, %v10561_v39, 0.0  ;;  %v12615_v39 = vpack.c.bf16 %v1685_v23, %v1684_v19  ;;  %v1677_v23 = vld [vmem:[%s14752_s17 + $0x158] sm:$0xff] }
0x5496   : > { %10563 = vadd.xlane.f32.xlu1 %v10562_v26 }
0x5523   : > { %v10564_v55 = vpop.xlane.xlu1 %10563 }
0x5524   : > { %v10565_v56 = vmul.f32 0.03125, %v10564_v55  ;;  %v1672_v55 = vld [vmem:[%s14752_s17 + $0x130] sm:$0xff] }
0x5526   : > { %v10566_v58 = vadd.f32 1e-05, %v10565_v56  ;;  %v1673_v56 = vld [vmem:[%s14752_s17 + $0x138] sm:$0xff] }
0x5528   : > { %12909 = vrsqrt.f32 %v10566_v58  ;;  %v12625_v58 = vpack.c.bf16 %v1673_v56, %v1672_v55  ;;  %v10591_v55 = vrot.slane %v1605_v52, %v5962_v30  ;;  %v10599_v56 = vrot.slane %v1605_v52, %v5970_v31 }
0x5532   : > { %v12910_v59 = vpop.eup %12909 }
0x5533   : > { %v10568_v60 = vmul.f32 %v12910_v59, %v10560_v48  ;;  %v1637_v48 = vld [vmem:[%s14752_s17 + $0x18] sm:$0xff]  ;;  %v1658_v59 = vld [vmem:[%s14752_s17 + $0xc0] sm:$0xff] }
0x5534   : > { %v12585_v26 = vpack.c.bf16 %v1637_v48, %v1636_v24  ;;  %v1662_v48 = vld [vmem:[%s14752_s17 + $0xe0] sm:$0xff] }
0x5535   : > { %v10575_v62 = vmul.f32 %v11514_v29, %v10568_v60  ;;  %v1659_v29 = vld [vmem:[%s14752_s17 + $0xc8] sm:$0xff]  ;;  %v1690_v60 = vld [vmem:[%s14752_s17 + $0x1c0] sm:$0xff] }
0x5537   : > { %v10582_v14 = vadd.f32 %v11515_v61, %v10575_v62  ;;  %v12595_v61 = vpack.c.bf16 %v1659_v29, %v1658_v59  ;;  %v1691_v62 = vld [vmem:[%s14752_s17 + $0x1c8] sm:$0xff] }
0x5538   : > { %v12627_v3 = vpack.c.bf16 %v1691_v62, %v1690_v60 }
0x5539   : > { %11516 = vmatmul.mubr.msk.f32.vlgmr.msra.gmra.mrb[102].mxu0 %vm1770_vm2, %v10582_v14  ;;  %11517 = vmatmul.mubr.msk.f32.vlgmr.msra.gmra.mrb[110].mxu1 %vm1770_vm2, %v10582_v14  ;;  %v1642_v14 = vld [vmem:[%s14752_s17 + $0x40] sm:$0xff] }
0x553a   : > { %12582 = vmatpush3.bf16.msra.mxu0 %v12581_v38  ;;  %12614 = vmatpush3.bf16.msra.mxu1 %v12613_v16  ;;  %v12597_v5 = vpack.c.bf16 %v1643_v63, %v1642_v14  ;;  %v1692_v38 = vld [vmem:[%s14752_s17 + $0x1d0] sm:$0xff] }
0x553b   : > { %12584 = vmatprep.subr.bf16.mxu0 %v12583_v47  ;;  %12616 = vmatprep.subr.bf16.mxu1 %v12615_v39  ;;  %v1644_v16 = vld [vmem:[%s14752_s17 + $0x50] sm:$0xff]  ;;  %v12631_v6 = vpack.c.bf16 %v1693_v12, %v1692_v38  ;;  %v1663_v39 = vld [vmem:[%s14752_s17 + $0xe8] sm:$0xff] }
0x553c   : > { %v12601_v19 = vpack.c.bf16 %v1645_v2, %v1644_v16  ;;  %v1676_v47 = vld [vmem:[%s14752_s17 + $0x150] sm:$0xff]  ;;  %v12603_v25 = vpack.c.bf16 %v1663_v39, %v1662_v48 }
0x553d   : > { %v12633_v24 = vpack.c.bf16 %v1677_v23, %v1676_v47 }
0x553e   : > { %12586 = vmatpush3.bf16.msra.mxu0 %v12585_v26  ;;  %12618 = vmatpush3.bf16.msra.mxu1 %v12617_v28  ;;  %v1694_v26 = vld [vmem:[%s14752_s17 + $0x1e0] sm:$0xff] }
0x553f   : > { %12588 = vmatprep.subr.bf16.mxu0 %v12587_v20  ;;  %12620 = vmatprep.subr.bf16.mxu1 %v12619_v40  ;;  %v1646_v28 = vld [vmem:[%s14752_s17 + $0x60] sm:$0xff]  ;;  %v12635_v22 = vpack.c.bf16 %v1695_v37, %v1694_v26  ;;  %v1665_v40 = vld [vmem:[%s14752_s17 + $0xf8] sm:$0xff] }
0x5540   : > { %v12605_v33 = vpack.c.bf16 %v1647_v49, %v1646_v28  ;;  %v1678_v20 = vld [vmem:[%s14752_s17 + $0x160] sm:$0xff]  ;;  %v12607_v44 = vpack.c.bf16 %v1665_v40, %v1664_v53 }
0x5541   : > { %v12637_v13 = vpack.c.bf16 %v1679_v35, %v1678_v20 }
0x5542   : > { %12590 = vmatpush3.bf16.msra.mxu0 %v12589_v41  ;;  %12622 = vmatpush3.bf16.msra.mxu1 %v12621_v50  ;;  %v1696_v41 = vld [vmem:[%s14752_s17 + $0x1f0] sm:$0xff] }
0x5543   : > { %12592 = vmatprep.subr.bf16.mxu0 %v12591_v46  ;;  %12624 = vmatprep.subr.bf16.mxu1 %v12623_v43  ;;  %v1648_v50 = vld [vmem:[%s14752_s17 + $0x70] sm:$0xff]  ;;  %v12639_v1 = vpack.c.bf16 %v1697_v45, %v1696_v41  ;;  %v10587_v43 = vrot.slane %v1605_v52, %v13452_v36 }
0x5544   : > { %v12609_v18 = vpack.c.bf16 %v1649_v42, %v1648_v50  ;;  %v1680_v46 = vld [vmem:[%s14752_s17 + $0x170] sm:$0xff] }
0x5545   : > { %v12641_v51 = vpack.c.bf16 %v1681_v57, %v1680_v46 }
0x5546   : > { %12594 = vmatpush3.bf16.msra.mxu0 %v12593_v54  ;;  %12626 = vmatpush3.bf16.msra.mxu1 %v12625_v58  ;;  %v10595_v54 = vrot.slane %v1605_v52, %v5966_v27 }
0x5547   : > { %12596 = vmatprep.subr.bf16.mxu0 %v12595_v61  ;;  %12628 = vmatprep.subr.bf16.mxu1 %v12627_v3 }
0x554a   : > { %12598 = vmatpush3.bf16.msra.mxu0 %v12597_v5  ;;  %12630 = vmatpush3.bf16.msra.mxu1 %v12629_v8 }
0x554b   : > { %12600 = vmatprep.subr.bf16.mxu0 %v12599_v15  ;;  %12632 = vmatprep.subr.bf16.mxu1 %v12631_v6 }
0x554e   : > { %12602 = vmatpush3.bf16.msra.mxu0 %v12601_v19  ;;  %12634 = vmatpush3.bf16.msra.mxu1 %v12633_v24 }
0x554f   : > { %12604 = vmatprep.subr.bf16.mxu0 %v12603_v25  ;;  %12636 = vmatprep.subr.bf16.mxu1 %v12635_v22 }
0x5552   : > { %12606 = vmatpush3.bf16.msra.mxu0 %v12605_v33  ;;  %12638 = vmatpush3.bf16.msra.mxu1 %v12637_v13 }
0x5553   : > { %12608 = vmatprep.subr.bf16.mxu0 %v12607_v44  ;;  %12640 = vmatprep.subr.bf16.mxu1 %v12639_v1 }
0x5556   : > { %12610 = vmatpush3.bf16.msra.mxu0 %v12609_v18  ;;  %12642 = vmatpush3.bf16.msra.mxu1 %v12641_v51 }
0x5557   : > { %12643 = vmatprep.subr.bf16.mxu0 %v13054_v11 }
0x560c   : > { %v10673_v58 = vpop.f32.mrb[102].mxu0  ;;  %v10744_v59 = vpop.f32.mrb[110].mxu1 }
0x560d   : > { %v14530_v29 = vadd.f32 %v10673_v58, %v10587_v43  ;;  %v14532_v60 = vadd.f32 %v10744_v59, %v10595_v54  ;;  %v10675_v61 = vpop.f32.mrb[103].mxu0  ;;  %v10746_v62 = vpop.f32.mrb[111].mxu1 }
0x560e   : > { %v14534_v14 = vadd.f32 %v10675_v61, %v10591_v55  ;;  %v14536_v36 = vadd.f32 %v10746_v62, %v10599_v56 }
0x560f   : > { %v14539_v27 = vmul.f32 0.70710677, %v14530_v29  ;;  %v14542_v30 = vmul.f32 0.70710677, %v14532_v60 }
0x5610   : > { %v14545_v32 = vmul.f32 0.70710677, %v14534_v14  ;;  %v14551_v5 = vmul.f32 0.70710677, %v14536_v36 }
0x5611   : > { %v10765_v31 = vand.u32 2147483647, %v14539_v27  ;;  %v10767_v63 = vand.u32 2147483647, %v14542_v30  ;;  %vm10757_vm15 = vcmp.ge.f32.partialorder %v14539_v27, 0.0  ;;  %vm10759_vm0 = vcmp.ge.f32.partialorder %v14542_v30, 0.0 }
0x5612   : > { %v10766_v3 = vand.u32 2147483647, %v14545_v32  ;;  %v10768_v38 = vand.u32 2147483647, %v14551_v5  ;;  %vm10758_vm3 = vcmp.ge.f32.partialorder %v14545_v32, 0.0  ;;  %vm10760_vm4 = vcmp.ge.f32.partialorder %v14551_v5, 0.0 }
0x5613   : > { %v10769_v7 = vmul.f32 0.3275911, %v10765_v31  ;;  %v10771_v4 = vmul.f32 0.3275911, %v10767_v63  ;;  %v10821_v2 = vmul.f32 %v10765_v31, %v10765_v31  ;;  %v10823_v6 = vmul.f32 %v10767_v63, %v10767_v63 }
0x5614   : > { %v10770_v8 = vmul.f32 0.3275911, %v10766_v3  ;;  %v10772_v12 = vmul.f32 0.3275911, %v10768_v38  ;;  %v10822_v23 = vmul.f32 %v10766_v3, %v10766_v3  ;;  %v10824_v25 = vmul.f32 %v10768_v38, %v10768_v38 }
0x5615   : > { %v10773_v9 = vadd.f32 1.0, %v10769_v7  ;;  %v10775_v10 = vadd.f32 1.0, %v10771_v4  ;;  %v10825_v47 = vsub.f32 0.0, %v10821_v2  ;;  %v10827_v39 = vsub.f32 0.0, %v10823_v6 }
0x5616   : > { %v10774_v15 = vadd.f32 1.0, %v10770_v8  ;;  %v10776_v16 = vadd.f32 1.0, %v10772_v12  ;;  %v10826_v33 = vsub.f32 0.0, %v10822_v23  ;;  %v10828_v41 = vsub.f32 0.0, %v10824_v25 }
0x5617   : > { %12911 = vrcp.f32 %v10773_v9  ;;  %v10829_v49 = vmul.f32 1.442695, %v10825_v47  ;;  %v10833_v35 = vmul.f32 1.442695, %v10827_v39  ;;  %v10750_v32 = vmul.f32 0.5, %v14534_v14 }
0x5618   : > { %12913 = vrcp.f32 %v10775_v10  ;;  %v10831_v1 = vmul.f32 1.442695, %v10826_v33  ;;  %v10835_v52 = vmul.f32 1.442695, %v10828_v41  ;;  %v10752_v5 = vmul.f32 0.5, %v14536_v36 }
0x5619   : > { %12915 = vrcp.f32 %v10774_v15 }
0x561a   : > { %12917 = vrcp.f32 %v10776_v16 }
0x561b   : > { %12919 = vpow2.f32 %v10829_v49 }
0x561c   : > { %12921 = vpow2.f32 %v10833_v35 }
0x561d   : > { %12923 = vpow2.f32 %v10831_v1 }
0x561e   : > { %12925 = vpow2.f32 %v10835_v52 }
0x5621   : > { %v12912_v19 = vpop.eup %12911 }
0x5622   : > { %v12914_v24 = vpop.eup %12913  ;;  %v10785_v48 = vmul.f32 1.0614054, %v12912_v19 }
0x5623   : > { %v10787_v26 = vmul.f32 1.0614054, %v12914_v24  ;;  %v12916_v28 = vpop.eup %12915 }
0x5624   : > { %v10789_v37 = vadd.f32 -1.4531521, %v10785_v48  ;;  %v10786_v13 = vmul.f32 1.0614054, %v12916_v28  ;;  %v12918_v53 = vpop.eup %12917 }
0x5625   : > { %v10791_v22 = vadd.f32 -1.4531521, %v10787_v26  ;;  %v10788_v50 = vmul.f32 1.0614054, %v12918_v53  ;;  %v12920_v10 = vpop.eup %12919 }
0x5626   : > { %v10793_v20 = vmul.f32 %v12912_v19, %v10789_v37  ;;  %v10790_v45 = vadd.f32 -1.4531521, %v10786_v13  ;;  %v12922_v15 = vpop.eup %12921 }
0x5627   : > { %v10795_v40 = vmul.f32 %v12914_v24, %v10791_v22  ;;  %v10792_v57 = vadd.f32 -1.4531521, %v10788_v50  ;;  %v12924_v39 = vpop.eup %12923  ;;  %v10763_v22 = vsel %vm10759_vm0, 1.0, %v13079_v17 }
0x5628   : > { %v10797_v44 = vadd.f32 1.4214138, %v10793_v20  ;;  %v10794_v46 = vmul.f32 %v12916_v28, %v10790_v45  ;;  %v12926_v37 = vpop.eup %12925  ;;  %v10762_v20 = vsel %vm10758_vm3, 1.0, %v13079_v17 }
0x5629   : > { %v10799_v42 = vadd.f32 1.4214138, %v10795_v40  ;;  %v10796_v55 = vmul.f32 %v12918_v53, %v10792_v57  ;;  %v10764_v40 = vsel %vm10760_vm4, 1.0, %v13079_v17  ;;  %v1490_v57 = vld [vmem:[%s14754_s12 + $0x10] sm:$0xff] }
0x562a   : > { %v10801_v18 = vmul.f32 %v12912_v19, %v10797_v44  ;;  %v10798_v54 = vadd.f32 1.4214138, %v10794_v46  ;;  %v10749_v44 = vmul.f32 0.5, %v14530_v29  ;;  %v1488_v29 = vld [vmem:[%s14754_s12] sm:$0xff]  ;;  %v1489_v46 = vld [vmem:[%s14754_s12 + $0x8] sm:$0xff] }
0x562b   : > { %v10803_v51 = vmul.f32 %v12914_v24, %v10799_v42  ;;  %v10800_v61 = vadd.f32 1.4214138, %v10796_v55  ;;  %v12644_v36 = vpack.c.bf16 %v1489_v46, %v1488_v29 }
0x562c   : > { %v10805_v43 = vadd.f32 -0.28449672, %v10801_v18  ;;  %v10802_v59 = vmul.f32 %v12916_v28, %v10798_v54  ;;  %v10751_v18 = vmul.f32 0.5, %v14532_v60 }
0x562d   : > { %v10807_v56 = vadd.f32 -0.28449672, %v10803_v51  ;;  %v10804_v3 = vmul.f32 %v12918_v53, %v10800_v61  ;;  %v1491_v51 = vld [vmem:[%s14754_s12 + $0x18] sm:$0xff] }
0x562e   : > { %v10809_v58 = vmul.f32 %v12912_v19, %v10805_v43  ;;  %v10806_v63 = vadd.f32 -0.28449672, %v10802_v59  ;;  %v12647_v52 = vpack.c.bf16 %v1491_v51, %v1490_v57  ;;  %v11518_v43 = vld [vmem:[%s14755_s4] ss:$0 sm:$0xff] }
0x562f   : > { %v10811_v62 = vmul.f32 %v12914_v24, %v10807_v56  ;;  %v10808_v9 = vadd.f32 -0.28449672, %v10804_v3 }
0x5630   : > { %v10813_v31 = vadd.f32 0.2548296, %v10809_v58  ;;  %v10810_v8 = vmul.f32 %v12916_v28, %v10806_v63 }
0x5631   : > { %v10815_v7 = vadd.f32 0.2548296, %v10811_v62  ;;  %v10812_v2 = vmul.f32 %v12918_v53, %v10808_v9  ;;  %v13080_v62 = vmov 0  }
0x5632   : > { %v10817_v4 = vmul.f32 %v12912_v19, %v10813_v31  ;;  %v10814_v16 = vadd.f32 0.2548296, %v10810_v8  ;;  %v10761_v19 = vsel %vm10757_vm15, 1.0, %v13079_v17  ;;  %12753 = vset.pattern.permute.xlu1 %v13080_v62  ;;  %12754 = vset.pattern.permute.xlu0 %v13080_v62  ;;  %v11519_v31 = vld [vmem:[%s14756_s2] ss:$0 sm:$0xff] }
0x5633   : > { %v10819_v38 = vmul.f32 %v12914_v24, %v10815_v7  ;;  %v10816_v48 = vadd.f32 0.2548296, %v10812_v2  ;;  %v11097_v8 = vld [vmem:[%s1478_s16] sm:$0x7f] }
0x5634   : > { %v10837_v12 = vmul.f32 %v12920_v10, %v10817_v4  ;;  %v10818_v23 = vmul.f32 %v12916_v28, %v10814_v16 }
0x5635   : > { %v10839_v6 = vmul.f32 %v12922_v15, %v10819_v38  ;;  %v10820_v24 = vmul.f32 %v12918_v53, %v10816_v48 }
0x5636   : > { %v10841_v47 = vsub.f32 1.0, %v10837_v12  ;;  %v10838_v25 = vmul.f32 %v12924_v39, %v10818_v23 }
0x5637   : > { %v10843_v26 = vsub.f32 1.0, %v10839_v6  ;;  %v10840_v33 = vmul.f32 %v12926_v37, %v10820_v24 }
0x5638   : > { %v10845_v49 = vmul.f32 %v10841_v47, %v10761_v19  ;;  %v10842_v27 = vsub.f32 1.0, %v10838_v25 }
0x5639   : > { %v10847_v28 = vmul.f32 %v10843_v26, %v10763_v22  ;;  %v10844_v30 = vsub.f32 1.0, %v10840_v33 }
0x563a   : > { %v10846_v35 = vmul.f32 %v10842_v27, %v10762_v20  ;;  %v10849_v13 = vadd.f32 1.0, %v10845_v49 }
0x563b   : > { %v10848_v53 = vmul.f32 %v10844_v30, %v10764_v40  ;;  %v10851_v45 = vadd.f32 1.0, %v10847_v28 }
0x563c   : > { %v10850_v41 = vadd.f32 1.0, %v10846_v35  ;;  %v10853_v1 = vmul.f32 %v10849_v13, %v10749_v44 }
0x563d   : > { %v10852_v42 = vadd.f32 1.0, %v10848_v53  ;;  %v10855_v14 = vmul.f32 %v10851_v45, %v10751_v18 }
0x563e   : > { %v10854_v50 = vmul.f32 %v10850_v41, %v10750_v32 }
0x563f   : > { %v10856_v17 = vmul.f32 %v10852_v42, %v10752_v5 }
0x5640   : > { %10927 = vmatprep.mubr.f32.mxu0 %v10854_v50 }
0x5641   : > { %10928 = vmatmul.mubr.f32.vlgmr.msra.gmra.mrb[104].mxu0 %v10853_v1  ;;  %10997 = vmatprep.mubr.f32.mxu1 %v10856_v17 }
0x5642   : > { %12444 = vmatprep.mubr.msk.f32.mxu0 %vm13055_vm1, %v13053_v0  ;;  %10998 = vmatmul.mubr.f32.vlgmr.msra.gmra.mrb[112].mxu1 %v10855_v14  ;;  %vm11083_vm1 = vcmask 522240  }
0x5643   : > { %12645 = vmatpush3.bf16.msra.mxu0 %v12644_v36 }
0x5644   : > { %12646 = vmatprep.subr.bf16.mxu0 %v13054_v11 }
0x5647   : > { %12648 = vmatpush3.bf16.msra.mxu0 %v12647_v52 }
0x5714   : > { %v11847_v60 = vpop.f32.mrb[104].mxu0 }
0x5715   : > { %v11848_v54 = vpop.f32.mrb[105].mxu0  ;;  %v11882_v55 = vpop.f32.mrb[112].mxu1 }
0x5716   : > { %v11849_v56 = vadd.f32 %v11848_v54, %v11847_v60  ;;  %v11883_v0 = vpop.f32.mrb[113].mxu1 }
0x5717   : > { %v11884_v59 = vadd.f32 %v11883_v0, %v11882_v55 }
0x5718   : > { %v10930_v58 = vadd.f32 %v11849_v56, %v11518_v43 }
0x571a   : > { %v11000_v61 = vadd.f32 %v11884_v59, %v10930_v58 }
0x571c   : > { %v11003_v11 = vadd.f32 %v11000_v61, %v14433_v21 }
0x571e   : > { %12445 = vmatmul.mubr.msk.f32.vlgmr.msra.gmra.mrb[106].mxu0 %vm1770_vm2, %v11003_v11 }
0x57f1   : > { %v11079_v63 = vpop.f32.mrb[106].mxu0 }
0x57f2   : > { %v11080_v3 = vadd.f32 %v11519_v31, %v11079_v63  ;;  %v12446_v7 = vpop.f32.mrb[107].mxu0 }
0x57f4   : > { %v11085_v4 = vsel %vm11083_vm1, %v11080_v3, -inf  ;;  %11084 = vst.msk [vmem:[%s1482_s15] sm:$0x7f] %vm11083_vm1, %v11080_v3 }
0x57f5   : > { %11086 = vmax.xlane.f32.xlu1 %v11085_v4 }
0x5806   : > { %11099 = vperm.xlu1 %12753, %v11097_v8  }
0x5882   : > { %v11087_v21 = vpop.xlane.xlu1 %11086 }
0x5883   : > { %v11088_v9 = vsub.f32 %v11080_v3, %v11087_v21 }
0x5885   : > { %v11089_v10 = vmul.f32 1.442695, %v11088_v9 }
0x5886   : > { %v11100_v38 = vpop.permute.xlu1 %11099 }
0x5887   : > { %12927 = vpow2.f32 %v11089_v10  ;;  %vm11101_vm2 = vcmp.eq.s32.totalorder %v13449_v34, %v11100_v38 }
0x5888   : > { %v11102_v15 = vsel %vm11101_vm2, %v11080_v3, 0.0 }
0x5889   : > { %v11103_v12 = vsel %vm11083_vm1, %v11102_v15, 0.0 }
0x588a   : > { %11104 = vadd.xlane.f32.xlu1 %v11103_v12 }
0x5891   : > { %v12928_v16 = vpop.eup %12927 }
0x5892   : > { %v11091_v2 = vsel %vm11083_vm1, %v12928_v16, 0.0 }
0x5893   : > { %11092 = vadd.xlane.f32.xlu0 %v11091_v2 }
0x5917   : > { %v11105_v39 = vpop.xlane.xlu1 %11104 }
0x5920   : > { %v11093_v6 = vpop.xlane.xlu0 %11092 }
0x5921   : > { %12929 = vlog2.f32 %v11093_v6 }
0x592b   : > { %v12930_v47 = vpop.eup %12929 }
0x592c   : > { %v11095_v23 = vmul.f32 0.6931472, %v12930_v47 }
0x592e   : > { %v11096_v48 = vadd.f32 %v11095_v23, %v11087_v21 }
0x5930   : > { %v11106_v26 = vsub.f32 %v11096_v48, %v11105_v39 }
0x5932   : > { %11108 = vst.msk [vmem:[%s1486_s18] sm:$0x7f] %vm11107_vm5, %v11106_v26 }
0x5933 PF: > { %s108_s22 = sadd.s32 1, %s13002_s22  }
0x5934   : > { %p105_p5 = scmp.ge.s32.totalorder %s108_s22, 4  }
0x5936   :  { %107 = sbr.rel (!%p105_p5) target bundleno = 97 (0x61), region = 311 }
0x593d   :  { %11142 = vsyncpa [#allocation3], 1 }
0x593e   :  { %11144 = vsyncpa [#allocation3 + $0x1], 1 }
0x593f   :  { %11145 = vsyncpa [#allocation5], 1 }

</bundles_post_ra>
